<compile_context>
chip_gen: v7x
topology: tpu7x:2x2x1
jax: 0.10.0
libtpu: 0.0.40
codegen_flags: <defaults>
</compile_context>

<pallas_src>
import functools
import math

import jax
import jax.numpy as jnp
from jax.experimental import pallas as pl
from jax.experimental.pallas import tpu as pltpu

LEAKY_SLOPE = 0.01    # F.leaky_relu default negative_slope
NORM_EPS = 1e-12      # F.normalize default eps
PAD_MULTIPLE = 256    # node-count padding granularity (MXU/tile friendly)


@functools.lru_cache(maxsize=1)
def _vmem_capacity_bytes():
    """Generation-aware VMEM capacity (128 MiB on v5e/v6e, 64 MiB per TC on v7x)."""
    try:
        return int(pltpu.get_tpu_info().vmem_capacity_bytes)
    except Exception:
        return 64 << 20   # conservative fallback


def _full_spec(shape):
    """Full-array BlockSpec for a grid=(1,) pallas_call."""
    n = len(shape)
    return pl.BlockSpec(shape, lambda i, _n=n: (0,) * _n)


# --------------------------------------------------------------------------------------
# Kernel 1: self-attention over feature embeddings + feature_line projection
# --------------------------------------------------------------------------------------
def _attention_kernel(x_ref, wq_ref, bq_ref, wk_ref, bk_ref, wv_ref, bv_ref,
                      wf_ref, bf_ref, out_ref, *, scale):
    x = x_ref[...]                                                        # (F, E)
    q = jnp.dot(x, wq_ref[...], preferred_element_type=jnp.float32) + bq_ref[...]
    k = jnp.dot(x, wk_ref[...], preferred_element_type=jnp.float32) + bk_ref[...]
    v = jnp.dot(x, wv_ref[...], preferred_element_type=jnp.float32) + bv_ref[...]
    # Contract the last dims directly (trans-b form) — no materialized transpose of k.
    logits = jax.lax.dot_general(q, k, (((1,), (1,)), ((), ())),
                                 preferred_element_type=jnp.float32) * scale   # (F, F)
    m = jnp.max(logits, axis=-1, keepdims=True)
    e = jnp.exp(logits - m)
    p = e / jnp.sum(e, axis=-1, keepdims=True)                            # exact softmax
    ctx = jnp.dot(p, v, preferred_element_type=jnp.float32)               # (F, E)
    out_ref[...] = (jnp.dot(ctx, wf_ref[...], preferred_element_type=jnp.float32)
                    + bf_ref[...])                                        # (F, 256)


def attention_feature(x, p):
    f, e = x.shape
    out_dim = p["wf"].shape[1]
    kernel = functools.partial(_attention_kernel, scale=1.0 / math.sqrt(e))
    return pl.pallas_call(
        kernel,
        out_shape=jax.ShapeDtypeStruct((f, out_dim), jnp.float32),
        grid=(1,),
        in_specs=[_full_spec(x.shape),
                  _full_spec(p["wq"].shape), _full_spec(p["bq"].shape),
                  _full_spec(p["wk"].shape), _full_spec(p["bk"].shape),
                  _full_spec(p["wv"].shape), _full_spec(p["bv"].shape),
                  _full_spec(p["wf"].shape), _full_spec(p["bf"].shape)],
        out_specs=_full_spec((f, out_dim)),
    )(x, p["wq"], p["bq"], p["wk"], p["bk"], p["wv"], p["bv"], p["wf"], p["bf"])


# --------------------------------------------------------------------------------------
# Kernel 2: one NGCF-style propagation layer, tiled over (row tile, adj-K tile)
# --------------------------------------------------------------------------------------
def _gcn_layer_kernel(adj_ref, ego_c_ref, ego_i_ref, wg_ref, bg_ref, wb_ref, bb_ref,
                      ego_out_ref, norm_out_ref, side_acc_ref, *, tk, ego_resident):
    k = pl.program_id(1)

    # side = adj @ ego, accumulated across the K grid axis in a VMEM f32 scratch.
    @pl.when(k == 0)
    def _():
        side_acc_ref[...] = jnp.zeros_like(side_acc_ref)

    if ego_resident:
        # ego (bf16) is fully VMEM-resident: slice the K window in place (no HBM re-stream).
        ks = pl.multiple_of(k * tk, 256)
        ego_k = ego_c_ref[pl.ds(ks, tk), :]
    else:
        # fallback: K-streamed bf16 ego tile delivered by the BlockSpec pipeline.
        ego_k = ego_c_ref[...]

    side_acc_ref[...] += jnp.dot(adj_ref[...], ego_k,                     # bf16 x bf16
                                 preferred_element_type=jnp.float32)      # f32 accumulate

    # Finalize this row tile on the last K step.
    @pl.when(k == pl.num_programs(1) - 1)
    def _():
        side = side_acc_ref[...]                                          # (TM, Din) f32
        ego = ego_i_ref[...]                                              # (TM, Din) f32

        s = jnp.dot(side, wg_ref[...], preferred_element_type=jnp.float32) + bg_ref[...]
        sum_emb = jnp.where(s > 0, s, LEAKY_SLOPE * s)                    # leaky_relu(GC_Linear)

        b = jnp.dot(ego * side, wb_ref[...], preferred_element_type=jnp.float32) + bb_ref[...]
        bi_emb = jnp.where(b > 0, b, LEAKY_SLOPE * b)                     # leaky_relu(Bi_Linear)

        new_ego = sum_emb + bi_emb                                        # dropout = identity (eval)

        sq = jnp.sum(new_ego * new_ego, axis=-1, keepdims=True)
        inv_norm = jax.lax.rsqrt(jnp.maximum(sq, NORM_EPS * NORM_EPS))    # 1/max(||x||, eps)

        ego_out_ref[...] = new_ego
        norm_out_ref[...] = new_ego * inv_norm                            # F.normalize(p=2, dim=1)


def _vmem_estimate(n_pad, d_in, d_out, tm, tk, ego_resident):
    adj_b = 2 * tm * tk * 2                                      # adj bf16, double-buffered
    ego_c = 2 * n_pad * d_in * 2 if ego_resident else 2 * tk * d_in * 2
    ego_i = 2 * tm * d_in * 4                                    # f32 row tile for ego*side
    scratch = tm * d_in * 4                                      # side accumulator
    outs = 2 * 2 * tm * d_out * 4                                # two outputs, double-buffered
    weights = 2 * (d_in * d_out + d_out) * 4                     # Wg/Wb + biases
    return adj_b + ego_c + ego_i + scratch + outs + weights


def _choose_tiles(n_pad, d_in, d_out, cap, ego_resident):
    """Largest tiles (divisors of padded N) that fit ~40% of this generation's VMEM."""
    budget = int(0.4 * cap)
    tm_cands = [t for t in (512, 256) if n_pad % t == 0]
    tk_cands = [n_pad] + [t for t in (2048, 1024, 512, 256) if t < n_pad and n_pad % t == 0]
    for tm in tm_cands:
        for tk in tk_cands:
            if _vmem_estimate(n_pad, d_in, d_out, tm, tk, ego_resident) <= budget:
                return tm, tk
    return tm_cands[-1], tk_cands[-1]


def gcn_layer(adj_bf16, ego_f32, layer_p):
    n_pad, d_in = ego_f32.shape
    d_out = layer_p["wg"].shape[1]
    cap = _vmem_capacity_bytes()

    # Hold the bf16 contraction copy of ego VMEM-resident whenever it fits comfortably;
    # otherwise stream it per K tile (large-N fallback).
    ego_resident = (n_pad * d_in * 2) <= cap // 4
    tm, tk = _choose_tiles(n_pad, d_in, d_out, cap, ego_resident)
    grid = (n_pad // tm, n_pad // tk)

    # Single f32 -> bf16 cast in the wrapper (not per grid step inside the hot loop).
    ego_bf16 = ego_f32.astype(jnp.bfloat16)

    if ego_resident:
        ego_c_spec = pl.BlockSpec((n_pad, d_in), lambda i, k: (0, 0))   # fetched once, resident
    else:
        ego_c_spec = pl.BlockSpec((tk, d_in), lambda i, k: (k, 0))      # K-streamed bf16

    est = _vmem_estimate(n_pad, d_in, d_out, tm, tk, ego_resident)
    vmem_limit = int(min(cap, max(2 * est, 32 << 20)))

    kernel = functools.partial(_gcn_layer_kernel, tk=tk, ego_resident=ego_resident)
    return pl.pallas_call(
        kernel,
        out_shape=(jax.ShapeDtypeStruct((n_pad, d_out), jnp.float32),
                   jax.ShapeDtypeStruct((n_pad, d_out), jnp.float32)),
        grid_spec=pltpu.PrefetchScalarGridSpec(
            num_scalar_prefetch=0,
            grid=grid,
            in_specs=[
                pl.BlockSpec((tm, tk), lambda i, k: (i, k)),        # adj tile (bf16 stream)
                ego_c_spec,                                         # bf16 ego (resident / stream)
                pl.BlockSpec((tm, d_in), lambda i, k: (i, 0)),      # f32 ego row tile (ego*side)
                pl.BlockSpec((d_in, d_out), lambda i, k: (0, 0)),   # Wg
                pl.BlockSpec((1, d_out), lambda i, k: (0, 0)),      # bg
                pl.BlockSpec((d_in, d_out), lambda i, k: (0, 0)),   # Wb
                pl.BlockSpec((1, d_out), lambda i, k: (0, 0)),      # bb
            ],
            out_specs=(pl.BlockSpec((tm, d_out), lambda i, k: (i, 0)),
                       pl.BlockSpec((tm, d_out), lambda i, k: (i, 0))),
            scratch_shapes=[pltpu.VMEM((tm, d_in), jnp.float32)],
        ),
        compiler_params=pltpu.CompilerParams(
            dimension_semantics=("parallel", "arbitrary"),   # row tiles sharded across TCs
            vmem_limit_bytes=vmem_limit,
        ),
    )(adj_bf16, ego_bf16, ego_f32,
      layer_p["wg"], layer_p["bg"], layer_p["wb"], layer_p["bb"])


# --------------------------------------------------------------------------------------
# MIMA.forward
# --------------------------------------------------------------------------------------
def prepare_adj(adj):
    """Pad adjacency to a multiple of PAD_MULTIPLE and cast to bf16 ONCE (outside the jit)."""
    n = adj.shape[0]
    n_pad = max(PAD_MULTIPLE, -(-n // PAD_MULTIPLE) * PAD_MULTIPLE)
    pad = n_pad - n
    adj_p = jnp.pad(adj.astype(jnp.float32), ((0, pad), (0, pad)))
    return adj_p.astype(jnp.bfloat16)


def mima_forward(adj_bf16_padded, features_data, params, n_users, n_items):
    # atten_score = feature_line(attention_layer(features_data))
    atten_score = attention_feature(features_data, params["attn"])           # (F, 256)

    ego = jnp.concatenate([params["user_emb"], params["item_emb"], atten_score], axis=0)  # (N, E)
    n = ego.shape[0]
    n_pad = adj_bf16_padded.shape[0]
    # Zero-padded rows; padded adj rows/cols are zero so padding never leaks into real rows.
    ego_p = jnp.pad(ego, ((0, n_pad - n), (0, 0)))

    all_embeddings = [ego]
    for layer_p in params["layers"]:
        ego_p, norm_p = gcn_layer(adj_bf16_padded, ego_p, layer_p)
        all_embeddings.append(norm_p[:n])
        # TODO(synk): original `all_embeddings = Math_Path_Layer(...)` is undefined/broken; skipped.

    all_embeddings = jnp.concatenate(all_embeddings, axis=1)
    u_g = all_embeddings[:n_users]
    i_g = all_embeddings[n_users:n_users + n_items]
    return u_g, i_g, atten_score


# --------------------------------------------------------------------------------------
# Pure-JAX f32 reference (for validation)
# --------------------------------------------------------------------------------------
def reference_forward(adj, features_data, params, n_users, n_items):
    p = params["attn"]
    x = features_data
    e = x.shape[1]
    q = x @ p["wq"] + p["bq"]
    k = x @ p["wk"] + p["bk"]
    v = x @ p["wv"] + p["bv"]
    att = jax.nn.softmax((q @ k.T) / math.sqrt(e), axis=-1)
    atten_score = (att @ v) @ p["wf"] + p["bf"]
    ego = jnp.concatenate([params["user_emb"], params["item_emb"], atten_score], axis=0)
    all_emb = [ego]
    for lp in params["layers"]:
        side = adj @ ego
        s = side @ lp["wg"] + lp["bg"]
        sum_emb = jnp.where(s > 0, s, LEAKY_SLOPE * s)
        b = (ego * side) @ lp["wb"] + lp["bb"]
        bi_emb = jnp.where(b > 0, b, LEAKY_SLOPE * b)
        ego = sum_emb + bi_emb
        nrm = jnp.maximum(jnp.linalg.norm(ego, axis=1, keepdims=True), NORM_EPS)
        all_emb.append(ego / nrm)
    all_emb = jnp.concatenate(all_emb, axis=1)
    return all_emb[:n_users], all_emb[n_users:n_users + n_items], atten_score


# --------------------------------------------------------------------------------------
# Deterministic parameter construction
# --------------------------------------------------------------------------------------
def _xavier(key, shape):
    fan_in, fan_out = shape[0], shape[1]
    bound = math.sqrt(6.0 / (fan_in + fan_out))
    return jax.random.uniform(key, shape, jnp.float32, -bound, bound)


def _linear(key, d_in, d_out):
    kw, kb = jax.random.split(key)
    bound = 1.0 / math.sqrt(d_in)
    w = jax.random.uniform(kw, (d_in, d_out), jnp.float32, -bound, bound)   # (in, out) layout
    b = jax.random.uniform(kb, (1, d_out), jnp.float32, -bound, bound)
    return w, b


def build_params(key, n_users, n_items, n_features, embedding_dim, weight_size):
    keys = jax.random.split(key, 16)
    params = {
        "user_emb": _xavier(keys[0], (n_users, embedding_dim)),
        "item_emb": _xavier(keys[1], (n_items, embedding_dim)),
        "feature_emb": _xavier(keys[2], (n_features, embedding_dim)),
    }
    wq, bq = _linear(keys[3], embedding_dim, embedding_dim)
    wk, bk = _linear(keys[4], embedding_dim, embedding_dim)
    wv, bv = _linear(keys[5], embedding_dim, embedding_dim)
    wf, bf = _linear(keys[6], embedding_dim, 256)          # feature_line: Linear(E, 256)
    params["attn"] = {"wq": wq, "bq": bq, "wk": wk, "bk": bk,
                      "wv": wv, "bv": bv, "wf": wf, "bf": bf}

    dims = [embedding_dim] + list(weight_size)
    layers = []
    for i in range(len(weight_size)):
        wg, bg = _linear(keys[7 + 2 * i], dims[i], dims[i + 1])   # GC_Linear_list[i]
        wb, bb = _linear(keys[8 + 2 * i], dims[i], dims[i + 1])   # Bi_Linear_list[i]
        layers.append({"wg": wg, "bg": bg, "wb": wb, "bb": bb})
    params["layers"] = layers
    return params


def build_norm_adj(key, n_nodes):
    """Dense symmetric-normalized random adjacency (stand-in for the scipy sparse norm_adj)."""
    a = (jax.random.uniform(key, (n_nodes, n_nodes)) < 0.05).astype(jnp.float32)
    a = jnp.maximum(a, a.T) + jnp.eye(n_nodes, dtype=jnp.float32)
    deg = jnp.sum(a, axis=1, keepdims=True)
    d_inv_sqrt = 1.0 / jnp.sqrt(jnp.maximum(deg, 1.0))
    return a * d_inv_sqrt * d_inv_sqrt.T


# --------------------------------------------------------------------------------------
if __name__ == "__main__":
    # Small but tiling-exercising shapes: N = 640 nodes -> padded to 768.
    n_users, n_items, n_features = 256, 256, 128
    embedding_dim = 256           # forced: feature_line outputs width 256, row-concatenated
    weight_size = [128, 128]      # 2 propagation layers

    key = jax.random.PRNGKey(0)
    k_params, k_adj = jax.random.split(key)

    params = build_params(k_params, n_users, n_items, n_features, embedding_dim, weight_size)
    n_nodes = n_users + n_items + n_features
    adj = build_norm_adj(k_adj, n_nodes)                      # (640, 640) dense normalized adj
    features_data = params["feature_emb"]                     # forward(norm_adj, feature_embedding.weight)

    adj_bf16 = prepare_adj(adj)                               # pad + bf16 cast ONCE, outside the jit
    jax.block_until_ready(adj_bf16)

    forward = jax.jit(lambda a, f, p: mima_forward(a, f, p, n_users, n_items))
    u_g, i_g, atten_score = forward(adj_bf16, features_data, params)
    jax.block_until_ready((u_g, i_g, atten_score))

    assert u_g.shape == (n_users, embedding_dim + sum(weight_size))
    assert i_g.shape == (n_items, embedding_dim + sum(weight_size))
    assert atten_score.shape == (n_features, 256)

    # Pure-JAX f32 reference check (loose tolerance: adj/ego contraction runs in bf16).
    u_ref, i_ref, a_ref = reference_forward(adj, features_data, params, n_users, n_items)

    def _rel(a, b):
        return float(jnp.linalg.norm(a - b) / (jnp.linalg.norm(b) + 1e-12))

    assert _rel(atten_score, a_ref) < 1e-3, ("atten", _rel(atten_score, a_ref))
    assert _rel(u_g, u_ref) < 3e-2, ("u_g", _rel(u_g, u_ref))
    assert _rel(i_g, i_ref) < 3e-2, ("i_g", _rel(i_g, i_ref))

    print("KERNEL_OK")
</pallas_src>

<mosaic_0001>
module attributes {stable_mosaic.version = 11 : i64} {
  func.func @_attention_kernel(%arg0: i32, %arg1: memref<128x256xf32, #tpu.memory_space<vmem>>, %arg2: memref<256x256xf32, #tpu.memory_space<vmem>>, %arg3: memref<1x256xf32, #tpu.memory_space<vmem>>, %arg4: memref<256x256xf32, #tpu.memory_space<vmem>>, %arg5: memref<1x256xf32, #tpu.memory_space<vmem>>, %arg6: memref<256x256xf32, #tpu.memory_space<vmem>>, %arg7: memref<1x256xf32, #tpu.memory_space<vmem>>, %arg8: memref<256x256xf32, #tpu.memory_space<vmem>>, %arg9: memref<1x256xf32, #tpu.memory_space<vmem>>, %arg10: memref<128x256xf32, #tpu.memory_space<vmem>>) attributes {dimension_semantics = [#tpu.dimension_semantics<arbitrary>], iteration_bounds = array<i64: 1>, scalar_prefetch = 0 : i64, scratch_operands = 0 : i64, tpu.core_type = #tpu.core_type<tc>, window_params = [{pipeline_mode = #tpu.pipeline_mode<synchronous>, transform_indices = @transform_0, window_bounds = array<i64: 128, 256>}, {pipeline_mode = #tpu.pipeline_mode<synchronous>, transform_indices = @transform_1, window_bounds = array<i64: 256, 256>}, {pipeline_mode = #tpu.pipeline_mode<synchronous>, transform_indices = @transform_2, window_bounds = array<i64: 1, 256>}, {pipeline_mode = #tpu.pipeline_mode<synchronous>, transform_indices = @transform_3, window_bounds = array<i64: 256, 256>}, {pipeline_mode = #tpu.pipeline_mode<synchronous>, transform_indices = @transform_4, window_bounds = array<i64: 1, 256>}, {pipeline_mode = #tpu.pipeline_mode<synchronous>, transform_indices = @transform_5, window_bounds = array<i64: 256, 256>}, {pipeline_mode = #tpu.pipeline_mode<synchronous>, transform_indices = @transform_6, window_bounds = array<i64: 1, 256>}, {pipeline_mode = #tpu.pipeline_mode<synchronous>, transform_indices = @transform_7, window_bounds = array<i64: 256, 256>}, {pipeline_mode = #tpu.pipeline_mode<synchronous>, transform_indices = @transform_8, window_bounds = array<i64: 1, 256>}, {pipeline_mode = #tpu.pipeline_mode<synchronous>, transform_indices = @transform_9, window_bounds = array<i64: 128, 256>}]} {
    %c0 = arith.constant 0 : index
    %c0_0 = arith.constant 0 : index
    %0 = vector.load %arg1[%c0, %c0_0] : memref<128x256xf32, #tpu.memory_space<vmem>>, vector<128x256xf32>
    %c0_1 = arith.constant 0 : index
    %c0_2 = arith.constant 0 : index
    %1 = vector.load %arg2[%c0_1, %c0_2] : memref<256x256xf32, #tpu.memory_space<vmem>>, vector<256x256xf32>
    %cst = arith.constant dense<0.000000e+00> : vector<128x256xf32>
    %2 = tpu.matmul %0, %1, %cst {dimension_numbers = #tpu.dot_dimension_numbers<[1], [0], [0], [1], [0, 0, 1, 1], [], []>} : vector<128x256xf32>, vector<256x256xf32>, vector<128x256xf32> -> vector<128x256xf32>
    %c0_3 = arith.constant 0 : index
    %c0_4 = arith.constant 0 : index
    %3 = vector.load %arg3[%c0_3, %c0_4] : memref<1x256xf32, #tpu.memory_space<vmem>>, vector<1x256xf32>
    %4 = vector.broadcast %3 : vector<1x256xf32> to vector<128x256xf32>
    %5 = arith.addf %2, %4 : vector<128x256xf32>
    %c0_5 = arith.constant 0 : index
    %c0_6 = arith.constant 0 : index
    %6 = vector.load %arg4[%c0_5, %c0_6] : memref<256x256xf32, #tpu.memory_space<vmem>>, vector<256x256xf32>
    %cst_7 = arith.constant dense<0.000000e+00> : vector<128x256xf32>
    %7 = tpu.matmul %0, %6, %cst_7 {dimension_numbers = #tpu.dot_dimension_numbers<[1], [0], [0], [1], [0, 0, 1, 1], [], []>} : vector<128x256xf32>, vector<256x256xf32>, vector<128x256xf32> -> vector<128x256xf32>
    %c0_8 = arith.constant 0 : index
    %c0_9 = arith.constant 0 : index
    %8 = vector.load %arg5[%c0_8, %c0_9] : memref<1x256xf32, #tpu.memory_space<vmem>>, vector<1x256xf32>
    %9 = vector.broadcast %8 : vector<1x256xf32> to vector<128x256xf32>
    %10 = arith.addf %7, %9 : vector<128x256xf32>
    %c0_10 = arith.constant 0 : index
    %c0_11 = arith.constant 0 : index
    %11 = vector.load %arg6[%c0_10, %c0_11] : memref<256x256xf32, #tpu.memory_space<vmem>>, vector<256x256xf32>
    %cst_12 = arith.constant dense<0.000000e+00> : vector<128x256xf32>
    %12 = tpu.matmul %0, %11, %cst_12 {dimension_numbers = #tpu.dot_dimension_numbers<[1], [0], [0], [1], [0, 0, 1, 1], [], []>} : vector<128x256xf32>, vector<256x256xf32>, vector<128x256xf32> -> vector<128x256xf32>
    %c0_13 = arith.constant 0 : index
    %c0_14 = arith.constant 0 : index
    %13 = vector.load %arg7[%c0_13, %c0_14] : memref<1x256xf32, #tpu.memory_space<vmem>>, vector<1x256xf32>
    %14 = vector.broadcast %13 : vector<1x256xf32> to vector<128x256xf32>
    %15 = arith.addf %12, %14 : vector<128x256xf32>
    %cst_15 = arith.constant dense<0.000000e+00> : vector<128x128xf32>
    %16 = tpu.matmul %5, %10, %cst_15 {dimension_numbers = #tpu.dot_dimension_numbers<[1], [1], [0], [0], [0, 0, 1, 0], [], []>} : vector<128x256xf32>, vector<128x256xf32>, vector<128x128xf32> -> vector<128x128xf32>
    %cst_16 = arith.constant 6.250000e-02 : f32
    %17 = vector.broadcast %cst_16 : f32 to vector<128x128xf32>
    %18 = arith.mulf %16, %17 : vector<128x128xf32>
    %cst_17 = arith.constant dense<0xFF800000> : vector<128xf32>
    %19 = vector.multi_reduction <maximumf>, %18, %cst_17 [1] : vector<128x128xf32> to vector<128xf32>
    %20 = vector.shape_cast %19 : vector<128xf32> to vector<128x1xf32>
    %21 = vector.broadcast %20 : vector<128x1xf32> to vector<128x128xf32>
    %22 = arith.subf %18, %21 : vector<128x128xf32>
    %23 = math.exp %22 : vector<128x128xf32>
    %cst_18 = arith.constant dense<0.000000e+00> : vector<128xf32>
    %24 = vector.multi_reduction <add>, %23, %cst_18 [1] : vector<128x128xf32> to vector<128xf32>
    %25 = vector.shape_cast %24 : vector<128xf32> to vector<128x1xf32>
    %26 = vector.broadcast %25 : vector<128x1xf32> to vector<128x128xf32>
    %27 = arith.divf %23, %26 : vector<128x128xf32>
    %cst_19 = arith.constant dense<0.000000e+00> : vector<128x256xf32>
    %28 = tpu.matmul %27, %15, %cst_19 {dimension_numbers = #tpu.dot_dimension_numbers<[1], [0], [0], [1], [0, 0, 1, 1], [], []>} : vector<128x128xf32>, vector<128x256xf32>, vector<128x256xf32> -> vector<128x256xf32>
    %c0_20 = arith.constant 0 : index
    %c0_21 = arith.constant 0 : index
    %29 = vector.load %arg8[%c0_20, %c0_21] : memref<256x256xf32, #tpu.memory_space<vmem>>, vector<256x256xf32>
    %cst_22 = arith.constant dense<0.000000e+00> : vector<128x256xf32>
    %30 = tpu.matmul %28, %29, %cst_22 {dimension_numbers = #tpu.dot_dimension_numbers<[1], [0], [0], [1], [0, 0, 1, 1], [], []>} : vector<128x256xf32>, vector<256x256xf32>, vector<128x256xf32> -> vector<128x256xf32>
    %c0_23 = arith.constant 0 : index
    %c0_24 = arith.constant 0 : index
    %31 = vector.load %arg9[%c0_23, %c0_24] : memref<1x256xf32, #tpu.memory_space<vmem>>, vector<1x256xf32>
    %32 = vector.broadcast %31 : vector<1x256xf32> to vector<128x256xf32>
    %33 = arith.addf %30, %32 : vector<128x256xf32>
    %c0_25 = arith.constant 0 : index
    %c0_26 = arith.constant 0 : index
    %34 = vector.load %arg10[%c0_25, %c0_26] : memref<128x256xf32, #tpu.memory_space<vmem>>, vector<128x256xf32>
    tpu.vector_store %arg10[%c0_25, %c0_26], %33 {strides = array<i32>} : memref<128x256xf32, #tpu.memory_space<vmem>>, vector<128x256xf32>,
    return
  }
  func.func @transform_0(%arg0: i32) -> (i32, i32) {
    %c0_i32 = arith.constant 0 : i32
    %c0_i32_0 = arith.constant 0 : i32
    %c0_i32_1 = arith.constant 0 : i32
    return %c0_i32, %c0_i32_0 : i32, i32
  }
  func.func @transform_1(%arg0: i32) -> (i32, i32) {
    %c0_i32 = arith.constant 0 : i32
    %c0_i32_0 = arith.constant 0 : i32
    %c0_i32_1 = arith.constant 0 : i32
    return %c0_i32, %c0_i32_0 : i32, i32
  }
  func.func @transform_2(%arg0: i32) -> (i32, i32) {
    %c0_i32 = arith.constant 0 : i32
    %c0_i32_0 = arith.constant 0 : i32
    %c0_i32_1 = arith.constant 0 : i32
    return %c0_i32, %c0_i32_0 : i32, i32
  }
  func.func @transform_3(%arg0: i32) -> (i32, i32) {
    %c0_i32 = arith.constant 0 : i32
    %c0_i32_0 = arith.constant 0 : i32
    %c0_i32_1 = arith.constant 0 : i32
    return %c0_i32, %c0_i32_0 : i32, i32
  }
  func.func @transform_4(%arg0: i32) -> (i32, i32) {
    %c0_i32 = arith.constant 0 : i32
    %c0_i32_0 = arith.constant 0 : i32
    %c0_i32_1 = arith.constant 0 : i32
    return %c0_i32, %c0_i32_0 : i32, i32
  }
  func.func @transform_5(%arg0: i32) -> (i32, i32) {
    %c0_i32 = arith.constant 0 : i32
    %c0_i32_0 = arith.constant 0 : i32
    %c0_i32_1 = arith.constant 0 : i32
    return %c0_i32, %c0_i32_0 : i32, i32
  }
  func.func @transform_6(%arg0: i32) -> (i32, i32) {
    %c0_i32 = arith.constant 0 : i32
    %c0_i32_0 = arith.constant 0 : i32
    %c0_i32_1 = arith.constant 0 : i32
    return %c0_i32, %c0_i32_0 : i32, i32
  }
  func.func @transform_7(%arg0: i32) -> (i32, i32) {
    %c0_i32 = arith.constant 0 : i32
    %c0_i32_0 = arith.constant 0 : i32
    %c0_i32_1 = arith.constant 0 : i32
    return %c0_i32, %c0_i32_0 : i32, i32
  }
  func.func @transform_8(%arg0: i32) -> (i32, i32) {
    %c0_i32 = arith.constant 0 : i32
    %c0_i32_0 = arith.constant 0 : i32
    %c0_i32_1 = arith.constant 0 : i32
    return %c0_i32, %c0_i32_0 : i32, i32
  }
  func.func @transform_9(%arg0: i32) -> (i32, i32) {
    %c0_i32 = arith.constant 0 : i32
    %c0_i32_0 = arith.constant 0 : i32
    %c0_i32_1 = arith.constant 0 : i32
    return %c0_i32, %c0_i32_0 : i32, i32
  }
}

module attributes {stable_mosaic.version = 11 : i64} {
  func.func @_gcn_layer_kernel(%arg0: i32, %arg1: i32, %arg2: memref<256x768xbf16, #tpu.memory_space<vmem>>, %arg3: memref<768x256xbf16, #tpu.memory_space<vmem>>, %arg4: memref<256x256xf32, #tpu.memory_space<vmem>>, %arg5: memref<256x128xf32, #tpu.memory_space<vmem>>, %arg6: memref<1x128xf32, #tpu.memory_space<vmem>>, %arg7: memref<256x128xf32, #tpu.memory_space<vmem>>, %arg8: memref<1x128xf32, #tpu.memory_space<vmem>>, %arg9: memref<256x128xf32, #tpu.memory_space<vmem>>, %arg10: memref<256x128xf32, #tpu.memory_space<vmem>>, %arg11: memref<256x256xf32, #tpu.memory_space<vmem>>) attributes {dimension_semantics = [#tpu.dimension_semantics<parallel>, #tpu.dimension_semantics<arbitrary>], iteration_bounds = array<i64: 3, 1>, scalar_prefetch = 0 : i64, scratch_operands = 1 : i64, tpu.core_type = #tpu.core_type<tc>, window_params = [{transform_indices = @transform_0, window_bounds = array<i64: 256, 768>}, {pipeline_mode = #tpu.pipeline_mode<synchronous>, transform_indices = @transform_1, window_bounds = array<i64: 768, 256>}, {transform_indices = @transform_2, window_bounds = array<i64: 256, 256>}, {pipeline_mode = #tpu.pipeline_mode<synchronous>, transform_indices = @transform_3, window_bounds = array<i64: 256, 128>}, {pipeline_mode = #tpu.pipeline_mode<synchronous>, transform_indices = @transform_4, window_bounds = array<i64: 1, 128>}, {pipeline_mode = #tpu.pipeline_mode<synchronous>, transform_indices = @transform_5, window_bounds = array<i64: 256, 128>}, {pipeline_mode = #tpu.pipeline_mode<synchronous>, transform_indices = @transform_6, window_bounds = array<i64: 1, 128>}, {transform_indices = @transform_7, window_bounds = array<i64: 256, 128>}, {transform_indices = @transform_8, window_bounds = array<i64: 256, 128>}]} {
    %c0_i32 = arith.constant 0 : i32
    %0 = arith.cmpi eq, %arg1, %c0_i32 : i32
    %1 = arith.extui %0 : i1 to i32
    %c0_i32_0 = arith.constant 0 : i32
    %2 = arith.cmpi ne, %1, %c0_i32_0 : i32
    scf.if %2 {
      %cst_9 = arith.constant 0.000000e+00 : f32
      %15 = vector.broadcast %cst_9 : f32 to vector<256x256xf32>
      %c0_10 = arith.constant 0 : index
      %c0_11 = arith.constant 0 : index
      %16 = vector.load %arg11[%c0_10, %c0_11] : memref<256x256xf32, #tpu.memory_space<vmem>>, vector<256x256xf32>
      tpu.vector_store %arg11[%c0_10, %c0_11], %15 {strides = array<i32>} : memref<256x256xf32, #tpu.memory_space<vmem>>, vector<256x256xf32>,
    } else {
    }
    %c768_i32 = arith.constant 768 : i32
    %3 = arith.muli %arg1, %c768_i32 : i32
    %4 = tpu.assume_multiple %3, 256 : i32
    %5 = arith.index_cast %4 : i32 to index
    %c0 = arith.constant 0 : index
    %6 = vector.load %arg3[%5, %c0] : memref<768x256xbf16, #tpu.memory_space<vmem>>, vector<768x256xbf16>
    %c0_1 = arith.constant 0 : index
    %c0_2 = arith.constant 0 : index
    %7 = vector.load %arg11[%c0_1, %c0_2] : memref<256x256xf32, #tpu.memory_space<vmem>>, vector<256x256xf32>
    %c0_3 = arith.constant 0 : index
    %c0_4 = arith.constant 0 : index
    %8 = vector.load %arg2[%c0_3, %c0_4] : memref<256x768xbf16, #tpu.memory_space<vmem>>, vector<256x768xbf16>
    %cst = arith.constant dense<0.000000e+00> : vector<256x256xf32>
    %9 = tpu.matmul %8, %6, %cst {dimension_numbers = #tpu.dot_dimension_numbers<[1], [0], [0], [1], [0, 0, 1, 1], [], []>} : vector<256x768xbf16>, vector<768x256xbf16>, vector<256x256xf32> -> vector<256x256xf32>
    %10 = arith.addf %7, %9 : vector<256x256xf32>
    %c0_5 = arith.constant 0 : index
    %c0_6 = arith.constant 0 : index
    %11 = vector.load %arg11[%c0_5, %c0_6] : memref<256x256xf32, #tpu.memory_space<vmem>>, vector<256x256xf32>
    tpu.vector_store %arg11[%c0_5, %c0_6], %10 {strides = array<i32>} : memref<256x256xf32, #tpu.memory_space<vmem>>, vector<256x256xf32>,
    %c0_i32_7 = arith.constant 0 : i32
    %12 = arith.cmpi eq, %arg1, %c0_i32_7 : i32
    %13 = arith.extui %12 : i1 to i32
    %c0_i32_8 = arith.constant 0 : i32
    %14 = arith.cmpi ne, %13, %c0_i32_8 : i32
    scf.if %14 {
      %c0_9 = arith.constant 0 : index
      %c0_10 = arith.constant 0 : index
      %15 = vector.load %arg11[%c0_9, %c0_10] : memref<256x256xf32, #tpu.memory_space<vmem>>, vector<256x256xf32>
      %c0_11 = arith.constant 0 : index
      %c0_12 = arith.constant 0 : index
      %16 = vector.load %arg4[%c0_11, %c0_12] : memref<256x256xf32, #tpu.memory_space<vmem>>, vector<256x256xf32>
      %c0_13 = arith.constant 0 : index
      %c0_14 = arith.constant 0 : index
      %17 = vector.load %arg5[%c0_13, %c0_14] : memref<256x128xf32, #tpu.memory_space<vmem>>, vector<256x128xf32>
      %cst_15 = arith.constant dense<0.000000e+00> : vector<256x128xf32>
      %18 = tpu.matmul %15, %17, %cst_15 {dimension_numbers = #tpu.dot_dimension_numbers<[1], [0], [0], [1], [0, 0, 1, 1], [], []>} : vector<256x256xf32>, vector<256x128xf32>, vector<256x128xf32> -> vector<256x128xf32>
      %c0_16 = arith.constant 0 : index
      %c0_17 = arith.constant 0 : index
      %19 = vector.load %arg6[%c0_16, %c0_17] : memref<1x128xf32, #tpu.memory_space<vmem>>, vector<1x128xf32>
      %20 = vector.broadcast %19 : vector<1x128xf32> to vector<256x128xf32>
      %21 = arith.addf %18, %20 : vector<256x128xf32>
      %cst_18 = arith.constant 0.000000e+00 : f32
      %22 = vector.broadcast %cst_18 : f32 to vector<256x128xf32>
      %23 = arith.cmpf ogt, %21, %22 : vector<256x128xf32>
      %cst_19 = arith.constant 0.00999999977 : f32
      %24 = vector.broadcast %cst_19 : f32 to vector<256x128xf32>
      %25 = arith.mulf %24, %21 : vector<256x128xf32>
      %26 = arith.select %23, %21, %25 : vector<256x128xi1>, vector<256x128xf32>
      %27 = arith.mulf %16, %15 : vector<256x256xf32>
      %c0_20 = arith.constant 0 : index
      %c0_21 = arith.constant 0 : index
      %28 = vector.load %arg7[%c0_20, %c0_21] : memref<256x128xf32, #tpu.memory_space<vmem>>, vector<256x128xf32>
      %cst_22 = arith.constant dense<0.000000e+00> : vector<256x128xf32>
      %29 = tpu.matmul %27, %28, %cst_22 {dimension_numbers = #tpu.dot_dimension_numbers<[1], [0], [0], [1], [0, 0, 1, 1], [], []>} : vector<256x256xf32>, vector<256x128xf32>, vector<256x128xf32> -> vector<256x128xf32>
      %c0_23 = arith.constant 0 : index
      %c0_24 = arith.constant 0 : index
      %30 = vector.load %arg8[%c0_23, %c0_24] : memref<1x128xf32, #tpu.memory_space<vmem>>, vector<1x128xf32>
      %31 = vector.broadcast %30 : vector<1x128xf32> to vector<256x128xf32>
      %32 = arith.addf %29, %31 : vector<256x128xf32>
      %cst_25 = arith.constant 0.000000e+00 : f32
      %33 = vector.broadcast %cst_25 : f32 to vector<256x128xf32>
      %34 = arith.cmpf ogt, %32, %33 : vector<256x128xf32>
      %cst_26 = arith.constant 0.00999999977 : f32
      %35 = vector.broadcast %cst_26 : f32 to vector<256x128xf32>
      %36 = arith.mulf %35, %32 : vector<256x128xf32>
      %37 = arith.select %34, %32, %36 : vector<256x128xi1>, vector<256x128xf32>
      %38 = arith.addf %26, %37 : vector<256x128xf32>
      %39 = arith.mulf %38, %38 : vector<256x128xf32>
      %cst_27 = arith.constant dense<0.000000e+00> : vector<256xf32>
      %40 = vector.multi_reduction <add>, %39, %cst_27 [1] : vector<256x128xf32> to vector<256xf32>
      %41 = vector.shape_cast %40 : vector<256xf32> to vector<256x1xf32>
      %cst_28 = arith.constant 1.000000e-24 : f32
      %42 = vector.broadcast %cst_28 : f32 to vector<256x1xf32>
      %43 = arith.maximumf %41, %42 : vector<256x1xf32>
      %44 = math.rsqrt %43 : vector<256x1xf32>
      %c0_29 = arith.constant 0 : index
      %c0_30 = arith.constant 0 : index
      %45 = vector.load %arg9[%c0_29, %c0_30] : memref<256x128xf32, #tpu.memory_space<vmem>>, vector<256x128xf32>
      tpu.vector_store %arg9[%c0_29, %c0_30], %38 {strides = array<i32>} : memref<256x128xf32, #tpu.memory_space<vmem>>, vector<256x128xf32>,
      %46 = vector.broadcast %44 : vector<256x1xf32> to vector<256x128xf32>
      %47 = arith.mulf %38, %46 : vector<256x128xf32>
      %c0_31 = arith.constant 0 : index
      %c0_32 = arith.constant 0 : index
      %48 = vector.load %arg10[%c0_31, %c0_32] : memref<256x128xf32, #tpu.memory_space<vmem>>, vector<256x128xf32>
      tpu.vector_store %arg10[%c0_31, %c0_32], %47 {strides = array<i32>} : memref<256x128xf32, #tpu.memory_space<vmem>>, vector<256x128xf32>,
    } else {
    }
    return
  }
  func.func @transform_0(%arg0: i32, %arg1: i32) -> (i32, i32) {
    %c0_i32 = arith.constant 0 : i32
    return %arg0, %arg1 : i32, i32
  }
  func.func @transform_1(%arg0: i32, %arg1: i32) -> (i32, i32) {
    %c0_i32 = arith.constant 0 : i32
    %c0_i32_0 = arith.constant 0 : i32
    %c0_i32_1 = arith.constant 0 : i32
    return %c0_i32, %c0_i32_0 : i32, i32
  }
  func.func @transform_2(%arg0: i32, %arg1: i32) -> (i32, i32) {
    %c0_i32 = arith.constant 0 : i32
    %c0_i32_0 = arith.constant 0 : i32
    return %arg0, %c0_i32 : i32, i32
  }
  func.func @transform_3(%arg0: i32, %arg1: i32) -> (i32, i32) {
    %c0_i32 = arith.constant 0 : i32
    %c0_i32_0 = arith.constant 0 : i32
    %c0_i32_1 = arith.constant 0 : i32
    return %c0_i32, %c0_i32_0 : i32, i32
  }
  func.func @transform_4(%arg0: i32, %arg1: i32) -> (i32, i32) {
    %c0_i32 = arith.constant 0 : i32
    %c0_i32_0 = arith.constant 0 : i32
    %c0_i32_1 = arith.constant 0 : i32
    return %c0_i32, %c0_i32_0 : i32, i32
  }
  func.func @transform_5(%arg0: i32, %arg1: i32) -> (i32, i32) {
    %c0_i32 = arith.constant 0 : i32
    %c0_i32_0 = arith.constant 0 : i32
    %c0_i32_1 = arith.constant 0 : i32
    return %c0_i32, %c0_i32_0 : i32, i32
  }
  func.func @transform_6(%arg0: i32, %arg1: i32) -> (i32, i32) {
    %c0_i32 = arith.constant 0 : i32
    %c0_i32_0 = arith.constant 0 : i32
    %c0_i32_1 = arith.constant 0 : i32
    return %c0_i32, %c0_i32_0 : i32, i32
  }
  func.func @transform_7(%arg0: i32, %arg1: i32) -> (i32, i32) {
    %c0_i32 = arith.constant 0 : i32
    %c0_i32_0 = arith.constant 0 : i32
    return %arg0, %c0_i32 : i32, i32
  }
  func.func @transform_8(%arg0: i32, %arg1: i32) -> (i32, i32) {
    %c0_i32 = arith.constant 0 : i32
    %c0_i32_0 = arith.constant 0 : i32
    return %arg0, %c0_i32 : i32, i32
  }
}

module attributes {stable_mosaic.version = 11 : i64} {
  func.func @_gcn_layer_kernel(%arg0: i32, %arg1: i32, %arg2: memref<256x768xbf16, #tpu.memory_space<vmem>>, %arg3: memref<768x128xbf16, #tpu.memory_space<vmem>>, %arg4: memref<256x128xf32, #tpu.memory_space<vmem>>, %arg5: memref<128x128xf32, #tpu.memory_space<vmem>>, %arg6: memref<1x128xf32, #tpu.memory_space<vmem>>, %arg7: memref<128x128xf32, #tpu.memory_space<vmem>>, %arg8: memref<1x128xf32, #tpu.memory_space<vmem>>, %arg9: memref<256x128xf32, #tpu.memory_space<vmem>>, %arg10: memref<256x128xf32, #tpu.memory_space<vmem>>, %arg11: memref<256x128xf32, #tpu.memory_space<vmem>>) attributes {dimension_semantics = [#tpu.dimension_semantics<parallel>, #tpu.dimension_semantics<arbitrary>], iteration_bounds = array<i64: 3, 1>, scalar_prefetch = 0 : i64, scratch_operands = 1 : i64, tpu.core_type = #tpu.core_type<tc>, window_params = [{transform_indices = @transform_0, window_bounds = array<i64: 256, 768>}, {pipeline_mode = #tpu.pipeline_mode<synchronous>, transform_indices = @transform_1, window_bounds = array<i64: 768, 128>}, {transform_indices = @transform_2, window_bounds = array<i64: 256, 128>}, {pipeline_mode = #tpu.pipeline_mode<synchronous>, transform_indices = @transform_3, window_bounds = array<i64: 128, 128>}, {pipeline_mode = #tpu.pipeline_mode<synchronous>, transform_indices = @transform_4, window_bounds = array<i64: 1, 128>}, {pipeline_mode = #tpu.pipeline_mode<synchronous>, transform_indices = @transform_5, window_bounds = array<i64: 128, 128>}, {pipeline_mode = #tpu.pipeline_mode<synchronous>, transform_indices = @transform_6, window_bounds = array<i64: 1, 128>}, {transform_indices = @transform_7, window_bounds = array<i64: 256, 128>}, {transform_indices = @transform_8, window_bounds = array<i64: 256, 128>}]} {
    %c0_i32 = arith.constant 0 : i32
    %0 = arith.cmpi eq, %arg1, %c0_i32 : i32
    %1 = arith.extui %0 : i1 to i32
    %c0_i32_0 = arith.constant 0 : i32
    %2 = arith.cmpi ne, %1, %c0_i32_0 : i32
    scf.if %2 {
      %cst_9 = arith.constant 0.000000e+00 : f32
      %15 = vector.broadcast %cst_9 : f32 to vector<256x128xf32>
      %c0_10 = arith.constant 0 : index
      %c0_11 = arith.constant 0 : index
      %16 = vector.load %arg11[%c0_10, %c0_11] : memref<256x128xf32, #tpu.memory_space<vmem>>, vector<256x128xf32>
      tpu.vector_store %arg11[%c0_10, %c0_11], %15 {strides = array<i32>} : memref<256x128xf32, #tpu.memory_space<vmem>>, vector<256x128xf32>,
    } else {
    }
    %c768_i32 = arith.constant 768 : i32
    %3 = arith.muli %arg1, %c768_i32 : i32
    %4 = tpu.assume_multiple %3, 256 : i32
    %5 = arith.index_cast %4 : i32 to index
    %c0 = arith.constant 0 : index
    %6 = vector.load %arg3[%5, %c0] : memref<768x128xbf16, #tpu.memory_space<vmem>>, vector<768x128xbf16>
    %c0_1 = arith.constant 0 : index
    %c0_2 = arith.constant 0 : index
    %7 = vector.load %arg11[%c0_1, %c0_2] : memref<256x128xf32, #tpu.memory_space<vmem>>, vector<256x128xf32>
    %c0_3 = arith.constant 0 : index
    %c0_4 = arith.constant 0 : index
    %8 = vector.load %arg2[%c0_3, %c0_4] : memref<256x768xbf16, #tpu.memory_space<vmem>>, vector<256x768xbf16>
    %cst = arith.constant dense<0.000000e+00> : vector<256x128xf32>
    %9 = tpu.matmul %8, %6, %cst {dimension_numbers = #tpu.dot_dimension_numbers<[1], [0], [0], [1], [0, 0, 1, 1], [], []>} : vector<256x768xbf16>, vector<768x128xbf16>, vector<256x128xf32> -> vector<256x128xf32>
    %10 = arith.addf %7, %9 : vector<256x128xf32>
    %c0_5 = arith.constant 0 : index
    %c0_6 = arith.constant 0 : index
    %11 = vector.load %arg11[%c0_5, %c0_6] : memref<256x128xf32, #tpu.memory_space<vmem>>, vector<256x128xf32>
    tpu.vector_store %arg11[%c0_5, %c0_6], %10 {strides = array<i32>} : memref<256x128xf32, #tpu.memory_space<vmem>>, vector<256x128xf32>,
    %c0_i32_7 = arith.constant 0 : i32
    %12 = arith.cmpi eq, %arg1, %c0_i32_7 : i32
    %13 = arith.extui %12 : i1 to i32
    %c0_i32_8 = arith.constant 0 : i32
    %14 = arith.cmpi ne, %13, %c0_i32_8 : i32
    scf.if %14 {
      %c0_9 = arith.constant 0 : index
      %c0_10 = arith.constant 0 : index
      %15 = vector.load %arg11[%c0_9, %c0_10] : memref<256x128xf32, #tpu.memory_space<vmem>>, vector<256x128xf32>
      %c0_11 = arith.constant 0 : index
      %c0_12 = arith.constant 0 : index
      %16 = vector.load %arg4[%c0_11, %c0_12] : memref<256x128xf32, #tpu.memory_space<vmem>>, vector<256x128xf32>
      %c0_13 = arith.constant 0 : index
      %c0_14 = arith.constant 0 : index
      %17 = vector.load %arg5[%c0_13, %c0_14] : memref<128x128xf32, #tpu.memory_space<vmem>>, vector<128x128xf32>
      %cst_15 = arith.constant dense<0.000000e+00> : vector<256x128xf32>
      %18 = tpu.matmul %15, %17, %cst_15 {dimension_numbers = #tpu.dot_dimension_numbers<[1], [0], [0], [1], [0, 0, 1, 1], [], []>} : vector<256x128xf32>, vector<128x128xf32>, vector<256x128xf32> -> vector<256x128xf32>
      %c0_16 = arith.constant 0 : index
      %c0_17 = arith.constant 0 : index
      %19 = vector.load %arg6[%c0_16, %c0_17] : memref<1x128xf32, #tpu.memory_space<vmem>>, vector<1x128xf32>
      %20 = vector.broadcast %19 : vector<1x128xf32> to vector<256x128xf32>
      %21 = arith.addf %18, %20 : vector<256x128xf32>
      %cst_18 = arith.constant 0.000000e+00 : f32
      %22 = vector.broadcast %cst_18 : f32 to vector<256x128xf32>
      %23 = arith.cmpf ogt, %21, %22 : vector<256x128xf32>
      %cst_19 = arith.constant 0.00999999977 : f32
      %24 = vector.broadcast %cst_19 : f32 to vector<256x128xf32>
      %25 = arith.mulf %24, %21 : vector<256x128xf32>
      %26 = arith.select %23, %21, %25 : vector<256x128xi1>, vector<256x128xf32>
      %27 = arith.mulf %16, %15 : vector<256x128xf32>
      %c0_20 = arith.constant 0 : index
      %c0_21 = arith.constant 0 : index
      %28 = vector.load %arg7[%c0_20, %c0_21] : memref<128x128xf32, #tpu.memory_space<vmem>>, vector<128x128xf32>
      %cst_22 = arith.constant dense<0.000000e+00> : vector<256x128xf32>
      %29 = tpu.matmul %27, %28, %cst_22 {dimension_numbers = #tpu.dot_dimension_numbers<[1], [0], [0], [1], [0, 0, 1, 1], [], []>} : vector<256x128xf32>, vector<128x128xf32>, vector<256x128xf32> -> vector<256x128xf32>
      %c0_23 = arith.constant 0 : index
      %c0_24 = arith.constant 0 : index
      %30 = vector.load %arg8[%c0_23, %c0_24] : memref<1x128xf32, #tpu.memory_space<vmem>>, vector<1x128xf32>
      %31 = vector.broadcast %30 : vector<1x128xf32> to vector<256x128xf32>
      %32 = arith.addf %29, %31 : vector<256x128xf32>
      %cst_25 = arith.constant 0.000000e+00 : f32
      %33 = vector.broadcast %cst_25 : f32 to vector<256x128xf32>
      %34 = arith.cmpf ogt, %32, %33 : vector<256x128xf32>
      %cst_26 = arith.constant 0.00999999977 : f32
      %35 = vector.broadcast %cst_26 : f32 to vector<256x128xf32>
      %36 = arith.mulf %35, %32 : vector<256x128xf32>
      %37 = arith.select %34, %32, %36 : vector<256x128xi1>, vector<256x128xf32>
      %38 = arith.addf %26, %37 : vector<256x128xf32>
      %39 = arith.mulf %38, %38 : vector<256x128xf32>
      %cst_27 = arith.constant dense<0.000000e+00> : vector<256xf32>
      %40 = vector.multi_reduction <add>, %39, %cst_27 [1] : vector<256x128xf32> to vector<256xf32>
      %41 = vector.shape_cast %40 : vector<256xf32> to vector<256x1xf32>
      %cst_28 = arith.constant 1.000000e-24 : f32
      %42 = vector.broadcast %cst_28 : f32 to vector<256x1xf32>
      %43 = arith.maximumf %41, %42 : vector<256x1xf32>
      %44 = math.rsqrt %43 : vector<256x1xf32>
      %c0_29 = arith.constant 0 : index
      %c0_30 = arith.constant 0 : index
      %45 = vector.load %arg9[%c0_29, %c0_30] : memref<256x128xf32, #tpu.memory_space<vmem>>, vector<256x128xf32>
      tpu.vector_store %arg9[%c0_29, %c0_30], %38 {strides = array<i32>} : memref<256x128xf32, #tpu.memory_space<vmem>>, vector<256x128xf32>,
      %46 = vector.broadcast %44 : vector<256x1xf32> to vector<256x128xf32>
      %47 = arith.mulf %38, %46 : vector<256x128xf32>
      %c0_31 = arith.constant 0 : index
      %c0_32 = arith.constant 0 : index
      %48 = vector.load %arg10[%c0_31, %c0_32] : memref<256x128xf32, #tpu.memory_space<vmem>>, vector<256x128xf32>
      tpu.vector_store %arg10[%c0_31, %c0_32], %47 {strides = array<i32>} : memref<256x128xf32, #tpu.memory_space<vmem>>, vector<256x128xf32>,
    } else {
    }
    return
  }
  func.func @transform_0(%arg0: i32, %arg1: i32) -> (i32, i32) {
    %c0_i32 = arith.constant 0 : i32
    return %arg0, %arg1 : i32, i32
  }
  func.func @transform_1(%arg0: i32, %arg1: i32) -> (i32, i32) {
    %c0_i32 = arith.constant 0 : i32
    %c0_i32_0 = arith.constant 0 : i32
    %c0_i32_1 = arith.constant 0 : i32
    return %c0_i32, %c0_i32_0 : i32, i32
  }
  func.func @transform_2(%arg0: i32, %arg1: i32) -> (i32, i32) {
    %c0_i32 = arith.constant 0 : i32
    %c0_i32_0 = arith.constant 0 : i32
    return %arg0, %c0_i32 : i32, i32
  }
  func.func @transform_3(%arg0: i32, %arg1: i32) -> (i32, i32) {
    %c0_i32 = arith.constant 0 : i32
    %c0_i32_0 = arith.constant 0 : i32
    %c0_i32_1 = arith.constant 0 : i32
    return %c0_i32, %c0_i32_0 : i32, i32
  }
  func.func @transform_4(%arg0: i32, %arg1: i32) -> (i32, i32) {
    %c0_i32 = arith.constant 0 : i32
    %c0_i32_0 = arith.constant 0 : i32
    %c0_i32_1 = arith.constant 0 : i32
    return %c0_i32, %c0_i32_0 : i32, i32
  }
  func.func @transform_5(%arg0: i32, %arg1: i32) -> (i32, i32) {
    %c0_i32 = arith.constant 0 : i32
    %c0_i32_0 = arith.constant 0 : i32
    %c0_i32_1 = arith.constant 0 : i32
    return %c0_i32, %c0_i32_0 : i32, i32
  }
  func.func @transform_6(%arg0: i32, %arg1: i32) -> (i32, i32) {
    %c0_i32 = arith.constant 0 : i32
    %c0_i32_0 = arith.constant 0 : i32
    %c0_i32_1 = arith.constant 0 : i32
    return %c0_i32, %c0_i32_0 : i32, i32
  }
  func.func @transform_7(%arg0: i32, %arg1: i32) -> (i32, i32) {
    %c0_i32 = arith.constant 0 : i32
    %c0_i32_0 = arith.constant 0 : i32
    return %arg0, %c0_i32 : i32, i32
  }
  func.func @transform_8(%arg0: i32, %arg1: i32) -> (i32, i32) {
    %c0_i32 = arith.constant 0 : i32
    %c0_i32_0 = arith.constant 0 : i32
    return %arg0, %c0_i32 : i32, i32
  }
}

</mosaic_0001>

<bundles_post_ra>
// kernel: _lambda_.3
= control target key start
LH: loop header
LB: loop body
LE: loop exit
PB: predicated region body
PF: predicated region fallthrough
CT: control target
= control target key end

     0   :  { %14 = vsyncpa [#allocation3], 0  ;;  %s3047_s0 = inlined_call_operand.hbm [shape: f32[128,256], index: 0, kind: input, shape index: {}]   ;;  %s3048_s1 = inlined_call_operand.hbm [shape: f32[256,256], index: 1, kind: input, shape index: {}]   ;;  %s3049_s2 = inlined_call_operand.hbm [shape: f32[1,256], index: 2, kind: input, shape index: {}]   ;;  %s3050_s3 = inlined_call_operand.hbm [shape: f32[256,256], index: 3, kind: input, shape index: {}]   ;;  %s3051_s4 = inlined_call_operand.hbm [shape: f32[1,256], index: 4, kind: input, shape index: {}]   ;;  %s3052_s5 = inlined_call_operand.hbm [shape: f32[256,256], index: 5, kind: input, shape index: {}]   ;;  %s3053_s6 = inlined_call_operand.hbm [shape: f32[1,256], index: 6, kind: input, shape index: {}]   ;;  %s3054_s7 = inlined_call_operand.hbm [shape: f32[256,256], index: 7, kind: input, shape index: {}]   ;;  %s3055_s8 = inlined_call_operand.hbm [shape: f32[1,256], index: 8, kind: input, shape index: {}]   ;;  %s3056_s9 = inlined_call_operand.vmem [shape: f32[128,256], index: 9, kind: output, shape index: {}]  }
   0x1   :  { %15 = vsyncpa [#allocation5], 0 }
   0x2   :  { %16 = vsyncpa [#allocation8], 0 }
   0x3   :  { %17 = vsyncpa [#allocation11], 0 }
   0x4   :  { %18 = vsyncpa [#allocation14], 0  ;;  %s2237_s30 = smov [#allocation4]   ;;  %s2238_s11 = smov [#allocation7]  }
   0x5   :  { %s36_s10 = sshll.u32 %s2237_s30, 4  ;;  %s58_s12 = sshll.u32 %s2238_s11, 4  ;;  %s37_s10 = int_to_ptr.vmem [resolvable:$true] %s36_s10  ;;  %s2299_s12 = int_to_ptr.vmem [resolvable:$true] %s58_s12 }
   0x6   :  { %s2029_s15 = scalar_lea.hbm %s3048_s1, 8192 }
   0x7   :  { %p2030_p0 = scmp.ne.s32.totalorder %s3048_s1, %s2029_s15  ;;  %p2033_p1 = scmp.lt.u32.totalorder %s2029_s15, %s3048_s1 }
   0x9   :  { %p2035_p2 = pnand %p2033_p1, %p2030_p0 }
   0xb   :  { %2038 = shalt.err (!%p2035_p2)
}
   0xc   :  { %s2039_s20 = scalar_lea.vmem %s37_s10, 8192  ;;  %p2044_p4 = scmp.lt.s32.totalorder %s37_s10, %s37_s10 }
   0xd   :  { %p2040_p3 = scmp.ne.s32.totalorder %s37_s10, %s2039_s20  ;;  %p2045_p5 = scmp.lt.s32.totalorder %s2039_s20, %s2039_s20 }
   0xf   :  { %p2046_p6 = por %p2045_p5, %p2044_p4 }
  0x11   :  { %p2047_p7 = pnand %p2046_p6, %p2040_p3 }
  0x13   :  { %2050 = shalt.err (!%p2047_p7)
}
  0x14   :  { %s2239_s21 = smov 256   ;;  %s2240_s22 = smov 16  }
  0x15   :  { %42 = dma.hbm_to_vmem [thread:$0]  %s3048_s1, 8192, %s37_s10, [#allocation5], %s2239_s21, %s2239_s21, %s2240_s22  }
  0x16   :  { %s2051_s27 = scalar_lea.hbm %s3050_s3, 8192 }
  0x17   :  { %p2052_p8 = scmp.ne.s32.totalorder %s3050_s3, %s2051_s27  ;;  %p2055_p9 = scmp.lt.u32.totalorder %s2051_s27, %s3050_s3 }
  0x19   :  { %p2057_p10 = pnand %p2055_p9, %p2052_p8 }
  0x1b   :  { %2060 = shalt.err (!%p2057_p10)
}
  0x1c   :  { %s2061_s13 = scalar_lea.vmem %s2299_s12, 8192  ;;  %p2066_p12 = scmp.lt.s32.totalorder %s2299_s12, %s2299_s12 }
  0x1d   :  { %p2062_p11 = scmp.ne.s32.totalorder %s2299_s12, %s2061_s13  ;;  %p2067_p13 = scmp.lt.s32.totalorder %s2061_s13, %s2061_s13 }
  0x1f   :  { %p2068_p0 = por %p2067_p13, %p2066_p12 }
  0x21   :  { %p2069_p1 = pnand %p2068_p0, %p2062_p11 }
  0x23   :  { %2072 = shalt.err (!%p2069_p1)
}
  0x24   :  { %64 = dma.hbm_to_vmem [thread:$0]  %s3050_s3, 8192, %s2299_s12, [#allocation8], %s2239_s21, %s2239_s21, %s2240_s22  }
  0x25   :  { %s2241_s14 = smov [#allocation10]   ;;  %s2242_s16 = smov [#allocation13]  }
  0x26   :  { %s80_s15 = sshll.u32 %s2241_s14, 4  ;;  %s102_s17 = sshll.u32 %s2242_s16, 4  ;;  %s81_s15 = int_to_ptr.vmem [resolvable:$true] %s80_s15  ;;  %s2336_s17 = int_to_ptr.vmem [resolvable:$true] %s102_s17 }
  0x27   :  { %s2073_s20 = scalar_lea.hbm %s3052_s5, 8192 }
  0x28   :  { %p2074_p2 = scmp.ne.s32.totalorder %s3052_s5, %s2073_s20  ;;  %p2077_p3 = scmp.lt.u32.totalorder %s2073_s20, %s3052_s5 }
  0x2a   :  { %p2079_p4 = pnand %p2077_p3, %p2074_p2 }
  0x2c   :  { %2082 = shalt.err (!%p2079_p4)
}
  0x2d   :  { %s2083_s3 = scalar_lea.vmem %s81_s15, 8192  ;;  %p2088_p6 = scmp.lt.s32.totalorder %s81_s15, %s81_s15 }
  0x2e   :  { %p2084_p5 = scmp.ne.s32.totalorder %s81_s15, %s2083_s3  ;;  %p2089_p7 = scmp.lt.s32.totalorder %s2083_s3, %s2083_s3 }
  0x30   :  { %p2090_p8 = por %p2089_p7, %p2088_p6 }
  0x32   :  { %p2091_p9 = pnand %p2090_p8, %p2084_p5 }
  0x34   :  { %2094 = shalt.err (!%p2091_p9)
}
  0x35   :  { %86 = dma.hbm_to_vmem [thread:$0]  %s3052_s5, 8192, %s81_s15, [#allocation11], %s2239_s21, %s2239_s21, %s2240_s22  }
  0x36   :  { %s2095_s30 = scalar_lea.hbm %s3054_s7, 8192 }
  0x37   :  { %p2096_p10 = scmp.ne.s32.totalorder %s3054_s7, %s2095_s30  ;;  %p2099_p11 = scmp.lt.u32.totalorder %s2095_s30, %s3054_s7 }
  0x39   :  { %p2101_p12 = pnand %p2099_p11, %p2096_p10 }
  0x3b   :  { %2104 = shalt.err (!%p2101_p12)
}
  0x3c   :  { %s2105_s14 = scalar_lea.vmem %s2336_s17, 8192  ;;  %p2110_p0 = scmp.lt.s32.totalorder %s2336_s17, %s2336_s17 }
  0x3d   :  { %p2106_p13 = scmp.ne.s32.totalorder %s2336_s17, %s2105_s14  ;;  %p2111_p1 = scmp.lt.s32.totalorder %s2105_s14, %s2105_s14 }
  0x3f   :  { %p2112_p2 = por %p2111_p1, %p2110_p0 }
  0x41   :  { %p2113_p3 = pnand %p2112_p2, %p2106_p13 }
  0x43   :  { %2116 = shalt.err (!%p2113_p3)
}
  0x44   :  { %108 = dma.hbm_to_vmem [thread:$0]  %s3054_s7, 8192, %s2336_s17, [#allocation14], %s2239_s21, %s2239_s21, %s2240_s22  }
  0x45   :  { %s2243_s16 = smov [#allocation2]   ;;  %s2244_s19 = smov [#allocation6]  }
  0x46   :  { %s24_s18 = sshll.u32 %s2243_s16, 4  ;;  %s49_s20 = sshll.u32 %s2244_s19, 4  ;;  %s25_s18 = int_to_ptr.vmem [resolvable:$true] %s24_s18  ;;  %s50_s20 = int_to_ptr.vmem [resolvable:$true] %s49_s20 }
  0x47   :  { %s2117_s25 = scalar_lea.hbm %s3047_s0, 4096 }
  0x48   :  { %p2118_p4 = scmp.ne.s32.totalorder %s3047_s0, %s2117_s25  ;;  %p2121_p5 = scmp.lt.u32.totalorder %s2117_s25, %s3047_s0 }
  0x4a   :  { %p2123_p6 = pnand %p2121_p5, %p2118_p4 }
  0x4c   :  { %2126 = shalt.err (!%p2123_p6)
}
  0x4d   :  { %s2127_s7 = scalar_lea.vmem %s25_s18, 4096  ;;  %p2132_p8 = scmp.lt.s32.totalorder %s25_s18, %s25_s18 }
  0x4e   :  { %p2128_p7 = scmp.ne.s32.totalorder %s25_s18, %s2127_s7  ;;  %p2133_p9 = scmp.lt.s32.totalorder %s2127_s7, %s2127_s7 }
  0x50   :  { %p2134_p10 = por %p2133_p9, %p2132_p8 }
  0x52   :  { %p2135_p11 = pnand %p2134_p10, %p2128_p7 }
  0x54   :  { %2138 = shalt.err (!%p2135_p11)
}
  0x55   :  { %30 = dma.hbm_to_vmem [thread:$0]  %s3047_s0, 4096, %s25_s18, [#allocation3], %s2239_s21, %s2239_s21, %s2240_s22  }
  0x56   :  { %s2139_s11 = scalar_lea.hbm %s3049_s2, 32 }
  0x57   :  { %p2140_p12 = scmp.ne.s32.totalorder %s3049_s2, %s2139_s11  ;;  %p2143_p13 = scmp.lt.u32.totalorder %s2139_s11, %s3049_s2 }
  0x59   :  { %p2145_p0 = pnand %p2143_p13, %p2140_p12 }
  0x5b   :  { %2148 = shalt.err (!%p2145_p0)
}
  0x5c   :  { %s2149_s5 = scalar_lea.vmem %s50_s20, 32  ;;  %p2154_p2 = scmp.lt.s32.totalorder %s50_s20, %s50_s20 }
  0x5d   :  { %p2150_p1 = scmp.ne.s32.totalorder %s50_s20, %s2149_s5  ;;  %p2155_p3 = scmp.lt.s32.totalorder %s2149_s5, %s2149_s5 }
  0x5f   :  { %p2156_p4 = por %p2155_p3, %p2154_p2 }
  0x61   :  { %p2157_p5 = pnand %p2156_p4, %p2150_p1 }
  0x63   :  { %2160 = shalt.err (!%p2157_p5)
}
  0x64   :  { %52 = dma.hbm_to_vmem [thread:$0]  %s3049_s2, 32, %s50_s20, [#allocation5]  }
  0x65   :  { %s2245_s22 = smov [#allocation9]   ;;  %s2246_s16 = smov [#allocation12]  }
  0x66   :  { %s71_s15 = sshll.u32 %s2245_s22, 4  ;;  %s93_s18 = sshll.u32 %s2246_s16, 4  ;;  %s72_s15 = int_to_ptr.vmem [resolvable:$true] %s71_s15  ;;  %s94_s18 = int_to_ptr.vmem [resolvable:$true] %s93_s18 }
  0x67   :  { %s2161_s24 = scalar_lea.hbm %s3051_s4, 32 }
  0x68   :  { %p2162_p6 = scmp.ne.s32.totalorder %s3051_s4, %s2161_s24  ;;  %p2165_p7 = scmp.lt.u32.totalorder %s2161_s24, %s3051_s4 }
  0x6a   :  { %p2167_p8 = pnand %p2165_p7, %p2162_p6 }
  0x6c   :  { %2170 = shalt.err (!%p2167_p8)
}
  0x6d   :  { %s2171_s2 = scalar_lea.vmem %s72_s15, 32  ;;  %p2176_p10 = scmp.lt.s32.totalorder %s72_s15, %s72_s15 }
  0x6e   :  { %p2172_p9 = scmp.ne.s32.totalorder %s72_s15, %s2171_s2  ;;  %p2177_p11 = scmp.lt.s32.totalorder %s2171_s2, %s2171_s2 }
  0x70   :  { %p2178_p12 = por %p2177_p11, %p2176_p10 }
  0x72   :  { %p2179_p13 = pnand %p2178_p12, %p2172_p9 }
  0x74   :  { %2182 = shalt.err (!%p2179_p13)
}
  0x75   :  { %74 = dma.hbm_to_vmem [thread:$0]  %s3051_s4, 32, %s72_s15, [#allocation8]  }
  0x76   :  { %s2183_s28 = scalar_lea.hbm %s3053_s6, 32 }
  0x77   :  { %p2184_p0 = scmp.ne.s32.totalorder %s3053_s6, %s2183_s28  ;;  %p2187_p1 = scmp.lt.u32.totalorder %s2183_s28, %s3053_s6 }
  0x79   :  { %p2189_p2 = pnand %p2187_p1, %p2184_p0 }
  0x7b   :  { %2192 = shalt.err (!%p2189_p2)
}
  0x7c   :  { %s2193_s1 = scalar_lea.vmem %s94_s18, 32  ;;  %p2198_p4 = scmp.lt.s32.totalorder %s94_s18, %s94_s18 }
  0x7d   :  { %p2194_p3 = scmp.ne.s32.totalorder %s94_s18, %s2193_s1  ;;  %p2199_p5 = scmp.lt.s32.totalorder %s2193_s1, %s2193_s1 }
  0x7f   :  { %p2200_p6 = por %p2199_p5, %p2198_p4 }
  0x81   :  { %p2201_p7 = pnand %p2200_p6, %p2194_p3 }
  0x83   :  { %2204 = shalt.err (!%p2201_p7)
}
  0x84   :  { %96 = dma.hbm_to_vmem [thread:$0]  %s3053_s6, 32, %s94_s18, [#allocation11]  }
  0x85   :  { %s2247_s14 = smov [#allocation15]   ;;  %s2205_s22 = scalar_lea.hbm %s3055_s8, 32 }
  0x86   :  { %s115_s5 = sshll.u32 %s2247_s14, 4  ;;  %p2206_p8 = scmp.ne.s32.totalorder %s3055_s8, %s2205_s22  ;;  %s116_s5 = int_to_ptr.vmem [resolvable:$true] %s115_s5 }
  0x87   :  { %p2209_p9 = scmp.lt.u32.totalorder %s2205_s22, %s3055_s8 }
  0x89   :  { %p2211_p10 = pnand %p2209_p9, %p2206_p8 }
  0x8b   :  { %2214 = shalt.err (!%p2211_p10)
}
  0x8c   :  { %s2215_s24 = scalar_lea.vmem %s116_s5, 32  ;;  %p2220_p12 = scmp.lt.s32.totalorder %s116_s5, %s116_s5 }
  0x8d   :  { %p2216_p11 = scmp.ne.s32.totalorder %s116_s5, %s2215_s24  ;;  %p2221_p13 = scmp.lt.s32.totalorder %s2215_s24, %s2215_s24 }
  0x8f   :  { %p2222_p0 = por %p2221_p13, %p2220_p12 }
  0x91   :  { %p2223_p1 = pnand %p2222_p0, %p2216_p11 }
  0x93   :  { %2226 = shalt.err (!%p2223_p1)
}
  0x94   :  { %118 = dma.hbm_to_vmem [thread:$0]  %s3055_s8, 32, %s116_s5, [#allocation14]  }
  0x95   :  { %2227 = dma.done.wait [#allocation3], 4096  }
  0x96   :  { %2228 = vsyncadd [#allocation3], 4294963200 }
  0x97   :  { %2229 = dma.done.wait [#allocation5], 8224  }
  0x98   :  { %2230 = vsyncadd [#allocation5], 4294959072 }
  0x99   :  { %2231 = dma.done.wait [#allocation8], 8224  }
  0x9a   :  { %2232 = vsyncadd [#allocation8], 4294959072 }
  0x9b   :  { %2233 = dma.done.wait [#allocation11], 8224  }
  0x9c   :  { %2234 = vsyncadd [#allocation11], 4294959072 }
  0x9d   :  { %2235 = dma.done.wait [#allocation14], 8224  }
  0x9e   :  { %2236 = vsyncadd [#allocation14], 4294959072  ;;  %v416_v0 = vld [vmem:[#allocation7 + $0x8] sm:$0xff]  ;;  %v418_v1 = vld [vmem:[#allocation7 + $0x18] sm:$0xff] }
  0x9f   :  { %v415_v2 = vld [vmem:[#allocation7] sm:$0xff]  ;;  %v1697_v3 = vpack.c.bf16 %v418_v1, %v416_v0  ;;  %v417_v4 = vld [vmem:[#allocation7 + $0x10] sm:$0xff]  ;;  %v420_v5 = vld [vmem:[#allocation7 + $0x28] sm:$0xff] }
  0xa0   :  { %v422_v6 = vld [vmem:[#allocation7 + $0x38] sm:$0xff]  ;;  %v1699_v7 = vpack.c.bf16 %v417_v4, %v415_v2  ;;  %v419_v9 = vld [vmem:[#allocation7 + $0x20] sm:$0xff]  ;;  %v421_v10 = vld [vmem:[#allocation7 + $0x30] sm:$0xff] }
  0xa1   :  { %v1701_v8 = vpack.c.bf16 %v422_v6, %v420_v5  ;;  %v424_v11 = vld [vmem:[#allocation7 + $0x48] sm:$0xff]  ;;  %1698 = vmatprep.subr.bf16.mxu1 %v1697_v3  ;;  %v426_v12 = vld [vmem:[#allocation7 + $0x58] sm:$0xff]  ;;  %v1703_v13 = vpack.c.bf16 %v421_v10, %v419_v9  ;;  %v423_v15 = vld [vmem:[#allocation7 + $0x40] sm:$0xff] }
  0xa2   :  { %1700 = vmatpush1.bf16.msra.mxu1 %v1699_v7  ;;  %v1705_v14 = vpack.c.bf16 %v426_v12, %v424_v11  ;;  %v425_v16 = vld [vmem:[#allocation7 + $0x50] sm:$0xff]  ;;  %v428_v17 = vld [vmem:[#allocation7 + $0x68] sm:$0xff]  ;;  %v430_v18 = vld [vmem:[#allocation7 + $0x78] sm:$0xff] }
  0xa3   :  { %1702 = vmatprep.subr.bf16.mxu1 %v1701_v8  ;;  %v1707_v19 = vpack.c.bf16 %v425_v16, %v423_v15  ;;  %v1709_v20 = vpack.c.bf16 %v430_v18, %v428_v17  ;;  %v427_v21 = vld [vmem:[#allocation7 + $0x60] sm:$0xff]  ;;  %v429_v22 = vld [vmem:[#allocation7 + $0x70] sm:$0xff]  ;;  %v432_v23 = vld [vmem:[#allocation7 + $0x88] sm:$0xff] }
  0xa4   :  { %v434_v24 = vld [vmem:[#allocation7 + $0x98] sm:$0xff]  ;;  %v1711_v25 = vpack.c.bf16 %v429_v22, %v427_v21  ;;  %v431_v27 = vld [vmem:[#allocation7 + $0x80] sm:$0xff]  ;;  %v433_v28 = vld [vmem:[#allocation7 + $0x90] sm:$0xff] }
  0xa5   :  { %v1713_v26 = vpack.c.bf16 %v434_v24, %v432_v23  ;;  %v436_v29 = vld [vmem:[#allocation7 + $0xa8] sm:$0xff]  ;;  %v438_v30 = vld [vmem:[#allocation7 + $0xb8] sm:$0xff]  ;;  %v1715_v31 = vpack.c.bf16 %v433_v28, %v431_v27  ;;  %v435_v33 = vld [vmem:[#allocation7 + $0xa0] sm:$0xff] }
  0xa6   :  { %1704 = vmatpush1.bf16.msra.mxu1 %v1703_v13  ;;  %v1717_v32 = vpack.c.bf16 %v438_v30, %v436_v29  ;;  %v437_v34 = vld [vmem:[#allocation7 + $0xb0] sm:$0xff]  ;;  %v440_v35 = vld [vmem:[#allocation7 + $0xc8] sm:$0xff]  ;;  %v442_v36 = vld [vmem:[#allocation7 + $0xd8] sm:$0xff] }
  0xa7   :  { %1706 = vmatprep.subr.bf16.mxu1 %v1705_v14  ;;  %v1719_v37 = vpack.c.bf16 %v437_v34, %v435_v33  ;;  %v1721_v38 = vpack.c.bf16 %v442_v36, %v440_v35  ;;  %v439_v39 = vld [vmem:[#allocation7 + $0xc0] sm:$0xff]  ;;  %v441_v40 = vld [vmem:[#allocation7 + $0xd0] sm:$0xff]  ;;  %v444_v42 = vld [vmem:[#allocation7 + $0xe8] sm:$0xff] }
  0xa8   :  { %v2436_v41 = vld [vmem:[#allocation2 + $0x8] sm:$0xff]  ;;  %v446_v43 = vld [vmem:[#allocation7 + $0xf8] sm:$0xff]  ;;  %v180_v47 = vld [vmem:[#allocation4 + $0x10] sm:$0xff]  ;;  %v1723_v48 = vpack.c.bf16 %v441_v40, %v439_v39 }
  0xa9   :  { %555 = vmatprep.mubr.f32.mxu1 %v2436_v41  ;;  %v179_v44 = vld [vmem:[#allocation4 + $0x8] sm:$0xff]  ;;  %318 = vmatprep.mubr.f32.mxu0 %v2436_v41  ;;  %v181_v45 = vld [vmem:[#allocation4 + $0x18] sm:$0xff]  ;;  %v178_v46 = vld [vmem:[#allocation4] sm:$0xff]  ;;  %v1725_v54 = vpack.c.bf16 %v446_v43, %v444_v42 }
  0xaa   :  { %1708 = vmatpush1.bf16.msra.mxu1 %v1707_v19  ;;  %v443_v49 = vld [vmem:[#allocation7 + $0xe0] sm:$0xff]  ;;  %v445_v50 = vld [vmem:[#allocation7 + $0xf0] sm:$0xff]  ;;  %v1633_v51 = vpack.c.bf16 %v181_v45, %v179_v44  ;;  %v1635_v52 = vpack.c.bf16 %v180_v47, %v178_v46  ;;  %v448_v58 = vld [vmem:[#allocation7 + $0x108] sm:$0xff] }
  0xab   :  { %1710 = vmatprep.subr.bf16.mxu1 %v1709_v20  ;;  %v183_v53 = vld [vmem:[#allocation4 + $0x28] sm:$0xff]  ;;  %v185_v55 = vld [vmem:[#allocation4 + $0x38] sm:$0xff]  ;;  %v182_v56 = vld [vmem:[#allocation4 + $0x20] sm:$0xff]  ;;  %v1727_v0 = vpack.c.bf16 %v445_v50, %v443_v49 }
  0xac   :  { %v184_v57 = vld [vmem:[#allocation4 + $0x30] sm:$0xff]  ;;  %v450_v59 = vld [vmem:[#allocation7 + $0x118] sm:$0xff]  ;;  %1634 = vmatprep.subr.bf16.mxu0 %v1633_v51  ;;  %v1637_v60 = vpack.c.bf16 %v185_v55, %v183_v53  ;;  %v187_v61 = vld [vmem:[#allocation4 + $0x48] sm:$0xff] }
  0xad   :  { %1636 = vmatpush1.bf16.msra.mxu0 %v1635_v52  ;;  %v1639_v62 = vpack.c.bf16 %v184_v57, %v182_v56  ;;  %v189_v63 = vld [vmem:[#allocation4 + $0x58] sm:$0xff]  ;;  %v447_v1 = vld [vmem:[#allocation7 + $0x100] sm:$0xff]  ;;  %v188_v4 = vld [vmem:[#allocation4 + $0x50] sm:$0xff]  ;;  %v1729_v5 = vpack.c.bf16 %v450_v59, %v448_v58 }
  0xae   :  { %1712 = vmatpush1.bf16.msra.mxu1 %v1711_v25  ;;  %1638 = vmatprep.subr.bf16.mxu0 %v1637_v60  ;;  %v1641_v2 = vpack.c.bf16 %v189_v63, %v187_v61  ;;  %v186_v3 = vld [vmem:[#allocation4 + $0x40] sm:$0xff]  ;;  %v449_v6 = vld [vmem:[#allocation7 + $0x110] sm:$0xff]  ;;  %v191_v7 = vld [vmem:[#allocation4 + $0x68] sm:$0xff] }
  0xaf   :  { %1714 = vmatprep.subr.bf16.mxu1 %v1713_v26  ;;  %v193_v8 = vld [vmem:[#allocation4 + $0x78] sm:$0xff]  ;;  %v452_v9 = vld [vmem:[#allocation7 + $0x128] sm:$0xff]  ;;  %v1643_v11 = vpack.c.bf16 %v188_v4, %v186_v3  ;;  %v1731_v12 = vpack.c.bf16 %v449_v6, %v447_v1  ;;  %v451_v13 = vld [vmem:[#allocation7 + $0x120] sm:$0xff] }
  0xb0   :  { %v454_v10 = vld [vmem:[#allocation7 + $0x138] sm:$0xff]  ;;  %v1645_v14 = vpack.c.bf16 %v193_v8, %v191_v7  ;;  %v192_v16 = vld [vmem:[#allocation4 + $0x70] sm:$0xff]  ;;  %v195_v19 = vld [vmem:[#allocation4 + $0x88] sm:$0xff] }
  0xb1   :  { %1640 = vmatpush1.bf16.msra.mxu0 %v1639_v62  ;;  %v190_v15 = vld [vmem:[#allocation4 + $0x60] sm:$0xff]  ;;  %v1733_v17 = vpack.c.bf16 %v454_v10, %v452_v9  ;;  %v453_v18 = vld [vmem:[#allocation7 + $0x130] sm:$0xff]  ;;  %v456_v21 = vld [vmem:[#allocation7 + $0x148] sm:$0xff] }
  0xb2   :  { %1716 = vmatpush1.bf16.msra.mxu1 %v1715_v31  ;;  %1642 = vmatprep.subr.bf16.mxu0 %v1641_v2  ;;  %v197_v20 = vld [vmem:[#allocation4 + $0x98] sm:$0xff]  ;;  %v1647_v23 = vpack.c.bf16 %v192_v16, %v190_v15  ;;  %v1735_v24 = vpack.c.bf16 %v453_v18, %v451_v13  ;;  %v455_v25 = vld [vmem:[#allocation7 + $0x140] sm:$0xff]  ;;  %v196_v28 = vld [vmem:[#allocation4 + $0x90] sm:$0xff] }
  0xb3   :  { %1718 = vmatprep.subr.bf16.mxu1 %v1717_v32  ;;  %v458_v22 = vld [vmem:[#allocation7 + $0x158] sm:$0xff]  ;;  %v1649_v26 = vpack.c.bf16 %v197_v20, %v195_v19  ;;  %v457_v30 = vld [vmem:[#allocation7 + $0x150] sm:$0xff]  ;;  %v199_v31 = vld [vmem:[#allocation4 + $0xa8] sm:$0xff] }
  0xb4   :  { %v194_v27 = vld [vmem:[#allocation4 + $0x80] sm:$0xff]  ;;  %v1737_v29 = vpack.c.bf16 %v458_v22, %v456_v21  ;;  %v201_v32 = vld [vmem:[#allocation4 + $0xb8] sm:$0xff]  ;;  %v460_v33 = vld [vmem:[#allocation7 + $0x168] sm:$0xff]  ;;  %v1739_v36 = vpack.c.bf16 %v457_v30, %v455_v25 }
  0xb5   :  { %1644 = vmatpush1.bf16.msra.mxu0 %v1643_v11  ;;  %v462_v34 = vld [vmem:[#allocation7 + $0x178] sm:$0xff]  ;;  %v1651_v35 = vpack.c.bf16 %v196_v28, %v194_v27  ;;  %v200_v40 = vld [vmem:[#allocation4 + $0xb0] sm:$0xff]  ;;  %v203_v44 = vld [vmem:[#allocation4 + $0xc8] sm:$0xff] }
  0xb6   :  { %1720 = vmatpush1.bf16.msra.mxu1 %v1719_v37  ;;  %1646 = vmatprep.subr.bf16.mxu0 %v1645_v14  ;;  %v459_v37 = vld [vmem:[#allocation7 + $0x160] sm:$0xff]  ;;  %v1741_v42 = vpack.c.bf16 %v462_v34, %v460_v33  ;;  %v461_v43 = vld [vmem:[#allocation7 + $0x170] sm:$0xff]  ;;  %v464_v46 = vld [vmem:[#allocation7 + $0x188] sm:$0xff] }
  0xb7   :  { %1722 = vmatprep.subr.bf16.mxu1 %v1721_v38  ;;  %v1653_v38 = vpack.c.bf16 %v201_v32, %v199_v31  ;;  %v198_v39 = vld [vmem:[#allocation4 + $0xa0] sm:$0xff]  ;;  %v205_v45 = vld [vmem:[#allocation4 + $0xd8] sm:$0xff]  ;;  %v1743_v49 = vpack.c.bf16 %v461_v43, %v459_v37  ;;  %v204_v53 = vld [vmem:[#allocation4 + $0xd0] sm:$0xff] }
  0xb8   :  { %v466_v47 = vld [vmem:[#allocation7 + $0x198] sm:$0xff]  ;;  %v463_v50 = vld [vmem:[#allocation7 + $0x180] sm:$0xff]  ;;  %v1657_v51 = vpack.c.bf16 %v205_v45, %v203_v44  ;;  %v465_v55 = vld [vmem:[#allocation7 + $0x190] sm:$0xff] }
  0xb9   :  { %1648 = vmatpush1.bf16.msra.mxu0 %v1647_v23  ;;  %v202_v52 = vld [vmem:[#allocation4 + $0xc0] sm:$0xff]  ;;  %v207_v56 = vld [vmem:[#allocation4 + $0xe8] sm:$0xff]  ;;  %v209_v57 = vld [vmem:[#allocation4 + $0xf8] sm:$0xff]  ;;  %v1747_v61 = vpack.c.bf16 %v465_v55, %v463_v50 }
  0xba   :  { %1724 = vmatpush1.bf16.msra.mxu1 %v1723_v48  ;;  %1650 = vmatprep.subr.bf16.mxu0 %v1649_v26  ;;  %v1655_v48 = vpack.c.bf16 %v200_v40, %v198_v39  ;;  %v468_v58 = vld [vmem:[#allocation7 + $0x1a8] sm:$0xff]  ;;  %v470_v59 = vld [vmem:[#allocation7 + $0x1b8] sm:$0xff]  ;;  %v1659_v60 = vpack.c.bf16 %v204_v53, %v202_v52  ;;  %v467_v62 = vld [vmem:[#allocation7 + $0x1a0] sm:$0xff]  ;;  %v1661_v63 = vpack.c.bf16 %v209_v57, %v207_v56 }
  0xbb   :  { %1726 = vmatprep.subr.bf16.mxu1 %v1725_v54  ;;  %v1745_v54 = vpack.c.bf16 %v466_v47, %v464_v46  ;;  %v208_v1 = vld [vmem:[#allocation4 + $0xf0] sm:$0xff]  ;;  %v1749_v2 = vpack.c.bf16 %v470_v59, %v468_v58  ;;  %v211_v4 = vld [vmem:[#allocation4 + $0x108] sm:$0xff]  ;;  %v474_v7 = vld [vmem:[#allocation7 + $0x1d8] sm:$0xff] }
  0xbc   :  { %v469_v3 = vld [vmem:[#allocation7 + $0x1b0] sm:$0xff]  ;;  %v472_v6 = vld [vmem:[#allocation7 + $0x1c8] sm:$0xff]  ;;  %v471_v10 = vld [vmem:[#allocation7 + $0x1c0] sm:$0xff] }
  0xbd   :  { %1652 = vmatpush1.bf16.msra.mxu0 %v1651_v35  ;;  %v1751_v9 = vpack.c.bf16 %v469_v3, %v467_v62  ;;  %v212_v13 = vld [vmem:[#allocation4 + $0x110] sm:$0xff]  ;;  %v1753_v14 = vpack.c.bf16 %v474_v7, %v472_v6  ;;  %v215_v16 = vld [vmem:[#allocation4 + $0x128] sm:$0xff]  ;;  %v478_v19 = vld [vmem:[#allocation7 + $0x1f8] sm:$0xff] }
  0xbe   :  { %1728 = vmatpush1.bf16.msra.mxu1 %v1727_v0  ;;  %1654 = vmatprep.subr.bf16.mxu0 %v1653_v38  ;;  %v206_v0 = vld [vmem:[#allocation4 + $0xe0] sm:$0xff]  ;;  %v473_v15 = vld [vmem:[#allocation7 + $0x1d0] sm:$0xff]  ;;  %v476_v18 = vld [vmem:[#allocation7 + $0x1e8] sm:$0xff] }
  0xbf   :  { %1730 = vmatprep.subr.bf16.mxu1 %v1729_v5  ;;  %v213_v5 = vld [vmem:[#allocation4 + $0x118] sm:$0xff]  ;;  %v1663_v8 = vpack.c.bf16 %v208_v1, %v206_v0  ;;  %v1755_v21 = vpack.c.bf16 %v473_v15, %v471_v10  ;;  %v475_v22 = vld [vmem:[#allocation7 + $0x1e0] sm:$0xff]  ;;  %v216_v25 = vld [vmem:[#allocation4 + $0x130] sm:$0xff]  ;;  %v1757_v26 = vpack.c.bf16 %v478_v19, %v476_v18 }
  0xc0   :  { %v1665_v11 = vpack.c.bf16 %v213_v5, %v211_v4  ;;  %v477_v27 = vld [vmem:[#allocation7 + $0x1f0] sm:$0xff]  ;;  %v219_v28 = vld [vmem:[#allocation4 + $0x148] sm:$0xff]  ;;  %v218_v33 = vld [vmem:[#allocation4 + $0x140] sm:$0xff] }
  0xc1   :  { %1656 = vmatpush1.bf16.msra.mxu0 %v1655_v48  ;;  %v1759_v31 = vpack.c.bf16 %v477_v27, %v475_v22  ;;  %v220_v34 = vld [vmem:[#allocation4 + $0x150] sm:$0xff]  ;;  %v223_v35 = vld [vmem:[#allocation4 + $0x168] sm:$0xff]  ;;  %v2440_v38 = vld [vmem:[#allocation2] sm:$0xff] }
  0xc2   :  { %1732 = vmatpush1.bf16.msra.mxu1 %v1731_v12  ;;  %1658 = vmatprep.subr.bf16.mxu0 %v1657_v51  ;;  %v210_v12 = vld [vmem:[#allocation4 + $0x100] sm:$0xff]  ;;  %v1675_v37 = vpack.c.bf16 %v220_v34, %v218_v33  ;;  %v2442_v43 = vld [vmem:[#allocation2 + $0x18] sm:$0xff]  ;;  %v227_v44 = vld [vmem:[#allocation4 + $0x188] sm:$0xff]  ;;  %v244_v34 = vlaneseq }
  0xc3   :  { %1734 = vmatprep.subr.bf16.mxu1 %v1733_v17  ;;  %v217_v17 = vld [vmem:[#allocation4 + $0x138] sm:$0xff]  ;;  %v1667_v20 = vpack.c.bf16 %v212_v13, %v210_v12  ;;  %v222_v40 = vld [vmem:[#allocation4 + $0x160] sm:$0xff]  ;;  %v2446_v47 = vld [vmem:[#allocation2 + $0x10] sm:$0xff] }
  0xc4   :  { %v1669_v23 = vpack.c.bf16 %v217_v17, %v215_v16  ;;  %v229_v45 = vld [vmem:[#allocation4 + $0x198] sm:$0xff]  ;;  %v228_v50 = vld [vmem:[#allocation4 + $0x190] sm:$0xff]  ;;  %v2448_v51 = vld [vmem:[#allocation2 + $0x28] sm:$0xff] }
  0xc5   :  { %1660 = vmatpush1.bf16.msra.mxu0 %v1659_v60  ;;  %v1681_v48 = vpack.c.bf16 %v229_v45, %v227_v44  ;;  %v231_v52 = vld [vmem:[#allocation4 + $0x1a8] sm:$0xff]  ;;  %v233_v53 = vld [vmem:[#allocation4 + $0x1b8] sm:$0xff]  ;;  %v2452_v55 = vld [vmem:[#allocation2 + $0x20] sm:$0xff] }
  0xc6   :  { %1736 = vmatpush1.bf16.msra.mxu1 %v1735_v24  ;;  %1662 = vmatprep.subr.bf16.mxu0 %v1661_v63  ;;  %v214_v24 = vld [vmem:[#allocation4 + $0x120] sm:$0xff]  ;;  %v1685_v56 = vpack.c.bf16 %v233_v53, %v231_v52  ;;  %v232_v58 = vld [vmem:[#allocation4 + $0x1b0] sm:$0xff]  ;;  %v2454_v59 = vld [vmem:[#allocation2 + $0x38] sm:$0xff] }
  0xc7   :  { %1738 = vmatprep.subr.bf16.mxu1 %v1737_v29  ;;  %v221_v29 = vld [vmem:[#allocation4 + $0x158] sm:$0xff]  ;;  %v1671_v30 = vpack.c.bf16 %v216_v25, %v214_v24  ;;  %v230_v57 = vld [vmem:[#allocation4 + $0x1a0] sm:$0xff]  ;;  %v235_v60 = vld [vmem:[#allocation4 + $0x1c8] sm:$0xff] }
  0xc8   :  { %v1673_v32 = vpack.c.bf16 %v221_v29, %v219_v28  ;;  %v1687_v62 = vpack.c.bf16 %v232_v58, %v230_v57  ;;  %v2458_v63 = vld [vmem:[#allocation2 + $0x30] sm:$0xff]  ;;  %v234_v1 = vld [vmem:[#allocation4 + $0x1c0] sm:$0xff]  ;;  %v2460_v3 = vld [vmem:[#allocation2 + $0x48] sm:$0xff] }
  0xc9   :  { %1664 = vmatpush1.bf16.msra.mxu0 %v1663_v8  ;;  %v239_v4 = vld [vmem:[#allocation4 + $0x1e8] sm:$0xff]  ;;  %v241_v5 = vld [vmem:[#allocation4 + $0x1f8] sm:$0xff]  ;;  %v2464_v7 = vld [vmem:[#allocation2 + $0x40] sm:$0xff] }
  0xca   :  { %1740 = vmatpush1.bf16.msra.mxu1 %v1739_v36  ;;  %1666 = vmatprep.subr.bf16.mxu0 %v1665_v11  ;;  %v225_v36 = vld [vmem:[#allocation4 + $0x178] sm:$0xff]  ;;  %v1693_v8 = vpack.c.bf16 %v241_v5, %v239_v4  ;;  %v240_v10 = vld [vmem:[#allocation4 + $0x1f0] sm:$0xff]  ;;  %v2476_v15 = vld [vmem:[#allocation2 + $0x60] sm:$0xff] }
  0xcb   :  { %1742 = vmatprep.subr.bf16.mxu1 %v1741_v42  ;;  %v1677_v39 = vpack.c.bf16 %v225_v36, %v223_v35  ;;  %v224_v42 = vld [vmem:[#allocation4 + $0x170] sm:$0xff]  ;;  %v2466_v11 = vld [vmem:[#allocation2 + $0x58] sm:$0xff]  ;;  %v2486_v18 = vld [vmem:[#allocation2 + $0x88] sm:$0xff]  ;;  %v245_v35 = vshrl.u32 %v244_v34, 7 }
  0xcc   :  { %v1679_v46 = vpack.c.bf16 %v224_v42, %v222_v40  ;;  %v2470_v13 = vld [vmem:[#allocation2 + $0x50] sm:$0xff]  ;;  %v2478_v16 = vld [vmem:[#allocation2 + $0x78] sm:$0xff]  ;;  %v2492_v19 = vld [vmem:[#allocation2 + $0x80] sm:$0xff] }
  0xcd   :  { %1668 = vmatpush1.bf16.msra.mxu0 %v1667_v20  ;;  %v2484_v17 = vld [vmem:[#allocation2 + $0x70] sm:$0xff]  ;;  %v2494_v20 = vld [vmem:[#allocation2 + $0x98] sm:$0xff]  ;;  %v2502_v22 = vld [vmem:[#allocation2 + $0xa8] sm:$0xff]  ;;  %v2565_v36 = vsub.s32 0, %v245_v35 }
  0xce   :  { %1744 = vmatpush1.bf16.msra.mxu1 %v1743_v49  ;;  %1670 = vmatprep.subr.bf16.mxu0 %v1669_v23  ;;  %v226_v49 = vld [vmem:[#allocation4 + $0x180] sm:$0xff]  ;;  %v2510_v24 = vld [vmem:[#allocation2 + $0xb8] sm:$0xff]  ;;  %v2516_v25 = vld [vmem:[#allocation2 + $0xb0] sm:$0xff] }
  0xcf   :  { %1746 = vmatprep.subr.bf16.mxu1 %v1745_v54  ;;  %v1683_v54 = vpack.c.bf16 %v228_v50, %v226_v49  ;;  %v2508_v23 = vld [vmem:[#allocation2 + $0xa0] sm:$0xff]  ;;  %v2526_v28 = vld [vmem:[#allocation2 + $0xd8] sm:$0xff]  ;;  %v2532_v29 = vld [vmem:[#allocation2 + $0xd0] sm:$0xff] }
  0xd0   :  { %v2524_v27 = vld [vmem:[#allocation2 + $0xc0] sm:$0xff]  ;;  %3065 = vst [vmem:[#allocation21_spill] sm:$0xff] %v2526_v28  ;;  %3066 = vst [vmem:[#allocation22_spill] sm:$0xff] %v2532_v29  ;;  %v2548_v33 = vld [vmem:[#allocation2 + $0xf0] sm:$0xff] }
  0xd1   :  { %1672 = vmatpush1.bf16.msra.mxu0 %v1671_v30  ;;  %v2534_v30 = vld [vmem:[#allocation2 + $0xe8] sm:$0xff]  ;;  %3070 = vst [vmem:[#allocation26_spill] sm:$0xff] %v2548_v33 }
  0xd2   :  { %1748 = vmatpush1.bf16.msra.mxu1 %v1747_v61  ;;  %1674 = vmatprep.subr.bf16.mxu0 %v1673_v32  ;;  %v237_v61 = vld [vmem:[#allocation4 + $0x1d8] sm:$0xff]  ;;  %3067 = vst [vmem:[#allocation23_spill] sm:$0xff] %v2534_v30  ;;  %v653_v53 = vld [vmem:[#allocation10 + $0x8] sm:$0xff]  ;;  %v656_v5 = vld [vmem:[#allocation10 + $0x20] sm:$0xff] }
  0xd3   :  { %1750 = vmatprep.subr.bf16.mxu1 %v1749_v2  ;;  %v1689_v0 = vpack.c.bf16 %v237_v61, %v235_v60  ;;  %v236_v2 = vld [vmem:[#allocation4 + $0x1d0] sm:$0xff]  ;;  %v2542_v32 = vld [vmem:[#allocation2 + $0xf8] sm:$0xff] }
  0xd4   :  { %v1691_v6 = vpack.c.bf16 %v236_v2, %v234_v1  ;;  %3069 = vst [vmem:[#allocation25_spill] sm:$0xff] %v2542_v32  ;;  %v654_v60 = vld [vmem:[#allocation10 + $0x10] sm:$0xff]  ;;  %v657_v61 = vld [vmem:[#allocation10 + $0x28] sm:$0xff] }
  0xd5   :  { %1676 = vmatpush1.bf16.msra.mxu0 %v1675_v37  ;;  %v479_v37 = vld [vmem:[#allocation9] sm:$0x3] }
  0xd6   :  { %1752 = vmatpush1.bf16.msra.mxu1 %v1751_v9  ;;  %1678 = vmatprep.subr.bf16.mxu0 %v1677_v39  ;;  %v238_v9 = vld [vmem:[#allocation4 + $0x1e0] sm:$0xff]  ;;  %v2567_v39 = vsub.s32 1, %v245_v35  ;;  %v2570_v42 = vrot.slane %v479_v37, %v2565_v36 }
  0xd7   :  { %1754 = vmatprep.subr.bf16.mxu1 %v1753_v14  ;;  %v1695_v12 = vpack.c.bf16 %v240_v10, %v238_v9  ;;  %v2472_v14 = vld [vmem:[#allocation2 + $0x68] sm:$0xff]  ;;  %v663_v10 = vld [vmem:[#allocation10 + $0x58] sm:$0xff] }
  0xd8   :  { %3071 = vst [vmem:[#allocation27_spill] sm:$0xff] %v2567_v39  ;;  %v2573_v45 = vrot.slane %v479_v37, %v2567_v39  ;;  %v660_v35 = vld [vmem:[#allocation10 + $0x40] sm:$0xff]  ;;  %v662_v37 = vld [vmem:[#allocation10 + $0x50] sm:$0xff] }
  0xd9   :  { %1680 = vmatpush1.bf16.msra.mxu0 %v1679_v46 }
  0xda   :  { %1756 = vmatpush1.bf16.msra.mxu1 %v1755_v21  ;;  %1682 = vmatprep.subr.bf16.mxu0 %v1681_v48  ;;  %v2500_v21 = vld [vmem:[#allocation2 + $0x90] sm:$0xff] }
  0xdb   :  { %1758 = vmatprep.subr.bf16.mxu1 %v1757_v26  ;;  %v2518_v26 = vld [vmem:[#allocation2 + $0xc8] sm:$0xff] }
  0xdd   :  { %1684 = vmatpush1.bf16.msra.mxu0 %v1683_v54  ;;  %v655_v54 = vld [vmem:[#allocation10 + $0x18] sm:$0xff] }
  0xde   :  { %1760 = vmatpush1.bf16.msra.mxu1 %v1759_v31  ;;  %1686 = vmatprep.subr.bf16.mxu0 %v1685_v56  ;;  %v2540_v31 = vld [vmem:[#allocation2 + $0xe0] sm:$0xff]  ;;  %v1761_v58 = vpack.c.bf16 %v655_v54, %v653_v53  ;;  %v1771_v53 = vpack.c.bf16 %v662_v37, %v660_v35  ;;  %v673_v37 = vld [vmem:[#allocation10 + $0xa8] sm:$0xff] }
  0xdf   :  { %3068 = vst [vmem:[#allocation24_spill] sm:$0xff] %v2540_v31  ;;  %v652_v56 = vld [vmem:[#allocation10] sm:$0xff] }
  0xe0   :  { %v1763_v2 = vpack.c.bf16 %v654_v60, %v652_v56 }
  0xe1   :  { %556 = vmatmul.mubr.f32.vlgmr.msra.gmra.mrb[0].mxu1 %v2440_v38  ;;  %1688 = vmatpush1.bf16.msra.mxu0 %v1687_v62  ;;  %v659_v62 = vld [vmem:[#allocation10 + $0x38] sm:$0xff] }
  0xe2   :  { %561 = vmatprep.mubr.f32.mxu1 %v2442_v43  ;;  %1690 = vmatprep.subr.bf16.mxu0 %v1689_v0  ;;  %v1765_v4 = vpack.c.bf16 %v659_v62, %v657_v61  ;;  %v669_v62 = vld [vmem:[#allocation10 + $0x88] sm:$0xff] }
  0xe5   :  { %562 = vmatmul.mubr.f32.gmra.mrb[2].mxu1 %v2446_v47  ;;  %1692 = vmatpush1.bf16.msra.mxu0 %v1691_v6  ;;  %v658_v6 = vld [vmem:[#allocation10 + $0x30] sm:$0xff] }
  0xe6   :  { %567 = vmatprep.mubr.f32.mxu1 %v2448_v51  ;;  %1694 = vmatprep.subr.bf16.mxu0 %v1693_v8  ;;  %v661_v8 = vld [vmem:[#allocation10 + $0x48] sm:$0xff] }
  0xe7   :  { %v1769_v34 = vpack.c.bf16 %v663_v10, %v661_v8  ;;  %v670_v8 = vld [vmem:[#allocation10 + $0x90] sm:$0xff] }
  0xe9   :  { %568 = vmatmul.mubr.f32.gmra.mrb[4].mxu1 %v2452_v55  ;;  %1696 = vmatpush1.bf16.msra.mxu0 %v1695_v12  ;;  %v1767_v12 = vpack.c.bf16 %v658_v6, %v656_v5  ;;  %v668_v6 = vld [vmem:[#allocation10 + $0x80] sm:$0xff] }
  0xea   :  { %573 = vmatprep.mubr.f32.mxu1 %v2454_v59  ;;  %1762 = vmatprep.subr.bf16.mxu0 %v1761_v58  ;;  %v666_v58 = vld [vmem:[#allocation10 + $0x70] sm:$0xff] }
  0xec   :  { %319 = vmatmul.mubr.f32.vlgmr.msra.gmra.mrb[0].mxu0 %v2440_v38 }
  0xed   :  { %574 = vmatmul.mubr.f32.gmra.mrb[6].mxu1 %v2458_v63  ;;  %324 = vmatprep.mubr.f32.mxu0 %v2442_v43 }
  0xee   :  { %579 = vmatprep.mubr.f32.mxu1 %v2460_v3  ;;  %1764 = vmatpush1.bf16.msra.mxu0 %v1763_v2 }
  0xef   :  { %1766 = vmatprep.subr.bf16.mxu0 %v1765_v4 }
  0xf0   :  { %325 = vmatmul.mubr.f32.gmra.mrb[2].mxu0 %v2446_v47 }
  0xf1   :  { %580 = vmatmul.mubr.f32.gmra.mrb[8].mxu1 %v2464_v7  ;;  %330 = vmatprep.mubr.f32.mxu0 %v2448_v51 }
  0xf2   :  { %585 = vmatprep.mubr.f32.mxu1 %v2466_v11  ;;  %1768 = vmatpush1.bf16.msra.mxu0 %v1767_v12 }
  0xf3   :  { %1770 = vmatprep.subr.bf16.mxu0 %v1769_v34 }
  0xf4   :  { %331 = vmatmul.mubr.f32.gmra.mrb[4].mxu0 %v2452_v55 }
  0xf5   :  { %586 = vmatmul.mubr.f32.gmra.mrb[10].mxu1 %v2470_v13  ;;  %336 = vmatprep.mubr.f32.mxu0 %v2454_v59 }
  0xf6   :  { %591 = vmatprep.mubr.f32.mxu1 %v2472_v14  ;;  %1772 = vmatpush1.bf16.msra.mxu0 %v1771_v53 }
  0xf8   :  { %337 = vmatmul.mubr.f32.gmra.mrb[6].mxu0 %v2458_v63 }
  0xf9   :  { %592 = vmatmul.mubr.f32.gmra.mrb[12].mxu1 %v2476_v15  ;;  %342 = vmatprep.mubr.f32.mxu0 %v2460_v3 }
  0xfa   :  { %597 = vmatprep.mubr.f32.mxu1 %v2478_v16 }
  0xfc   :  { %343 = vmatmul.mubr.f32.gmra.mrb[8].mxu0 %v2464_v7 }
  0xfd   :  { %598 = vmatmul.mubr.f32.gmra.mrb[14].mxu1 %v2484_v17  ;;  %348 = vmatprep.mubr.f32.mxu0 %v2466_v11 }
  0xfe   :  { %603 = vmatprep.mubr.f32.mxu1 %v2486_v18 }
 0x100   :  { %349 = vmatmul.mubr.f32.gmra.mrb[10].mxu0 %v2470_v13 }
 0x101   :  { %604 = vmatmul.mubr.f32.gmra.mrb[16].mxu1 %v2492_v19  ;;  %354 = vmatprep.mubr.f32.mxu0 %v2472_v14 }
 0x102   :  { %609 = vmatprep.mubr.f32.mxu1 %v2494_v20 }
 0x104   :  { %355 = vmatmul.mubr.f32.gmra.mrb[12].mxu0 %v2476_v15 }
 0x105   :  { %610 = vmatmul.mubr.f32.gmra.mrb[18].mxu1 %v2500_v21  ;;  %360 = vmatprep.mubr.f32.mxu0 %v2478_v16 }
 0x106   :  { %615 = vmatprep.mubr.f32.mxu1 %v2502_v22 }
 0x108   :  { %361 = vmatmul.mubr.f32.gmra.mrb[14].mxu0 %v2484_v17 }
 0x109   :  { %616 = vmatmul.mubr.f32.gmra.mrb[20].mxu1 %v2508_v23  ;;  %366 = vmatprep.mubr.f32.mxu0 %v2486_v18 }
 0x10a   :  { %621 = vmatprep.mubr.f32.mxu1 %v2510_v24 }
 0x10c   :  { %367 = vmatmul.mubr.f32.gmra.mrb[16].mxu0 %v2492_v19 }
 0x10d   :  { %622 = vmatmul.mubr.f32.gmra.mrb[22].mxu1 %v2516_v25  ;;  %372 = vmatprep.mubr.f32.mxu0 %v2494_v20 }
 0x10e   :  { %627 = vmatprep.mubr.f32.mxu1 %v2518_v26 }
 0x110   :  { %373 = vmatmul.mubr.f32.gmra.mrb[18].mxu0 %v2500_v21 }
 0x111   :  { %628 = vmatmul.mubr.f32.gmra.mrb[24].mxu1 %v2524_v27  ;;  %378 = vmatprep.mubr.f32.mxu0 %v2502_v22 }
 0x112   :  { %633 = vmatprep.mubr.f32.mxu1 %v2526_v28 }
 0x114   :  { %379 = vmatmul.mubr.f32.gmra.mrb[20].mxu0 %v2508_v23 }
 0x115   :  { %634 = vmatmul.mubr.f32.gmra.mrb[26].mxu1 %v2532_v29  ;;  %384 = vmatprep.mubr.f32.mxu0 %v2510_v24 }
 0x116   :  { %639 = vmatprep.mubr.f32.mxu1 %v2534_v30 }
 0x118   :  { %385 = vmatmul.mubr.f32.gmra.mrb[22].mxu0 %v2516_v25 }
 0x119   :  { %640 = vmatmul.mubr.f32.gmra.mrb[28].mxu1 %v2540_v31  ;;  %390 = vmatprep.mubr.f32.mxu0 %v2518_v26 }
 0x11a   :  { %645 = vmatprep.mubr.f32.mxu1 %v2542_v32 }
 0x11c   :  { %391 = vmatmul.mubr.f32.gmra.mrb[24].mxu0 %v2524_v27 }
 0x11d   :  { %646 = vmatmul.mubr.f32.gmra.mrb[30].mxu1 %v2548_v33  ;;  %396 = vmatprep.mubr.f32.mxu0 %v2526_v28 }
 0x120   :  { %397 = vmatmul.mubr.f32.gmra.mrb[26].mxu0 %v2532_v29 }
 0x121   :  { %402 = vmatprep.mubr.f32.mxu0 %v2534_v30 }
 0x124   :  { %403 = vmatmul.mubr.f32.gmra.mrb[28].mxu0 %v2540_v31 }
 0x125   :  { %408 = vmatprep.mubr.f32.mxu0 %v2542_v32 }
 0x128   :  { %409 = vmatmul.mubr.f32.gmra.mrb[30].mxu0 %v2548_v33 }
 0x129   :  { %792 = vmatprep.mubr.f32.mxu0 %v2436_v41 }
 0x1b4   :  { %v557_v40 = vpop.f32.mrb[0].mxu1 }
 0x1b5   :  { %v559_v44 = vpop.f32.mrb[1].mxu1  ;;  %v558_v48 = vadd.f32 %v557_v40, %v2570_v42 }
 0x1b6   :  { %v560_v50 = vadd.f32 %v559_v44, %v2573_v45  ;;  %v665_v44 = vld [vmem:[#allocation10 + $0x68] sm:$0xff] }
 0x1b8   :  { %v563_v46 = vpop.f32.mrb[2].mxu1 }
 0x1b9   :  { %v564_v41 = vadd.f32 %v563_v46, %v2570_v42  ;;  %v565_v49 = vpop.f32.mrb[3].mxu1  ;;  %v667_v46 = vld [vmem:[#allocation10 + $0x78] sm:$0xff] }
 0x1ba   :  { %v566_v52 = vadd.f32 %v565_v49, %v2573_v45  ;;  %v1773_v56 = vpack.c.bf16 %v667_v46, %v665_v44 }
 0x1bb   :  { %v1827_v57 = vpack.c.bf16 %v564_v41, %v558_v48 }
 0x1bc   :  { %v1825_v0 = vpack.c.bf16 %v566_v52, %v560_v50  ;;  %v569_v1 = vpop.f32.mrb[4].mxu1  ;;  %1774 = vmatprep.subr.bf16.mxu0 %v1773_v56 }
 0x1bd   :  { %v571_v9 = vpop.f32.mrb[5].mxu1  ;;  %v570_v48 = vadd.f32 %v569_v1, %v2570_v42  ;;  %v2583_v1 = vld [vmem:[#allocation6] sm:$0x3] }
 0x1be   :  { %1826 = vmatprep.subr.bf16.mxu1 %v1825_v0  ;;  %v572_v50 = vadd.f32 %v571_v9, %v2573_v45  ;;  %v671_v0 = vld [vmem:[#allocation10 + $0x98] sm:$0xff]  ;;  %v2589_v35 = vrot.slane %v2583_v1, %v2567_v39 }
 0x1bf   :  { %1828 = vmatpush1.bf16.xpose.msra.mxu1 %v1827_v57  ;;  %v664_v57 = vld [vmem:[#allocation10 + $0x60] sm:$0xff]  ;;  %v1777_v5 = vpack.c.bf16 %v671_v0, %v669_v62 }
 0x1c0   :  { %v575_v40 = vpop.f32.mrb[6].mxu1  ;;  %v1775_v4 = vpack.c.bf16 %v666_v58, %v664_v57  ;;  %v677_v58 = vld [vmem:[#allocation10 + $0xc8] sm:$0xff] }
 0x1c1   :  { %v576_v41 = vadd.f32 %v575_v40, %v2570_v42  ;;  %v577_v49 = vpop.f32.mrb[7].mxu1  ;;  %v675_v40 = vld [vmem:[#allocation10 + $0xb8] sm:$0xff] }
 0x1c2   :  { %v578_v52 = vadd.f32 %v577_v49, %v2573_v45  ;;  %1776 = vmatpush1.bf16.msra.mxu0 %v1775_v4  ;;  %v2593_v49 = vpop.f32.mrb[0].mxu0  ;;  %v1781_v57 = vpack.c.bf16 %v675_v40, %v673_v37 }
 0x1c3   :  { %v1831_v54 = vpack.c.bf16 %v576_v41, %v570_v48  ;;  %v1779_v48 = vpack.c.bf16 %v670_v8, %v668_v6  ;;  %1778 = vmatprep.subr.bf16.mxu0 %v1777_v5  ;;  %v322_v56 = vpop.f32.mrb[1].mxu0  ;;  %v676_v5 = vld [vmem:[#allocation10 + $0xc0] sm:$0xff]  ;;  %v678_v6 = vld [vmem:[#allocation10 + $0xd0] sm:$0xff] }
 0x1c4   :  { %v1829_v60 = vpack.c.bf16 %v578_v52, %v572_v50  ;;  %v581_v61 = vpop.f32.mrb[8].mxu1  ;;  %v672_v50 = vld [vmem:[#allocation10 + $0xa0] sm:$0xff]  ;;  %v674_v52 = vld [vmem:[#allocation10 + $0xb0] sm:$0xff]  ;;  %v323_v62 = vadd.f32 %v322_v56, %v2589_v35 }
 0x1c5   :  { %v583_v2 = vpop.f32.mrb[9].mxu1  ;;  %v582_v10 = vadd.f32 %v581_v61, %v2570_v42  ;;  %v1783_v0 = vpack.c.bf16 %v674_v52, %v672_v50  ;;  %v682_v56 = vld [vmem:[#allocation10 + $0xf0] sm:$0xff] }
 0x1c6   :  { %1830 = vmatprep.subr.bf16.mxu1 %v1829_v60  ;;  %v584_v44 = vadd.f32 %v583_v2, %v2573_v45  ;;  %v679_v60 = vld [vmem:[#allocation10 + $0xd8] sm:$0xff]  ;;  %1780 = vmatpush1.bf16.msra.mxu0 %v1779_v48  ;;  %v2596_v2 = vpop.f32.mrb[2].mxu0  ;;  %v1787_v48 = vpack.c.bf16 %v678_v6, %v676_v5  ;;  %v684_v6 = vld [vmem:[#allocation10 + $0x100] sm:$0xff] }
 0x1c7   :  { %1832 = vmatpush1.bf16.xpose.msra.mxu1 %v1831_v54  ;;  %953 = vmatprep.mubr.f32.mxu1 %v323_v62  ;;  %v1785_v4 = vpack.c.bf16 %v679_v60, %v677_v58  ;;  %v687_v62 = vld [vmem:[#allocation10 + $0x118] sm:$0xff] }
 0x1c8   :  { %v587_v9 = vpop.f32.mrb[10].mxu1  ;;  %1782 = vmatprep.subr.bf16.mxu0 %v1781_v57 }
 0x1c9   :  { %v588_v12 = vadd.f32 %v587_v9, %v2570_v42  ;;  %v589_v34 = vpop.f32.mrb[11].mxu1  ;;  %v2598_v9 = vpop.f32.mrb[3].mxu0 }
 0x1ca   :  { %v590_v46 = vadd.f32 %v589_v34, %v2573_v45  ;;  %1784 = vmatpush1.bf16.msra.mxu0 %v1783_v0  ;;  %v2604_v50 = vpop.f32.mrb[4].mxu0 }
 0x1cb   :  { %v1835_v41 = vpack.c.bf16 %v588_v12, %v582_v10  ;;  %v681_v10 = vld [vmem:[#allocation10 + $0xe8] sm:$0xff]  ;;  %v683_v12 = vld [vmem:[#allocation10 + $0xf8] sm:$0xff]  ;;  %1786 = vmatprep.subr.bf16.mxu0 %v1785_v4  ;;  %v2606_v60 = vpop.f32.mrb[5].mxu0  ;;  %v686_v4 = vld [vmem:[#allocation10 + $0x110] sm:$0xff] }
 0x1cc   :  { %v1833_v53 = vpack.c.bf16 %v590_v46, %v584_v44  ;;  %v593_v54 = vpop.f32.mrb[12].mxu1  ;;  %v1789_v52 = vpack.c.bf16 %v683_v12, %v681_v10  ;;  %v2608_v0 = vpop.f32.mrb[6].mxu0 }
 0x1cd   :  { %v595_v61 = vpop.f32.mrb[13].mxu1  ;;  %v594_v34 = vadd.f32 %v593_v54, %v2570_v42  ;;  %v685_v54 = vld [vmem:[#allocation10 + $0x108] sm:$0xff]  ;;  %v2610_v12 = vpop.f32.mrb[7].mxu0 }
 0x1ce   :  { %1834 = vmatprep.subr.bf16.mxu1 %v1833_v53  ;;  %v596_v44 = vadd.f32 %v595_v61, %v2573_v45  ;;  %v680_v53 = vld [vmem:[#allocation10 + $0xe0] sm:$0xff]  ;;  %1788 = vmatpush1.bf16.msra.mxu0 %v1787_v48  ;;  %v1793_v5 = vpack.c.bf16 %v687_v62, %v685_v54  ;;  %v690_v62 = vld [vmem:[#allocation10 + $0x130] sm:$0xff] }
 0x1cf   :  { %1836 = vmatpush1.bf16.xpose.msra.mxu1 %v1835_v41  ;;  %v1791_v61 = vpack.c.bf16 %v682_v56, %v680_v53  ;;  %1790 = vmatprep.subr.bf16.mxu0 %v1789_v52  ;;  %v1795_v53 = vpack.c.bf16 %v686_v4, %v684_v6  ;;  %v2616_v56 = vpop.f32.mrb[8].mxu0  ;;  %v688_v54 = vld [vmem:[#allocation10 + $0x120] sm:$0xff] }
 0x1d0   :  { %v599_v8 = vpop.f32.mrb[14].mxu1  ;;  %v2618_v32 = vpop.f32.mrb[9].mxu0 }
 0x1d1   :  { %v600_v37 = vadd.f32 %v599_v8, %v2570_v42  ;;  %v601_v40 = vpop.f32.mrb[15].mxu1 }
 0x1d2   :  { %v602_v46 = vadd.f32 %v601_v40, %v2573_v45  ;;  %1792 = vmatpush1.bf16.msra.mxu0 %v1791_v61 }
 0x1d3   :  { %v1839_v41 = vpack.c.bf16 %v600_v37, %v594_v34  ;;  %v689_v34 = vld [vmem:[#allocation10 + $0x128] sm:$0xff]  ;;  %v691_v37 = vld [vmem:[#allocation10 + $0x138] sm:$0xff]  ;;  %1794 = vmatprep.subr.bf16.mxu0 %v1793_v5  ;;  %v2620_v61 = vpop.f32.mrb[10].mxu0 }
 0x1d4   :  { %v1837_v57 = vpack.c.bf16 %v602_v46, %v596_v44  ;;  %v605_v58 = vpop.f32.mrb[16].mxu1  ;;  %v352_v5 = vpop.f32.mrb[11].mxu0 }
 0x1d5   :  { %v607_v8 = vpop.f32.mrb[17].mxu1  ;;  %v606_v40 = vadd.f32 %v605_v58, %v2570_v42  ;;  %v693_v58 = vld [vmem:[#allocation10 + $0x148] sm:$0xff] }
 0x1d6   :  { %1838 = vmatprep.subr.bf16.mxu1 %v1837_v57  ;;  %v608_v48 = vadd.f32 %v607_v8, %v2573_v45  ;;  %v1797_v57 = vpack.c.bf16 %v691_v37, %v689_v34  ;;  %1796 = vmatpush1.bf16.msra.mxu0 %v1795_v53  ;;  %v1799_v8 = vpack.c.bf16 %v690_v62, %v688_v54 }
 0x1d7   :  { %1840 = vmatpush1.bf16.xpose.msra.mxu1 %v1839_v41 }
 0x1d8   :  { %v611_v10 = vpop.f32.mrb[18].mxu1  ;;  %1798 = vmatprep.subr.bf16.mxu0 %v1797_v57 }
 0x1d9   :  { %v612_v44 = vadd.f32 %v611_v10, %v2570_v42  ;;  %v613_v46 = vpop.f32.mrb[19].mxu1  ;;  %v695_v10 = vld [vmem:[#allocation10 + $0x158] sm:$0xff] }
 0x1da   :  { %v614_v41 = vadd.f32 %v613_v46, %v2573_v45  ;;  %v1801_v6 = vpack.c.bf16 %v695_v10, %v693_v58  ;;  %1800 = vmatpush1.bf16.msra.mxu0 %v1799_v8 }
 0x1db   :  { %v1843_v52 = vpack.c.bf16 %v612_v44, %v606_v40  ;;  %v2625_v44 = vadd.f32 %v352_v5, %v2589_v35 }
 0x1dc   :  { %v1841_v39 = vpack.c.bf16 %v614_v41, %v608_v48  ;;  %v617_v33 = vpop.f32.mrb[20].mxu1  ;;  %v2629_v41 = vpop.f32.mrb[12].mxu0  ;;  %1802 = vmatprep.subr.bf16.mxu0 %v1801_v6 }
 0x1dd   :  { %v619_v31 = vpop.f32.mrb[21].mxu1  ;;  %v618_v34 = vadd.f32 %v617_v33, %v2570_v42  ;;  %v358_v57 = vpop.f32.mrb[13].mxu0 }
 0x1de   :  { %1842 = vmatprep.subr.bf16.mxu1 %v1841_v39  ;;  %v620_v46 = vadd.f32 %v619_v31, %v2573_v45  ;;  %v2632_v33 = vadd.f32 %v358_v57, %v2589_v35  ;;  %v2634_v62 = vpop.f32.mrb[14].mxu0 }
 0x1df   :  { %1844 = vmatpush1.bf16.xpose.msra.mxu1 %v1843_v52  ;;  %v364_v31 = vpop.f32.mrb[15].mxu0 }
 0x1e0   :  { %v623_v4 = vpop.f32.mrb[22].mxu1  ;;  %v2639_v6 = vadd.f32 %v364_v31, %v2589_v35 }
 0x1e1   :  { %v624_v37 = vadd.f32 %v623_v4, %v2570_v42  ;;  %v625_v40 = vpop.f32.mrb[23].mxu1 }
 0x1e2   :  { %v626_v39 = vadd.f32 %v625_v40, %v2573_v45  ;;  %v2643_v40 = vpop.f32.mrb[16].mxu0 }
 0x1e3   :  { %v1847_v48 = vpack.c.bf16 %v624_v37, %v618_v34 }
 0x1e4   :  { %v1845_v53 = vpack.c.bf16 %v626_v39, %v620_v46  ;;  %v629_v52 = vpop.f32.mrb[24].mxu1 }
 0x1e5   :  { %v631_v54 = vpop.f32.mrb[25].mxu1  ;;  %v630_v10 = vadd.f32 %v629_v52, %v2570_v42 }
 0x1e6   :  { %1846 = vmatprep.subr.bf16.mxu1 %v1845_v53  ;;  %v632_v5 = vadd.f32 %v631_v54, %v2573_v45 }
 0x1e7   :  { %1848 = vmatpush1.bf16.xpose.msra.mxu1 %v1847_v48  ;;  %v370_v48 = vpop.f32.mrb[17].mxu0 }
 0x1e8   :  { %v635_v58 = vpop.f32.mrb[26].mxu1  ;;  %v371_v57 = vadd.f32 %v370_v48, %v2589_v35  ;;  %v2646_v52 = vpop.f32.mrb[18].mxu0 }
 0x1e9   :  { %v636_v8 = vadd.f32 %v635_v58, %v2570_v42  ;;  %v637_v4 = vpop.f32.mrb[27].mxu1  ;;  %v376_v31 = vpop.f32.mrb[19].mxu0 }
 0x1ea   :  { %v638_v34 = vadd.f32 %v637_v4, %v2573_v45  ;;  %v380_v29 = vpop.f32.mrb[20].mxu0 }
 0x1eb   :  { %v1851_v37 = vpack.c.bf16 %v636_v8, %v630_v10  ;;  %v377_v10 = vadd.f32 %v376_v31, %v2589_v35 }
 0x1ec   :  { %v1849_v46 = vpack.c.bf16 %v638_v34, %v632_v5  ;;  %v641_v39 = vpop.f32.mrb[28].mxu1 }
 0x1ed   :  { %v643_v53 = vpop.f32.mrb[29].mxu1  ;;  %v642_v30 = vadd.f32 %v641_v39, %v2570_v42  ;;  %v2656_v39 = vrot.slane %v2583_v1, %v2565_v36 }
 0x1ee   :  { %1850 = vmatprep.subr.bf16.mxu1 %v1849_v46  ;;  %v644_v8 = vadd.f32 %v643_v53, %v2573_v45  ;;  %v382_v46 = vpop.f32.mrb[21].mxu0  ;;  %v329_v53 = vadd.f32 %v2598_v9, %v2589_v35 }
 0x1ef   :  { %1852 = vmatpush1.bf16.xpose.msra.mxu1 %v1851_v37  ;;  %v383_v37 = vadd.f32 %v382_v46, %v2589_v35  ;;  %v386_v28 = vpop.f32.mrb[22].mxu0 }
 0x1f0   :  { %v647_v58 = vpop.f32.mrb[30].mxu1 }
 0x1f1   :  { %v648_v54 = vadd.f32 %v647_v58, %v2570_v42  ;;  %v649_v4 = vpop.f32.mrb[31].mxu1  ;;  %v388_v42 = vpop.f32.mrb[23].mxu0 }
 0x1f2   :  { %v650_v5 = vadd.f32 %v649_v4, %v2573_v45  ;;  %v389_v58 = vadd.f32 %v388_v42, %v2589_v35  ;;  %v392_v45 = vpop.f32.mrb[24].mxu0  ;;  %v335_v4 = vadd.f32 %v2606_v60, %v2589_v35 }
 0x1f3   :  { %v1855_v34 = vpack.c.bf16 %v648_v54, %v642_v30  ;;  %v321_v30 = vadd.f32 %v2593_v49, %v2656_v39  ;;  %v394_v31 = vpop.f32.mrb[25].mxu0  ;;  %v341_v49 = vadd.f32 %v2610_v12, %v2589_v35  ;;  %v351_v12 = vadd.f32 %v2620_v61, %v2656_v39 }
 0x1f4   :  { %v1853_v48 = vpack.c.bf16 %v650_v5, %v644_v8  ;;  %v395_v54 = vadd.f32 %v394_v31, %v2589_v35  ;;  %v398_v1 = vpop.f32.mrb[26].mxu0  ;;  %v327_v8 = vadd.f32 %v2596_v2, %v2656_v39  ;;  %v347_v2 = vadd.f32 %v2618_v32, %v2589_v35 }
 0x1f5   :  { %v400_v5 = vpop.f32.mrb[27].mxu0  ;;  %v357_v32 = vadd.f32 %v2629_v41, %v2656_v39  ;;  %v381_v61 = vadd.f32 %v380_v29, %v2656_v39  ;;  %v393_v41 = vadd.f32 %v392_v45, %v2656_v39 }
 0x1f6   :  { %1854 = vmatprep.subr.bf16.mxu1 %v1853_v48  ;;  %v333_v48 = vadd.f32 %v2604_v50, %v2656_v39  ;;  %v345_v50 = vadd.f32 %v2616_v56, %v2656_v39  ;;  %v375_v56 = vadd.f32 %v2646_v52, %v2656_v39  ;;  %v699_v52 = vld [vmem:[#allocation10 + $0x178] sm:$0xff] }
 0x1f7   :  { %1856 = vmatpush1.bf16.xpose.msra.mxu1 %v1855_v34  ;;  %v401_v34 = vadd.f32 %v400_v5, %v2589_v35  ;;  %v404_v9 = vpop.f32.mrb[28].mxu0  ;;  %v702_v5 = vld [vmem:[#allocation10 + $0x190] sm:$0xff] }
 0x1f8   :  { %v406_v46 = vpop.f32.mrb[29].mxu0 }
 0x1f9   :  { %v407_v42 = vadd.f32 %v406_v46, %v2589_v35  ;;  %v706_v46 = vld [vmem:[#allocation10 + $0x1b0] sm:$0xff] }
 0x1fb   :  { %v410_v60 = vpop.f32.mrb[30].mxu0 }
 0x1fc   :  { %v411_v29 = vadd.f32 %v410_v60, %v2656_v39  ;;  %v711_v60 = vld [vmem:[#allocation10 + $0x1d8] sm:$0xff] }
 0x1fe   :  { %954 = vmatmul.mubr.f32.vlgmr.msra.gmra.mrb[32].mxu1 %v321_v30  ;;  %v412_v30 = vpop.f32.mrb[31].mxu0 }
 0x1ff   :  { %958 = vmatprep.mubr.f32.mxu1 %v329_v53  ;;  %v339_v53 = vadd.f32 %v2608_v0, %v2656_v39  ;;  %v413_v31 = vadd.f32 %v412_v30, %v2589_v35  ;;  %v363_v35 = vadd.f32 %v2634_v62, %v2656_v39  ;;  %v369_v0 = vadd.f32 %v2643_v40, %v2656_v39  ;;  %v694_v40 = vld [vmem:[#allocation10 + $0x150] sm:$0xff]  ;;  %v708_v30 = vld [vmem:[#allocation10 + $0x1c0] sm:$0xff] }
 0x200   :  { %v405_v62 = vadd.f32 %v404_v9, %v2656_v39 }
 0x202   :  { %959 = vmatmul.mubr.f32.gmra.mrb[34].mxu1 %v327_v8  ;;  %v700_v8 = vld [vmem:[#allocation10 + $0x180] sm:$0xff] }
 0x203   :  { %963 = vmatprep.mubr.f32.mxu1 %v335_v4  ;;  %v703_v4 = vld [vmem:[#allocation10 + $0x198] sm:$0xff] }
 0x206   :  { %964 = vmatmul.mubr.f32.gmra.mrb[36].mxu1 %v333_v48  ;;  %v704_v48 = vld [vmem:[#allocation10 + $0x1a0] sm:$0xff] }
 0x207   :  { %968 = vmatprep.mubr.f32.mxu1 %v341_v49  ;;  %v707_v49 = vld [vmem:[#allocation10 + $0x1b8] sm:$0xff] }
 0x20a   :  { %969 = vmatmul.mubr.f32.gmra.mrb[38].mxu1 %v339_v53 }
 0x20b   :  { %973 = vmatprep.mubr.f32.mxu1 %v347_v2  ;;  %v709_v2 = vld [vmem:[#allocation10 + $0x1c8] sm:$0xff] }
 0x20c   :  { %v1817_v53 = vpack.c.bf16 %v711_v60, %v709_v2 }
 0x20e   :  { %974 = vmatmul.mubr.f32.gmra.mrb[40].mxu1 %v345_v50 }
 0x20f   :  { %978 = vmatprep.mubr.f32.mxu1 %v2625_v44  ;;  %v387_v44 = vadd.f32 %v386_v28, %v2656_v39 }
 0x212   :  { %979 = vmatmul.mubr.f32.gmra.mrb[42].mxu1 %v351_v12  ;;  %v713_v12 = vld [vmem:[#allocation10 + $0x1e8] sm:$0xff] }
 0x213   :  { %983 = vmatprep.mubr.f32.mxu1 %v2632_v33  ;;  %v399_v33 = vadd.f32 %v398_v1, %v2656_v39  ;;  %v1811_v39 = vpack.c.bf16 %v702_v5, %v700_v8 }
 0x216   :  { %984 = vmatmul.mubr.f32.gmra.mrb[44].mxu1 %v357_v32  ;;  %v715_v32 = vld [vmem:[#allocation10 + $0x1f8] sm:$0xff] }
 0x217   :  { %988 = vmatprep.mubr.f32.mxu1 %v2639_v6  ;;  %v692_v6 = vld [vmem:[#allocation10 + $0x140] sm:$0xff] }
 0x218   :  { %v1803_v28 = vpack.c.bf16 %v694_v40, %v692_v6 }
 0x21a   :  { %989 = vmatmul.mubr.f32.gmra.mrb[46].mxu1 %v363_v35  ;;  %1804 = vmatpush1.bf16.msra.mxu0 %v1803_v28  ;;  %v1821_v35 = vpack.c.bf16 %v715_v32, %v713_v12  ;;  %v3078_v12 = vld [vmem:[#allocation27_spill] sm:$0xff] }
 0x21b   :  { %993 = vmatprep.mubr.f32.mxu1 %v371_v57  ;;  %v697_v57 = vld [vmem:[#allocation10 + $0x168] sm:$0xff] }
 0x21e   :  { %994 = vmatmul.mubr.f32.gmra.mrb[48].mxu1 %v369_v0  ;;  %v712_v0 = vld [vmem:[#allocation10 + $0x1e0] sm:$0xff] }
 0x21f   :  { %998 = vmatprep.mubr.f32.mxu1 %v377_v10  ;;  %v1805_v10 = vpack.c.bf16 %v699_v52, %v697_v57 }
 0x221   :  { %1806 = vmatprep.subr.bf16.mxu0 %v1805_v10 }
 0x222   :  { %999 = vmatmul.mubr.f32.gmra.mrb[50].mxu1 %v375_v56  ;;  %v714_v56 = vld [vmem:[#allocation10 + $0x1f0] sm:$0xff] }
 0x223   :  { %1003 = vmatprep.mubr.f32.mxu1 %v383_v37  ;;  %v696_v37 = vld [vmem:[#allocation10 + $0x160] sm:$0xff] }
 0x226   :  { %1004 = vmatmul.mubr.f32.gmra.mrb[52].mxu1 %v381_v61  ;;  %v1823_v61 = vpack.c.bf16 %v714_v56, %v712_v0 }
 0x227   :  { %1008 = vmatprep.mubr.f32.mxu1 %v389_v58  ;;  %v698_v58 = vld [vmem:[#allocation10 + $0x170] sm:$0xff] }
 0x228   :  { %v1807_v45 = vpack.c.bf16 %v698_v58, %v696_v37 }
 0x22a   :  { %1009 = vmatmul.mubr.f32.gmra.mrb[54].mxu1 %v387_v44  ;;  %1808 = vmatpush1.bf16.msra.mxu0 %v1807_v45 }
 0x22b   :  { %1013 = vmatprep.mubr.f32.mxu1 %v395_v54  ;;  %v701_v54 = vld [vmem:[#allocation10 + $0x188] sm:$0xff] }
 0x22c   :  { %v1809_v1 = vpack.c.bf16 %v703_v4, %v701_v54 }
 0x22e   :  { %1014 = vmatmul.mubr.f32.gmra.mrb[56].mxu1 %v393_v41  ;;  %1810 = vmatprep.subr.bf16.mxu0 %v1809_v1 }
 0x22f   :  { %1018 = vmatprep.mubr.f32.mxu1 %v401_v34  ;;  %v705_v34 = vld [vmem:[#allocation10 + $0x1a8] sm:$0xff]  ;;  %1812 = vmatpush1.bf16.msra.mxu0 %v1811_v39 }
 0x230   :  { %v1813_v9 = vpack.c.bf16 %v707_v49, %v705_v34 }
 0x232   :  { %1019 = vmatmul.mubr.f32.gmra.mrb[58].mxu1 %v399_v33  ;;  %1814 = vmatprep.subr.bf16.mxu0 %v1813_v9 }
 0x233   :  { %1023 = vmatprep.mubr.f32.mxu1 %v407_v42  ;;  %v1815_v42 = vpack.c.bf16 %v706_v46, %v704_v48 }
 0x235   :  { %1816 = vmatpush1.bf16.msra.mxu0 %v1815_v42 }
 0x236   :  { %1024 = vmatmul.mubr.f32.gmra.mrb[60].mxu1 %v405_v62  ;;  %1818 = vmatprep.subr.bf16.mxu0 %v1817_v53 }
 0x237   :  { %1028 = vmatprep.mubr.f32.mxu1 %v413_v31  ;;  %v710_v31 = vld [vmem:[#allocation10 + $0x1d0] sm:$0xff] }
 0x238   :  { %v1819_v50 = vpack.c.bf16 %v710_v31, %v708_v30  ;;  %v716_v30 = vld [vmem:[#allocation12] sm:$0x3] }
 0x239   :  { %v2780_v31 = vrot.slane %v716_v30, %v2565_v36  ;;  %v2783_v32 = vrot.slane %v716_v30, %v3078_v12 }
 0x23a   :  { %1029 = vmatmul.mubr.f32.gmra.mrb[62].mxu1 %v411_v29  ;;  %1820 = vmatpush1.bf16.msra.mxu0 %v1819_v50 }
 0x23b   :  { %1822 = vmatprep.subr.bf16.mxu0 %v1821_v35 }
 0x23e   :  { %1824 = vmatpush1.bf16.msra.mxu0 %v1823_v61 }
 0x241   :  { %793 = vmatmul.mubr.f32.vlgmr.msra.gmra.mrb[32].mxu0 %v2440_v38  ;;  %v3072_v38 = vld [vmem:[#allocation21_spill] sm:$0xff] }
 0x242   :  { %798 = vmatprep.mubr.f32.mxu0 %v2442_v43  ;;  %v3073_v43 = vld [vmem:[#allocation22_spill] sm:$0xff] }
 0x245   :  { %799 = vmatmul.mubr.f32.gmra.mrb[34].mxu0 %v2446_v47  ;;  %v3074_v47 = vld [vmem:[#allocation23_spill] sm:$0xff] }
 0x246   :  { %804 = vmatprep.mubr.f32.mxu0 %v2448_v51  ;;  %v3075_v51 = vld [vmem:[#allocation24_spill] sm:$0xff] }
 0x249   :  { %805 = vmatmul.mubr.f32.gmra.mrb[36].mxu0 %v2452_v55  ;;  %v3076_v55 = vld [vmem:[#allocation25_spill] sm:$0xff] }
 0x24a   :  { %810 = vmatprep.mubr.f32.mxu0 %v2454_v59  ;;  %v3077_v59 = vld [vmem:[#allocation26_spill] sm:$0xff] }
 0x24d   :  { %811 = vmatmul.mubr.f32.gmra.mrb[38].mxu0 %v2458_v63 }
 0x24e   :  { %816 = vmatprep.mubr.f32.mxu0 %v2460_v3 }
 0x251   :  { %817 = vmatmul.mubr.f32.gmra.mrb[40].mxu0 %v2464_v7 }
 0x252   :  { %822 = vmatprep.mubr.f32.mxu0 %v2466_v11 }
 0x255   :  { %823 = vmatmul.mubr.f32.gmra.mrb[42].mxu0 %v2470_v13 }
 0x256   :  { %828 = vmatprep.mubr.f32.mxu0 %v2472_v14 }
 0x259   :  { %829 = vmatmul.mubr.f32.gmra.mrb[44].mxu0 %v2476_v15 }
 0x25a   :  { %834 = vmatprep.mubr.f32.mxu0 %v2478_v16 }
 0x25d   :  { %835 = vmatmul.mubr.f32.gmra.mrb[46].mxu0 %v2484_v17 }
 0x25e   :  { %840 = vmatprep.mubr.f32.mxu0 %v2486_v18 }
 0x261   :  { %841 = vmatmul.mubr.f32.gmra.mrb[48].mxu0 %v2492_v19 }
 0x262   :  { %846 = vmatprep.mubr.f32.mxu0 %v2494_v20 }
 0x265   :  { %847 = vmatmul.mubr.f32.gmra.mrb[50].mxu0 %v2500_v21 }
 0x266   :  { %852 = vmatprep.mubr.f32.mxu0 %v2502_v22 }
 0x269   :  { %853 = vmatmul.mubr.f32.gmra.mrb[52].mxu0 %v2508_v23 }
 0x26a   :  { %858 = vmatprep.mubr.f32.mxu0 %v2510_v24 }
 0x26d   :  { %859 = vmatmul.mubr.f32.gmra.mrb[54].mxu0 %v2516_v25 }
 0x26e   :  { %864 = vmatprep.mubr.f32.mxu0 %v2518_v26 }
 0x271   :  { %865 = vmatmul.mubr.f32.gmra.mrb[56].mxu0 %v2524_v27 }
 0x272   :  { %870 = vmatprep.mubr.f32.mxu0 %v3072_v38 }
 0x275   :  { %871 = vmatmul.mubr.f32.gmra.mrb[58].mxu0 %v3073_v43 }
 0x276   :  { %876 = vmatprep.mubr.f32.mxu0 %v3074_v47 }
 0x279   :  { %877 = vmatmul.mubr.f32.gmra.mrb[60].mxu0 %v3075_v51 }
 0x27a   :  { %882 = vmatprep.mubr.f32.mxu0 %v3076_v55 }
 0x27d   :  { %883 = vmatmul.mubr.f32.gmra.mrb[62].mxu0 %v3077_v59 }
 0x2d1   :  { %v955_v63 = vpop.f32.mrb[32].mxu1 }
 0x2d2   :  { %v2731_v3 = vmul.f32 0.0625, %v955_v63  ;;  %v957_v7 = vpop.f32.mrb[33].mxu1 }
 0x2d4   :  { %1050 = vmax.xlane.f32.xlu0 %v2731_v3 }
 0x2d5   :  { %v960_v11 = vpop.f32.mrb[34].mxu1 }
 0x2d6   :  { %v2734_v13 = vmul.f32 0.0625, %v960_v11  ;;  %v962_v14 = vpop.f32.mrb[35].mxu1 }
 0x2d8   :  { %1052 = vmax.xlane.f32.xlu0 %v2734_v13 }
 0x2d9   :  { %v965_v15 = vpop.f32.mrb[36].mxu1 }
 0x2da   :  { %v2737_v16 = vmul.f32 0.0625, %v965_v15  ;;  %v967_v17 = vpop.f32.mrb[37].mxu1 }
 0x2dc   :  { %1054 = vmax.xlane.f32.xlu1 %v2737_v16 }
 0x2dd   :  { %v970_v18 = vpop.f32.mrb[38].mxu1 }
 0x2de   :  { %v2740_v19 = vmul.f32 0.0625, %v970_v18  ;;  %v972_v20 = vpop.f32.mrb[39].mxu1 }
 0x2e0   :  { %1056 = vmax.xlane.f32.xlu1 %v2740_v19 }
 0x2e1   :  { %v975_v21 = vpop.f32.mrb[40].mxu1 }
 0x2e2   :  { %v2743_v22 = vmul.f32 0.0625, %v975_v21  ;;  %v977_v23 = vpop.f32.mrb[41].mxu1 }
 0x2e4   :  { %1058 = vmax.xlane.f32.xlu0 %v2743_v22 }
 0x2e5   :  { %v980_v24 = vpop.f32.mrb[42].mxu1 }
 0x2e6   :  { %v2746_v25 = vmul.f32 0.0625, %v980_v24  ;;  %v982_v26 = vpop.f32.mrb[43].mxu1 }
 0x2e8   :  { %1060 = vmax.xlane.f32.xlu1 %v2746_v25 }
 0x2e9   :  { %v985_v27 = vpop.f32.mrb[44].mxu1 }
 0x2ea   :  { %v2749_v44 = vmul.f32 0.0625, %v985_v27  ;;  %v987_v41 = vpop.f32.mrb[45].mxu1 }
 0x2ec   :  { %1062 = vmax.xlane.f32.xlu0 %v2749_v44 }
 0x2ed   :  { %v990_v33 = vpop.f32.mrb[46].mxu1 }
 0x2ee   :  { %v2752_v62 = vmul.f32 0.0625, %v990_v33  ;;  %v992_v29 = vpop.f32.mrb[47].mxu1 }
 0x2f0   :  { %1064 = vmax.xlane.f32.xlu1 %v2752_v62 }
 0x2f1   :  { %v995_v6 = vpop.f32.mrb[48].mxu1 }
 0x2f2   :  { %v2755_v40 = vmul.f32 0.0625, %v995_v6  ;;  %v997_v28 = vpop.f32.mrb[49].mxu1 }
 0x2f4   :  { %1066 = vmax.xlane.f32.xlu0 %v2755_v40 }
 0x2f5   :  { %v1000_v57 = vpop.f32.mrb[50].mxu1 }
 0x2f6   :  { %v2758_v52 = vmul.f32 0.0625, %v1000_v57  ;;  %v1002_v10 = vpop.f32.mrb[51].mxu1 }
 0x2f8   :  { %1068 = vmax.xlane.f32.xlu1 %v2758_v52 }
 0x2f9   :  { %v1005_v37 = vpop.f32.mrb[52].mxu1 }
 0x2fa   :  { %v2761_v58 = vmul.f32 0.0625, %v1005_v37  ;;  %v1007_v45 = vpop.f32.mrb[53].mxu1 }
 0x2fc   :  { %1070 = vmax.xlane.f32.xlu0 %v2761_v58 }
 0x2fd   :  { %v1010_v54 = vpop.f32.mrb[54].mxu1 }
 0x2fe   :  { %v2764_v4 = vmul.f32 0.0625, %v1010_v54  ;;  %v1012_v1 = vpop.f32.mrb[55].mxu1 }
 0x300   :  { %1072 = vmax.xlane.f32.xlu1 %v2764_v4 }
 0x301   :  { %v1015_v8 = vpop.f32.mrb[56].mxu1 }
 0x302   :  { %v2767_v5 = vmul.f32 0.0625, %v1015_v8  ;;  %v1017_v39 = vpop.f32.mrb[57].mxu1 }
 0x304   :  { %1074 = vmax.xlane.f32.xlu0 %v2767_v5 }
 0x305   :  { %v1020_v34 = vpop.f32.mrb[58].mxu1 }
 0x306   :  { %v2770_v49 = vmul.f32 0.0625, %v1020_v34  ;;  %v1022_v9 = vpop.f32.mrb[59].mxu1 }
 0x308   :  { %1076 = vmax.xlane.f32.xlu1 %v2770_v49 }
 0x309   :  { %v1025_v48 = vpop.f32.mrb[60].mxu1 }
 0x30a   :  { %v2773_v46 = vmul.f32 0.0625, %v1025_v48  ;;  %v1027_v42 = vpop.f32.mrb[61].mxu1 }
 0x30c   :  { %1078 = vmax.xlane.f32.xlu0 %v2773_v46 }
 0x30d   :  { %v1030_v2 = vpop.f32.mrb[62].mxu1 }
 0x30e   :  { %v2776_v60 = vmul.f32 0.0625, %v1030_v2  ;;  %v1032_v53 = vpop.f32.mrb[63].mxu1 }
 0x310   :  { %1080 = vmax.xlane.f32.xlu1 %v2776_v60 }
 0x314   :  { %v794_v50 = vpop.f32.mrb[32].mxu0 }
 0x315   :  { %v796_v35 = vpop.f32.mrb[33].mxu0  ;;  %v795_v0 = vadd.f32 %v794_v50, %v2780_v31 }
 0x316   :  { %v797_v56 = vadd.f32 %v796_v35, %v2783_v32 }
 0x318   :  { %v800_v61 = vpop.f32.mrb[34].mxu0 }
 0x319   :  { %v801_v38 = vadd.f32 %v800_v61, %v2780_v31  ;;  %v802_v43 = vpop.f32.mrb[35].mxu0 }
 0x31a   :  { %v803_v47 = vadd.f32 %v802_v43, %v2783_v32 }
 0x31b   :  { %v1859_v51 = vpack.c.bf16 %v801_v38, %v795_v0 }
 0x31c   :  { %v1857_v55 = vpack.c.bf16 %v803_v47, %v797_v56  ;;  %v806_v59 = vpop.f32.mrb[36].mxu0 }
 0x31d   :  { %v808_v63 = vpop.f32.mrb[37].mxu0  ;;  %v807_v7 = vadd.f32 %v806_v59, %v2780_v31 }
 0x31e   :  { %1858 = vmatprep.subr.bf16.mxu0 %v1857_v55  ;;  %v809_v11 = vadd.f32 %v808_v63, %v2783_v32 }
 0x31f   :  { %1860 = vmatpush1.bf16.msra.mxu0 %v1859_v51 }
 0x320   :  { %v812_v14 = vpop.f32.mrb[38].mxu0 }
 0x321   :  { %v813_v15 = vadd.f32 %v812_v14, %v2780_v31  ;;  %v814_v17 = vpop.f32.mrb[39].mxu0 }
 0x322   :  { %v815_v18 = vadd.f32 %v814_v17, %v2783_v32 }
 0x323   :  { %v1863_v20 = vpack.c.bf16 %v813_v15, %v807_v7 }
 0x324   :  { %v1861_v21 = vpack.c.bf16 %v815_v18, %v809_v11  ;;  %v818_v23 = vpop.f32.mrb[40].mxu0 }
 0x325   :  { %v820_v24 = vpop.f32.mrb[41].mxu0  ;;  %v819_v26 = vadd.f32 %v818_v23, %v2780_v31 }
 0x326   :  { %1862 = vmatprep.subr.bf16.mxu0 %v1861_v21  ;;  %v821_v27 = vadd.f32 %v820_v24, %v2783_v32 }
 0x327   :  { %1864 = vmatpush1.bf16.msra.mxu0 %v1863_v20 }
 0x328   :  { %v824_v41 = vpop.f32.mrb[42].mxu0 }
 0x329   :  { %v825_v33 = vadd.f32 %v824_v41, %v2780_v31  ;;  %v826_v29 = vpop.f32.mrb[43].mxu0 }
 0x32a   :  { %v827_v6 = vadd.f32 %v826_v29, %v2783_v32 }
 0x32b   :  { %v1867_v28 = vpack.c.bf16 %v825_v33, %v819_v26 }
 0x32c   :  { %v1865_v57 = vpack.c.bf16 %v827_v6, %v821_v27  ;;  %v830_v10 = vpop.f32.mrb[44].mxu0 }
 0x32d   :  { %v832_v37 = vpop.f32.mrb[45].mxu0  ;;  %v831_v45 = vadd.f32 %v830_v10, %v2780_v31 }
 0x32e   :  { %1866 = vmatprep.subr.bf16.mxu0 %v1865_v57  ;;  %v833_v54 = vadd.f32 %v832_v37, %v2783_v32 }
 0x32f   :  { %1868 = vmatpush1.bf16.msra.mxu0 %v1867_v28 }
 0x330   :  { %v836_v1 = vpop.f32.mrb[46].mxu0 }
 0x331   :  { %v837_v8 = vadd.f32 %v836_v1, %v2780_v31  ;;  %v838_v39 = vpop.f32.mrb[47].mxu0 }
 0x332   :  { %v839_v34 = vadd.f32 %v838_v39, %v2783_v32 }
 0x333   :  { %v1871_v9 = vpack.c.bf16 %v837_v8, %v831_v45 }
 0x334   :  { %v1869_v48 = vpack.c.bf16 %v839_v34, %v833_v54  ;;  %v842_v42 = vpop.f32.mrb[48].mxu0 }
 0x335   :  { %v844_v2 = vpop.f32.mrb[49].mxu0  ;;  %v843_v50 = vadd.f32 %v842_v42, %v2780_v31 }
 0x336   :  { %1870 = vmatprep.subr.bf16.mxu0 %v1869_v48  ;;  %v845_v35 = vadd.f32 %v844_v2, %v2783_v32 }
 0x337   :  { %1872 = vmatpush1.bf16.msra.mxu0 %v1871_v9 }
 0x338   :  { %v848_v0 = vpop.f32.mrb[50].mxu0 }
 0x339   :  { %v849_v61 = vadd.f32 %v848_v0, %v2780_v31  ;;  %v850_v38 = vpop.f32.mrb[51].mxu0 }
 0x33a   :  { %v851_v47 = vadd.f32 %v850_v38, %v2783_v32 }
 0x33b   :  { %v1875_v55 = vpack.c.bf16 %v849_v61, %v843_v50 }
 0x33c   :  { %v1873_v59 = vpack.c.bf16 %v851_v47, %v845_v35  ;;  %v854_v63 = vpop.f32.mrb[52].mxu0 }
 0x33d   :  { %v856_v7 = vpop.f32.mrb[53].mxu0  ;;  %v855_v15 = vadd.f32 %v854_v63, %v2780_v31 }
 0x33e   :  { %1874 = vmatprep.subr.bf16.mxu0 %v1873_v59  ;;  %v857_v17 = vadd.f32 %v856_v7, %v2783_v32 }
 0x33f   :  { %1876 = vmatpush1.bf16.msra.mxu0 %v1875_v55 }
 0x340   :  { %v860_v18 = vpop.f32.mrb[54].mxu0 }
 0x341   :  { %v861_v21 = vadd.f32 %v860_v18, %v2780_v31 }
 0x343   :  { %v1879_v27 = vpack.c.bf16 %v861_v21, %v855_v15 }
 0x361   :  { %v1051_v53 = vpop.xlane.xlu0 %1050 }
 0x362   :  { %v1082_v30 = vsub.f32 %v2731_v3, %v1051_v53 }
 0x364   :  { %v1098_v56 = vmul.f32 1.442695, %v1082_v30 }
 0x365   :  { %v1053_v43 = vpop.xlane.xlu0 %1052 }
 0x366   :  { %1965 = vpow2.f32 %v1098_v56  ;;  %v1083_v51 = vsub.f32 %v2734_v13, %v1053_v43  ;;  %v862_v13 = vpop.f32.mrb[55].mxu0 }
 0x367   :  { %v863_v24 = vadd.f32 %v862_v13, %v2783_v32  ;;  %v866_v33 = vpop.f32.mrb[56].mxu0 }
 0x368   :  { %v1100_v3 = vmul.f32 1.442695, %v1083_v51  ;;  %v868_v6 = vpop.f32.mrb[57].mxu0  ;;  %v867_v10 = vadd.f32 %v866_v33, %v2780_v31 }
 0x369   :  { %v1055_v11 = vpop.xlane.xlu1 %1054  ;;  %v1877_v41 = vpack.c.bf16 %v863_v24, %v857_v17  ;;  %v869_v37 = vadd.f32 %v868_v6, %v2783_v32 }
 0x36a   :  { %1967 = vpow2.f32 %v1100_v3  ;;  %v1084_v14 = vsub.f32 %v2737_v16, %v1055_v11 }
 0x36b   :  { %1878 = vmatprep.subr.bf16.mxu0 %v1877_v41 }
 0x36c   :  { %v1102_v20 = vmul.f32 1.442695, %v1084_v14  ;;  %1880 = vmatpush1.bf16.msra.mxu0 %v1879_v27 }
 0x36d   :  { %v1057_v23 = vpop.xlane.xlu1 %1056 }
 0x36e   :  { %1969 = vpow2.f32 %v1102_v20  ;;  %v1085_v26 = vsub.f32 %v2740_v19, %v1057_v23  ;;  %v872_v19 = vpop.f32.mrb[58].mxu0 }
 0x36f   :  { %v873_v1 = vadd.f32 %v872_v19, %v2780_v31  ;;  %v874_v8 = vpop.f32.mrb[59].mxu0 }
 0x370   :  { %v2813_v16 = vpop.eup %1965  ;;  %v1104_v29 = vmul.f32 1.442695, %v1085_v26  ;;  %v875_v34 = vadd.f32 %v874_v8, %v2783_v32  ;;  %v878_v42 = vpop.f32.mrb[60].mxu0 }
 0x371   :  { %v1059_v28 = vpop.xlane.xlu0 %1058  ;;  %1130 = vadd.xlane.f32.xlu0 %v2813_v16  ;;  %v1883_v9 = vpack.c.bf16 %v873_v1, %v867_v10  ;;  %v880_v30 = vpop.f32.mrb[61].mxu0  ;;  %v879_v0 = vadd.f32 %v878_v42, %v2780_v31  ;;  %v1357_v42 = vld [vmem:[#allocation13 + $0x10] sm:$0xff] }
 0x372   :  { %1971 = vpow2.f32 %v1104_v29  ;;  %v1086_v57 = vsub.f32 %v2743_v22, %v1059_v28  ;;  %v1881_v48 = vpack.c.bf16 %v875_v34, %v869_v37  ;;  %v881_v56 = vadd.f32 %v880_v30, %v2783_v32  ;;  %v1362_v30 = vld [vmem:[#allocation13 + $0x38] sm:$0xff] }
 0x374   :  { %v2819_v45 = vpop.eup %1967  ;;  %v1106_v54 = vmul.f32 1.442695, %v1086_v57  ;;  %1882 = vmatprep.subr.bf16.mxu0 %v1881_v48 }
 0x375   :  { %v1061_v39 = vpop.xlane.xlu1 %1060  ;;  %1132 = vadd.xlane.f32.xlu1 %v2819_v45  ;;  %1884 = vmatpush1.bf16.msra.mxu0 %v1883_v9  ;;  %v1355_v9 = vld [vmem:[#allocation13] sm:$0xff] }
 0x376   :  { %1973 = vpow2.f32 %v1106_v54  ;;  %v1087_v22 = vsub.f32 %v2746_v25, %v1061_v39  ;;  %v884_v25 = vpop.f32.mrb[62].mxu0 }
 0x377   :  { %v885_v43 = vadd.f32 %v884_v25, %v2780_v31  ;;  %v886_v47 = vpop.f32.mrb[63].mxu0  ;;  %v1364_v25 = vld [vmem:[#allocation13 + $0x48] sm:$0xff] }
 0x378   :  { %v2825_v2 = vpop.eup %1969  ;;  %v1108_v53 = vmul.f32 1.442695, %v1087_v22  ;;  %v887_v55 = vadd.f32 %v886_v47, %v2783_v32  ;;  %v1356_v22 = vld [vmem:[#allocation13 + $0x8] sm:$0xff] }
 0x379   :  { %v1063_v50 = vpop.xlane.xlu0 %1062  ;;  %1134 = vadd.xlane.f32.xlu0 %v2825_v2  ;;  %v1887_v59 = vpack.c.bf16 %v885_v43, %v879_v0  ;;  %v1359_v0 = vld [vmem:[#allocation13 + $0x20] sm:$0xff] }
 0x37a   :  { %1975 = vpow2.f32 %v1108_v53  ;;  %v1088_v35 = vsub.f32 %v2749_v44, %v1063_v50  ;;  %v1885_v63 = vpack.c.bf16 %v887_v55, %v881_v56  ;;  %v1360_v53 = vld [vmem:[#allocation13 + $0x28] sm:$0xff]  ;;  %v1891_v50 = vpack.c.bf16 %v1357_v42, %v1355_v9  ;;  %v1361_v56 = vld [vmem:[#allocation13 + $0x30] sm:$0xff] }
 0x37b   :  { %v1895_v43 = vpack.c.bf16 %v1361_v56, %v1359_v0  ;;  %v1365_v55 = vld [vmem:[#allocation13 + $0x50] sm:$0xff]  ;;  %v1388_v9 = vld [vmem:[#allocation13 + $0x108] sm:$0xff]  ;;  %v1394_v0 = vld [vmem:[#allocation13 + $0x138] sm:$0xff] }
 0x37c   :  { %v2831_v61 = vpop.eup %1971  ;;  %v1110_v38 = vmul.f32 1.442695, %v1088_v35  ;;  %1886 = vmatprep.subr.bf16.mxu0 %v1885_v63  ;;  %v1893_v35 = vpack.c.bf16 %v1362_v30, %v1360_v53  ;;  %v1387_v30 = vld [vmem:[#allocation13 + $0x100] sm:$0xff] }
 0x37d   :  { %v1065_v51 = vpop.xlane.xlu1 %1064  ;;  %1136 = vadd.xlane.f32.xlu1 %v2831_v61  ;;  %1888 = vmatpush1.bf16.msra.mxu0 %v1887_v59  ;;  %v1370_v59 = vld [vmem:[#allocation13 + $0x78] sm:$0xff] }
 0x37e   :  { %1977 = vpow2.f32 %v1110_v38  ;;  %v1089_v44 = vsub.f32 %v2752_v62, %v1065_v51  ;;  %v1366_v38 = vld [vmem:[#allocation13 + $0x58] sm:$0xff]  ;;  %v1363_v51 = vld [vmem:[#allocation13 + $0x40] sm:$0xff] }
 0x37f   :  { %v1897_v47 = vpack.c.bf16 %v1366_v38, %v1364_v25  ;;  %v1899_v63 = vpack.c.bf16 %v1365_v55, %v1363_v51  ;;  %v1391_v38 = vld [vmem:[#allocation13 + $0x120] sm:$0xff]  ;;  %v1398_v51 = vld [vmem:[#allocation13 + $0x158] sm:$0xff] }
 0x380   :  { %v2837_v3 = vpop.eup %1973  ;;  %v1112_v7 = vmul.f32 1.442695, %v1089_v44  ;;  %v1368_v44 = vld [vmem:[#allocation13 + $0x68] sm:$0xff] }
 0x381   :  { %v1067_v11 = vpop.xlane.xlu0 %1066  ;;  %1138 = vadd.xlane.f32.xlu0 %v2837_v3 }
 0x382   :  { %1979 = vpow2.f32 %v1112_v7  ;;  %v1090_v31 = vsub.f32 %v2755_v40, %v1067_v11  ;;  %v2248_v40 = vmov 0.0   ;;  %v1901_v7 = vpack.c.bf16 %v1370_v59, %v1368_v44  ;;  %v1367_v11 = vld [vmem:[#allocation13 + $0x60] sm:$0xff] }
 0x383   :  { %1258 = vmatprep.mubr.f32.mxu0 %v2248_v40  ;;  %v1395_v59 = vld [vmem:[#allocation13 + $0x140] sm:$0xff] }
 0x384   :  { %v2841_v14 = vpop.eup %1975  ;;  %v1114_v15 = vmul.f32 1.442695, %v1090_v31  ;;  %v1369_v31 = vld [vmem:[#allocation13 + $0x70] sm:$0xff] }
 0x385   :  { %v1069_v32 = vpop.xlane.xlu1 %1068  ;;  %1140 = vadd.xlane.f32.xlu1 %v2841_v14 }
 0x386   :  { %1981 = vpow2.f32 %v1114_v15  ;;  %v1091_v62 = vsub.f32 %v2758_v52, %v1069_v32  ;;  %v1372_v15 = vld [vmem:[#allocation13 + $0x88] sm:$0xff]  ;;  %v1374_v32 = vld [vmem:[#allocation13 + $0x98] sm:$0xff] }
 0x388   :  { %v2845_v17 = vpop.eup %1977  ;;  %v1116_v18 = vmul.f32 1.442695, %v1091_v62  ;;  %v1903_v62 = vpack.c.bf16 %v1369_v31, %v1367_v11  ;;  %v1402_v11 = vld [vmem:[#allocation13 + $0x178] sm:$0xff] }
 0x389   :  { %v1071_v20 = vpop.xlane.xlu0 %1070  ;;  %1142 = vadd.xlane.f32.xlu0 %v2845_v17 }
 0x38a   :  { %1983 = vpow2.f32 %v1116_v18  ;;  %v1092_v21 = vsub.f32 %v2761_v58, %v1071_v20  ;;  %v1905_v18 = vpack.c.bf16 %v1374_v32, %v1372_v15  ;;  %v1371_v20 = vld [vmem:[#allocation13 + $0x80] sm:$0xff] }
 0x38b   :  { %v1399_v32 = vld [vmem:[#allocation13 + $0x160] sm:$0xff] }
 0x38c   :  { %v2850_v13 = vpop.eup %1979  ;;  %v1118_v23 = vmul.f32 1.442695, %v1092_v21  ;;  %v1373_v21 = vld [vmem:[#allocation13 + $0x90] sm:$0xff] }
 0x38d   :  { %v1073_v24 = vpop.xlane.xlu1 %1072  ;;  %1144 = vadd.xlane.f32.xlu1 %v2850_v13 }
 0x38e   :  { %1985 = vpow2.f32 %v1118_v23  ;;  %v1093_v52 = vsub.f32 %v2764_v4, %v1073_v24  ;;  %v1376_v23 = vld [vmem:[#allocation13 + $0xa8] sm:$0xff]  ;;  %v1378_v24 = vld [vmem:[#allocation13 + $0xb8] sm:$0xff] }
 0x390   :  { %v2854_v26 = vpop.eup %1981  ;;  %v1120_v27 = vmul.f32 1.442695, %v1093_v52  ;;  %v1907_v52 = vpack.c.bf16 %v1373_v21, %v1371_v20  ;;  %v1406_v20 = vld [vmem:[#allocation13 + $0x198] sm:$0xff] }
 0x391   :  { %v1075_v41 = vpop.xlane.xlu0 %1074  ;;  %1146 = vadd.xlane.f32.xlu0 %v2854_v26 }
 0x392   :  { %1987 = vpow2.f32 %v1120_v27  ;;  %v1094_v58 = vsub.f32 %v2767_v5, %v1075_v41  ;;  %v1909_v27 = vpack.c.bf16 %v1378_v24, %v1376_v23  ;;  %v1375_v41 = vld [vmem:[#allocation13 + $0xa0] sm:$0xff] }
 0x393   :  { %v1403_v24 = vld [vmem:[#allocation13 + $0x180] sm:$0xff] }
 0x394   :  { %v2858_v33 = vpop.eup %1983  ;;  %v1122_v29 = vmul.f32 1.442695, %v1094_v58  ;;  %v1377_v58 = vld [vmem:[#allocation13 + $0xb0] sm:$0xff] }
 0x395   :  { %v1077_v6 = vpop.xlane.xlu1 %1076  ;;  %1148 = vadd.xlane.f32.xlu1 %v2858_v33 }
 0x396   :  { %1989 = vpow2.f32 %v1122_v29  ;;  %v1095_v28 = vsub.f32 %v2770_v49, %v1077_v6  ;;  %v1380_v29 = vld [vmem:[#allocation13 + $0xc8] sm:$0xff]  ;;  %v1382_v6 = vld [vmem:[#allocation13 + $0xd8] sm:$0xff] }
 0x398   :  { %v2862_v57 = vpop.eup %1985  ;;  %v1124_v4 = vmul.f32 1.442695, %v1095_v28  ;;  %v1911_v28 = vpack.c.bf16 %v1377_v58, %v1375_v41  ;;  %v1410_v41 = vld [vmem:[#allocation13 + $0x1b8] sm:$0xff] }
 0x399   :  { %1150 = vadd.xlane.f32.xlu0 %v2862_v57  ;;  %v1079_v10 = vpop.xlane.xlu0 %1078 }
 0x39a   :  { %1991 = vpow2.f32 %v1124_v4  ;;  %v1096_v37 = vsub.f32 %v2773_v46, %v1079_v10  ;;  %v1913_v4 = vpack.c.bf16 %v1382_v6, %v1380_v29  ;;  %v1379_v10 = vld [vmem:[#allocation13 + $0xc0] sm:$0xff] }
 0x39b   :  { %v1407_v6 = vld [vmem:[#allocation13 + $0x1a0] sm:$0xff] }
 0x39c   :  { %v2866_v19 = vpop.eup %1987  ;;  %v1126_v5 = vmul.f32 1.442695, %v1096_v37  ;;  %v1381_v37 = vld [vmem:[#allocation13 + $0xd0] sm:$0xff] }
 0x39d   :  { %1152 = vadd.xlane.f32.xlu1 %v2866_v19  ;;  %v1081_v54 = vpop.xlane.xlu1 %1080 }
 0x39e   :  { %1993 = vpow2.f32 %v1126_v5  ;;  %v1097_v1 = vsub.f32 %v2776_v60, %v1081_v54  ;;  %v1358_v60 = vld [vmem:[#allocation13 + $0x18] sm:$0xff]  ;;  %v1384_v5 = vld [vmem:[#allocation13 + $0xe8] sm:$0xff] }
 0x39f   :  { %v1889_v48 = vpack.c.bf16 %v1358_v60, %v1356_v22  ;;  %v1386_v54 = vld [vmem:[#allocation13 + $0xf8] sm:$0xff]  ;;  %v1383_v22 = vld [vmem:[#allocation13 + $0xe0] sm:$0xff]  ;;  %v1385_v60 = vld [vmem:[#allocation13 + $0xf0] sm:$0xff] }
 0x3a0   :  { %v2870_v8 = vpop.eup %1989  ;;  %v1128_v49 = vmul.f32 1.442695, %v1097_v1  ;;  %v1915_v1 = vpack.c.bf16 %v1381_v37, %v1379_v10  ;;  %v1919_v42 = vpack.c.bf16 %v1385_v60, %v1383_v22  ;;  %v1414_v10 = vld [vmem:[#allocation13 + $0x1d8] sm:$0xff]  ;;  %v1416_v22 = vld [vmem:[#allocation13 + $0x1e8] sm:$0xff] }
 0x3a1   :  { %1154 = vadd.xlane.f32.xlu0 %v2870_v8  ;;  %1890 = vmatprep.subr.bf16.mxu1 %v1889_v48  ;;  %v1390_v48 = vld [vmem:[#allocation13 + $0x118] sm:$0xff] }
 0x3a2   :  { %1995 = vpow2.f32 %v1128_v49  ;;  %1892 = vmatpush1.bf16.msra.mxu1 %v1891_v50  ;;  %v1917_v49 = vpack.c.bf16 %v1386_v54, %v1384_v5  ;;  %v1921_v53 = vpack.c.bf16 %v1390_v48, %v1388_v9  ;;  %v1389_v50 = vld [vmem:[#allocation13 + $0x110] sm:$0xff]  ;;  %v1411_v54 = vld [vmem:[#allocation13 + $0x1c0] sm:$0xff]  ;;  %v1418_v60 = vld [vmem:[#allocation13 + $0x1f8] sm:$0xff] }
 0x3a3   :  { %1894 = vmatprep.subr.bf16.mxu1 %v1893_v35  ;;  %v1392_v35 = vld [vmem:[#allocation13 + $0x128] sm:$0xff]  ;;  %v1923_v56 = vpack.c.bf16 %v1389_v50, %v1387_v30  ;;  %v1949_v48 = vpack.c.bf16 %v1418_v60, %v1416_v22 }
 0x3a4   :  { %v2873_v39 = vpop.eup %1991  ;;  %v1925_v25 = vpack.c.bf16 %v1394_v0, %v1392_v35 }
 0x3a5   :  { %1156 = vadd.xlane.f32.xlu1 %v2873_v39 }
 0x3a6   :  { %1896 = vmatpush1.bf16.msra.mxu1 %v1895_v43  ;;  %v1393_v43 = vld [vmem:[#allocation13 + $0x130] sm:$0xff] }
 0x3a7   :  { %1898 = vmatprep.subr.bf16.mxu1 %v1897_v47  ;;  %v1396_v47 = vld [vmem:[#allocation13 + $0x148] sm:$0xff]  ;;  %v1927_v55 = vpack.c.bf16 %v1393_v43, %v1391_v38 }
 0x3a8   :  { %v2876_v46 = vpop.eup %1993  ;;  %v1929_v44 = vpack.c.bf16 %v1398_v51, %v1396_v47 }
 0x3a9   :  { %1158 = vadd.xlane.f32.xlu0 %v2876_v46 }
 0x3aa   :  { %1900 = vmatpush1.bf16.msra.mxu1 %v1899_v63  ;;  %v1397_v63 = vld [vmem:[#allocation13 + $0x150] sm:$0xff] }
 0x3ab   :  { %1902 = vmatprep.subr.bf16.mxu1 %v1901_v7  ;;  %v1400_v7 = vld [vmem:[#allocation13 + $0x168] sm:$0xff]  ;;  %v1931_v31 = vpack.c.bf16 %v1397_v63, %v1395_v59 }
 0x3ac   :  { %v2879_v34 = vpop.eup %1995  ;;  %v1933_v15 = vpack.c.bf16 %v1402_v11, %v1400_v7 }
 0x3ad   :  { %1160 = vadd.xlane.f32.xlu1 %v2879_v34 }
 0x3ae   :  { %1904 = vmatpush1.bf16.msra.mxu1 %v1903_v62  ;;  %v1401_v62 = vld [vmem:[#allocation13 + $0x170] sm:$0xff] }
 0x3af   :  { %1906 = vmatprep.subr.bf16.mxu1 %v1905_v18  ;;  %v1404_v18 = vld [vmem:[#allocation13 + $0x188] sm:$0xff]  ;;  %v1935_v21 = vpack.c.bf16 %v1401_v62, %v1399_v32 }
 0x3b0   :  { %v1937_v23 = vpack.c.bf16 %v1406_v20, %v1404_v18 }
 0x3b2   :  { %1908 = vmatpush1.bf16.msra.mxu1 %v1907_v52  ;;  %v1405_v52 = vld [vmem:[#allocation13 + $0x190] sm:$0xff] }
 0x3b3   :  { %1910 = vmatprep.subr.bf16.mxu1 %v1909_v27  ;;  %v1408_v27 = vld [vmem:[#allocation13 + $0x1a8] sm:$0xff]  ;;  %v1939_v58 = vpack.c.bf16 %v1405_v52, %v1403_v24 }
 0x3b4   :  { %v1941_v29 = vpack.c.bf16 %v1410_v41, %v1408_v27 }
 0x3b6   :  { %1912 = vmatpush1.bf16.msra.mxu1 %v1911_v28  ;;  %v1409_v28 = vld [vmem:[#allocation13 + $0x1b0] sm:$0xff] }
 0x3b7   :  { %1914 = vmatprep.subr.bf16.mxu1 %v1913_v4  ;;  %v1412_v4 = vld [vmem:[#allocation13 + $0x1c8] sm:$0xff]  ;;  %v1943_v37 = vpack.c.bf16 %v1409_v28, %v1407_v6 }
 0x3b8   :  { %v1945_v5 = vpack.c.bf16 %v1414_v10, %v1412_v4  ;;  %v1417_v10 = vld [vmem:[#allocation13 + $0x1f0] sm:$0xff] }
 0x3ba   :  { %1916 = vmatpush1.bf16.msra.mxu1 %v1915_v1  ;;  %v1413_v1 = vld [vmem:[#allocation13 + $0x1d0] sm:$0xff] }
 0x3bb   :  { %1918 = vmatprep.subr.bf16.mxu1 %v1917_v49  ;;  %v1947_v9 = vpack.c.bf16 %v1413_v1, %v1411_v54 }
 0x3be   :  { %1920 = vmatpush1.bf16.msra.mxu1 %v1919_v42 }
 0x3bf   :  { %1922 = vmatprep.subr.bf16.mxu1 %v1921_v53 }
 0x3c2   :  { %1924 = vmatpush1.bf16.msra.mxu1 %v1923_v56 }
 0x3c3   :  { %1926 = vmatprep.subr.bf16.mxu1 %v1925_v25 }
 0x3c6   :  { %1928 = vmatpush1.bf16.msra.mxu1 %v1927_v55 }
 0x3c7   :  { %1930 = vmatprep.subr.bf16.mxu1 %v1929_v44 }
 0x3ca   :  { %1932 = vmatpush1.bf16.msra.mxu1 %v1931_v31 }
 0x3cb   :  { %1934 = vmatprep.subr.bf16.mxu1 %v1933_v15 }
 0x3ce   :  { %1936 = vmatpush1.bf16.msra.mxu1 %v1935_v21 }
 0x3cf   :  { %1938 = vmatprep.subr.bf16.mxu1 %v1937_v23 }
 0x3d2   :  { %1940 = vmatpush1.bf16.msra.mxu1 %v1939_v58 }
 0x3d3   :  { %1942 = vmatprep.subr.bf16.mxu1 %v1941_v29 }
 0x3d6   :  { %1944 = vmatpush1.bf16.msra.mxu1 %v1943_v37 }
 0x3d7   :  { %1946 = vmatprep.subr.bf16.mxu1 %v1945_v5 }
 0x3da   :  { %1948 = vmatpush1.bf16.msra.mxu1 %v1947_v9 }
 0x3db   :  { %1950 = vmatprep.subr.bf16.mxu1 %v1949_v48 }
 0x3fe   :  { %v1131_v49 = vpop.xlane.xlu0 %1130 }
 0x3ff   :  { %1997 = vrcp.f32 %v1131_v49 }
 0x402   :  { %v1133_v42 = vpop.xlane.xlu1 %1132 }
 0x403   :  { %1999 = vrcp.f32 %v1133_v42 }
 0x406   :  { %v1135_v53 = vpop.xlane.xlu0 %1134 }
 0x407   :  { %2001 = vrcp.f32 %v1135_v53 }
 0x409   :  { %v1998_v30 = vpop.eup %1997 }
 0x40a   :  { %v1163_v50 = vmul.f32 %v1998_v30, %v2813_v16  ;;  %v1137_v35 = vpop.xlane.xlu1 %1136 }
 0x40b   :  { %2003 = vrcp.f32 %v1137_v35 }
 0x40c   :  { %1259 = vmatmul.mubr.f32.vlgmr.msra.gmra.mrb[64].mxu0 %v1163_v50 }
 0x40d   :  { %v2000_v0 = vpop.eup %1999  ;;  %1264 = vmatprep.mubr.f32.mxu0 %v2248_v40 }
 0x40e   :  { %v1139_v56 = vpop.xlane.xlu0 %1138  ;;  %v1165_v25 = vmul.f32 %v2000_v0, %v2819_v45 }
 0x40f   :  { %2005 = vrcp.f32 %v1139_v56 }
 0x410   :  { %1265 = vmatmul.mubr.f32.gmra.mrb[66].mxu0 %v1165_v25 }
 0x411   :  { %v2002_v38 = vpop.eup %2001  ;;  %1270 = vmatprep.mubr.f32.mxu0 %v2248_v40 }
 0x412   :  { %v1141_v43 = vpop.xlane.xlu1 %1140  ;;  %v1167_v47 = vmul.f32 %v2002_v38, %v2825_v2 }
 0x413   :  { %2007 = vrcp.f32 %v1141_v43 }
 0x414   :  { %1271 = vmatmul.mubr.f32.gmra.mrb[68].mxu0 %v1167_v47 }
 0x415   :  { %v2004_v16 = vpop.eup %2003  ;;  %1276 = vmatprep.mubr.f32.mxu0 %v2248_v40 }
 0x416   :  { %v1143_v51 = vpop.xlane.xlu0 %1142  ;;  %v1169_v55 = vmul.f32 %v2004_v16, %v2831_v61 }
 0x417   :  { %2009 = vrcp.f32 %v1143_v51 }
 0x418   :  { %1277 = vmatmul.mubr.f32.gmra.mrb[70].mxu0 %v1169_v55 }
 0x419   :  { %v2006_v44 = vpop.eup %2005  ;;  %1282 = vmatprep.mubr.f32.mxu0 %v2248_v40 }
 0x41a   :  { %v1145_v45 = vpop.xlane.xlu1 %1144  ;;  %v1171_v59 = vmul.f32 %v2006_v44, %v2837_v3 }
 0x41b   :  { %2011 = vrcp.f32 %v1145_v45 }
 0x41c   :  { %1283 = vmatmul.mubr.f32.gmra.mrb[72].mxu0 %v1171_v59 }
 0x41d   :  { %v2008_v63 = vpop.eup %2007  ;;  %1288 = vmatprep.mubr.f32.mxu0 %v2248_v40 }
 0x41e   :  { %v1147_v2 = vpop.xlane.xlu0 %1146  ;;  %v1173_v7 = vmul.f32 %v2008_v63, %v2841_v14 }
 0x41f   :  { %2013 = vrcp.f32 %v1147_v2 }
 0x420   :  { %1289 = vmatmul.mubr.f32.gmra.mrb[74].mxu0 %v1173_v7 }
 0x421   :  { %v2010_v11 = vpop.eup %2009  ;;  %1294 = vmatprep.mubr.f32.mxu0 %v2248_v40 }
 0x422   :  { %v1149_v61 = vpop.xlane.xlu1 %1148  ;;  %v1175_v31 = vmul.f32 %v2010_v11, %v2845_v17  ;;  %v1419_v11 = vld [vmem:[#allocation15] sm:$0x3] }
 0x423   :  { %2015 = vrcp.f32 %v1149_v61  ;;  %v2914_v61 = vrot.slane %v1419_v11, %v2565_v36 }
 0x424   :  { %1295 = vmatmul.mubr.f32.gmra.mrb[76].mxu0 %v1175_v31  ;;  %v2917_v31 = vrot.slane %v1419_v11, %v3078_v12 }
 0x425   :  { %v2012_v15 = vpop.eup %2011  ;;  %1300 = vmatprep.mubr.f32.mxu0 %v2248_v40 }
 0x426   :  { %v1151_v3 = vpop.xlane.xlu0 %1150  ;;  %v1177_v32 = vmul.f32 %v2012_v15, %v2850_v13 }
 0x427   :  { %2017 = vrcp.f32 %v1151_v3 }
 0x428   :  { %1301 = vmatmul.mubr.f32.gmra.mrb[78].mxu0 %v1177_v32 }
 0x429   :  { %v2014_v62 = vpop.eup %2013  ;;  %1306 = vmatprep.mubr.f32.mxu0 %v2248_v40 }
 0x42a   :  { %v1153_v14 = vpop.xlane.xlu1 %1152  ;;  %v1179_v18 = vmul.f32 %v2014_v62, %v2854_v26 }
 0x42b   :  { %2019 = vrcp.f32 %v1153_v14 }
 0x42c   :  { %1307 = vmatmul.mubr.f32.gmra.mrb[80].mxu0 %v1179_v18 }
 0x42d   :  { %v2016_v20 = vpop.eup %2015  ;;  %1312 = vmatprep.mubr.f32.mxu0 %v2248_v40 }
 0x42e   :  { %v1155_v17 = vpop.xlane.xlu0 %1154  ;;  %v1181_v21 = vmul.f32 %v2016_v20, %v2858_v33 }
 0x42f   :  { %2021 = vrcp.f32 %v1155_v17 }
 0x430   :  { %1313 = vmatmul.mubr.f32.gmra.mrb[82].mxu0 %v1181_v21 }
 0x431   :  { %v2018_v23 = vpop.eup %2017  ;;  %1318 = vmatprep.mubr.f32.mxu0 %v2248_v40 }
 0x432   :  { %v1157_v13 = vpop.xlane.xlu1 %1156  ;;  %v1183_v24 = vmul.f32 %v2018_v23, %v2862_v57 }
 0x433   :  { %2023 = vrcp.f32 %v1157_v13 }
 0x434   :  { %1319 = vmatmul.mubr.f32.gmra.mrb[84].mxu0 %v1183_v24 }
 0x435   :  { %v2020_v52 = vpop.eup %2019  ;;  %1324 = vmatprep.mubr.f32.mxu0 %v2248_v40 }
 0x436   :  { %v1159_v26 = vpop.xlane.xlu0 %1158  ;;  %v1185_v27 = vmul.f32 %v2020_v52, %v2866_v19 }
 0x437   :  { %2025 = vrcp.f32 %v1159_v26 }
 0x438   :  { %1325 = vmatmul.mubr.f32.gmra.mrb[86].mxu0 %v1185_v27 }
 0x439   :  { %v2022_v41 = vpop.eup %2021  ;;  %1330 = vmatprep.mubr.f32.mxu0 %v2248_v40 }
 0x43a   :  { %v1161_v33 = vpop.xlane.xlu1 %1160  ;;  %v1187_v58 = vmul.f32 %v2022_v41, %v2870_v8  ;;  %v1415_v8 = vld [vmem:[#allocation13 + $0x1e0] sm:$0xff] }
 0x43b   :  { %2027 = vrcp.f32 %v1161_v33  ;;  %v1951_v37 = vpack.c.bf16 %v1417_v10, %v1415_v8 }
 0x43c   :  { %1331 = vmatmul.mubr.f32.gmra.mrb[88].mxu0 %v1187_v58 }
 0x43d   :  { %v2024_v29 = vpop.eup %2023  ;;  %1336 = vmatprep.mubr.f32.mxu0 %v2248_v40  ;;  %1952 = vmatpush1.bf16.msra.mxu1 %v1951_v37 }
 0x43e   :  { %v1189_v57 = vmul.f32 %v2024_v29, %v2873_v39 }
 0x440   :  { %1337 = vmatmul.mubr.f32.gmra.mrb[90].mxu0 %v1189_v57 }
 0x441   :  { %v2026_v6 = vpop.eup %2025  ;;  %1342 = vmatprep.mubr.f32.mxu0 %v2248_v40 }
 0x442   :  { %v1191_v19 = vmul.f32 %v2026_v6, %v2876_v46 }
 0x444   :  { %1343 = vmatmul.mubr.f32.gmra.mrb[92].mxu0 %v1191_v19 }
 0x445   :  { %v2028_v28 = vpop.eup %2027  ;;  %1348 = vmatprep.mubr.f32.mxu0 %v2248_v40 }
 0x446   :  { %v1193_v4 = vmul.f32 %v2028_v28, %v2879_v34 }
 0x448   :  { %1349 = vmatmul.mubr.f32.gmra.mrb[94].mxu0 %v1193_v4 }
 0x4df   :  { %v1260_v5 = vpop.f32.mrb[64].mxu0 }
 0x4e0   :  { %v1262_v54 = vpop.f32.mrb[65].mxu0 }
 0x4e1   :  { %1495 = vmatprep.mubr.f32.mxu1 %v1262_v54 }
 0x4e2   :  { %1496 = vmatmul.mubr.f32.vlgmr.msra.gmra.mrb[64].mxu1 %v1260_v5 }
 0x4e3   :  { %v1266_v39 = vpop.f32.mrb[66].mxu0 }
 0x4e4   :  { %v1268_v1 = vpop.f32.mrb[67].mxu0 }
 0x4e5   :  { %1501 = vmatprep.mubr.f32.mxu1 %v1268_v1 }
 0x4e6   :  { %1502 = vmatmul.mubr.f32.gmra.mrb[66].mxu1 %v1266_v39 }
 0x4e7   :  { %v1272_v46 = vpop.f32.mrb[68].mxu0 }
 0x4e8   :  { %v1274_v49 = vpop.f32.mrb[69].mxu0 }
 0x4e9   :  { %1507 = vmatprep.mubr.f32.mxu1 %v1274_v49 }
 0x4ea   :  { %1508 = vmatmul.mubr.f32.gmra.mrb[68].mxu1 %v1272_v46 }
 0x4eb   :  { %v1278_v40 = vpop.f32.mrb[70].mxu0 }
 0x4ec   :  { %v1280_v22 = vpop.f32.mrb[71].mxu0 }
 0x4ed   :  { %1513 = vmatprep.mubr.f32.mxu1 %v1280_v22 }
 0x4ee   :  { %1514 = vmatmul.mubr.f32.gmra.mrb[70].mxu1 %v1278_v40 }
 0x4ef   :  { %v1284_v34 = vpop.f32.mrb[72].mxu0 }
 0x4f0   :  { %v1286_v60 = vpop.f32.mrb[73].mxu0 }
 0x4f1   :  { %1519 = vmatprep.mubr.f32.mxu1 %v1286_v60 }
 0x4f2   :  { %1520 = vmatmul.mubr.f32.gmra.mrb[72].mxu1 %v1284_v34 }
 0x4f3   :  { %v1290_v9 = vpop.f32.mrb[74].mxu0 }
 0x4f4   :  { %v1292_v48 = vpop.f32.mrb[75].mxu0 }
 0x4f5   :  { %1525 = vmatprep.mubr.f32.mxu1 %v1292_v48 }
 0x4f6   :  { %1526 = vmatmul.mubr.f32.gmra.mrb[74].mxu1 %v1290_v9 }
 0x4f7   :  { %v1296_v42 = vpop.f32.mrb[76].mxu0 }
 0x4f8   :  { %v1298_v53 = vpop.f32.mrb[77].mxu0 }
 0x4f9   :  { %1531 = vmatprep.mubr.f32.mxu1 %v1298_v53 }
 0x4fa   :  { %1532 = vmatmul.mubr.f32.gmra.mrb[76].mxu1 %v1296_v42 }
 0x4fb   :  { %v1302_v30 = vpop.f32.mrb[78].mxu0 }
 0x4fc   :  { %v1304_v50 = vpop.f32.mrb[79].mxu0 }
 0x4fd   :  { %1537 = vmatprep.mubr.f32.mxu1 %v1304_v50 }
 0x4fe   :  { %1538 = vmatmul.mubr.f32.gmra.mrb[78].mxu1 %v1302_v30 }
 0x4ff   :  { %v1308_v35 = vpop.f32.mrb[80].mxu0 }
 0x500   :  { %v1310_v0 = vpop.f32.mrb[81].mxu0 }
 0x501   :  { %1543 = vmatprep.mubr.f32.mxu1 %v1310_v0 }
 0x502   :  { %1544 = vmatmul.mubr.f32.gmra.mrb[80].mxu1 %v1308_v35 }
 0x503   :  { %v1314_v56 = vpop.f32.mrb[82].mxu0 }
 0x504   :  { %v1316_v25 = vpop.f32.mrb[83].mxu0 }
 0x505   :  { %1549 = vmatprep.mubr.f32.mxu1 %v1316_v25 }
 0x506   :  { %1550 = vmatmul.mubr.f32.gmra.mrb[82].mxu1 %v1314_v56 }
 0x507   :  { %v1320_v38 = vpop.f32.mrb[84].mxu0 }
 0x508   :  { %v1322_v43 = vpop.f32.mrb[85].mxu0 }
 0x509   :  { %1555 = vmatprep.mubr.f32.mxu1 %v1322_v43 }
 0x50a   :  { %1556 = vmatmul.mubr.f32.gmra.mrb[84].mxu1 %v1320_v38 }
 0x50b   :  { %v1326_v47 = vpop.f32.mrb[86].mxu0 }
 0x50c   :  { %v1328_v16 = vpop.f32.mrb[87].mxu0 }
 0x50d   :  { %1561 = vmatprep.mubr.f32.mxu1 %v1328_v16 }
 0x50e   :  { %1562 = vmatmul.mubr.f32.gmra.mrb[86].mxu1 %v1326_v47 }
 0x50f   :  { %v1332_v51 = vpop.f32.mrb[88].mxu0 }
 0x510   :  { %v1334_v55 = vpop.f32.mrb[89].mxu0 }
 0x511   :  { %1567 = vmatprep.mubr.f32.mxu1 %v1334_v55 }
 0x512   :  { %1568 = vmatmul.mubr.f32.gmra.mrb[88].mxu1 %v1332_v51 }
 0x513   :  { %v1338_v44 = vpop.f32.mrb[90].mxu0 }
 0x514   :  { %v1340_v45 = vpop.f32.mrb[91].mxu0 }
 0x515   :  { %1573 = vmatprep.mubr.f32.mxu1 %v1340_v45 }
 0x516   :  { %1574 = vmatmul.mubr.f32.gmra.mrb[90].mxu1 %v1338_v44 }
 0x517   :  { %v1344_v59 = vpop.f32.mrb[92].mxu0 }
 0x518   :  { %v1346_v63 = vpop.f32.mrb[93].mxu0 }
 0x519   :  { %1579 = vmatprep.mubr.f32.mxu1 %v1346_v63 }
 0x51a   :  { %1580 = vmatmul.mubr.f32.gmra.mrb[92].mxu1 %v1344_v59 }
 0x51b   :  { %v1350_v2 = vpop.f32.mrb[94].mxu0 }
 0x51c   :  { %v1352_v7 = vpop.f32.mrb[95].mxu0 }
 0x51d   :  { %1585 = vmatprep.mubr.f32.mxu1 %v1352_v7 }
 0x51e   :  { %1586 = vmatmul.mubr.f32.gmra.mrb[94].mxu1 %v1350_v2 }
 0x5b5   :  { %v1497_v15 = vpop.f32.mrb[64].mxu1 }
 0x5b6   :  { %v1498_v3 = vadd.f32 %v1497_v15, %v2914_v61  ;;  %v1499_v32 = vpop.f32.mrb[65].mxu1 }
 0x5b7   :  { %v1500_v62 = vadd.f32 %v1499_v32, %v2917_v31 }
 0x5b8   :  { %1592 = vst [vmem:[%s3056_s9] sm:$0xff] %v1498_v3 }
 0x5b9   :  { %1593 = vst [vmem:[%s3056_s9 + $0x8] sm:$0xff] %v1500_v62  ;;  %v1503_v14 = vpop.f32.mrb[66].mxu1 }
 0x5ba   :  { %v1504_v36 = vadd.f32 %v1503_v14, %v2914_v61  ;;  %v1505_v18 = vpop.f32.mrb[67].mxu1 }
 0x5bb   :  { %v1506_v12 = vadd.f32 %v1505_v18, %v2917_v31 }
 0x5bc   :  { %1594 = vst [vmem:[%s3056_s9 + $0x10] sm:$0xff] %v1504_v36 }
 0x5bd   :  { %1595 = vst [vmem:[%s3056_s9 + $0x18] sm:$0xff] %v1506_v12  ;;  %v1509_v20 = vpop.f32.mrb[68].mxu1 }
 0x5be   :  { %v1510_v17 = vadd.f32 %v1509_v20, %v2914_v61  ;;  %v1511_v21 = vpop.f32.mrb[69].mxu1 }
 0x5bf   :  { %v1512_v23 = vadd.f32 %v1511_v21, %v2917_v31 }
 0x5c0   :  { %1596 = vst [vmem:[%s3056_s9 + $0x20] sm:$0xff] %v1510_v17 }
 0x5c1   :  { %1597 = vst [vmem:[%s3056_s9 + $0x28] sm:$0xff] %v1512_v23  ;;  %v1515_v13 = vpop.f32.mrb[70].mxu1 }
 0x5c2   :  { %v1516_v24 = vadd.f32 %v1515_v13, %v2914_v61  ;;  %v1517_v52 = vpop.f32.mrb[71].mxu1 }
 0x5c3   :  { %v1518_v26 = vadd.f32 %v1517_v52, %v2917_v31 }
 0x5c4   :  { %1598 = vst [vmem:[%s3056_s9 + $0x30] sm:$0xff] %v1516_v24 }
 0x5c5   :  { %1599 = vst [vmem:[%s3056_s9 + $0x38] sm:$0xff] %v1518_v26  ;;  %v1521_v27 = vpop.f32.mrb[72].mxu1 }
 0x5c6   :  { %v1522_v41 = vadd.f32 %v1521_v27, %v2914_v61  ;;  %v1523_v33 = vpop.f32.mrb[73].mxu1 }
 0x5c7   :  { %v1524_v58 = vadd.f32 %v1523_v33, %v2917_v31 }
 0x5c8   :  { %1600 = vst [vmem:[%s3056_s9 + $0x40] sm:$0xff] %v1522_v41 }
 0x5c9   :  { %1601 = vst [vmem:[%s3056_s9 + $0x48] sm:$0xff] %v1524_v58  ;;  %v1527_v29 = vpop.f32.mrb[74].mxu1 }
 0x5ca   :  { %v1528_v57 = vadd.f32 %v1527_v29, %v2914_v61  ;;  %v1529_v6 = vpop.f32.mrb[75].mxu1 }
 0x5cb   :  { %v1530_v19 = vadd.f32 %v1529_v6, %v2917_v31 }
 0x5cc   :  { %1602 = vst [vmem:[%s3056_s9 + $0x50] sm:$0xff] %v1528_v57 }
 0x5cd   :  { %1603 = vst [vmem:[%s3056_s9 + $0x58] sm:$0xff] %v1530_v19  ;;  %v1533_v28 = vpop.f32.mrb[76].mxu1 }
 0x5ce   :  { %v1534_v4 = vadd.f32 %v1533_v28, %v2914_v61  ;;  %v1535_v8 = vpop.f32.mrb[77].mxu1 }
 0x5cf   :  { %v1536_v10 = vadd.f32 %v1535_v8, %v2917_v31 }
 0x5d0   :  { %1604 = vst [vmem:[%s3056_s9 + $0x60] sm:$0xff] %v1534_v4 }
 0x5d1   :  { %1605 = vst [vmem:[%s3056_s9 + $0x68] sm:$0xff] %v1536_v10  ;;  %v1539_v37 = vpop.f32.mrb[78].mxu1 }
 0x5d2   :  { %v1540_v5 = vadd.f32 %v1539_v37, %v2914_v61  ;;  %v1541_v54 = vpop.f32.mrb[79].mxu1 }
 0x5d3   :  { %v1542_v39 = vadd.f32 %v1541_v54, %v2917_v31 }
 0x5d4   :  { %1606 = vst [vmem:[%s3056_s9 + $0x70] sm:$0xff] %v1540_v5 }
 0x5d5   :  { %1607 = vst [vmem:[%s3056_s9 + $0x78] sm:$0xff] %v1542_v39  ;;  %v1545_v1 = vpop.f32.mrb[80].mxu1 }
 0x5d6   :  { %v1546_v46 = vadd.f32 %v1545_v1, %v2914_v61  ;;  %v1547_v49 = vpop.f32.mrb[81].mxu1 }
 0x5d7   :  { %v1548_v40 = vadd.f32 %v1547_v49, %v2917_v31 }
 0x5d8   :  { %1608 = vst [vmem:[%s3056_s9 + $0x80] sm:$0xff] %v1546_v46 }
 0x5d9   :  { %1609 = vst [vmem:[%s3056_s9 + $0x88] sm:$0xff] %v1548_v40  ;;  %v1551_v22 = vpop.f32.mrb[82].mxu1 }
 0x5da   :  { %v1552_v34 = vadd.f32 %v1551_v22, %v2914_v61  ;;  %v1553_v60 = vpop.f32.mrb[83].mxu1 }
 0x5db   :  { %v1554_v9 = vadd.f32 %v1553_v60, %v2917_v31 }
 0x5dc   :  { %1610 = vst [vmem:[%s3056_s9 + $0x90] sm:$0xff] %v1552_v34 }
 0x5dd   :  { %1611 = vst [vmem:[%s3056_s9 + $0x98] sm:$0xff] %v1554_v9  ;;  %v1557_v48 = vpop.f32.mrb[84].mxu1 }
 0x5de   :  { %v1558_v42 = vadd.f32 %v1557_v48, %v2914_v61  ;;  %v1559_v53 = vpop.f32.mrb[85].mxu1 }
 0x5df   :  { %v1560_v30 = vadd.f32 %v1559_v53, %v2917_v31 }
 0x5e0   :  { %1612 = vst [vmem:[%s3056_s9 + $0xa0] sm:$0xff] %v1558_v42 }
 0x5e1   :  { %1613 = vst [vmem:[%s3056_s9 + $0xa8] sm:$0xff] %v1560_v30  ;;  %v1563_v50 = vpop.f32.mrb[86].mxu1 }
 0x5e2   :  { %v1564_v35 = vadd.f32 %v1563_v50, %v2914_v61  ;;  %v1565_v0 = vpop.f32.mrb[87].mxu1 }
 0x5e3   :  { %v1566_v56 = vadd.f32 %v1565_v0, %v2917_v31 }
 0x5e4   :  { %1614 = vst [vmem:[%s3056_s9 + $0xb0] sm:$0xff] %v1564_v35 }
 0x5e5   :  { %1615 = vst [vmem:[%s3056_s9 + $0xb8] sm:$0xff] %v1566_v56  ;;  %v1569_v25 = vpop.f32.mrb[88].mxu1 }
 0x5e6   :  { %v1570_v38 = vadd.f32 %v1569_v25, %v2914_v61  ;;  %v1571_v43 = vpop.f32.mrb[89].mxu1 }
 0x5e7   :  { %v1572_v47 = vadd.f32 %v1571_v43, %v2917_v31 }
 0x5e8   :  { %1616 = vst [vmem:[%s3056_s9 + $0xc0] sm:$0xff] %v1570_v38 }
 0x5e9   :  { %1617 = vst [vmem:[%s3056_s9 + $0xc8] sm:$0xff] %v1572_v47  ;;  %v1575_v16 = vpop.f32.mrb[90].mxu1 }
 0x5ea   :  { %v1576_v51 = vadd.f32 %v1575_v16, %v2914_v61  ;;  %v1577_v55 = vpop.f32.mrb[91].mxu1 }
 0x5eb   :  { %v1578_v44 = vadd.f32 %v1577_v55, %v2917_v31 }
 0x5ec   :  { %1618 = vst [vmem:[%s3056_s9 + $0xd0] sm:$0xff] %v1576_v51 }
 0x5ed   :  { %1619 = vst [vmem:[%s3056_s9 + $0xd8] sm:$0xff] %v1578_v44  ;;  %v1581_v45 = vpop.f32.mrb[92].mxu1 }
 0x5ee   :  { %v1582_v59 = vadd.f32 %v1581_v45, %v2914_v61  ;;  %v1583_v63 = vpop.f32.mrb[93].mxu1 }
 0x5ef   :  { %v1584_v2 = vadd.f32 %v1583_v63, %v2917_v31 }
 0x5f0   :  { %1620 = vst [vmem:[%s3056_s9 + $0xe0] sm:$0xff] %v1582_v59 }
 0x5f1   :  { %1621 = vst [vmem:[%s3056_s9 + $0xe8] sm:$0xff] %v1584_v2  ;;  %v1587_v7 = vpop.f32.mrb[94].mxu1 }
 0x5f2   :  { %v1588_v11 = vadd.f32 %v1587_v7, %v2914_v61  ;;  %v1589_v15 = vpop.f32.mrb[95].mxu1 }
 0x5f3   :  { %v1590_v3 = vadd.f32 %v1589_v15, %v2917_v31 }
 0x5f4   :  { %1622 = vst [vmem:[%s3056_s9 + $0xf0] sm:$0xff] %v1588_v11 }
 0x5f5   :  { %1623 = vst [vmem:[%s3056_s9 + $0xf8] sm:$0xff] %v1590_v3 }
 0x5f6   :  { %1628 = vsyncpa [#allocation3], 1 }
 0x5f7   :  { %1629 = vsyncpa [#allocation5], 1 }
 0x5f8   :  { %1630 = vsyncpa [#allocation8], 1 }
 0x5f9   :  { %1631 = vsyncpa [#allocation11], 1 }
 0x5fa   :  { %1632 = vsyncpa [#allocation14], 1 }

// kernel: _lambda_.5
= control target key start
LH: loop header
LB: loop body
LE: loop exit
PB: predicated region body
PF: predicated region fallthrough
CT: control target
= control target key end

     0   :  { %14 = vsyncpa [#allocation4], 0  ;;  %s5641_s0 = inlined_call_operand.vmem [shape: bf16[768,768], index: 0, kind: input, shape index: {}]   ;;  %s5642_s1 = inlined_call_operand.vmem [shape: bf16[768,128], index: 1, kind: input, shape index: {}]   ;;  %s5643_s2 = inlined_call_operand.vmem [shape: f32[768,128], index: 2, kind: input, shape index: {}]   ;;  %s5644_s3 = inlined_call_operand.vmem [shape: f32[128,128], index: 3, kind: input, shape index: {}]   ;;  %s5645_s4 = inlined_call_operand.vmem [shape: f32[1,128], index: 4, kind: input, shape index: {}]   ;;  %s5646_s5 = inlined_call_operand.vmem [shape: f32[128,128], index: 5, kind: input, shape index: {}]   ;;  %s5647_s6 = inlined_call_operand.vmem [shape: f32[1,128], index: 6, kind: input, shape index: {}]   ;;  %s5648_s7 = inlined_call_operand.hbm [shape: f32[768,128], index: 7, kind: output, shape index: {0}]   ;;  %s5649_s8 = inlined_call_operand.vmem [shape: f32[768,128], index: 8, kind: output, shape index: {1}]  }
   0x1   :  { %16 = vsyncpa [#allocation4 + $0x1], 0  ;;  %s4430_s27 = smov 0   ;;  %s4432_s28 = smov 0  }
   0x2   :  { %s4434_s29 = smov 0   ;;  %s4436_s30 = smov 0  }
   0x3   :  { %s4438_s9 = smov 0   ;;  %s4440_s10 = smov 0  }
   0x4 LB: > { %s3168_s11 = sadd.s32 4294967295, %s4380_s10   ;;  %s3169_s12 = sadd.s32 4294967294, %s4380_s10   ;;  %s4380_s10 = sphi %s4440_s10, %s22_s10   ;;  %s4376_s9 = sphi %s4438_s9, %s5656_s9   ;;  %s4372_s30 = sphi %s4436_s30, %s5655_s30   ;;  %s4368_s29 = sphi %s4434_s29, %s5654_s29   ;;  %s4364_s28 = sphi %s4432_s28, %s5653_s28   ;;  %s4360_s27 = sphi %s4430_s27, %s5652_s27  }
   0x5   : > { %s34_s13 = sadd.s32 1, %s4376_s9  ;;  %s200_s14 = sadd.s32 1, %s4368_s29 }
   0x6   : > { %p36_p0 = scmp.ge.s32.totalorder %s34_s13, 3  ;;  %p210_p1 = scmp.ne.s32.totalorder %s4368_s29, %s4364_s28 }
   0x7   : > { %p211_p2 = scmp.eq.s32.totalorder %s3168_s11, 2  ;;  %p216_p3 = scmp.ne.s32.totalorder %s4364_s28, %s4360_s27 }
   0x8   : > { %s5658_s13 = smov (%p36_p0, %s34_s13), 0  ;;  %p217_p5 = scmp.eq.s32.totalorder %s3169_s12, 2 }
   0x9   : > { %p4470_p4 = por %p211_p2, %p210_p1  ;;  %s197_s16 = ssub.s32 %s4376_s9, %s5658_s13 }
   0xa   : > { %p3172_p6 = scmp.ge.s32.totalorder %s4380_s10, 1  ;;  %p198_p7 = scmp.eq.s32.totalorder %s197_s16, 0 }
   0xb   : > { %p4477_p8 = por %p217_p5, %p216_p3  ;;  %p300_p9 = scmp.lt.s32.totalorder %s4380_s10, 4 }
   0xc   : > { %s4483_s18 = scalar_select %p198_p7, %s4368_s29, %s200_s14  }
   0xd   : > { %p301_p10 = pnand %p3172_p6, %p300_p9 }
   0xe   : > { %v4046_v0 = vld [vmem:[%s5642_s1 + $0x40] sm:$0xff] (!%p301_p10)   ;;  %v4050_v4 = vld [vmem:[%s5642_s1 + $0x48] sm:$0xff] (!%p301_p10)   ;;  %v4054_v8 = vld [vmem:[%s5642_s1 + $0x50] sm:$0xff] (!%p301_p10)   ;;  %s3174_s25 = sshll.u32 (!%p301_p10), %s4372_s30, 5 }
   0xf   : > { %304 = sbr.rel (%p301_p10) target bundleno = 962 (0x3c2), region = 48  ;;  %v4047_v1 = vld [vmem:[%s5642_s1 + $0xc0] sm:$0xff] (!%p301_p10)   ;;  %3332 = vmatprep.subr.bf16.mxu0 (!%p301_p10), %v4046_v0  ;;  %v4051_v5 = vld [vmem:[%s5642_s1 + $0xc8] sm:$0xff] (!%p301_p10)   ;;  %v4055_v9 = vld [vmem:[%s5642_s1 + $0xd0] sm:$0xff] (!%p301_p10)   ;;  %p351_p11 = scmp.lt.s32.totalorder (!%p301_p10), %s3174_s25, 95 }
  0x10   : > { %v4048_v2 = vld [vmem:[%s5642_s1] sm:$0xff] (!%p301_p10)   ;;  %3444 = vmatprep.subr.bf16.mxu1 (!%p301_p10), %v4047_v1  ;;  %v4052_v6 = vld [vmem:[%s5642_s1 + $0x8] sm:$0xff] (!%p301_p10)   ;;  %v4056_v10 = vld [vmem:[%s5642_s1 + $0x10] sm:$0xff] (!%p301_p10)  }
  0x11   : > { %v4049_v3 = vld [vmem:[%s5642_s1 + $0x80] sm:$0xff] (!%p301_p10)   ;;  %3333 = vmatpush3.bf16.msra.mxu0 (!%p301_p10), %v4048_v2  ;;  %v4053_v7 = vld [vmem:[%s5642_s1 + $0x88] sm:$0xff] (!%p301_p10)   ;;  %v4057_v11 = vld [vmem:[%s5642_s1 + $0x90] sm:$0xff] (!%p301_p10)  }
  0x12   : > { %3445 = vmatpush3.bf16.msra.mxu1 (!%p301_p10), %v4049_v3  ;;  %3334 = vmatprep.subr.bf16.mxu0 (!%p301_p10), %v4050_v4  ;;  %v4058_v12 = vld [vmem:[%s5642_s1 + $0x58] sm:$0xff] (!%p301_p10)   ;;  %v4062_v16 = vld [vmem:[%s5642_s1 + $0x60] sm:$0xff] (!%p301_p10)   ;;  %v4066_v20 = vld [vmem:[%s5642_s1 + $0x68] sm:$0xff] (!%p301_p10)  }
  0x13   : > { %3446 = vmatprep.subr.bf16.mxu1 (!%p301_p10), %v4051_v5  ;;  %v4059_v13 = vld [vmem:[%s5642_s1 + $0xd8] sm:$0xff] (!%p301_p10)   ;;  %v4063_v17 = vld [vmem:[%s5642_s1 + $0xe0] sm:$0xff] (!%p301_p10)   ;;  %v4067_v21 = vld [vmem:[%s5642_s1 + $0xe8] sm:$0xff] (!%p301_p10)  }
  0x14   : > { %v4060_v14 = vld [vmem:[%s5642_s1 + $0x18] sm:$0xff] (!%p301_p10)   ;;  %v4064_v18 = vld [vmem:[%s5642_s1 + $0x20] sm:$0xff] (!%p301_p10)   ;;  %v4068_v22 = vld [vmem:[%s5642_s1 + $0x28] sm:$0xff] (!%p301_p10)  }
  0x15   : > { %3335 = vmatpush3.bf16.msra.mxu0 (!%p301_p10), %v4052_v6  ;;  %v4061_v15 = vld [vmem:[%s5642_s1 + $0x98] sm:$0xff] (!%p301_p10)   ;;  %v4065_v19 = vld [vmem:[%s5642_s1 + $0xa0] sm:$0xff] (!%p301_p10)   ;;  %v4069_v23 = vld [vmem:[%s5642_s1 + $0xa8] sm:$0xff] (!%p301_p10)  }
  0x16   : > { %3447 = vmatpush3.bf16.msra.mxu1 %v4053_v7  ;;  %3336 = vmatprep.subr.bf16.mxu0 %v4054_v8  ;;  %s5660_s25 = smov (!%p351_p11, %s3174_s25), 95  ;;  %v4070_v24 = vld [vmem:[%s5642_s1 + $0x70] sm:$0xff]   ;;  %v4074_v28 = vld [vmem:[%s5642_s1 + $0x78] sm:$0xff]   ;;  %v4084_v36 = vld [vmem:[%s5642_s1 + $0x140] sm:$0xff]  }
  0x17   : > { %3448 = vmatprep.subr.bf16.mxu1 %v4055_v9  ;;  %v4071_v25 = vld [vmem:[%s5642_s1 + $0xf0] sm:$0xff]   ;;  %s3988_s26 = smul.u32 24, %s5660_s25  ;;  %v4075_v29 = vld [vmem:[%s5642_s1 + $0xf8] sm:$0xff]   ;;  %v4085_v37 = vld [vmem:[%s5642_s1 + $0x100] sm:$0xff]   ;;  %s3177_s22 = sshll.u32 %s5660_s25, 3 }
  0x18   : > { %v4072_v26 = vld [vmem:[%s5642_s1 + $0x30] sm:$0xff]   ;;  %v4076_v30 = vld [vmem:[%s5642_s1 + $0x38] sm:$0xff]   ;;  %v4098_v44 = vld [vmem:[%s5642_s1 + $0x148] sm:$0xff]   ;;  %s5024_s24 = scalar_lea.vmem %s5643_s2, %s3177_s22 }
  0x19   : > { %3337 = vmatpush3.bf16.msra.mxu0 %v4056_v10  ;;  %v4073_v27 = vld [vmem:[%s5642_s1 + $0xb0] sm:$0xff]   ;;  %s4582_s11 = scalar_lea.vmem %s5641_s0, %s3988_s26  ;;  %v4077_v31 = vld [vmem:[%s5642_s1 + $0xb8] sm:$0xff]   ;;  %v4099_v45 = vld [vmem:[%s5642_s1 + $0x108] sm:$0xff]   ;;  %s339_s26 = sand.u32 1, %s4364_s28  }
  0x1a   : > { %3449 = vmatpush3.bf16.msra.mxu1 %v4057_v11  ;;  %3338 = vmatprep.subr.bf16.mxu0 %v4058_v12  ;;  %v4078_v32 = vld [vmem:[%s4582_s11] ss:$24 sps:$4 sm:$0xff]   ;;  %v4080_v33 = vld [vmem:[%s4582_s11 + $0x4] ss:$24 sps:$4 sm:$0xff]   ;;  %v4086_v38 = vld [vmem:[%s4582_s11 + $0x34] ss:$24 sps:$4 sm:$0xff]  }
  0x1b   : > { %3450 = vmatprep.subr.bf16.mxu1 %v4059_v13  ;;  %v4081_v34 = vld [vmem:[%s4582_s11 + $0x8] ss:$24 sps:$4 sm:$0xff]   ;;  %v4083_v35 = vld [vmem:[%s4582_s11 + $0xc] ss:$24 sps:$4 sm:$0xff]   ;;  %1440 = vmatprep.mubr.bf16.mxu0 %v4080_v33  ;;  %v4088_v39 = vld [vmem:[%s4582_s11 + $0x3c] ss:$24 sps:$4 sm:$0xff]  }
  0x1c   : > { %1601 = vmatprep.mubr.bf16.mxu1 %v4083_v35  ;;  %v4090_v40 = vld [vmem:[%s4582_s11 + $0x30] ss:$24 sps:$4 sm:$0xff]   ;;  %v4092_v42 = vld [vmem:[%s4582_s11 + $0x64] ss:$24 sps:$4 sm:$0xff]   ;;  %v4096_v46 = vld [vmem:[%s4582_s11 + $0x60] ss:$24 sps:$4 sm:$0xff]  }
  0x1d   : > { %3339 = vmatpush3.bf16.msra.mxu0 %v4060_v14  ;;  %v4091_v41 = vld [vmem:[%s4582_s11 + $0x38] ss:$24 sps:$4 sm:$0xff]   ;;  %v4094_v43 = vld [vmem:[%s4582_s11 + $0x6c] ss:$24 sps:$4 sm:$0xff]   ;;  %v4097_v47 = vld [vmem:[%s4582_s11 + $0x68] ss:$24 sps:$4 sm:$0xff]  }
  0x1e   : > { %3451 = vmatpush3.bf16.msra.mxu1 %v4061_v15  ;;  %3340 = vmatprep.subr.bf16.mxu0 %v4062_v16  ;;  %v4100_v48 = vld [vmem:[%s4582_s11 + $0x94] ss:$24 sps:$4 sm:$0xff]   ;;  %v4104_v52 = vld [vmem:[%s4582_s11 + $0x90] ss:$24 sps:$4 sm:$0xff]   ;;  %v4106_v54 = vld [vmem:[%s4582_s11 + $0xc4] ss:$24 sps:$4 sm:$0xff]  }
  0x1f   : > { %3452 = vmatprep.subr.bf16.mxu1 %v4063_v17  ;;  %v4102_v49 = vld [vmem:[%s4582_s11 + $0x9c] ss:$24 sps:$4 sm:$0xff]   ;;  %v4105_v53 = vld [vmem:[%s4582_s11 + $0x98] ss:$24 sps:$4 sm:$0xff]   ;;  %v4108_v55 = vld [vmem:[%s4582_s11 + $0xcc] ss:$24 sps:$4 sm:$0xff]  }
  0x20   : > { %v4112_v50 = vld [vmem:[%s5642_s1 + $0x150] sm:$0xff]   ;;  %v4126_v56 = vld [vmem:[%s5642_s1 + $0x158] sm:$0xff]   ;;  %v4111_v59 = vld [vmem:[%s4582_s11 + $0xc8] ss:$24 sps:$4 sm:$0xff]   ;;  %s3173_s20 = sshll.u32 %s339_s26, 8  ;;  %s5524_s16 = scalar_lea.sflag [#allocation4], %s339_s26 }
  0x21   : > { %3341 = vmatpush3.bf16.msra.mxu0 %v4064_v18  ;;  %v4113_v51 = vld [vmem:[%s5642_s1 + $0x110] sm:$0xff]   ;;  %v4127_v57 = vld [vmem:[%s5642_s1 + $0x118] sm:$0xff]   ;;  %v4140_v61 = vld [vmem:[%s5642_s1 + $0x160] sm:$0xff]   ;;  %s5211_s21 = scalar_lea.vmem [#allocation3], %s3173_s20 }
  0x22   : > { %3453 = vmatpush3.bf16.msra.mxu1 %v4065_v19  ;;  %3342 = vmatprep.subr.bf16.mxu0 %v4066_v20  ;;  %v4110_v58 = vld [vmem:[%s4582_s11 + $0xc0] ss:$24 sps:$4 sm:$0xff]   ;;  %v4114_v60 = vld [vmem:[%s4582_s11 + $0xf4] ss:$24 sps:$4 sm:$0xff]   ;;  %v4118_v0 = vld [vmem:[%s4582_s11 + $0xf0] ss:$24 sps:$4 sm:$0xff]  }
  0x23   : > { %3454 = vmatprep.subr.bf16.mxu1 %v4067_v21  ;;  %v4141_v62 = vld [vmem:[%s5642_s1 + $0x120] sm:$0xff]   ;;  %v4116_v63 = vld [vmem:[%s4582_s11 + $0xfc] ss:$24 sps:$4 sm:$0xff]   ;;  %v4119_v1 = vld [vmem:[%s4582_s11 + $0xf8] ss:$24 sps:$4 sm:$0xff]   ;;  %s3049_s23 = sshll.u32 %s5211_s21, 4  ;;  %s5520_s23 = int_to_ptr.vmem [resolvable:$true] %s3049_s23 }
  0x24   : > { %v4120_v2 = vld [vmem:[%s4582_s11 + $0x124] ss:$24 sps:$4 sm:$0xff]   ;;  %v4154_v3 = vld [vmem:[%s5642_s1 + $0x168] sm:$0xff]   ;;  %v4124_v6 = vld [vmem:[%s4582_s11 + $0x120] ss:$24 sps:$4 sm:$0xff]   ;;  %s4302_s19 = scalar_lea.vmem %s5520_s23, 4096 }
  0x25   : > { %3343 = vmatpush3.bf16.msra.mxu0 %v4068_v22  ;;  %v4155_v4 = vld [vmem:[%s5642_s1 + $0x128] sm:$0xff]   ;;  %v4168_v8 = vld [vmem:[%s5642_s1 + $0x170] sm:$0xff]   ;;  %v4182_v13 = vld [vmem:[%s5642_s1 + $0x178] sm:$0xff]   ;;  %p4303_p12 = scmp.ne.s32.totalorder %s5520_s23, %s4302_s19 }
  0x26   : > { %3455 = vmatpush3.bf16.msra.mxu1 %v4069_v23  ;;  %3344 = vmatprep.subr.bf16.mxu0 %v4070_v24  ;;  %v4122_v5 = vld [vmem:[%s4582_s11 + $0x12c] ss:$24 sps:$4 sm:$0xff]   ;;  %v4125_v7 = vld [vmem:[%s4582_s11 + $0x128] ss:$24 sps:$4 sm:$0xff]   ;;  %v4169_v9 = vld [vmem:[%s5642_s1 + $0x130] sm:$0xff]  }
  0x27   : > { %3456 = vmatprep.subr.bf16.mxu1 %v4071_v25  ;;  %v4128_v10 = vld [vmem:[%s4582_s11 + $0x154] ss:$24 sps:$4 sm:$0xff]   ;;  %v4132_v12 = vld [vmem:[%s4582_s11 + $0x150] ss:$24 sps:$4 sm:$0xff]   ;;  %v4183_v14 = vld [vmem:[%s5642_s1 + $0x138] sm:$0xff]   ;;  %p4304_p13 = pnand %p4303_p12, %p4470_p4 }
  0x28   : > { %v4130_v11 = vld [vmem:[%s4582_s11 + $0x15c] ss:$24 sps:$4 sm:$0xff]   ;;  %v4133_v15 = vld [vmem:[%s4582_s11 + $0x158] ss:$24 sps:$4 sm:$0xff]   ;;  %v4136_v17 = vld [vmem:[%s4582_s11 + $0x18c] ss:$24 sps:$4 sm:$0xff]  }
  0x29   : > { %3345 = vmatpush3.bf16.msra.mxu0 %v4072_v26  ;;  %v4134_v16 = vld [vmem:[%s4582_s11 + $0x184] ss:$24 sps:$4 sm:$0xff]   ;;  %v4138_v18 = vld [vmem:[%s4582_s11 + $0x180] ss:$24 sps:$4 sm:$0xff]   ;;  %v4142_v20 = vld [vmem:[%s4582_s11 + $0x1b4] ss:$24 sps:$4 sm:$0xff]   ;;  %p4305_p0 = pneg %p4304_p13 }
  0x2a   : > { %3457 = vmatpush3.bf16.msra.mxu1 %v4073_v27  ;;  %3346 = vmatprep.subr.bf16.mxu0 %v4074_v28  ;;  %v4139_v19 = vld [vmem:[%s4582_s11 + $0x188] ss:$24 sps:$4 sm:$0xff]   ;;  %v4144_v21 = vld [vmem:[%s4582_s11 + $0x1bc] ss:$24 sps:$4 sm:$0xff]   ;;  %v4147_v23 = vld [vmem:[%s4582_s11 + $0x1b8] ss:$24 sps:$4 sm:$0xff]  }
  0x2b   : > { %3458 = vmatprep.subr.bf16.mxu1 %v4075_v29  ;;  %v4146_v22 = vld [vmem:[%s4582_s11 + $0x1b0] ss:$24 sps:$4 sm:$0xff]   ;;  %v4148_v24 = vld [vmem:[%s4582_s11 + $0x1e4] ss:$24 sps:$4 sm:$0xff]   ;;  %v4152_v26 = vld [vmem:[%s4582_s11 + $0x1e0] ss:$24 sps:$4 sm:$0xff]  }
  0x2c   : > { %v4150_v25 = vld [vmem:[%s4582_s11 + $0x1ec] ss:$24 sps:$4 sm:$0xff]   ;;  %v4153_v27 = vld [vmem:[%s4582_s11 + $0x1e8] ss:$24 sps:$4 sm:$0xff]   ;;  %v4158_v29 = vld [vmem:[%s4582_s11 + $0x21c] ss:$24 sps:$4 sm:$0xff]  }
  0x2d   : > { %3347 = vmatpush3.bf16.msra.mxu0 %v4076_v30  ;;  %v4156_v28 = vld [vmem:[%s4582_s11 + $0x214] ss:$24 sps:$4 sm:$0xff]   ;;  %v4160_v30 = vld [vmem:[%s4582_s11 + $0x210] ss:$24 sps:$4 sm:$0xff]  }
  0x2e   : > { %3459 = vmatpush3.bf16.msra.mxu1 %v4077_v31  ;;  %3556 = vmatprep.subr.bf16.mxu0 %v4084_v36  ;;  %v4161_v31 = vld [vmem:[%s4582_s11 + $0x218] ss:$24 sps:$4 sm:$0xff]   ;;  %v4164_v33 = vld [vmem:[%s4582_s11 + $0x24c] ss:$24 sps:$4 sm:$0xff]   ;;  %v4167_v35 = vld [vmem:[%s4582_s11 + $0x248] ss:$24 sps:$4 sm:$0xff]  }
  0x2f   : > { %v4170_v36 = vld [vmem:[%s4582_s11 + $0x274] ss:$24 sps:$4 sm:$0xff]  }
  0x30   : > { %1441 = vmatmul.mubr.bf16.vlgmr.msra.gmra.mrb[0].mxu0 %v4078_v32  ;;  %v4162_v32 = vld [vmem:[%s4582_s11 + $0x244] ss:$24 sps:$4 sm:$0xff]  }
  0x31   : > { %1602 = vmatmul.mubr.bf16.vlgmr.msra.gmra.mrb[0].mxu1 %v4081_v34  ;;  %3557 = vmatpush3.bf16.msra.mxu0 %v4085_v37  ;;  %v4166_v34 = vld [vmem:[%s4582_s11 + $0x240] ss:$24 sps:$4 sm:$0xff]   ;;  %v4172_v37 = vld [vmem:[%s4582_s11 + $0x27c] ss:$24 sps:$4 sm:$0xff]  }
  0x32   : > { %1448 = vmatprep.mubr.bf16.mxu0 %v4086_v38  ;;  %1609 = vmatprep.mubr.bf16.mxu1 %v4088_v39  ;;  %v4174_v38 = vld [vmem:[%s4582_s11 + $0x270] ss:$24 sps:$4 sm:$0xff]  }
  0x33   : > { %3558 = vmatprep.subr.bf16.mxu0 %v4098_v44  ;;  %v4175_v39 = vld [vmem:[%s4582_s11 + $0x278] ss:$24 sps:$4 sm:$0xff]   ;;  %v4184_v44 = vld [vmem:[%s4582_s11 + $0x2d4] ss:$24 sps:$4 sm:$0xff]  }
  0x35   : > { %3559 = vmatpush3.bf16.msra.mxu0 %v4099_v45  ;;  %v4186_v45 = vld [vmem:[%s4582_s11 + $0x2dc] ss:$24 sps:$4 sm:$0xff]  }
  0x36   : > { %3560 = vmatprep.subr.bf16.mxu0 %v4112_v50  ;;  %v4193_v50 = vld [vmem:[%s4582_s11 + $0x44] ss:$24 sps:$4 sm:$0xff]  }
  0x38   : > { %1449 = vmatmul.mubr.bf16.gmra.mrb[4].mxu0 %v4090_v40  ;;  %v4176_v40 = vld [vmem:[%s4582_s11 + $0x2a4] ss:$24 sps:$4 sm:$0xff]  }
  0x39   : > { %1610 = vmatmul.mubr.bf16.gmra.mrb[4].mxu1 %v4091_v41  ;;  %1456 = vmatprep.mubr.bf16.mxu0 %v4092_v42  ;;  %v4178_v41 = vld [vmem:[%s4582_s11 + $0x2ac] ss:$24 sps:$4 sm:$0xff]   ;;  %v4180_v42 = vld [vmem:[%s4582_s11 + $0x2a0] ss:$24 sps:$4 sm:$0xff]  }
  0x3a   : > { %1617 = vmatprep.mubr.bf16.mxu1 %v4094_v43  ;;  %3561 = vmatpush3.bf16.msra.mxu0 %v4113_v51  ;;  %v4181_v43 = vld [vmem:[%s4582_s11 + $0x2a8] ss:$24 sps:$4 sm:$0xff]  }
  0x3b   : > { %3562 = vmatprep.subr.bf16.mxu0 %v4126_v56  ;;  %v4195_v51 = vld [vmem:[%s4582_s11 + $0x40] ss:$24 sps:$4 sm:$0xff]   ;;  %v4202_v56 = vld [vmem:[%s4582_s11 + $0xd4] ss:$24 sps:$4 sm:$0xff]  }
  0x3e   : > { %3563 = vmatpush3.bf16.msra.mxu0 %v4127_v57  ;;  %v2022_v57 = vld [vmem:[%s5644_s3] sm:$0xff] }
  0x3f   : > { %3564 = vmatprep.subr.bf16.mxu0 %v4140_v61  ;;  %v4205_v61 = vld [vmem:[%s4582_s11 + $0x104] ss:$24 sps:$4 sm:$0xff]  }
  0x40   : > { %1457 = vmatmul.mubr.bf16.gmra.mrb[8].mxu0 %v4096_v46  ;;  %v4188_v46 = vld [vmem:[%s4582_s11 + $0x2d0] ss:$24 sps:$4 sm:$0xff]  }
  0x41   : > { %1618 = vmatmul.mubr.bf16.gmra.mrb[8].mxu1 %v4097_v47  ;;  %1464 = vmatprep.mubr.bf16.mxu0 %v4100_v48  ;;  %v4189_v47 = vld [vmem:[%s4582_s11 + $0x2d8] ss:$24 sps:$4 sm:$0xff]   ;;  %v4192_v48 = vld [vmem:[%s4582_s11 + $0x14] ss:$24 sps:$4 sm:$0xff]  }
  0x42   : > { %1625 = vmatprep.mubr.bf16.mxu1 %v4102_v49  ;;  %3565 = vmatpush3.bf16.msra.mxu0 %v4141_v62  ;;  %v4190_v49 = vld [vmem:[%s4582_s11 + $0x10] ss:$24 sps:$4 sm:$0xff]   ;;  %v4207_v62 = vld [vmem:[%s4582_s11 + $0x100] ss:$24 sps:$4 sm:$0xff]  }
  0x43   : > { %3566 = vmatprep.subr.bf16.mxu0 %v4154_v3  ;;  %v4210_v3 = vld [vmem:[%s4582_s11 + $0x130] ss:$24 sps:$4 sm:$0xff]  }
  0x46   : > { %3567 = vmatpush3.bf16.msra.mxu0 %v4155_v4  ;;  %v4211_v4 = vld [vmem:[%s4582_s11 + $0x164] ss:$24 sps:$4 sm:$0xff]  }
  0x47   : > { %3568 = vmatprep.subr.bf16.mxu0 %v4168_v8  ;;  %v2027_v8 = vld [vmem:[%s5644_s3 + $0x28] sm:$0xff] }
  0x48   : > { %1465 = vmatmul.mubr.bf16.gmra.mrb[12].mxu0 %v4104_v52  ;;  %v4196_v52 = vld [vmem:[%s4582_s11 + $0x74] ss:$24 sps:$4 sm:$0xff]  }
  0x49   : > { %1626 = vmatmul.mubr.bf16.gmra.mrb[12].mxu1 %v4105_v53  ;;  %1472 = vmatprep.mubr.bf16.mxu0 %v4106_v54  ;;  %v4198_v53 = vld [vmem:[%s4582_s11 + $0x70] ss:$24 sps:$4 sm:$0xff]   ;;  %v4199_v54 = vld [vmem:[%s4582_s11 + $0xa4] ss:$24 sps:$4 sm:$0xff]  }
  0x4a   : > { %1633 = vmatprep.mubr.bf16.mxu1 %v4108_v55  ;;  %3569 = vmatpush3.bf16.msra.mxu0 %v4169_v9  ;;  %v4201_v55 = vld [vmem:[%s4582_s11 + $0xa0] ss:$24 sps:$4 sm:$0xff]  }
  0x4b   : > { %3570 = vmatprep.subr.bf16.mxu0 %v4182_v13  ;;  %v4220_v13 = vld [vmem:[%s4582_s11 + $0x1f4] ss:$24 sps:$4 sm:$0xff]  }
  0x4e   : > { %3571 = vmatpush3.bf16.msra.mxu0 %v4183_v14  ;;  %v2028_v14 = vld [vmem:[%s5644_s3 + $0x30] sm:$0xff] }
  0x50   : > { %1473 = vmatmul.mubr.bf16.gmra.mrb[16].mxu0 %v4110_v58  ;;  %v2023_v58 = vld [vmem:[%s5644_s3 + $0x8] sm:$0xff] }
  0x51   : > { %1634 = vmatmul.mubr.bf16.gmra.mrb[16].mxu1 %v4111_v59  ;;  %1480 = vmatprep.mubr.bf16.mxu0 %v4114_v60  ;;  %v3924_v59 = vpack.c.bf16 %v2023_v58, %v2022_v57  ;;  %v4204_v60 = vld [vmem:[%s4582_s11 + $0xd0] ss:$24 sps:$4 sm:$0xff]  }
  0x52   : > { %1641 = vmatprep.mubr.bf16.mxu1 %v4116_v63  ;;  %v4208_v63 = vld [vmem:[%s4582_s11 + $0x134] ss:$24 sps:$4 sm:$0xff]  }
  0x53   : > { %3925 = vmatprep.subr.bf16.mxu1 %v3924_v59 }
  0x54   : > { %3927 = vmatpush3.bf16.msra.mxu1 %v3924_v59 }
  0x58   : > { %1481 = vmatmul.mubr.bf16.gmra.mrb[20].mxu0 %v4118_v0  ;;  %v2024_v0 = vld [vmem:[%s5644_s3 + $0x10] sm:$0xff] }
  0x59   : > { %1642 = vmatmul.mubr.bf16.gmra.mrb[20].mxu1 %v4119_v1  ;;  %1488 = vmatprep.mubr.bf16.mxu0 %v4120_v2  ;;  %v2025_v1 = vld [vmem:[%s5644_s3 + $0x18] sm:$0xff] }
  0x5a   : > { %1649 = vmatprep.mubr.bf16.mxu1 %v4122_v5  ;;  %v3928_v2 = vpack.c.bf16 %v2025_v1, %v2024_v0  ;;  %v4213_v5 = vld [vmem:[%s4582_s11 + $0x160] ss:$24 sps:$4 sm:$0xff]  }
  0x5c   : > { %3929 = vmatprep.subr.bf16.mxu1 %v3928_v2 }
  0x5d   : > { %3931 = vmatpush3.bf16.msra.mxu1 %v3928_v2  ;;  %v4231_v2 = vld [vmem:[%s4582_s11 + $0x280] ss:$24 sps:$4 sm:$0xff]  }
  0x60   : > { %1489 = vmatmul.mubr.bf16.gmra.mrb[24].mxu0 %v4124_v6  ;;  %v4214_v6 = vld [vmem:[%s4582_s11 + $0x194] ss:$24 sps:$4 sm:$0xff]  }
  0x61   : > { %1650 = vmatmul.mubr.bf16.gmra.mrb[24].mxu1 %v4125_v7  ;;  %1496 = vmatprep.mubr.bf16.mxu0 %v4128_v10  ;;  %v2026_v7 = vld [vmem:[%s5644_s3 + $0x20] sm:$0xff]  ;;  %v4216_v10 = vld [vmem:[%s4582_s11 + $0x190] ss:$24 sps:$4 sm:$0xff]  }
  0x62   : > { %1657 = vmatprep.mubr.bf16.mxu1 %v4130_v11  ;;  %v3932_v9 = vpack.c.bf16 %v2027_v8, %v2026_v7  ;;  %v4217_v11 = vld [vmem:[%s4582_s11 + $0x1c4] ss:$24 sps:$4 sm:$0xff]  }
  0x64   : > { %3933 = vmatprep.subr.bf16.mxu1 %v3932_v9 }
  0x65   : > { %3935 = vmatpush3.bf16.msra.mxu1 %v3932_v9 }
  0x68   : > { %1497 = vmatmul.mubr.bf16.gmra.mrb[28].mxu0 %v4132_v12  ;;  %v4219_v12 = vld [vmem:[%s4582_s11 + $0x1c0] ss:$24 sps:$4 sm:$0xff]  }
  0x69   : > { %1658 = vmatmul.mubr.bf16.gmra.mrb[28].mxu1 %v4133_v15  ;;  %1504 = vmatprep.mubr.bf16.mxu0 %v4134_v16  ;;  %v2029_v15 = vld [vmem:[%s5644_s3 + $0x38] sm:$0xff] }
  0x6a   : > { %1665 = vmatprep.mubr.bf16.mxu1 %v4136_v17  ;;  %v3936_v16 = vpack.c.bf16 %v2029_v15, %v2028_v14  ;;  %v2030_v17 = vld [vmem:[%s5644_s3 + $0x40] sm:$0xff] }
  0x6c   : > { %3937 = vmatprep.subr.bf16.mxu1 %v3936_v16 }
  0x6d   : > { %3939 = vmatpush3.bf16.msra.mxu1 %v3936_v16 }
  0x70   : > { %1505 = vmatmul.mubr.bf16.gmra.mrb[32].mxu0 %v4138_v18  ;;  %v2031_v18 = vld [vmem:[%s5644_s3 + $0x48] sm:$0xff] }
  0x71   : > { %1666 = vmatmul.mubr.bf16.gmra.mrb[32].mxu1 %v4139_v19  ;;  %1512 = vmatprep.mubr.bf16.mxu0 %v4142_v20  ;;  %v3940_v19 = vpack.c.bf16 %v2031_v18, %v2030_v17  ;;  %v4222_v20 = vld [vmem:[%s4582_s11 + $0x1f0] ss:$24 sps:$4 sm:$0xff]  }
  0x72   : > { %1673 = vmatprep.mubr.bf16.mxu1 %v4144_v21  ;;  %v4223_v21 = vld [vmem:[%s4582_s11 + $0x224] ss:$24 sps:$4 sm:$0xff]   ;;  %v4234_v18 = vld [vmem:[%s4582_s11 + $0x2b0] ss:$24 sps:$4 sm:$0xff]  }
  0x73   : > { %3941 = vmatprep.subr.bf16.mxu1 %v3940_v19 }
  0x74   : > { %3943 = vmatpush3.bf16.msra.mxu1 %v3940_v19 }
  0x78   : > { %1513 = vmatmul.mubr.bf16.gmra.mrb[36].mxu0 %v4146_v22  ;;  %v2032_v22 = vld [vmem:[%s5644_s3 + $0x50] sm:$0xff] }
  0x79   : > { %1674 = vmatmul.mubr.bf16.gmra.mrb[36].mxu1 %v4147_v23  ;;  %1520 = vmatprep.mubr.bf16.mxu0 %v4148_v24  ;;  %v2033_v23 = vld [vmem:[%s5644_s3 + $0x58] sm:$0xff] }
  0x7a   : > { %1681 = vmatprep.mubr.bf16.mxu1 %v4150_v25  ;;  %v3944_v24 = vpack.c.bf16 %v2033_v23, %v2032_v22  ;;  %v2034_v25 = vld [vmem:[%s5644_s3 + $0x60] sm:$0xff] }
  0x7b   : > { %v4235_v22 = vld [vmem:[%s4582_s11 + $0x2e4] ss:$24 sps:$4 sm:$0xff]  }
  0x7c   : > { %3945 = vmatprep.subr.bf16.mxu1 %v3944_v24 }
  0x7d   : > { %3947 = vmatpush3.bf16.msra.mxu1 %v3944_v24 }
  0x80   : > { %1521 = vmatmul.mubr.bf16.gmra.mrb[40].mxu0 %v4152_v26  ;;  %v2035_v26 = vld [vmem:[%s5644_s3 + $0x68] sm:$0xff] }
  0x81   : > { %1682 = vmatmul.mubr.bf16.gmra.mrb[40].mxu1 %v4153_v27  ;;  %1528 = vmatprep.mubr.bf16.mxu0 %v4156_v28  ;;  %v3948_v27 = vpack.c.bf16 %v2035_v26, %v2034_v25 }
  0x82   : > { %1689 = vmatprep.mubr.bf16.mxu1 %v4158_v29 }
  0x83   : > { %3949 = vmatprep.subr.bf16.mxu1 %v3948_v27 }
  0x84   : > { %3951 = vmatpush3.bf16.msra.mxu1 %v3948_v27 }
  0x88   : > { %1529 = vmatmul.mubr.bf16.gmra.mrb[44].mxu0 %v4160_v30 }
  0x89   : > { %1690 = vmatmul.mubr.bf16.gmra.mrb[44].mxu1 %v4161_v31  ;;  %1536 = vmatprep.mubr.bf16.mxu0 %v4162_v32  ;;  %v4225_v31 = vld [vmem:[%s4582_s11 + $0x220] ss:$24 sps:$4 sm:$0xff]  }
  0x8a   : > { %1697 = vmatprep.mubr.bf16.mxu1 %v4164_v33 }
  0x90   : > { %1537 = vmatmul.mubr.bf16.gmra.mrb[48].mxu0 %v4166_v34 }
  0x91   : > { %1698 = vmatmul.mubr.bf16.gmra.mrb[48].mxu1 %v4167_v35  ;;  %1544 = vmatprep.mubr.bf16.mxu0 %v4170_v36  ;;  %v4226_v35 = vld [vmem:[%s4582_s11 + $0x254] ss:$24 sps:$4 sm:$0xff]  }
  0x92   : > { %1705 = vmatprep.mubr.bf16.mxu1 %v4172_v37  ;;  %v2036_v36 = vld [vmem:[%s5644_s3 + $0x70] sm:$0xff]  ;;  %v2037_v37 = vld [vmem:[%s5644_s3 + $0x78] sm:$0xff] }
  0x98   : > { %1545 = vmatmul.mubr.bf16.gmra.mrb[52].mxu0 %v4174_v38 }
  0x99   : > { %1706 = vmatmul.mubr.bf16.gmra.mrb[52].mxu1 %v4175_v39  ;;  %1552 = vmatprep.mubr.bf16.mxu0 %v4176_v40 }
  0x9a   : > { %1713 = vmatprep.mubr.bf16.mxu1 %v4178_v41  ;;  %v3952_v41 = vpack.c.bf16 %v2037_v37, %v2036_v36 }
  0x9c   : > { %3953 = vmatprep.subr.bf16.mxu1 %v3952_v41 }
  0x9d   : > { %3955 = vmatpush3.bf16.msra.mxu1 %v3952_v41 }
  0xa0   : > { %1553 = vmatmul.mubr.bf16.gmra.mrb[56].mxu0 %v4180_v42 }
  0xa1   : > { %1714 = vmatmul.mubr.bf16.gmra.mrb[56].mxu1 %v4181_v43  ;;  %1560 = vmatprep.mubr.bf16.mxu0 %v4184_v44 }
  0xa2   : > { %1721 = vmatprep.mubr.bf16.mxu1 %v4186_v45 }
  0xa8   : > { %1561 = vmatmul.mubr.bf16.gmra.mrb[60].mxu0 %v4188_v46 }
  0xa9   : > { %1722 = vmatmul.mubr.bf16.gmra.mrb[60].mxu1 %v4189_v47  ;;  %1762 = vmatprep.mubr.bf16.mxu0 %v4192_v48 }
  0xb0   : > { %1763 = vmatmul.mubr.bf16.vlgmr.msra.gmra.mrb[64].mxu0 %v4190_v49 }
  0xb1   : > { %1770 = vmatprep.mubr.bf16.mxu0 %v4193_v50  ;;  %v4228_v50 = vld [vmem:[%s4582_s11 + $0x250] ss:$24 sps:$4 sm:$0xff]  }
  0xb8   : > { %1771 = vmatmul.mubr.bf16.gmra.mrb[68].mxu0 %v4195_v51 }
  0xb9   : > { %1778 = vmatprep.mubr.bf16.mxu0 %v4196_v52 }
  0xc0   : > { %1779 = vmatmul.mubr.bf16.gmra.mrb[72].mxu0 %v4198_v53 }
  0xc1   : > { %1786 = vmatprep.mubr.bf16.mxu0 %v4199_v54  ;;  %v4229_v54 = vld [vmem:[%s4582_s11 + $0x284] ss:$24 sps:$4 sm:$0xff]  }
  0xc8   : > { %1787 = vmatmul.mubr.bf16.gmra.mrb[76].mxu0 %v4201_v55 }
  0xc9   : > { %1794 = vmatprep.mubr.bf16.mxu0 %v4202_v56 }
  0xd0   : > { %1795 = vmatmul.mubr.bf16.gmra.mrb[80].mxu0 %v4204_v60 }
  0xd1   : > { %1802 = vmatprep.mubr.bf16.mxu0 %v4205_v61 }
  0xd8   : > { %1803 = vmatmul.mubr.bf16.gmra.mrb[84].mxu0 %v4207_v62 }
  0xd9   : > { %1810 = vmatprep.mubr.bf16.mxu0 %v4208_v63 }
  0xe0   : > { %1811 = vmatmul.mubr.bf16.gmra.mrb[88].mxu0 %v4210_v3 }
  0xe1   : > { %1818 = vmatprep.mubr.bf16.mxu0 %v4211_v4 }
  0xe8   : > { %1819 = vmatmul.mubr.bf16.gmra.mrb[92].mxu0 %v4213_v5 }
  0xe9   : > { %1826 = vmatprep.mubr.bf16.mxu0 %v4214_v6  ;;  %v4232_v6 = vld [vmem:[%s4582_s11 + $0x2b4] ss:$24 sps:$4 sm:$0xff]  }
  0xf0   : > { %1827 = vmatmul.mubr.bf16.gmra.mrb[96].mxu0 %v4216_v10 }
  0xf1   : > { %1834 = vmatprep.mubr.bf16.mxu0 %v4217_v11 }
  0xf8   : > { %1835 = vmatmul.mubr.bf16.gmra.mrb[100].mxu0 %v4219_v12 }
  0xf9   : > { %1842 = vmatprep.mubr.bf16.mxu0 %v4220_v13 }
 0x100   : > { %1843 = vmatmul.mubr.bf16.gmra.mrb[104].mxu0 %v4222_v20 }
 0x101   : > { %1850 = vmatprep.mubr.bf16.mxu0 %v4223_v21 }
 0x103   : > { %v3348_v28 = vpop.f32.mrb[0].mxu0 }
 0x104   : > { %v3460_v29 = vpop.f32.mrb[0].mxu1  ;;  %v3349_v30 = vpop.f32.mrb[1].mxu0 }
 0x105   : > { %v3350_v32 = vadd.f32 %v3349_v30, %v3348_v28  ;;  %v3461_v33 = vpop.f32.mrb[1].mxu1  ;;  %v3351_v34 = vpop.f32.mrb[2].mxu0 }
 0x106   : > { %v3462_v38 = vadd.f32 %v3461_v33, %v3460_v29  ;;  %v3463_v39 = vpop.f32.mrb[2].mxu1  ;;  %v3352_v40 = vpop.f32.mrb[3].mxu0 }
 0x107   : > { %v3353_v42 = vadd.f32 %v3352_v40, %v3351_v34  ;;  %v3464_v43 = vpop.f32.mrb[3].mxu1  ;;  %v4237_v34 = vld [vmem:[%s4582_s11 + $0x2e0] ss:$24 sps:$4 sm:$0xff]   ;;  %s3331_s11 = sshll.u32 %s4372_s30, 12  ;;  %s4382_s30 = smov [#allocation3]  }
 0x108   : > { %v4775_v44 = vadd.f32 %v3462_v38, %v3350_v32  ;;  %v3465_v45 = vadd.f32 %v3464_v43, %v3463_v39  ;;  %1851 = vmatmul.mubr.bf16.gmra.mrb[108].mxu0 %v4225_v31  ;;  %s5518_s14 = scalar_lea.hbm %s5648_s7, %s3331_s11  ;;  %s4306_s20 = sshll.u32 %s4382_s30, 4  ;;  %s4307_s20 = int_to_ptr.vmem [resolvable:$false] %s4306_s20 }
 0x109   : > { %1858 = vmatprep.mubr.bf16.mxu0 %v4226_v35  ;;  %p4309_p1 = scmp.lt.s32.totalorder %s5520_s23, %s4307_s20 }
 0x10a   : > { %v4777_v46 = vadd.f32 %v3465_v45, %v3353_v42 }
 0x10b   : > { %v3354_v47 = vpop.f32.mrb[4].mxu0 }
 0x10c   : > { %v3466_v48 = vpop.f32.mrb[4].mxu1  ;;  %v3355_v49 = vpop.f32.mrb[5].mxu0 }
 0x10d   : > { %v3356_v51 = vadd.f32 %v3355_v49, %v3354_v47  ;;  %v3467_v52 = vpop.f32.mrb[5].mxu1  ;;  %v3357_v53 = vpop.f32.mrb[6].mxu0 }
 0x10e   : > { %v3468_v55 = vadd.f32 %v3467_v52, %v3466_v48  ;;  %v3469_v56 = vpop.f32.mrb[6].mxu1  ;;  %v3358_v57 = vpop.f32.mrb[7].mxu0 }
 0x10f   : > { %v3359_v58 = vadd.f32 %v3358_v57, %v3357_v53  ;;  %v3470_v59 = vpop.f32.mrb[7].mxu1 }
 0x110   : > { %v4781_v60 = vadd.f32 %v3468_v55, %v3356_v51  ;;  %v3471_v61 = vadd.f32 %v3470_v59, %v3469_v56  ;;  %1859 = vmatmul.mubr.bf16.gmra.mrb[112].mxu0 %v4228_v50 }
 0x111   : > { %1866 = vmatprep.mubr.bf16.mxu0 %v4229_v54 }
 0x112   : > { %v4783_v62 = vadd.f32 %v3471_v61, %v3359_v58 }
 0x113   : > { %v3360_v63 = vpop.f32.mrb[8].mxu0 }
 0x114   : > { %v3472_v0 = vpop.f32.mrb[8].mxu1  ;;  %v3361_v1 = vpop.f32.mrb[9].mxu0 }
 0x115   : > { %v3362_v3 = vadd.f32 %v3361_v1, %v3360_v63  ;;  %v3473_v4 = vpop.f32.mrb[9].mxu1  ;;  %v3363_v5 = vpop.f32.mrb[10].mxu0 }
 0x116   : > { %v3474_v7 = vadd.f32 %v3473_v4, %v3472_v0  ;;  %v3475_v8 = vpop.f32.mrb[10].mxu1  ;;  %v3364_v9 = vpop.f32.mrb[11].mxu0 }
 0x117   : > { %v3365_v10 = vadd.f32 %v3364_v9, %v3363_v5  ;;  %v3476_v11 = vpop.f32.mrb[11].mxu1 }
 0x118   : > { %v4787_v12 = vadd.f32 %v3474_v7, %v3362_v3  ;;  %v3477_v13 = vadd.f32 %v3476_v11, %v3475_v8  ;;  %1867 = vmatmul.mubr.bf16.gmra.mrb[116].mxu0 %v4231_v2 }
 0x119   : > { %1874 = vmatprep.mubr.bf16.mxu0 %v4232_v6 }
 0x11a   : > { %v4789_v14 = vadd.f32 %v3477_v13, %v3365_v10 }
 0x11b   : > { %v3366_v15 = vpop.f32.mrb[12].mxu0 }
 0x11c   : > { %v3478_v16 = vpop.f32.mrb[12].mxu1  ;;  %v3367_v17 = vpop.f32.mrb[13].mxu0 }
 0x11d   : > { %v3368_v19 = vadd.f32 %v3367_v17, %v3366_v15  ;;  %v3479_v20 = vpop.f32.mrb[13].mxu1  ;;  %v3369_v21 = vpop.f32.mrb[14].mxu0 }
 0x11e   : > { %v3480_v23 = vadd.f32 %v3479_v20, %v3478_v16  ;;  %v3481_v24 = vpop.f32.mrb[14].mxu1  ;;  %v3370_v25 = vpop.f32.mrb[15].mxu0 }
 0x11f   : > { %v3371_v26 = vadd.f32 %v3370_v25, %v3369_v21  ;;  %v3482_v27 = vpop.f32.mrb[15].mxu1 }
 0x120   : > { %v4793_v28 = vadd.f32 %v3480_v23, %v3368_v19  ;;  %v3483_v29 = vadd.f32 %v3482_v27, %v3481_v24  ;;  %1875 = vmatmul.mubr.bf16.gmra.mrb[120].mxu0 %v4234_v18 }
 0x121   : > { %1882 = vmatprep.mubr.bf16.mxu0 %v4235_v22 }
 0x122   : > { %v4795_v30 = vadd.f32 %v3483_v29, %v3371_v26 }
 0x123   : > { %v3372_v31 = vpop.f32.mrb[16].mxu0 }
 0x124   : > { %v3484_v32 = vpop.f32.mrb[16].mxu1  ;;  %v3373_v33 = vpop.f32.mrb[17].mxu0 }
 0x125   : > { %v3374_v35 = vadd.f32 %v3373_v33, %v3372_v31  ;;  %v3485_v36 = vpop.f32.mrb[17].mxu1  ;;  %v3375_v37 = vpop.f32.mrb[18].mxu0 }
 0x126   : > { %v3486_v38 = vadd.f32 %v3485_v36, %v3484_v32  ;;  %v3487_v39 = vpop.f32.mrb[18].mxu1  ;;  %v3376_v40 = vpop.f32.mrb[19].mxu0 }
 0x127   : > { %v3377_v41 = vadd.f32 %v3376_v40, %v3375_v37  ;;  %v3488_v42 = vpop.f32.mrb[19].mxu1 }
 0x128   : > { %v4798_v43 = vadd.f32 %v3486_v38, %v3374_v35  ;;  %v3489_v45 = vadd.f32 %v3488_v42, %v3487_v39  ;;  %1883 = vmatmul.mubr.bf16.gmra.mrb[124].mxu0 %v4237_v34 }
 0x12a   : > { %v4800_v47 = vadd.f32 %v3489_v45, %v3377_v41 }
 0x12b   : > { %v3378_v48 = vpop.f32.mrb[20].mxu0 }
 0x12c   : > { %v3490_v49 = vpop.f32.mrb[20].mxu1  ;;  %v3379_v50 = vpop.f32.mrb[21].mxu0 }
 0x12d   : > { %v3380_v51 = vadd.f32 %v3379_v50, %v3378_v48  ;;  %v3491_v52 = vpop.f32.mrb[21].mxu1  ;;  %v3381_v53 = vpop.f32.mrb[22].mxu0  ;;  %v2399_v50 = vld [vmem:[%s5646_s5 + $0x8] sm:$0xff] }
 0x12e   : > { %v3492_v54 = vadd.f32 %v3491_v52, %v3490_v49  ;;  %v3493_v55 = vpop.f32.mrb[22].mxu1  ;;  %v3382_v56 = vpop.f32.mrb[23].mxu0  ;;  %v2398_v49 = vld [vmem:[%s5646_s5] sm:$0xff] }
 0x12f   : > { %v3383_v57 = vadd.f32 %v3382_v56, %v3381_v53  ;;  %v3494_v58 = vpop.f32.mrb[23].mxu1  ;;  %v4824_v52 = vpack.c.bf16 %v2399_v50, %v2398_v49 }
 0x130   : > { %v4802_v59 = vadd.f32 %v3492_v54, %v3380_v51  ;;  %v3495_v61 = vadd.f32 %v3494_v58, %v3493_v55 }
 0x131   : > { %3957 = vmatprep.subr.bf16.mxu1 %v4824_v52 }
 0x132   : > { %v4804_v63 = vadd.f32 %v3495_v61, %v3383_v57 }
 0x133   : > { %v3384_v0 = vpop.f32.mrb[24].mxu0 }
 0x134   : > { %v3496_v1 = vpop.f32.mrb[24].mxu1  ;;  %v3385_v2 = vpop.f32.mrb[25].mxu0 }
 0x135   : > { %v3386_v3 = vadd.f32 %v3385_v2, %v3384_v0  ;;  %v3497_v4 = vpop.f32.mrb[25].mxu1  ;;  %v3387_v5 = vpop.f32.mrb[26].mxu0 }
 0x136   : > { %v3498_v6 = vadd.f32 %v3497_v4, %v3496_v1  ;;  %v3499_v7 = vpop.f32.mrb[26].mxu1  ;;  %v3388_v8 = vpop.f32.mrb[27].mxu0 }
 0x137   : > { %v3389_v9 = vadd.f32 %v3388_v8, %v3387_v5  ;;  %v3500_v10 = vpop.f32.mrb[27].mxu1 }
 0x138   : > { %v4806_v11 = vadd.f32 %v3498_v6, %v3386_v3  ;;  %v3501_v13 = vadd.f32 %v3500_v10, %v3499_v7 }
 0x13a   : > { %v4808_v15 = vadd.f32 %v3501_v13, %v3389_v9 }
 0x13b   : > { %v3390_v16 = vpop.f32.mrb[28].mxu0 }
 0x13c   : > { %v3502_v17 = vpop.f32.mrb[28].mxu1  ;;  %v3391_v18 = vpop.f32.mrb[29].mxu0 }
 0x13d   : > { %v3392_v19 = vadd.f32 %v3391_v18, %v3390_v16  ;;  %v3503_v20 = vpop.f32.mrb[29].mxu1  ;;  %v3393_v21 = vpop.f32.mrb[30].mxu0 }
 0x13e   : > { %v3504_v22 = vadd.f32 %v3503_v20, %v3502_v17  ;;  %v3505_v23 = vpop.f32.mrb[30].mxu1  ;;  %v3394_v24 = vpop.f32.mrb[31].mxu0 }
 0x13f   : > { %v3395_v25 = vadd.f32 %v3394_v24, %v3393_v21  ;;  %v3506_v26 = vpop.f32.mrb[31].mxu1 }
 0x140   : > { %v4810_v27 = vadd.f32 %v3504_v22, %v3392_v19  ;;  %v3507_v29 = vadd.f32 %v3506_v26, %v3505_v23 }
 0x142   : > { %v4812_v31 = vadd.f32 %v3507_v29, %v3395_v25 }
 0x143   : > { %v3396_v32 = vpop.f32.mrb[32].mxu0 }
 0x144   : > { %v3508_v33 = vpop.f32.mrb[32].mxu1  ;;  %v3397_v34 = vpop.f32.mrb[33].mxu0 }
 0x145   : > { %v3398_v35 = vadd.f32 %v3397_v34, %v3396_v32  ;;  %v3509_v36 = vpop.f32.mrb[33].mxu1  ;;  %v3399_v37 = vpop.f32.mrb[34].mxu0 }
 0x146   : > { %v3510_v38 = vadd.f32 %v3509_v36, %v3508_v33  ;;  %v3511_v39 = vpop.f32.mrb[34].mxu1  ;;  %v3400_v40 = vpop.f32.mrb[35].mxu0 }
 0x147   : > { %v3401_v41 = vadd.f32 %v3400_v40, %v3399_v37  ;;  %v3512_v42 = vpop.f32.mrb[35].mxu1 }
 0x148   : > { %v4814_v45 = vadd.f32 %v3510_v38, %v3398_v35  ;;  %v3513_v48 = vadd.f32 %v3512_v42, %v3511_v39 }
 0x14a   : > { %v4822_v51 = vadd.f32 %v3513_v48, %v3401_v41 }
 0x14b   : > { %v3402_v53 = vpop.f32.mrb[36].mxu0 }
 0x14c   : > { %v3514_v54 = vpop.f32.mrb[36].mxu1  ;;  %v3403_v55 = vpop.f32.mrb[37].mxu0 }
 0x14d   : > { %v3404_v56 = vadd.f32 %v3403_v55, %v3402_v53  ;;  %v3515_v57 = vpop.f32.mrb[37].mxu1  ;;  %v3405_v58 = vpop.f32.mrb[38].mxu0 }
 0x14e   : > { %v3516_v61 = vadd.f32 %v3515_v57, %v3514_v54  ;;  %v3517_v0 = vpop.f32.mrb[38].mxu1  ;;  %v3406_v1 = vpop.f32.mrb[39].mxu0 }
 0x14f   : > { %v3407_v2 = vadd.f32 %v3406_v1, %v3405_v58  ;;  %v3518_v3 = vpop.f32.mrb[39].mxu1 }
 0x150   : > { %v4827_v4 = vadd.f32 %v3516_v61, %v3404_v56  ;;  %v3519_v5 = vadd.f32 %v3518_v3, %v3517_v0 }
 0x152   : > { %v4829_v6 = vadd.f32 %v3519_v5, %v3407_v2 }
 0x153   : > { %v3408_v7 = vpop.f32.mrb[40].mxu0 }
 0x154   : > { %v3520_v8 = vpop.f32.mrb[40].mxu1  ;;  %v3409_v9 = vpop.f32.mrb[41].mxu0 }
 0x155   : > { %v3410_v10 = vadd.f32 %v3409_v9, %v3408_v7  ;;  %v3521_v13 = vpop.f32.mrb[41].mxu1  ;;  %v3411_v16 = vpop.f32.mrb[42].mxu0 }
 0x156   : > { %v3522_v17 = vadd.f32 %v3521_v13, %v3520_v8  ;;  %v3523_v18 = vpop.f32.mrb[42].mxu1  ;;  %v3412_v19 = vpop.f32.mrb[43].mxu0 }
 0x157   : > { %v3413_v20 = vadd.f32 %v3412_v19, %v3411_v16  ;;  %v3524_v21 = vpop.f32.mrb[43].mxu1 }
 0x158   : > { %v4831_v22 = vadd.f32 %v3522_v17, %v3410_v10  ;;  %v3525_v23 = vadd.f32 %v3524_v21, %v3523_v18 }
 0x15a   : > { %v4833_v24 = vadd.f32 %v3525_v23, %v3413_v20 }
 0x15b   : > { %v3414_v25 = vpop.f32.mrb[44].mxu0 }
 0x15c   : > { %v3526_v26 = vpop.f32.mrb[44].mxu1  ;;  %v3415_v29 = vpop.f32.mrb[45].mxu0 }
 0x15d   : > { %v3416_v32 = vadd.f32 %v3415_v29, %v3414_v25  ;;  %v3527_v33 = vpop.f32.mrb[45].mxu1  ;;  %v3417_v34 = vpop.f32.mrb[46].mxu0 }
 0x15e   : > { %v3528_v35 = vadd.f32 %v3527_v33, %v3526_v26  ;;  %v3529_v36 = vpop.f32.mrb[46].mxu1  ;;  %v3418_v37 = vpop.f32.mrb[47].mxu0 }
 0x15f   : > { %v3419_v38 = vadd.f32 %v3418_v37, %v3417_v34  ;;  %v3530_v39 = vpop.f32.mrb[47].mxu1 }
 0x160   : > { %v4835_v40 = vadd.f32 %v3528_v35, %v3416_v32  ;;  %v3531_v41 = vadd.f32 %v3530_v39, %v3529_v36 }
 0x162   : > { %v4837_v42 = vadd.f32 %v3531_v41, %v3419_v38 }
 0x163   : > { %v3420_v48 = vpop.f32.mrb[48].mxu0 }
 0x164   : > { %v3532_v49 = vpop.f32.mrb[48].mxu1  ;;  %v3421_v50 = vpop.f32.mrb[49].mxu0 }
 0x165   : > { %v3422_v53 = vadd.f32 %v3421_v50, %v3420_v48  ;;  %v3533_v54 = vpop.f32.mrb[49].mxu1  ;;  %v3423_v55 = vpop.f32.mrb[50].mxu0 }
 0x166   : > { %v3534_v56 = vadd.f32 %v3533_v54, %v3532_v49  ;;  %v3535_v57 = vpop.f32.mrb[50].mxu1  ;;  %v3424_v58 = vpop.f32.mrb[51].mxu0 }
 0x167   : > { %v3425_v61 = vadd.f32 %v3424_v58, %v3423_v55  ;;  %v3536_v0 = vpop.f32.mrb[51].mxu1 }
 0x168   : > { %v4839_v1 = vadd.f32 %v3534_v56, %v3422_v53  ;;  %v3537_v2 = vadd.f32 %v3536_v0, %v3535_v57 }
 0x16a   : > { %v4841_v3 = vadd.f32 %v3537_v2, %v3425_v61 }
 0x16b   : > { %v3426_v5 = vpop.f32.mrb[52].mxu0 }
 0x16c   : > { %v3538_v7 = vpop.f32.mrb[52].mxu1  ;;  %v3427_v8 = vpop.f32.mrb[53].mxu0 }
 0x16d   : > { %v3428_v9 = vadd.f32 %v3427_v8, %v3426_v5  ;;  %v3539_v10 = vpop.f32.mrb[53].mxu1  ;;  %v3429_v13 = vpop.f32.mrb[54].mxu0 }
 0x16e   : > { %v3540_v16 = vadd.f32 %v3539_v10, %v3538_v7  ;;  %v3541_v17 = vpop.f32.mrb[54].mxu1  ;;  %v3430_v18 = vpop.f32.mrb[55].mxu0 }
 0x16f   : > { %v3431_v19 = vadd.f32 %v3430_v18, %v3429_v13  ;;  %v3542_v20 = vpop.f32.mrb[55].mxu1 }
 0x170   : > { %v4843_v21 = vadd.f32 %v3540_v16, %v3428_v9  ;;  %v3543_v23 = vadd.f32 %v3542_v20, %v3541_v17  ;;  %v2400_v20 = vld [vmem:[%s5646_s5 + $0x10] sm:$0xff] }
 0x172   : > { %v4845_v25 = vadd.f32 %v3543_v23, %v3431_v19  ;;  %v2401_v23 = vld [vmem:[%s5646_s5 + $0x18] sm:$0xff] }
 0x173   : > { %v3432_v26 = vpop.f32.mrb[56].mxu0 }
 0x174   : > { %v3544_v29 = vpop.f32.mrb[56].mxu1  ;;  %v3433_v32 = vpop.f32.mrb[57].mxu0 }
 0x175   : > { %v3434_v33 = vadd.f32 %v3433_v32, %v3432_v26  ;;  %v3545_v34 = vpop.f32.mrb[57].mxu1  ;;  %v3435_v35 = vpop.f32.mrb[58].mxu0 }
 0x176   : > { %v3546_v36 = vadd.f32 %v3545_v34, %v3544_v29  ;;  %v3547_v37 = vpop.f32.mrb[58].mxu1  ;;  %v3436_v38 = vpop.f32.mrb[59].mxu0  ;;  %v2402_v34 = vld [vmem:[%s5646_s5 + $0x20] sm:$0xff] }
 0x177   : > { %v3437_v39 = vadd.f32 %v3436_v38, %v3435_v35  ;;  %v3548_v41 = vpop.f32.mrb[59].mxu1  ;;  %v2403_v35 = vld [vmem:[%s5646_s5 + $0x28] sm:$0xff] }
 0x178   : > { %v4847_v48 = vadd.f32 %v3546_v36, %v3434_v33  ;;  %v3549_v49 = vadd.f32 %v3548_v41, %v3547_v37  ;;  %v3960_v33 = vpack.c.bf16 %v2401_v23, %v2400_v20  ;;  %v3964_v38 = vpack.c.bf16 %v2403_v35, %v2402_v34  ;;  %v2404_v41 = vld [vmem:[%s5646_s5 + $0x30] sm:$0xff]  ;;  %v2413_v35 = vld [vmem:[%s5646_s5 + $0x78] sm:$0xff] }
 0x179   : > { %v2412_v34 = vld [vmem:[%s5646_s5 + $0x70] sm:$0xff] }
 0x17a   : > { %v4849_v50 = vadd.f32 %v3549_v49, %v3437_v39  ;;  %v2405_v49 = vld [vmem:[%s5646_s5 + $0x38] sm:$0xff] }
 0x17b   : > { %v3438_v53 = vpop.f32.mrb[60].mxu0 }
 0x17c   : > { %v3550_v54 = vpop.f32.mrb[60].mxu1  ;;  %v3439_v55 = vpop.f32.mrb[61].mxu0 }
 0x17d   : > { %v3440_v56 = vadd.f32 %v3439_v55, %v3438_v53  ;;  %v3551_v57 = vpop.f32.mrb[61].mxu1  ;;  %v3441_v58 = vpop.f32.mrb[62].mxu0  ;;  %v3968_v55 = vpack.c.bf16 %v2405_v49, %v2404_v41 }
 0x17e   : > { %v3552_v61 = vadd.f32 %v3551_v57, %v3550_v54  ;;  %v3553_v0 = vpop.f32.mrb[62].mxu1  ;;  %v3442_v2 = vpop.f32.mrb[63].mxu0  ;;  %v2407_v57 = vld [vmem:[%s5646_s5 + $0x48] sm:$0xff] }
 0x17f   : > { %v3443_v5 = vadd.f32 %v3442_v2, %v3441_v58  ;;  %v3554_v7 = vpop.f32.mrb[63].mxu1 }
 0x180   : > { %v4851_v8 = vadd.f32 %v3552_v61, %v3440_v56  ;;  %v3555_v9 = vadd.f32 %v3554_v7, %v3553_v0  ;;  %v2406_v56 = vld [vmem:[%s5646_s5 + $0x40] sm:$0xff]  ;;  %v2409_v7 = vld [vmem:[%s5646_s5 + $0x58] sm:$0xff] }
 0x181   : > { %v3972_v0 = vpack.c.bf16 %v2407_v57, %v2406_v56 }
 0x182   : > { %v4853_v10 = vadd.f32 %v3555_v9, %v3443_v5  ;;  %v2408_v5 = vld [vmem:[%s5646_s5 + $0x50] sm:$0xff] }
 0x183   : > { %v3572_v13 = vpop.f32.mrb[64].mxu0 }
 0x184   : > { %v3573_v16 = vpop.f32.mrb[65].mxu0 }
 0x185   : > { %v3574_v17 = vadd.f32 %v3573_v16, %v3572_v13  ;;  %v3575_v18 = vpop.f32.mrb[66].mxu0 }
 0x186   : > { %v3576_v19 = vpop.f32.mrb[67].mxu0 }
 0x187   : > { %v4862_v26 = vadd.f32 %v3574_v17, %v4775_v44  ;;  %v3577_v29 = vadd.f32 %v3576_v19, %v3575_v18  ;;  %v3976_v17 = vpack.c.bf16 %v2409_v7, %v2408_v5  ;;  %v2410_v18 = vld [vmem:[%s5646_s5 + $0x60] sm:$0xff]  ;;  %v2411_v19 = vld [vmem:[%s5646_s5 + $0x68] sm:$0xff] }
 0x189   : > { %v4865_v32 = vadd.f32 %v3577_v29, %v4777_v46  ;;  %3796 = vmatprep.mubr.f32.mxu1 %v4862_v26  ;;  %v3980_v29 = vpack.c.bf16 %v2411_v19, %v2410_v18 }
 0x18b   : > { %v3578_v36 = vpop.f32.mrb[68].mxu0  ;;  %3797 = vmatmul.mubr.f32.vlgmr.msra.gmra.mrb[64].mxu1 %v4865_v32 }
 0x18c   : > { %v3579_v44 = vpop.f32.mrb[69].mxu0  ;;  %3959 = vmatpush3.bf16.msra.mxu1 %v4824_v52 }
 0x18d   : > { %v3580_v37 = vadd.f32 %v3579_v44, %v3578_v36  ;;  %v3581_v46 = vpop.f32.mrb[70].mxu0  ;;  %3961 = vmatprep.subr.bf16.mxu1 %v3960_v33 }
 0x18e   : > { %v3582_v39 = vpop.f32.mrb[71].mxu0 }
 0x18f   : > { %v4883_v53 = vadd.f32 %v3580_v37, %v4781_v60  ;;  %v3583_v54 = vadd.f32 %v3582_v39, %v3581_v46  ;;  %v3984_v46 = vpack.c.bf16 %v2413_v35, %v2412_v34 }
 0x190   : > { %3963 = vmatpush3.bf16.msra.mxu1 %v3960_v33 }
 0x191   : > { %v4886_v52 = vadd.f32 %v3583_v54, %v4783_v62  ;;  %3799 = vmatprep.mubr.f32.mxu1 %v4883_v53  ;;  %3965 = vmatprep.subr.bf16.mxu1 %v3964_v38 }
 0x193   : > { %v3584_v58 = vpop.f32.mrb[72].mxu0  ;;  %3800 = vmatmul.mubr.f32.gmra.mrb[66].mxu1 %v4886_v52 }
 0x194   : > { %v3585_v60 = vpop.f32.mrb[73].mxu0  ;;  %3967 = vmatpush3.bf16.msra.mxu1 %v3964_v38 }
 0x195   : > { %v3586_v61 = vadd.f32 %v3585_v60, %v3584_v58  ;;  %v3587_v62 = vpop.f32.mrb[74].mxu0  ;;  %3969 = vmatprep.subr.bf16.mxu1 %v3968_v55 }
 0x196   : > { %v3588_v2 = vpop.f32.mrb[75].mxu0 }
 0x197   : > { %v4903_v9 = vadd.f32 %v3586_v61, %v4787_v12  ;;  %v3589_v13 = vadd.f32 %v3588_v2, %v3587_v62 }
 0x198   : > { %3971 = vmatpush3.bf16.msra.mxu1 %v3968_v55 }
 0x199   : > { %v4906_v16 = vadd.f32 %v3589_v13, %v4789_v14  ;;  %3802 = vmatprep.mubr.f32.mxu1 %v4903_v9  ;;  %3973 = vmatprep.subr.bf16.mxu1 %v3972_v0 }
 0x19b   : > { %v3590_v20 = vpop.f32.mrb[76].mxu0  ;;  %3803 = vmatmul.mubr.f32.gmra.mrb[68].mxu1 %v4906_v16 }
 0x19c   : > { %v3591_v12 = vpop.f32.mrb[77].mxu0  ;;  %3975 = vmatpush3.bf16.msra.mxu1 %v3972_v0 }
 0x19d   : > { %v3592_v23 = vadd.f32 %v3591_v12, %v3590_v20  ;;  %v3593_v14 = vpop.f32.mrb[78].mxu0  ;;  %3977 = vmatprep.subr.bf16.mxu1 %v3976_v17 }
 0x19e   : > { %v3594_v33 = vpop.f32.mrb[79].mxu0 }
 0x19f   : > { %v4923_v36 = vadd.f32 %v3592_v23, %v4793_v28  ;;  %v3595_v44 = vadd.f32 %v3594_v33, %v3593_v14 }
 0x1a0   : > { %3979 = vmatpush3.bf16.msra.mxu1 %v3976_v17 }
 0x1a1   : > { %v4926_v37 = vadd.f32 %v3595_v44, %v4795_v30  ;;  %3805 = vmatprep.mubr.f32.mxu1 %v4923_v36  ;;  %3981 = vmatprep.subr.bf16.mxu1 %v3980_v29 }
 0x1a3   : > { %v3596_v38 = vpop.f32.mrb[80].mxu0  ;;  %3806 = vmatmul.mubr.f32.gmra.mrb[70].mxu1 %v4926_v37 }
 0x1a4   : > { %v3597_v39 = vpop.f32.mrb[81].mxu0  ;;  %3983 = vmatpush3.bf16.msra.mxu1 %v3980_v29 }
 0x1a5   : > { %v3598_v41 = vadd.f32 %v3597_v39, %v3596_v38  ;;  %v3599_v49 = vpop.f32.mrb[82].mxu0  ;;  %3985 = vmatprep.subr.bf16.mxu1 %v3984_v46 }
 0x1a6   : > { %v3600_v54 = vpop.f32.mrb[83].mxu0 }
 0x1a7   : > { %v4931_v28 = vadd.f32 %v3598_v41, %v4798_v43  ;;  %v3601_v55 = vadd.f32 %v3600_v54, %v3599_v49 }
 0x1a8   : > { %3987 = vmatpush3.bf16.msra.mxu1 %v3984_v46 }
 0x1a9   : > { %v4934_v30 = vadd.f32 %v3601_v55, %v4800_v47  ;;  %3808 = vmatprep.mubr.f32.mxu1 %v4931_v28 }
 0x1ab   : > { %v3602_v56 = vpop.f32.mrb[84].mxu0  ;;  %3809 = vmatmul.mubr.f32.gmra.mrb[72].mxu1 %v4934_v30 }
 0x1ac   : > { %v3603_v57 = vpop.f32.mrb[85].mxu0 }
 0x1ad   : > { %v3604_v58 = vadd.f32 %v3603_v57, %v3602_v56  ;;  %v3605_v60 = vpop.f32.mrb[86].mxu0 }
 0x1ae   : > { %v3606_v61 = vpop.f32.mrb[87].mxu0 }
 0x1af   : > { %v4939_v62 = vadd.f32 %v3604_v58, %v4802_v59  ;;  %v3607_v0 = vadd.f32 %v3606_v61, %v3605_v60 }
 0x1b1   : > { %v4942_v43 = vadd.f32 %v3607_v0, %v4804_v63  ;;  %3811 = vmatprep.mubr.f32.mxu1 %v4939_v62 }
 0x1b3   : > { %v3608_v47 = vpop.f32.mrb[88].mxu0  ;;  %3812 = vmatmul.mubr.f32.gmra.mrb[74].mxu1 %v4942_v43 }
 0x1b4   : > { %v3609_v2 = vpop.f32.mrb[89].mxu0 }
 0x1b5   : > { %v3610_v5 = vadd.f32 %v3609_v2, %v3608_v47  ;;  %v3611_v7 = vpop.f32.mrb[90].mxu0 }
 0x1b6   : > { %v3612_v13 = vpop.f32.mrb[91].mxu0 }
 0x1b7   : > { %v4947_v17 = vadd.f32 %v3610_v5, %v4806_v11  ;;  %v3613_v18 = vadd.f32 %v3612_v13, %v3611_v7 }
 0x1b9   : > { %v4950_v59 = vadd.f32 %v3613_v18, %v4808_v15  ;;  %3814 = vmatprep.mubr.f32.mxu1 %v4947_v17 }
 0x1bb   : > { %v3614_v63 = vpop.f32.mrb[92].mxu0  ;;  %3815 = vmatmul.mubr.f32.gmra.mrb[76].mxu1 %v4950_v59 }
 0x1bc   : > { %v3615_v19 = vpop.f32.mrb[93].mxu0 }
 0x1bd   : > { %v3616_v20 = vadd.f32 %v3615_v19, %v3614_v63  ;;  %v3617_v12 = vpop.f32.mrb[94].mxu0 }
 0x1be   : > { %v3618_v23 = vpop.f32.mrb[95].mxu0 }
 0x1bf   : > { %v4955_v14 = vadd.f32 %v3616_v20, %v4810_v27  ;;  %v3619_v29 = vadd.f32 %v3618_v23, %v3617_v12 }
 0x1c1   : > { %v4958_v11 = vadd.f32 %v3619_v29, %v4812_v31  ;;  %3817 = vmatprep.mubr.f32.mxu1 %v4955_v14 }
 0x1c3   : > { %v3620_v15 = vpop.f32.mrb[96].mxu0  ;;  %3818 = vmatmul.mubr.f32.gmra.mrb[78].mxu1 %v4958_v11 }
 0x1c4   : > { %v3621_v33 = vpop.f32.mrb[97].mxu0 }
 0x1c5   : > { %v3622_v34 = vadd.f32 %v3621_v33, %v3620_v15  ;;  %v3623_v35 = vpop.f32.mrb[98].mxu0 }
 0x1c6   : > { %v3624_v44 = vpop.f32.mrb[99].mxu0 }
 0x1c7   : > { %v4963_v46 = vadd.f32 %v3622_v34, %v4814_v45  ;;  %v3625_v38 = vadd.f32 %v3624_v44, %v3623_v35 }
 0x1c9   : > { %v4966_v27 = vadd.f32 %v3625_v38, %v4822_v51  ;;  %3820 = vmatprep.mubr.f32.mxu1 %v4963_v46 }
 0x1cb   : > { %v3626_v31 = vpop.f32.mrb[100].mxu0  ;;  %3821 = vmatmul.mubr.f32.gmra.mrb[80].mxu1 %v4966_v27 }
 0x1cc   : > { %v3627_v39 = vpop.f32.mrb[101].mxu0 }
 0x1cd   : > { %v3628_v41 = vadd.f32 %v3627_v39, %v3626_v31  ;;  %v3629_v49 = vpop.f32.mrb[102].mxu0 }
 0x1ce   : > { %v3630_v54 = vpop.f32.mrb[103].mxu0 }
 0x1cf   : > { %v4971_v55 = vadd.f32 %v3628_v41, %v4827_v4  ;;  %v3631_v56 = vadd.f32 %v3630_v54, %v3629_v49 }
 0x1d1   : > { %v4974_v45 = vadd.f32 %v3631_v56, %v4829_v6  ;;  %3823 = vmatprep.mubr.f32.mxu1 %v4971_v55 }
 0x1d3   : > { %v3632_v51 = vpop.f32.mrb[104].mxu0  ;;  %3824 = vmatmul.mubr.f32.gmra.mrb[82].mxu1 %v4974_v45 }
 0x1d4   : > { %v3633_v57 = vpop.f32.mrb[105].mxu0 }
 0x1d5   : > { %v3634_v58 = vadd.f32 %v3633_v57, %v3632_v51  ;;  %v3635_v60 = vpop.f32.mrb[106].mxu0 }
 0x1d6   : > { %v3636_v61 = vpop.f32.mrb[107].mxu0 }
 0x1d7   : > { %v4979_v0 = vadd.f32 %v3634_v58, %v4831_v22  ;;  %v3637_v47 = vadd.f32 %v3636_v61, %v3635_v60 }
 0x1d9   : > { %v4982_v4 = vadd.f32 %v3637_v47, %v4833_v24  ;;  %3826 = vmatprep.mubr.f32.mxu1 %v4979_v0  ;;  %v1990_v47 = vld [vmem:[%s5024_s24] sm:$0xff] }
 0x1db   : > { %v3638_v6 = vpop.f32.mrb[108].mxu0  ;;  %3827 = vmatmul.mubr.f32.gmra.mrb[84].mxu1 %v4982_v4 }
 0x1dc   : > { %v3639_v2 = vpop.f32.mrb[109].mxu0 }
 0x1dd   : > { %v3640_v5 = vadd.f32 %v3639_v2, %v3638_v6  ;;  %v3641_v7 = vpop.f32.mrb[110].mxu0  ;;  %v1991_v2 = vld [vmem:[%s5024_s24 + $0x8] sm:$0xff] }
 0x1de   : > { %v3642_v13 = vpop.f32.mrb[111].mxu0 }
 0x1df   : > { %v4987_v18 = vadd.f32 %v3640_v5, %v4835_v40  ;;  %v3643_v63 = vadd.f32 %v3642_v13, %v3641_v7  ;;  %v2366_v5 = vmul.f32 %v1990_v47, %v4862_v26  ;;  %v1992_v7 = vld [vmem:[%s5024_s24 + $0x10] sm:$0xff]  ;;  %v2018_v47 = vld [vmem:[%s5024_s24 + $0xe0] sm:$0xff] }
 0x1e0   : > { %v2368_v13 = vmul.f32 %v1992_v7, %v4883_v53 }
 0x1e1   : > { %v4990_v22 = vadd.f32 %v3643_v63, %v4837_v42  ;;  %3829 = vmatprep.mubr.f32.mxu1 %v4987_v18  ;;  %v1993_v63 = vld [vmem:[%s5024_s24 + $0x18] sm:$0xff] }
 0x1e3   : > { %v3644_v24 = vpop.f32.mrb[112].mxu0  ;;  %3830 = vmatmul.mubr.f32.gmra.mrb[86].mxu1 %v4990_v22 }
 0x1e4   : > { %v3645_v19 = vpop.f32.mrb[113].mxu0 }
 0x1e5   : > { %v3646_v20 = vadd.f32 %v3645_v19, %v3644_v24  ;;  %v3647_v12 = vpop.f32.mrb[114].mxu0  ;;  %v2369_v24 = vmul.f32 %v1993_v63, %v4886_v52  ;;  %v1995_v19 = vld [vmem:[%s5024_s24 + $0x28] sm:$0xff] }
 0x1e6   : > { %v3648_v23 = vpop.f32.mrb[115].mxu0 }
 0x1e7   : > { %v4995_v29 = vadd.f32 %v3646_v20, %v4839_v1  ;;  %v3649_v15 = vadd.f32 %v3648_v23, %v3647_v12  ;;  %v1996_v20 = vld [vmem:[%s5024_s24 + $0x30] sm:$0xff]  ;;  %v1997_v12 = vld [vmem:[%s5024_s24 + $0x38] sm:$0xff]  ;;  %v1998_v23 = vld [vmem:[%s5024_s24 + $0x40] sm:$0xff] }
 0x1e8   : > { %v2372_v53 = vmul.f32 %v1996_v20, %v4923_v36  ;;  %v2373_v52 = vmul.f32 %v1997_v12, %v4926_v37 }
 0x1e9   : > { %v4998_v40 = vadd.f32 %v3649_v15, %v4841_v3  ;;  %3832 = vmatprep.mubr.f32.mxu1 %v4995_v29  ;;  %v1999_v15 = vld [vmem:[%s5024_s24 + $0x48] sm:$0xff] }
 0x1eb   : > { %v3650_v42 = vpop.f32.mrb[116].mxu0  ;;  %3833 = vmatmul.mubr.f32.gmra.mrb[88].mxu1 %v4998_v40 }
 0x1ec   : > { %v3651_v33 = vpop.f32.mrb[117].mxu0 }
 0x1ed   : > { %v3652_v34 = vadd.f32 %v3651_v33, %v3650_v42  ;;  %v3653_v35 = vpop.f32.mrb[118].mxu0  ;;  %v2000_v42 = vld [vmem:[%s5024_s24 + $0x50] sm:$0xff]  ;;  %v2001_v33 = vld [vmem:[%s5024_s24 + $0x58] sm:$0xff] }
 0x1ee   : > { %v3654_v44 = vpop.f32.mrb[119].mxu0  ;;  %v2376_v36 = vmul.f32 %v2000_v42, %v4939_v62  ;;  %v2377_v37 = vmul.f32 %v2001_v33, %v4942_v43 }
 0x1ef   : > { %v5003_v38 = vadd.f32 %v3652_v34, %v4843_v21  ;;  %v3655_v31 = vadd.f32 %v3654_v44, %v3653_v35  ;;  %v2002_v34 = vld [vmem:[%s5024_s24 + $0x60] sm:$0xff]  ;;  %v2003_v35 = vld [vmem:[%s5024_s24 + $0x68] sm:$0xff]  ;;  %v2004_v44 = vld [vmem:[%s5024_s24 + $0x70] sm:$0xff] }
 0x1f0   : > { %v2380_v62 = vmul.f32 %v2004_v44, %v4955_v14 }
 0x1f1   : > { %v5006_v1 = vadd.f32 %v3655_v31, %v4845_v25  ;;  %3835 = vmatprep.mubr.f32.mxu1 %v5003_v38  ;;  %v2005_v31 = vld [vmem:[%s5024_s24 + $0x78] sm:$0xff] }
 0x1f2   : > { %v2381_v43 = vmul.f32 %v2005_v31, %v4958_v11 }
 0x1f3   : > { %v3656_v3 = vpop.f32.mrb[120].mxu0  ;;  %3836 = vmatmul.mubr.f32.gmra.mrb[90].mxu1 %v5006_v1 }
 0x1f4   : > { %v3657_v39 = vpop.f32.mrb[121].mxu0 }
 0x1f5   : > { %v3658_v41 = vadd.f32 %v3657_v39, %v3656_v3  ;;  %v3659_v49 = vpop.f32.mrb[122].mxu0  ;;  %v2006_v3 = vld [vmem:[%s5024_s24 + $0x80] sm:$0xff]  ;;  %v2007_v39 = vld [vmem:[%s5024_s24 + $0x88] sm:$0xff] }
 0x1f6   : > { %v3660_v54 = vpop.f32.mrb[123].mxu0 }
 0x1f7   : > { %v5011_v56 = vadd.f32 %v3658_v41, %v4847_v48  ;;  %v3661_v51 = vadd.f32 %v3660_v54, %v3659_v49  ;;  %v2008_v41 = vld [vmem:[%s5024_s24 + $0x90] sm:$0xff]  ;;  %v2009_v49 = vld [vmem:[%s5024_s24 + $0x98] sm:$0xff]  ;;  %v2010_v54 = vld [vmem:[%s5024_s24 + $0xa0] sm:$0xff] }
 0x1f8   : > { %v2384_v14 = vmul.f32 %v2008_v41, %v4971_v55  ;;  %v2385_v11 = vmul.f32 %v2009_v49, %v4974_v45 }
 0x1f9   : > { %v5015_v21 = vadd.f32 %v3661_v51, %v4849_v50  ;;  %3838 = vmatprep.mubr.f32.mxu1 %v5011_v56  ;;  %v2011_v51 = vld [vmem:[%s5024_s24 + $0xa8] sm:$0xff] }
 0x1fb   : > { %v3662_v25 = vpop.f32.mrb[124].mxu0  ;;  %3839 = vmatmul.mubr.f32.gmra.mrb[92].mxu1 %v5015_v21 }
 0x1fc   : > { %v3663_v48 = vpop.f32.mrb[125].mxu0 }
 0x1fd   : > { %v3664_v57 = vadd.f32 %v3663_v48, %v3662_v25  ;;  %v3665_v58 = vpop.f32.mrb[126].mxu0  ;;  %v2012_v25 = vld [vmem:[%s5024_s24 + $0xb0] sm:$0xff]  ;;  %v2013_v48 = vld [vmem:[%s5024_s24 + $0xb8] sm:$0xff] }
 0x1fe   : > { %v3666_v50 = vpop.f32.mrb[127].mxu0  ;;  %v2388_v55 = vmul.f32 %v2012_v25, %v4987_v18  ;;  %v2389_v45 = vmul.f32 %v2013_v48, %v4990_v22  ;;  %v2017_v18 = vld [vmem:[%s5024_s24 + $0xd8] sm:$0xff]  ;;  %v2394_v22 = vmul.f32 %v2018_v47, %v5011_v56 }
 0x1ff   : > { %v5027_v60 = vadd.f32 %v3664_v57, %v4851_v8  ;;  %v3667_v61 = vadd.f32 %v3666_v50, %v3665_v58  ;;  %v2367_v8 = vmul.f32 %v1991_v2, %v4865_v32  ;;  %v2371_v32 = vmul.f32 %v1995_v19, %v4906_v16  ;;  %v2014_v57 = vld [vmem:[%s5024_s24 + $0xc0] sm:$0xff]  ;;  %v2015_v58 = vld [vmem:[%s5024_s24 + $0xc8] sm:$0xff]  ;;  %v2016_v50 = vld [vmem:[%s5024_s24 + $0xd0] sm:$0xff] }
 0x200   : > { %v2375_v16 = vmul.f32 %v1999_v15, %v4934_v30  ;;  %v2379_v30 = vmul.f32 %v2003_v35, %v4950_v59  ;;  %v2383_v59 = vmul.f32 %v2007_v39, %v4966_v27  ;;  %v2387_v27 = vmul.f32 %v2011_v51, %v4982_v4  ;;  %v5121_v35 = vld [vmem:[%s5645_s4] ss:$0 sm:$0xff] }
 0x201   : > { %v5031_v6 = vadd.f32 %v3667_v61, %v4853_v10  ;;  %3841 = vmatprep.mubr.f32.mxu1 %v5027_v60  ;;  %v1994_v10 = vld [vmem:[%s5024_s24 + $0x20] sm:$0xff]  ;;  %v2391_v4 = vmul.f32 %v2015_v58, %v4998_v40  ;;  %v2392_v61 = vmul.f32 %v2016_v50, %v5003_v38  ;;  %v2393_v2 = vmul.f32 %v2017_v18, %v5006_v1 }
 0x202   : > { %v2370_v26 = vmul.f32 %v1994_v10, %v4903_v9  ;;  %v2374_v9 = vmul.f32 %v1998_v23, %v4931_v28  ;;  %v2378_v28 = vmul.f32 %v2002_v34, %v4947_v17  ;;  %v2382_v17 = vmul.f32 %v2006_v3, %v4963_v46 }
 0x203   : > { %3842 = vmatmul.mubr.f32.gmra.mrb[94].mxu1 %v5031_v6  ;;  %v2386_v46 = vmul.f32 %v2010_v54, %v4979_v0  ;;  %v2390_v0 = vmul.f32 %v2014_v57, %v4995_v29  ;;  %v2020_v29 = vld [vmem:[%s5024_s24 + $0xf0] sm:$0xff] }
 0x204   : > { %3876 = vmatprep.mubr.f32.mxu1 %v2366_v5  ;;  %v2019_v5 = vld [vmem:[%s5024_s24 + $0xe8] sm:$0xff] }
 0x205   : > { %v2395_v7 = vmul.f32 %v2019_v5, %v5015_v21 }
 0x207   : > { %3877 = vmatmul.mubr.f32.vlgmr.msra.gmra.mrb[96].mxu1 %v2367_v8  ;;  %v2396_v8 = vmul.f32 %v2020_v29, %v5027_v60 }
 0x208   : > { %3879 = vmatprep.mubr.f32.mxu1 %v2368_v13  ;;  %v2021_v13 = vld [vmem:[%s5024_s24 + $0xf8] sm:$0xff] }
 0x209   : > { %v2397_v40 = vmul.f32 %v2021_v13, %v5031_v6 }
 0x20b   : > { %3880 = vmatmul.mubr.f32.gmra.mrb[98].mxu1 %v2369_v24 }
 0x20c   : > { %3882 = vmatprep.mubr.f32.mxu1 %v2370_v26 }
 0x20f   : > { %3883 = vmatmul.mubr.f32.gmra.mrb[100].mxu1 %v2371_v32 }
 0x210   : > { %3885 = vmatprep.mubr.f32.mxu1 %v2372_v53 }
 0x213   : > { %3886 = vmatmul.mubr.f32.gmra.mrb[102].mxu1 %v2373_v52 }
 0x214   : > { %3888 = vmatprep.mubr.f32.mxu1 %v2374_v9 }
 0x217   : > { %3889 = vmatmul.mubr.f32.gmra.mrb[104].mxu1 %v2375_v16 }
 0x218   : > { %3891 = vmatprep.mubr.f32.mxu1 %v2376_v36 }
 0x21b   : > { %3892 = vmatmul.mubr.f32.gmra.mrb[106].mxu1 %v2377_v37 }
 0x21c   : > { %3894 = vmatprep.mubr.f32.mxu1 %v2378_v28 }
 0x21f   : > { %3895 = vmatmul.mubr.f32.gmra.mrb[108].mxu1 %v2379_v30 }
 0x220   : > { %3897 = vmatprep.mubr.f32.mxu1 %v2380_v62 }
 0x223   : > { %3898 = vmatmul.mubr.f32.gmra.mrb[110].mxu1 %v2381_v43 }
 0x224   : > { %3900 = vmatprep.mubr.f32.mxu1 %v2382_v17 }
 0x227   : > { %3901 = vmatmul.mubr.f32.gmra.mrb[112].mxu1 %v2383_v59 }
 0x228   : > { %3903 = vmatprep.mubr.f32.mxu1 %v2384_v14 }
 0x22b   : > { %3904 = vmatmul.mubr.f32.gmra.mrb[114].mxu1 %v2385_v11 }
 0x22c   : > { %3906 = vmatprep.mubr.f32.mxu1 %v2386_v46 }
 0x22f   : > { %3907 = vmatmul.mubr.f32.gmra.mrb[116].mxu1 %v2387_v27 }
 0x230   : > { %3909 = vmatprep.mubr.f32.mxu1 %v2388_v55 }
 0x233   : > { %3910 = vmatmul.mubr.f32.gmra.mrb[118].mxu1 %v2389_v45 }
 0x234   : > { %3912 = vmatprep.mubr.f32.mxu1 %v2390_v0 }
 0x237   : > { %3913 = vmatmul.mubr.f32.gmra.mrb[120].mxu1 %v2391_v4 }
 0x238   : > { %3915 = vmatprep.mubr.f32.mxu1 %v2392_v61 }
 0x23b   : > { %3916 = vmatmul.mubr.f32.gmra.mrb[122].mxu1 %v2393_v2 }
 0x23c   : > { %3918 = vmatprep.mubr.f32.mxu1 %v2394_v22 }
 0x23f   : > { %3919 = vmatmul.mubr.f32.gmra.mrb[124].mxu1 %v2395_v7 }
 0x240   : > { %3921 = vmatprep.mubr.f32.mxu1 %v2396_v8 }
 0x243   : > { %3922 = vmatmul.mubr.f32.gmra.mrb[126].mxu1 %v2397_v40 }
 0x25e   : > { %v3798_v38 = vpop.f32.mrb[64].mxu1 }
 0x25f   : > { %v2111_v63 = vpop.f32.mrb[65].mxu1  ;;  %v2117_v62 = vadd.f32 %v3798_v38, %v5121_v35 }
 0x260   : > { %v2112_v31 = vadd.f32 %v5121_v35, %v2111_v63 }
 0x261   : > { %v2303_v43 = vmul.f32 0.01, %v2117_v62  ;;  %vm2271_vm0 = vcmp.gt.f32.partialorder %v2117_v62, 0.0 }
 0x262   : > { %v2302_v17 = vmul.f32 0.01, %v2112_v31  ;;  %vm2270_vm1 = vcmp.gt.f32.partialorder %v2112_v31, 0.0 }
 0x263   : > { %v5140_v25 = vsel %vm2271_vm0, %v2117_v62, %v2303_v43 }
 0x264   : > { %v5142_v27 = vsel %vm2270_vm1, %v2112_v31, %v2302_v17 }
 0x266   : > { %v3801_v10 = vpop.f32.mrb[66].mxu1 }
 0x267   : > { %v2121_v1 = vpop.f32.mrb[67].mxu1  ;;  %v2127_v3 = vadd.f32 %v3801_v10, %v5121_v35 }
 0x268   : > { %v2122_v39 = vadd.f32 %v5121_v35, %v2121_v1 }
 0x269   : > { %v2305_v41 = vmul.f32 0.01, %v2127_v3  ;;  %vm2273_vm2 = vcmp.gt.f32.partialorder %v2127_v3, 0.0 }
 0x26a   : > { %vm2272_vm3 = vcmp.gt.f32.partialorder %v2122_v39, 0.0  ;;  %v2304_v55 = vmul.f32 0.01, %v2122_v39 }
 0x26b   : > { %v5144_v48 = vsel %vm2273_vm2, %v2127_v3, %v2305_v41 }
 0x26c   : > { %v5149_v47 = vsel %vm2272_vm3, %v2122_v39, %v2304_v55 }
 0x26e   : > { %v3804_v24 = vpop.f32.mrb[68].mxu1 }
 0x26f   : > { %v2131_v56 = vpop.f32.mrb[69].mxu1  ;;  %v2137_v59 = vadd.f32 %v3804_v24, %v5121_v35 }
 0x270   : > { %v2132_v49 = vadd.f32 %v5121_v35, %v2131_v56 }
 0x271   : > { %vm2275_vm4 = vcmp.gt.f32.partialorder %v2137_v59, 0.0  ;;  %v2307_v57 = vmul.f32 0.01, %v2137_v59 }
 0x272   : > { %vm2274_vm5 = vcmp.gt.f32.partialorder %v2132_v49, 0.0  ;;  %v2306_v0 = vmul.f32 0.01, %v2132_v49 }
 0x273   : > { %v5152_v22 = vsel %vm2275_vm4, %v2137_v59, %v2307_v57 }
 0x274   : > { %v5159_v13 = vsel %vm2274_vm5, %v2132_v49, %v2306_v0 }
 0x276   : > { %v3807_v26 = vpop.f32.mrb[70].mxu1 }
 0x277   : > { %v2141_v19 = vpop.f32.mrb[71].mxu1  ;;  %v2147_v54 = vadd.f32 %v3807_v26, %v5121_v35  ;;  %v5174_v26 = vld [vmem:[%s5647_s6] ss:$0 sm:$0xff] }
 0x278   : > { %v2142_v46 = vadd.f32 %v5121_v35, %v2141_v19 }
 0x279   : > { %vm2277_vm6 = vcmp.gt.f32.partialorder %v2147_v54, 0.0  ;;  %v2309_v58 = vmul.f32 0.01, %v2147_v54 }
 0x27a   : > { %v2308_v50 = vmul.f32 0.01, %v2142_v46  ;;  %vm2276_vm7 = vcmp.gt.f32.partialorder %v2142_v46, 0.0 }
 0x27b   : > { %v5162_v40 = vsel %vm2277_vm6, %v2147_v54, %v2309_v58 }
 0x27c   : > { %v5167_v10 = vsel %vm2276_vm7, %v2142_v46, %v2308_v50 }
 0x27e   : > { %v3810_v20 = vpop.f32.mrb[72].mxu1 }
 0x27f   : > { %v2151_v32 = vpop.f32.mrb[73].mxu1  ;;  %v2157_v51 = vadd.f32 %v3810_v20, %v5121_v35 }
 0x280   : > { %v2152_v45 = vadd.f32 %v5121_v35, %v2151_v32 }
 0x281   : > { %v2311_v4 = vmul.f32 0.01, %v2157_v51  ;;  %vm2279_vm8 = vcmp.gt.f32.partialorder %v2157_v51, 0.0 }
 0x282   : > { %v2310_v5 = vmul.f32 0.01, %v2152_v45  ;;  %vm2278_vm9 = vcmp.gt.f32.partialorder %v2152_v45, 0.0 }
 0x283   : > { %v5169_v1 = vsel %vm2279_vm8, %v2157_v51, %v2311_v4 }
 0x284   : > { %v5177_v20 = vsel %vm2278_vm9, %v2152_v45, %v2310_v5 }
 0x286   : > { %v3813_v53 = vpop.f32.mrb[74].mxu1 }
 0x287   : > { %v2161_v21 = vpop.f32.mrb[75].mxu1  ;;  %v2167_v61 = vadd.f32 %v3813_v53, %v5121_v35 }
 0x288   : > { %v2162_v18 = vadd.f32 %v5121_v35, %v2161_v21 }
 0x289   : > { %v2313_v24 = vmul.f32 0.01, %v2167_v61  ;;  %vm2281_vm10 = vcmp.gt.f32.partialorder %v2167_v61, 0.0 }
 0x28a   : > { %v2312_v56 = vmul.f32 0.01, %v2162_v18  ;;  %vm2280_vm11 = vcmp.gt.f32.partialorder %v2162_v18, 0.0 }
 0x28b   : > { %v5182_v62 = vsel %vm2281_vm10, %v2167_v61, %v2313_v24 }
 0x28c   : > { %v5184_v31 = vsel %vm2280_vm11, %v2162_v18, %v2312_v56 }
 0x28e   : > { %v3816_v12 = vpop.f32.mrb[76].mxu1 }
 0x28f   : > { %v2171_v60 = vpop.f32.mrb[77].mxu1  ;;  %v2177_v2 = vadd.f32 %v3816_v12, %v5121_v35 }
 0x290   : > { %v2172_v29 = vadd.f32 %v5121_v35, %v2171_v60 }
 0x291   : > { %vm2283_vm12 = vcmp.gt.f32.partialorder %v2177_v2, 0.0  ;;  %v2315_v19 = vmul.f32 0.01, %v2177_v2 }
 0x292   : > { %vm2282_vm13 = vcmp.gt.f32.partialorder %v2172_v29, 0.0  ;;  %v2314_v32 = vmul.f32 0.01, %v2172_v29 }
 0x293   : > { %v5190_v43 = vsel %vm2283_vm12, %v2177_v2, %v2315_v19 }
 0x294   : > { %v5195_v39 = vsel %vm2282_vm13, %v2172_v29, %v2314_v32 }
 0x296   : > { %v3819_v23 = vpop.f32.mrb[78].mxu1 }
 0x297   : > { %v2181_v52 = vpop.f32.mrb[79].mxu1  ;;  %v2187_v7 = vadd.f32 %v3819_v23, %v5121_v35 }
 0x298   : > { %v2182_v38 = vadd.f32 %v5121_v35, %v2181_v52 }
 0x299   : > { %v2317_v53 = vmul.f32 0.01, %v2187_v7  ;;  %vm2285_vm14 = vcmp.gt.f32.partialorder %v2187_v7, 0.0 }
 0x29a   : > { %v2316_v12 = vmul.f32 0.01, %v2182_v38  ;;  %vm2284_vm15 = vcmp.gt.f32.partialorder %v2182_v38, 0.0 }
 0x29b   : > { %v5197_v41 = vsel %vm2285_vm14, %v2187_v7, %v2317_v53 }
 0x29c   : > { %v5199_v54 = vsel %vm2284_vm15, %v2182_v38, %v2316_v12 }
 0x29e   : > { %v5098_v9 = vpop.f32.mrb[80].mxu1 }
 0x29f   : > { %v5100_v6 = vpop.f32.mrb[81].mxu1  ;;  %v2197_v60 = vadd.f32 %v5098_v9, %v5121_v35 }
 0x2a0   : > { %v2192_v17 = vadd.f32 %v5121_v35, %v5100_v6 }
 0x2a1   : > { %v2319_v46 = vmul.f32 0.01, %v2197_v60  ;;  %vm2287_vm2 = vcmp.gt.f32.partialorder %v2197_v60, 0.0 }
 0x2a2   : > { %v2318_v58 = vmul.f32 0.01, %v2192_v17  ;;  %vm2286_vm4 = vcmp.gt.f32.partialorder %v2192_v17, 0.0 }
 0x2a6   : > { %v5102_v15 = vpop.f32.mrb[82].mxu1 }
 0x2a7   : > { %v5104_v42 = vpop.f32.mrb[83].mxu1  ;;  %v2207_v5 = vadd.f32 %v5102_v15, %v5121_v35  ;;  %v5229_v15 = vsel %vm2286_vm4, %v2192_v17, %v2318_v58 }
 0x2a8   : > { %v2202_v38 = vadd.f32 %v5121_v35, %v5104_v42 }
 0x2a9   : > { %vm2289_vm8 = vcmp.gt.f32.partialorder %v2207_v5, 0.0 }
 0x2aa   : > { %vm2288_vm9 = vcmp.gt.f32.partialorder %v2202_v38, 0.0 }
 0x2ae   : > { %v5106_v16 = vpop.f32.mrb[84].mxu1 }
 0x2af   : > { %v5108_v36 = vpop.f32.mrb[85].mxu1 }
 0x2b6   : > { %v5110_v33 = vpop.f32.mrb[86].mxu1 }
 0x2b7   : > { %v5112_v34 = vpop.f32.mrb[87].mxu1 }
 0x2be   : > { %v5114_v37 = vpop.f32.mrb[88].mxu1 }
 0x2bf   : > { %v5116_v28 = vpop.f32.mrb[89].mxu1 }
 0x2c6   : > { %v5123_v44 = vpop.f32.mrb[90].mxu1 }
 0x2c7   : > { %v5125_v30 = vpop.f32.mrb[91].mxu1 }
 0x2ce   : > { %v5132_v14 = vpop.f32.mrb[92].mxu1 }
 0x2cf   : > { %v5136_v11 = vpop.f32.mrb[93].mxu1 }
 0x2d6   : > { %v5156_v8 = vpop.f32.mrb[94].mxu1 }
 0x2d7   : > { %v5165_v63 = vpop.f32.mrb[95].mxu1 }
 0x2da   : > { %v3878_v21 = vpop.f32.mrb[96].mxu1 }
 0x2db   : > { %v2493_v23 = vadd.f32 %v3878_v21, %v5174_v26  ;;  %v2487_v52 = vpop.f32.mrb[97].mxu1 }
 0x2dc   : > { %v2488_v3 = vadd.f32 %v5174_v26, %v2487_v52 }
 0x2dd   : > { %vm2647_vm0 = vcmp.gt.f32.partialorder %v2493_v23, 0.0  ;;  %v2679_v9 = vmul.f32 0.01, %v2493_v23 }
 0x2de   : > { %vm2646_vm1 = vcmp.gt.f32.partialorder %v2488_v3, 0.0  ;;  %v2678_v59 = vmul.f32 0.01, %v2488_v3  ;;  %v3881_v49 = vpop.f32.mrb[98].mxu1 }
 0x2df   : > { %v2711_v51 = vsel %vm2647_vm0, %v2493_v23, %v2679_v9  ;;  %v2503_v55 = vadd.f32 %v3881_v49, %v5174_v26  ;;  %v2497_v57 = vpop.f32.mrb[99].mxu1 }
 0x2e0   : > { %v2710_v45 = vsel %vm2646_vm1, %v2488_v3, %v2678_v59  ;;  %v2498_v6 = vadd.f32 %v5174_v26, %v2497_v57  ;;  %v5204_v0 = vadd.f32 %v2711_v51, %v5140_v25  ;;  %v5215_v25 = vsel %vm2287_vm2, %v2197_v60, %v2319_v46 }
 0x2e1   : > { %vm2649_vm3 = vcmp.gt.f32.partialorder %v2503_v55, 0.0  ;;  %v2681_v50 = vmul.f32 0.01, %v2503_v55  ;;  %v5207_v4 = vadd.f32 %v2710_v45, %v5142_v27  ;;  %v2321_v60 = vmul.f32 0.01, %v2207_v5 }
 0x2e2   : > { %vm2648_vm5 = vcmp.gt.f32.partialorder %v2498_v6, 0.0  ;;  %v2680_v61 = vmul.f32 0.01, %v2498_v6  ;;  %v3884_v18 = vpop.f32.mrb[100].mxu1  ;;  %v2775_v2 = vmul.f32 %v5204_v0, %v5204_v0  ;;  %2935 = vst [vmem:[%s5211_s21 + $0x8] sm:$0xff] %v5204_v0  ;;  %v2217_v51 = vadd.f32 %v5106_v16, %v5121_v35 }
 0x2e3   : > { %v2713_v27 = vsel %vm2649_vm3, %v2503_v55, %v2681_v50  ;;  %v2513_v29 = vadd.f32 %v3884_v18, %v5174_v26  ;;  %v2507_v7 = vpop.f32.mrb[101].mxu1  ;;  %2934 = vst [vmem:[%s5211_s21] sm:$0xff] %v5207_v4  ;;  %v2320_v59 = vmul.f32 0.01, %v2202_v38  ;;  %v2212_v16 = vadd.f32 %v5121_v35, %v5108_v36 }
 0x2e4   : > { %v2712_v24 = vsel %vm2648_vm5, %v2498_v6, %v2680_v61  ;;  %v2508_v56 = vadd.f32 %v5174_v26, %v2507_v7  ;;  %2808 = vadd.xlane.f32.xlu0 %v2775_v2  ;;  %v5226_v19 = vadd.f32 %v2713_v27, %v5144_v48  ;;  %v2774_v48 = vmul.f32 %v5207_v4, %v5207_v4 }
 0x2e5   : > { %vm2651_vm6 = vcmp.gt.f32.partialorder %v2513_v29, 0.0  ;;  %v2683_v32 = vmul.f32 0.01, %v2513_v29  ;;  %v5232_v53 = vadd.f32 %v2712_v24, %v5149_v47  ;;  %vm2291_vm13 = vcmp.gt.f32.partialorder %v2217_v51, 0.0 }
 0x2e6   : > { %vm2650_vm7 = vcmp.gt.f32.partialorder %v2508_v56, 0.0  ;;  %v2682_v21 = vmul.f32 0.01, %v2508_v56  ;;  %v3887_v12 = vpop.f32.mrb[102].mxu1  ;;  %v2777_v42 = vmul.f32 %v5226_v19, %v5226_v19  ;;  %2937 = vst [vmem:[%s5211_s21 + $0x18] sm:$0xff] %v5226_v19  ;;  %vm2290_vm15 = vcmp.gt.f32.partialorder %v2212_v16, 0.0 }
 0x2e7   : > { %v2715_v23 = vsel %vm2651_vm6, %v2513_v29, %v2683_v32  ;;  %v2523_v52 = vadd.f32 %v3887_v12, %v5174_v26  ;;  %v2517_v3 = vpop.f32.mrb[103].mxu1  ;;  %2936 = vst [vmem:[%s5211_s21 + $0x10] sm:$0xff] %v5232_v53  ;;  %v2776_v45 = vmul.f32 %v5232_v53, %v5232_v53 }
 0x2e8   : > { %v2714_v47 = vsel %vm2650_vm7, %v2508_v56, %v2682_v21  ;;  %v2518_v17 = vadd.f32 %v5174_v26, %v2517_v3  ;;  %2812 = vadd.xlane.f32.xlu1 %v2777_v42  ;;  %2806 = vadd.xlane.f32.xlu0 %v2774_v48  ;;  %v5245_v9 = vadd.f32 %v2715_v23, %v5152_v22  ;;  %v2322_v48 = vmul.f32 0.01, %v2212_v16 }
 0x2e9   : > { %vm2653_vm10 = vcmp.gt.f32.partialorder %v2523_v52, 0.0  ;;  %v2685_v49 = vmul.f32 0.01, %v2523_v52  ;;  %v5248_v46 = vadd.f32 %v2714_v47, %v5159_v13  ;;  %v5257_v22 = vsel %vm2289_vm8, %v2207_v5, %v2321_v60 }
 0x2ea   : > { %vm2652_vm11 = vcmp.gt.f32.partialorder %v2518_v17, 0.0  ;;  %v2684_v55 = vmul.f32 0.01, %v2518_v17  ;;  %v3890_v57 = vpop.f32.mrb[104].mxu1  ;;  %2939 = vst [vmem:[%s5211_s21 + $0x28] sm:$0xff] %v5245_v9  ;;  %v5271_v5 = vsel %vm2288_vm9, %v2202_v38, %v2320_v59  ;;  %v2779_v24 = vmul.f32 %v5245_v9, %v5245_v9 }
 0x2eb   : > { %v2717_v6 = vsel %vm2653_vm10, %v2523_v52, %v2685_v49  ;;  %v2533_v58 = vadd.f32 %v3890_v57, %v5174_v26  ;;  %v2527_v50 = vpop.f32.mrb[105].mxu1  ;;  %v2778_v13 = vmul.f32 %v5248_v46, %v5248_v46  ;;  %2938 = vst [vmem:[%s5211_s21 + $0x20] sm:$0xff] %v5248_v46  ;;  %v2227_v52 = vadd.f32 %v5110_v33, %v5121_v35 }
 0x2ec   : > { %v2716_v61 = vsel %vm2652_vm11, %v2518_v17, %v2684_v55  ;;  %v2528_v18 = vadd.f32 %v5174_v26, %v2527_v50  ;;  %2810 = vadd.xlane.f32.xlu1 %v2776_v45  ;;  %v5268_v2 = vadd.f32 %v2717_v6, %v5162_v40  ;;  %v2323_v40 = vmul.f32 0.01, %v2217_v51 }
 0x2ed   : > { %vm2655_vm12 = vcmp.gt.f32.partialorder %v2533_v58, 0.0  ;;  %v2687_v27 = vmul.f32 0.01, %v2533_v58  ;;  %2814 = vadd.xlane.f32.xlu0 %v2778_v13  ;;  %v5274_v29 = vadd.f32 %v2716_v61, %v5167_v10  ;;  %v2222_v33 = vadd.f32 %v5121_v35, %v5112_v34 }
 0x2ee   : > { %vm2654_vm14 = vcmp.gt.f32.partialorder %v2528_v18, 0.0  ;;  %v2686_v36 = vmul.f32 0.01, %v2528_v18  ;;  %v3893_v7 = vpop.f32.mrb[106].mxu1  ;;  %2941 = vst [vmem:[%s5211_s21 + $0x38] sm:$0xff] %v5268_v2  ;;  %v2781_v17 = vmul.f32 %v5268_v2, %v5268_v2  ;;  %v5313_v6 = vsel %vm2290_vm15, %v2212_v16, %v2322_v48 }
 0x2ef   : > { %v2719_v56 = vsel %vm2655_vm12, %v2533_v58, %v2687_v27  ;;  %v2543_v38 = vadd.f32 %v3893_v7, %v5174_v26  ;;  %v2537_v32 = vpop.f32.mrb[107].mxu1  ;;  %v2780_v21 = vmul.f32 %v5274_v29, %v5274_v29  ;;  %2940 = vst [vmem:[%s5211_s21 + $0x30] sm:$0xff] %v5274_v29  ;;  %vm2293_vm3 = vcmp.gt.f32.partialorder %v2227_v52, 0.0 }
 0x2f0   : > { %v2718_v10 = vsel %vm2654_vm14, %v2528_v18, %v2686_v36  ;;  %v2538_v12 = vadd.f32 %v5174_v26, %v2537_v32  ;;  %2816 = vadd.xlane.f32.xlu1 %v2779_v24  ;;  %v5287_v42 = vadd.f32 %v2719_v56, %v5169_v1  ;;  %v5299_v1 = vsel %vm2291_vm13, %v2217_v51, %v2323_v40 }
 0x2f1   : > { %vm2657_vm0 = vcmp.gt.f32.partialorder %v2543_v38, 0.0  ;;  %v2689_v60 = vmul.f32 0.01, %v2543_v38  ;;  %2818 = vadd.xlane.f32.xlu0 %v2780_v21  ;;  %v5290_v23 = vadd.f32 %v2718_v10, %v5177_v20  ;;  %vm2292_vm5 = vcmp.gt.f32.partialorder %v2222_v33, 0.0 }
 0x2f2   : > { %vm2656_vm1 = vcmp.gt.f32.partialorder %v2538_v12, 0.0  ;;  %v2688_v3 = vmul.f32 0.01, %v2538_v12  ;;  %v3896_v47 = vpop.f32.mrb[108].mxu1  ;;  %2943 = vst [vmem:[%s5211_s21 + $0x48] sm:$0xff] %v5287_v42  ;;  %v2783_v61 = vmul.f32 %v5287_v42, %v5287_v42  ;;  %v2237_v32 = vadd.f32 %v5114_v37, %v5121_v35 }
 0x2f3   : > { %v2721_v59 = vsel %vm2657_vm0, %v2543_v38, %v2689_v60  ;;  %v2553_v49 = vadd.f32 %v3896_v47, %v5174_v26  ;;  %v2547_v55 = vpop.f32.mrb[109].mxu1  ;;  %v2782_v20 = vmul.f32 %v5290_v23, %v5290_v23  ;;  %2942 = vst [vmem:[%s5211_s21 + $0x40] sm:$0xff] %v5290_v23  ;;  %v2324_v40 = vmul.f32 0.01, %v2222_v33 }
 0x2f4   : > { %v2720_v57 = vsel %vm2656_vm1, %v2538_v12, %v2688_v3  ;;  %v2548_v45 = vadd.f32 %v5174_v26, %v2547_v55  ;;  %2820 = vadd.xlane.f32.xlu1 %v2781_v17  ;;  %v5310_v51 = vadd.f32 %v2721_v59, %v5182_v62  ;;  %v2325_v62 = vmul.f32 0.01, %v2227_v52 }
 0x2f5   : > { %vm2659_vm2 = vcmp.gt.f32.partialorder %v2553_v49, 0.0  ;;  %v2691_v58 = vmul.f32 0.01, %v2553_v49  ;;  %2822 = vadd.xlane.f32.xlu0 %v2782_v20  ;;  %v5316_v50 = vadd.f32 %v2720_v57, %v5184_v31  ;;  %v2232_v37 = vadd.f32 %v5121_v35, %v5116_v28 }
 0x2f6   : > { %vm2658_vm4 = vcmp.gt.f32.partialorder %v2548_v45, 0.0  ;;  %v2690_v34 = vmul.f32 0.01, %v2548_v45  ;;  %v3899_v13 = vpop.f32.mrb[110].mxu1  ;;  %2945 = vst [vmem:[%s5211_s21 + $0x58] sm:$0xff] %v5310_v51  ;;  %v2785_v12 = vmul.f32 %v5310_v51, %v5310_v51  ;;  %v5355_v59 = vsel %vm2292_vm5, %v2222_v33, %v2324_v40 }
 0x2f7   : > { %v2723_v18 = vsel %vm2659_vm2, %v2553_v49, %v2691_v58  ;;  %v2563_v16 = vadd.f32 %v3899_v13, %v5174_v26  ;;  %v2557_v27 = vpop.f32.mrb[111].mxu1  ;;  %v2784_v36 = vmul.f32 %v5316_v50, %v5316_v50  ;;  %2944 = vst [vmem:[%s5211_s21 + $0x50] sm:$0xff] %v5316_v50  ;;  %vm2295_vm9 = vcmp.gt.f32.partialorder %v2237_v32, 0.0 }
 0x2f8   : > { %v2722_v31 = vsel %vm2658_vm4, %v2548_v45, %v2690_v34  ;;  %v2558_v7 = vadd.f32 %v5174_v26, %v2557_v27  ;;  %2824 = vadd.xlane.f32.xlu1 %v2783_v61  ;;  %v5329_v24 = vadd.f32 %v2723_v18, %v5190_v43  ;;  %v5341_v43 = vsel %vm2293_vm3, %v2227_v52, %v2325_v62 }
 0x2f9   : > { %vm2661_vm6 = vcmp.gt.f32.partialorder %v2563_v16, 0.0  ;;  %v2693_v56 = vmul.f32 0.01, %v2563_v16  ;;  %2826 = vadd.xlane.f32.xlu0 %v2784_v36  ;;  %v5332_v38 = vadd.f32 %v2722_v31, %v5195_v39  ;;  %vm2294_vm11 = vcmp.gt.f32.partialorder %v2232_v37, 0.0 }
 0x2fa   : > { %vm2660_vm7 = vcmp.gt.f32.partialorder %v2558_v7, 0.0  ;;  %v2692_v21 = vmul.f32 0.01, %v2558_v7  ;;  %v3902_v10 = vpop.f32.mrb[112].mxu1  ;;  %2947 = vst [vmem:[%s5211_s21 + $0x68] sm:$0xff] %v5329_v24  ;;  %v2787_v57 = vmul.f32 %v5329_v24, %v5329_v24  ;;  %v2247_v27 = vadd.f32 %v5123_v44, %v5121_v35 }
 0x2fb   : > { %v2725_v48 = vsel %vm2661_vm6, %v2563_v16, %v2693_v56  ;;  %v2573_v60 = vadd.f32 %v3902_v10, %v5174_v26  ;;  %v2567_v3 = vpop.f32.mrb[113].mxu1  ;;  %v2786_v39 = vmul.f32 %v5332_v38, %v5332_v38  ;;  %2946 = vst [vmem:[%s5211_s21 + $0x60] sm:$0xff] %v5332_v38  ;;  %v2326_v62 = vmul.f32 0.01, %v2232_v37 }
 0x2fc   : > { %v2724_v47 = vsel %vm2660_vm7, %v2558_v7, %v2692_v21  ;;  %v2568_v17 = vadd.f32 %v5174_v26, %v2567_v3  ;;  %2828 = vadd.xlane.f32.xlu1 %v2785_v12  ;;  %v5352_v52 = vadd.f32 %v2725_v48, %v5197_v41  ;;  %v2327_v41 = vmul.f32 0.01, %v2237_v32 }
 0x2fd   : > { %vm2663_vm8 = vcmp.gt.f32.partialorder %v2573_v60, 0.0  ;;  %v2695_v49 = vmul.f32 0.01, %v2573_v60  ;;  %2830 = vadd.xlane.f32.xlu0 %v2786_v39  ;;  %v5358_v55 = vadd.f32 %v2724_v47, %v5199_v54  ;;  %v2242_v44 = vadd.f32 %v5121_v35, %v5125_v30 }
 0x2fe   : > { %vm2662_vm10 = vcmp.gt.f32.partialorder %v2568_v17, 0.0  ;;  %v2694_v28 = vmul.f32 0.01, %v2568_v17  ;;  %v3905_v20 = vpop.f32.mrb[114].mxu1  ;;  %2949 = vst [vmem:[%s5211_s21 + $0x78] sm:$0xff] %v5352_v52  ;;  %v2789_v7 = vmul.f32 %v5352_v52, %v5352_v52  ;;  %v5397_v48 = vsel %vm2294_vm11, %v2232_v37, %v2326_v62 }
 0x2ff   : > { %v2727_v45 = vsel %vm2663_vm8, %v2573_v60, %v2695_v49  ;;  %v2583_v33 = vadd.f32 %v3905_v20, %v5174_v26  ;;  %v2577_v58 = vpop.f32.mrb[115].mxu1  ;;  %v2788_v34 = vmul.f32 %v5358_v55, %v5358_v55  ;;  %2948 = vst [vmem:[%s5211_s21 + $0x70] sm:$0xff] %v5358_v55  ;;  %vm2297_vm15 = vcmp.gt.f32.partialorder %v2247_v27, 0.0 }
 0x300   : > { %v2726_v54 = vsel %vm2662_vm10, %v2568_v17, %v2694_v28  ;;  %v2578_v13 = vadd.f32 %v5174_v26, %v2577_v58  ;;  %2832 = vadd.xlane.f32.xlu1 %v2787_v57  ;;  %v5371_v61 = vadd.f32 %v2727_v45, %v5215_v25  ;;  %v5383_v25 = vsel %vm2295_vm9, %v2237_v32, %v2327_v41 }
 0x301   : > { %vm2665_vm12 = vcmp.gt.f32.partialorder %v2583_v33, 0.0  ;;  %v2697_v18 = vmul.f32 0.01, %v2583_v33  ;;  %2834 = vadd.xlane.f32.xlu0 %v2788_v34  ;;  %v5374_v16 = vadd.f32 %v2726_v54, %v5229_v15  ;;  %vm2296_vm1 = vcmp.gt.f32.partialorder %v2242_v44, 0.0 }
 0x302   : > { %vm2664_vm13 = vcmp.gt.f32.partialorder %v2578_v13, 0.0  ;;  %v2696_v36 = vmul.f32 0.01, %v2578_v13  ;;  %v3908_v31 = vpop.f32.mrb[116].mxu1  ;;  %2951 = vst [vmem:[%s5211_s21 + $0x88] sm:$0xff] %v5371_v61  ;;  %v2791_v47 = vmul.f32 %v5371_v61, %v5371_v61  ;;  %v2257_v58 = vadd.f32 %v5132_v14, %v5121_v35 }
 0x303   : > { %v2729_v40 = vsel %vm2665_vm12, %v2583_v33, %v2697_v18  ;;  %v2593_v56 = vadd.f32 %v3908_v31, %v5174_v26  ;;  %v2587_v21 = vpop.f32.mrb[117].mxu1  ;;  %v2790_v15 = vmul.f32 %v5374_v16, %v5374_v16  ;;  %2950 = vst [vmem:[%s5211_s21 + $0x80] sm:$0xff] %v5374_v16  ;;  %v2328_v41 = vmul.f32 0.01, %v2242_v44 }
 0x304   : > { %v2728_v10 = vsel %vm2664_vm13, %v2578_v13, %v2696_v36  ;;  %v2588_v12 = vadd.f32 %v5174_v26, %v2587_v21  ;;  %2836 = vadd.xlane.f32.xlu1 %v2789_v7  ;;  %v5394_v32 = vadd.f32 %v2729_v40, %v5257_v22  ;;  %v2329_v22 = vmul.f32 0.01, %v2247_v27 }
 0x305   : > { %vm2667_vm14 = vcmp.gt.f32.partialorder %v2593_v56, 0.0  ;;  %v2699_v60 = vmul.f32 0.01, %v2593_v56  ;;  %2838 = vadd.xlane.f32.xlu0 %v2790_v15  ;;  %v5400_v3 = vadd.f32 %v2728_v10, %v5271_v5  ;;  %v2252_v14 = vadd.f32 %v5121_v35, %v5136_v11 }
 0x306   : > { %vm2666_vm0 = vcmp.gt.f32.partialorder %v2588_v12, 0.0  ;;  %v2698_v30 = vmul.f32 0.01, %v2588_v12  ;;  %v3911_v39 = vpop.f32.mrb[118].mxu1  ;;  %2953 = vst [vmem:[%s5211_s21 + $0x98] sm:$0xff] %v5394_v32  ;;  %v2793_v13 = vmul.f32 %v5394_v32, %v5394_v32  ;;  %vm2299_vm5 = vcmp.gt.f32.partialorder %v2257_v58, 0.0 }
 0x307   : > { %v2731_v17 = vsel %vm2667_vm14, %v2593_v56, %v2699_v60  ;;  %v2603_v37 = vadd.f32 %v3911_v39, %v5174_v26  ;;  %v2597_v49 = vpop.f32.mrb[119].mxu1  ;;  %v2792_v28 = vmul.f32 %v5400_v3, %v5400_v3  ;;  %2952 = vst [vmem:[%s5211_s21 + $0x90] sm:$0xff] %v5400_v3  ;;  %vm2298_vm7 = vcmp.gt.f32.partialorder %v2252_v14, 0.0 }
 0x308   : > { %v2730_v5 = vsel %vm2666_vm0, %v2588_v12, %v2698_v30  ;;  %v2598_v20 = vadd.f32 %v5174_v26, %v2597_v49  ;;  %2840 = vadd.xlane.f32.xlu1 %v2791_v47  ;;  %v5413_v57 = vadd.f32 %v2731_v17, %v5299_v1  ;;  %v2361_v1 = vsel %vm2297_vm15, %v2247_v27, %v2329_v22 }
 0x309   : > { %vm2669_vm2 = vcmp.gt.f32.partialorder %v2603_v37, 0.0  ;;  %v2701_v45 = vmul.f32 0.01, %v2603_v37  ;;  %2842 = vadd.xlane.f32.xlu0 %v2792_v28  ;;  %v5416_v33 = vadd.f32 %v2730_v5, %v5313_v6  ;;  %v2360_v27 = vsel %vm2296_vm1, %v2242_v44, %v2328_v41 }
 0x30a   : > { %vm2668_vm3 = vcmp.gt.f32.partialorder %v2598_v20, 0.0  ;;  %v2700_v34 = vmul.f32 0.01, %v2598_v20  ;;  %v3914_v54 = vpop.f32.mrb[120].mxu1  ;;  %2955 = vst [vmem:[%s5211_s21 + $0xa8] sm:$0xff] %v5413_v57  ;;  %v2795_v10 = vmul.f32 %v5413_v57, %v5413_v57  ;;  %v2267_v49 = vadd.f32 %v5156_v8, %v5121_v35 }
 0x30b   : > { %v2733_v62 = vsel %vm2669_vm2, %v2603_v37, %v2701_v45  ;;  %v2613_v18 = vadd.f32 %v3914_v54, %v5174_v26  ;;  %v2607_v36 = vpop.f32.mrb[121].mxu1  ;;  %v2794_v6 = vmul.f32 %v5416_v33, %v5416_v33  ;;  %2954 = vst [vmem:[%s5211_s21 + $0xa0] sm:$0xff] %v5416_v33  ;;  %v2330_v22 = vmul.f32 0.01, %v2252_v14 }
 0x30c   : > { %v2732_v31 = vsel %vm2668_vm3, %v2598_v20, %v2700_v34  ;;  %v2608_v7 = vadd.f32 %v5174_v26, %v2607_v36  ;;  %2844 = vadd.xlane.f32.xlu1 %v2793_v13  ;;  %v5434_v40 = vadd.f32 %v2733_v62, %v5341_v43  ;;  %v2331_v43 = vmul.f32 0.01, %v2257_v58 }
 0x30d   : > { %vm2671_vm4 = vcmp.gt.f32.partialorder %v2613_v18, 0.0  ;;  %v2703_v56 = vmul.f32 0.01, %v2613_v18  ;;  %2846 = vadd.xlane.f32.xlu0 %v2794_v6  ;;  %v5438_v21 = vadd.f32 %v2732_v31, %v5355_v59  ;;  %v2262_v8 = vadd.f32 %v5121_v35, %v5165_v63 }
 0x30e   : > { %vm2670_vm6 = vcmp.gt.f32.partialorder %v2608_v7, 0.0  ;;  %v2702_v15 = vmul.f32 0.01, %v2608_v7  ;;  %v3917_v11 = vpop.f32.mrb[122].mxu1  ;;  %2957 = vst [vmem:[%s5211_s21 + $0xb8] sm:$0xff] %v5434_v40  ;;  %v2797_v20 = vmul.f32 %v5434_v40, %v5434_v40  ;;  %vm2301_vm11 = vcmp.gt.f32.partialorder %v2267_v49, 0.0 }
 0x30f   : > { %v2735_v12 = vsel %vm2671_vm4, %v2613_v18, %v2703_v56  ;;  %v2623_v44 = vadd.f32 %v3917_v11, %v5174_v26  ;;  %v2617_v60 = vpop.f32.mrb[123].mxu1  ;;  %v2796_v30 = vmul.f32 %v5438_v21, %v5438_v21  ;;  %2956 = vst [vmem:[%s5211_s21 + $0xb0] sm:$0xff] %v5438_v21  ;;  %v2333_v63 = vmul.f32 0.01, %v2267_v49 }
 0x310   : > { %v2734_v59 = vsel %vm2670_vm6, %v2608_v7, %v2702_v15  ;;  %v2618_v39 = vadd.f32 %v5174_v26, %v2617_v60  ;;  %2848 = vadd.xlane.f32.xlu1 %v2795_v10  ;;  %v5451_v47 = vadd.f32 %v2735_v12, %v5383_v25  ;;  %v2363_v25 = vsel %vm2299_vm5, %v2257_v58, %v2331_v43 }
 0x311   : > { %vm2673_vm8 = vcmp.gt.f32.partialorder %v2623_v44, 0.0  ;;  %v2705_v17 = vmul.f32 0.01, %v2623_v44  ;;  %2850 = vadd.xlane.f32.xlu0 %v2796_v30  ;;  %v5454_v37 = vadd.f32 %v2734_v59, %v5397_v48  ;;  %v2362_v58 = vsel %vm2298_vm7, %v2252_v14, %v2330_v22 }
 0x312   : > { %vm2672_vm9 = vcmp.gt.f32.partialorder %v2618_v39, 0.0  ;;  %v2704_v28 = vmul.f32 0.01, %v2618_v39  ;;  %v3920_v5 = vpop.f32.mrb[124].mxu1  ;;  %2959 = vst [vmem:[%s5211_s21 + $0xc8] sm:$0xff] %v5451_v47  ;;  %v2799_v35 = vmul.f32 %v5451_v47, %v5451_v47  ;;  %vm2300_vm13 = vcmp.gt.f32.partialorder %v2262_v8, 0.0 }
 0x313   : > { %v2737_v41 = vsel %vm2673_vm8, %v2623_v44, %v2705_v17  ;;  %v2633_v45 = vadd.f32 %v3920_v5, %v5174_v26  ;;  %v2627_v34 = vpop.f32.mrb[125].mxu1  ;;  %v2798_v48 = vmul.f32 %v5454_v37, %v5454_v37  ;;  %2958 = vst [vmem:[%s5211_s21 + $0xc0] sm:$0xff] %v5454_v37 }
 0x314   : > { %v2736_v54 = vsel %vm2672_vm9, %v2618_v39, %v2704_v28  ;;  %v2628_v13 = vadd.f32 %v5174_v26, %v2627_v34  ;;  %2852 = vadd.xlane.f32.xlu1 %v2797_v20  ;;  %v5471_v62 = vadd.f32 %v2737_v41, %v2361_v1 }
 0x315   : > { %vm2675_vm10 = vcmp.gt.f32.partialorder %v2633_v45, 0.0  ;;  %v2707_v18 = vmul.f32 0.01, %v2633_v45  ;;  %2854 = vadd.xlane.f32.xlu0 %v2798_v48  ;;  %v5474_v36 = vadd.f32 %v2736_v54, %v2360_v27  ;;  %v2332_v27 = vmul.f32 0.01, %v2262_v8 }
 0x316   : > { %vm2674_vm12 = vcmp.gt.f32.partialorder %v2628_v13, 0.0  ;;  %v2706_v6 = vmul.f32 0.01, %v2628_v13  ;;  %v3923_v31 = vpop.f32.mrb[126].mxu1  ;;  %2961 = vst [vmem:[%s5211_s21 + $0xd8] sm:$0xff] %v5471_v62  ;;  %v2801_v60 = vmul.f32 %v5471_v62, %v5471_v62 }
 0x317   : > { %v2739_v1 = vsel %vm2675_vm10, %v2633_v45, %v2707_v18  ;;  %v2643_v7 = vadd.f32 %v3923_v31, %v5174_v26  ;;  %v2637_v14 = vpop.f32.mrb[127].mxu1  ;;  %v2800_v56 = vmul.f32 %v5474_v36, %v5474_v36  ;;  %2960 = vst [vmem:[%s5211_s21 + $0xd0] sm:$0xff] %v5474_v36  ;;  %v2364_v39 = vsel %vm2300_vm13, %v2262_v8, %v2332_v27 }
 0x318   : > { %v2738_v15 = vsel %vm2674_vm12, %v2628_v13, %v2706_v6  ;;  %v2638_v11 = vadd.f32 %v5174_v26, %v2637_v14  ;;  %2856 = vadd.xlane.f32.xlu1 %v2799_v35  ;;  %v5486_v10 = vadd.f32 %v2739_v1, %v2363_v25  ;;  %v2365_v26 = vsel %vm2301_vm11, %v2267_v49, %v2333_v63 }
 0x319   : > { %vm2677_vm14 = vcmp.gt.f32.partialorder %v2643_v7, 0.0  ;;  %v2709_v43 = vmul.f32 0.01, %v2643_v7  ;;  %2858 = vadd.xlane.f32.xlu0 %v2800_v56  ;;  %v5488_v12 = vadd.f32 %v2738_v15, %v2362_v58 }
 0x31a   : > { %vm2676_vm15 = vcmp.gt.f32.partialorder %v2638_v11, 0.0  ;;  %v2708_v44 = vmul.f32 0.01, %v2638_v11  ;;  %2963 = vst [vmem:[%s5211_s21 + $0xe8] sm:$0xff] %v5486_v10  ;;  %v2803_v49 = vmul.f32 %v5486_v10, %v5486_v10 }
 0x31b   : > { %v2741_v30 = vsel %vm2677_vm14, %v2643_v7, %v2709_v43  ;;  %v2802_v59 = vmul.f32 %v5488_v12, %v5488_v12  ;;  %2962 = vst [vmem:[%s5211_s21 + $0xe0] sm:$0xff] %v5488_v12 }
 0x31c   : > { %v2740_v22 = vsel %vm2676_vm15, %v2638_v11, %v2708_v44  ;;  %2860 = vadd.xlane.f32.xlu1 %v2801_v60  ;;  %v5499_v17 = vadd.f32 %v2741_v30, %v2365_v26 }
 0x31d   : > { %2862 = vadd.xlane.f32.xlu0 %v2802_v59  ;;  %v5501_v28 = vadd.f32 %v2740_v22, %v2364_v39 }
 0x31e   : > { %2965 = vst [vmem:[%s5211_s21 + $0xf8] sm:$0xff] %v5499_v17  ;;  %v2805_v20 = vmul.f32 %v5499_v17, %v5499_v17 }
 0x31f   : > { %v2804_v5 = vmul.f32 %v5501_v28, %v5501_v28  ;;  %2964 = vst [vmem:[%s5211_s21 + $0xf0] sm:$0xff] %v5501_v28  ;;  %s4308_s21 = scalar_lea.vmem %s4307_s20, 8192 }
 0x320   : > { %2864 = vadd.xlane.f32.xlu1 %v2803_v49  ;;  %p4310_p2 = scmp.lt.s32.totalorder %s4308_s21, %s4302_s19 }
 0x321   : > { %2866 = vadd.xlane.f32.xlu0 %v2804_v5 }
 0x322   : > { %p4311_p3 = por %p4310_p2, %p4309_p1 }
 0x324   : > { %2868 = vadd.xlane.f32.xlu1 %v2805_v20  ;;  %p4312_p5 = pnand %p4311_p3, %p4305_p0 }
 0x326   : > { %4315 = shalt.err (!%p4312_p5)
}
 0x327   : > { %s4316_s26 = scalar_lea.hbm %s5518_s14, 4096  ;;  %s4320_s12 = scalar_lea.hbm %s5648_s7, 12288 }
 0x328   : > { %p4317_p6 = scmp.ne.s32.totalorder %s5518_s14, %s4316_s26  ;;  %p4321_p10 = scmp.lt.u32.totalorder %s5518_s14, %s5648_s7 }
 0x329   : > { %p4322_p11 = scmp.lt.u32.totalorder %s4320_s12, %s4316_s26  ;;  %p4324_p13 = scmp.lt.u32.totalorder %s4316_s26, %s5518_s14 }
 0x32a   : > { %p4318_p7 = pnand %p4317_p6, %p4470_p4 }
 0x32b   : > { %p4323_p12 = por %p4322_p11, %p4321_p10 }
 0x32c   : > { %p4319_p9 = pneg %p4318_p7 }
 0x32d   : > { %p4325_p0 = por %p4324_p13, %p4323_p12 }
 0x32f   : > { %p4326_p1 = pnand %p4325_p0, %p4319_p9 }
 0x331   : > { %4329 = shalt.err (!%p4326_p1)
}
 0x332   : > { %s4383_s19 = smov 128   ;;  %s4384_s21 = smov 8  }
 0x333   : > { %3989 = dma.vmem_to_hbm [thread:$0]  (%p4470_p4), %s5520_s23, 4096, %s5518_s14, %s5524_s16, %s4383_s19, %s4383_s19, %s4384_s21  }
 0x334   : > { %s5553_s14 = scalar_lea.vmem %s5649_s8, %s3177_s22 }
 0x371   : > { %v2809_v25 = vpop.xlane.xlu0 %2808 }
 0x372   : > { %v2871_v41 = vmax.f32 %v2809_v25, 1e-24 }
 0x374   : > { %4238 = vrsqrt.f32 %v2871_v41 }
 0x375   : > { %v2813_v45 = vpop.xlane.xlu1 %2812  ;;  %v2807_v34 = vpop.xlane.xlu0 %2806 }
 0x376   : > { %v2873_v48 = vmax.f32 %v2813_v45, 1e-24  ;;  %v2870_v8 = vmax.f32 %v2807_v34, 1e-24 }
 0x378   : > { %4240 = vrsqrt.f32 %v2873_v48 }
 0x379   : > { %4242 = vrsqrt.f32 %v2870_v8  ;;  %v2811_v54 = vpop.xlane.xlu1 %2810 }
 0x37a   : > { %v2872_v13 = vmax.f32 %v2811_v54, 1e-24  ;;  %v2815_v58 = vpop.xlane.xlu0 %2814 }
 0x37b   : > { %v2874_v18 = vmax.f32 %v2815_v58, 1e-24 }
 0x37c   : > { %4244 = vrsqrt.f32 %v2872_v13 }
 0x37d   : > { %4246 = vrsqrt.f32 %v2874_v18  ;;  %v2817_v6 = vpop.xlane.xlu1 %2816 }
 0x37e   : > { %v4239_v31 = vpop.eup %4238  ;;  %v2875_v35 = vmax.f32 %v2817_v6, 1e-24  ;;  %v2819_v63 = vpop.xlane.xlu0 %2818 }
 0x37f   : > { %v2967_v1 = vmul.f32 %v4239_v31, %v5204_v0  ;;  %v2876_v7 = vmax.f32 %v2819_v63, 1e-24 }
 0x380   : > { %4248 = vrsqrt.f32 %v2875_v35 }
 0x381   : > { %2999 = vst [vmem:[%s5553_s14 + $0x8] sm:$0xff] %v2967_v1  ;;  %4250 = vrsqrt.f32 %v2876_v7  ;;  %v2821_v14 = vpop.xlane.xlu1 %2820 }
 0x382   : > { %v4241_v56 = vpop.eup %4240  ;;  %v2877_v27 = vmax.f32 %v2821_v14, 1e-24  ;;  %v2823_v15 = vpop.xlane.xlu0 %2822 }
 0x383   : > { %v4243_v11 = vpop.eup %4242  ;;  %v2969_v43 = vmul.f32 %v4241_v56, %v5226_v19  ;;  %v2878_v44 = vmax.f32 %v2823_v15, 1e-24 }
 0x384   : > { %v2966_v60 = vmul.f32 %v4243_v11, %v5207_v4  ;;  %4252 = vrsqrt.f32 %v2877_v27 }
 0x385   : > { %3001 = vst [vmem:[%s5553_s14 + $0x18] sm:$0xff] %v2969_v43  ;;  %4254 = vrsqrt.f32 %v2878_v44  ;;  %v2825_v0 = vpop.xlane.xlu1 %2824 }
 0x386   : > { %v4245_v26 = vpop.eup %4244  ;;  %2998 = vst [vmem:[%s5553_s14] sm:$0xff] %v2966_v60  ;;  %v2879_v30 = vmax.f32 %v2825_v0, 1e-24  ;;  %v2827_v59 = vpop.xlane.xlu0 %2826 }
 0x387   : > { %v4247_v39 = vpop.eup %4246  ;;  %v2968_v22 = vmul.f32 %v4245_v26, %v5232_v53  ;;  %v2880_v49 = vmax.f32 %v2827_v59, 1e-24 }
 0x388   : > { %v2970_v19 = vmul.f32 %v4247_v39, %v5248_v46  ;;  %4256 = vrsqrt.f32 %v2879_v30 }
 0x389   : > { %3000 = vst [vmem:[%s5553_s14 + $0x10] sm:$0xff] %v2968_v22  ;;  %4258 = vrsqrt.f32 %v2880_v49  ;;  %v2829_v4 = vpop.xlane.xlu1 %2828 }
 0x38a   : > { %v4249_v5 = vpop.eup %4248  ;;  %3002 = vst [vmem:[%s5553_s14 + $0x20] sm:$0xff] %v2970_v19  ;;  %v2881_v20 = vmax.f32 %v2829_v4, 1e-24  ;;  %v2831_v25 = vpop.xlane.xlu0 %2830 }
 0x38b   : > { %v4251_v41 = vpop.eup %4250  ;;  %v2971_v45 = vmul.f32 %v4249_v5, %v5245_v9  ;;  %v2882_v34 = vmax.f32 %v2831_v25, 1e-24 }
 0x38c   : > { %v2972_v53 = vmul.f32 %v4251_v41, %v5274_v29  ;;  %4260 = vrsqrt.f32 %v2881_v20 }
 0x38d   : > { %3003 = vst [vmem:[%s5553_s14 + $0x28] sm:$0xff] %v2971_v45  ;;  %4262 = vrsqrt.f32 %v2882_v34  ;;  %v2833_v46 = vpop.xlane.xlu1 %2832 }
 0x38e   : > { %v4253_v48 = vpop.eup %4252  ;;  %3004 = vst [vmem:[%s5553_s14 + $0x30] sm:$0xff] %v2972_v53  ;;  %v2883_v8 = vmax.f32 %v2833_v46, 1e-24  ;;  %v2835_v54 = vpop.xlane.xlu0 %2834 }
 0x38f   : > { %v4255_v13 = vpop.eup %4254  ;;  %v2973_v58 = vmul.f32 %v4253_v48, %v5268_v2  ;;  %v2884_v18 = vmax.f32 %v2835_v54, 1e-24 }
 0x390   : > { %v2974_v9 = vmul.f32 %v4255_v13, %v5290_v23  ;;  %4264 = vrsqrt.f32 %v2883_v8 }
 0x391   : > { %3005 = vst [vmem:[%s5553_s14 + $0x38] sm:$0xff] %v2973_v58  ;;  %4266 = vrsqrt.f32 %v2884_v18  ;;  %v2837_v29 = vpop.xlane.xlu1 %2836 }
 0x392   : > { %v4257_v6 = vpop.eup %4256  ;;  %3006 = vst [vmem:[%s5553_s14 + $0x40] sm:$0xff] %v2974_v9  ;;  %v2885_v31 = vmax.f32 %v2837_v29, 1e-24  ;;  %v2839_v35 = vpop.xlane.xlu0 %2838 }
 0x393   : > { %v4259_v63 = vpop.eup %4258  ;;  %v2975_v1 = vmul.f32 %v4257_v6, %v5287_v42  ;;  %v2886_v7 = vmax.f32 %v2839_v35, 1e-24 }
 0x394   : > { %v2976_v2 = vmul.f32 %v4259_v63, %v5316_v50  ;;  %4268 = vrsqrt.f32 %v2885_v31 }
 0x395   : > { %3007 = vst [vmem:[%s5553_s14 + $0x48] sm:$0xff] %v2975_v1  ;;  %4270 = vrsqrt.f32 %v2886_v7  ;;  %v2841_v23 = vpop.xlane.xlu1 %2840 }
 0x396   : > { %v4261_v14 = vpop.eup %4260  ;;  %3008 = vst [vmem:[%s5553_s14 + $0x50] sm:$0xff] %v2976_v2  ;;  %v2887_v56 = vmax.f32 %v2841_v23, 1e-24  ;;  %v2843_v27 = vpop.xlane.xlu0 %2842 }
 0x397   : > { %v4263_v15 = vpop.eup %4262  ;;  %v2977_v11 = vmul.f32 %v4261_v14, %v5310_v51  ;;  %v2888_v43 = vmax.f32 %v2843_v27, 1e-24 }
 0x398   : > { %v2978_v42 = vmul.f32 %v4263_v15, %v5332_v38  ;;  %4272 = vrsqrt.f32 %v2887_v56 }
 0x399   : > { %3009 = vst [vmem:[%s5553_s14 + $0x58] sm:$0xff] %v2977_v11  ;;  %4274 = vrsqrt.f32 %v2888_v43  ;;  %v2845_v50 = vpop.xlane.xlu1 %2844 }
 0x39a   : > { %v4265_v44 = vpop.eup %4264  ;;  %3010 = vst [vmem:[%s5553_s14 + $0x60] sm:$0xff] %v2978_v42  ;;  %v2889_v60 = vmax.f32 %v2845_v50, 1e-24  ;;  %v2847_v0 = vpop.xlane.xlu0 %2846 }
 0x39b   : > { %v4267_v26 = vpop.eup %4266  ;;  %v2979_v30 = vmul.f32 %v4265_v44, %v5329_v24  ;;  %v2890_v59 = vmax.f32 %v2847_v0, 1e-24 }
 0x39c   : > { %v2980_v51 = vmul.f32 %v4267_v26, %v5358_v55  ;;  %4276 = vrsqrt.f32 %v2889_v60 }
 0x39d   : > { %3011 = vst [vmem:[%s5553_s14 + $0x68] sm:$0xff] %v2979_v30  ;;  %4278 = vrsqrt.f32 %v2890_v59  ;;  %v2849_v38 = vpop.xlane.xlu1 %2848 }
 0x39e   : > { %v4269_v39 = vpop.eup %4268  ;;  %3012 = vst [vmem:[%s5553_s14 + $0x70] sm:$0xff] %v2980_v51  ;;  %v2891_v22 = vmax.f32 %v2849_v38, 1e-24  ;;  %v2851_v49 = vpop.xlane.xlu0 %2850 }
 0x39f   : > { %v4271_v19 = vpop.eup %4270  ;;  %v2981_v4 = vmul.f32 %v4269_v39, %v5352_v52  ;;  %v2892_v5 = vmax.f32 %v2851_v49, 1e-24 }
 0x3a0   : > { %v2982_v24 = vmul.f32 %v4271_v19, %v5374_v16  ;;  %4280 = vrsqrt.f32 %v2891_v22 }
 0x3a1   : > { %3013 = vst [vmem:[%s5553_s14 + $0x78] sm:$0xff] %v2981_v4  ;;  %4282 = vrsqrt.f32 %v2892_v5  ;;  %v2853_v55 = vpop.xlane.xlu1 %2852 }
 0x3a2   : > { %v4273_v20 = vpop.eup %4272  ;;  %3014 = vst [vmem:[%s5553_s14 + $0x80] sm:$0xff] %v2982_v24  ;;  %v2893_v25 = vmax.f32 %v2853_v55, 1e-24  ;;  %v2855_v41 = vpop.xlane.xlu0 %2854 }
 0x3a3   : > { %v4275_v45 = vpop.eup %4274  ;;  %v2983_v34 = vmul.f32 %v4273_v20, %v5371_v61  ;;  %v2894_v53 = vmax.f32 %v2855_v41, 1e-24 }
 0x3a4   : > { %v2984_v52 = vmul.f32 %v4275_v45, %v5400_v3  ;;  %4284 = vrsqrt.f32 %v2893_v25 }
 0x3a5   : > { %3015 = vst [vmem:[%s5553_s14 + $0x88] sm:$0xff] %v2983_v34  ;;  %4286 = vrsqrt.f32 %v2894_v53  ;;  %v2857_v16 = vpop.xlane.xlu1 %2856 }
 0x3a6   : > { %v4277_v46 = vpop.eup %4276  ;;  %3016 = vst [vmem:[%s5553_s14 + $0x90] sm:$0xff] %v2984_v52  ;;  %v2895_v48 = vmax.f32 %v2857_v16, 1e-24  ;;  %v2859_v8 = vpop.xlane.xlu0 %2858 }
 0x3a7   : > { %v4279_v54 = vpop.eup %4278  ;;  %v2985_v13 = vmul.f32 %v4277_v46, %v5394_v32  ;;  %v2896_v58 = vmax.f32 %v2859_v8, 1e-24 }
 0x3a8   : > { %v2986_v61 = vmul.f32 %v4279_v54, %v5416_v33  ;;  %4288 = vrsqrt.f32 %v2895_v48 }
 0x3a9   : > { %3017 = vst [vmem:[%s5553_s14 + $0x98] sm:$0xff] %v2985_v13  ;;  %4290 = vrsqrt.f32 %v2896_v58  ;;  %v2861_v3 = vpop.xlane.xlu1 %2860 }
 0x3aa   : > { %v4281_v18 = vpop.eup %4280  ;;  %3018 = vst [vmem:[%s5553_s14 + $0xa0] sm:$0xff] %v2986_v61  ;;  %v2897_v9 = vmax.f32 %v2861_v3, 1e-24  ;;  %v2863_v29 = vpop.xlane.xlu0 %2862 }
 0x3ab   : > { %v4283_v6 = vpop.eup %4282  ;;  %v2987_v31 = vmul.f32 %v4281_v18, %v5413_v57  ;;  %v2898_v35 = vmax.f32 %v2863_v29, 1e-24 }
 0x3ac   : > { %v2988_v32 = vmul.f32 %v4283_v6, %v5438_v21  ;;  %4292 = vrsqrt.f32 %v2897_v9 }
 0x3ad   : > { %3019 = vst [vmem:[%s5553_s14 + $0xa8] sm:$0xff] %v2987_v31  ;;  %4294 = vrsqrt.f32 %v2898_v35  ;;  %v2865_v33 = vpop.xlane.xlu1 %2864 }
 0x3ae   : > { %v4285_v63 = vpop.eup %4284  ;;  %3020 = vst [vmem:[%s5553_s14 + $0xb0] sm:$0xff] %v2988_v32  ;;  %v2899_v1 = vmax.f32 %v2865_v33, 1e-24  ;;  %v2867_v7 = vpop.xlane.xlu0 %2866 }
 0x3af   : > { %v4287_v2 = vpop.eup %4286  ;;  %v2989_v23 = vmul.f32 %v4285_v63, %v5434_v40  ;;  %v2900_v14 = vmax.f32 %v2867_v7, 1e-24 }
 0x3b0   : > { %v2990_v57 = vmul.f32 %v4287_v2, %v5454_v37  ;;  %4296 = vrsqrt.f32 %v2899_v1 }
 0x3b1   : > { %3021 = vst [vmem:[%s5553_s14 + $0xb8] sm:$0xff] %v2989_v23  ;;  %4298 = vrsqrt.f32 %v2900_v14  ;;  %v2869_v21 = vpop.xlane.xlu1 %2868 }
 0x3b2   : > { %v4289_v56 = vpop.eup %4288  ;;  %3022 = vst [vmem:[%s5553_s14 + $0xc0] sm:$0xff] %v2990_v57  ;;  %v2901_v27 = vmax.f32 %v2869_v21, 1e-24 }
 0x3b3   : > { %v4291_v15 = vpop.eup %4290  ;;  %v2991_v11 = vmul.f32 %v4289_v56, %v5451_v47 }
 0x3b4   : > { %v2992_v43 = vmul.f32 %v4291_v15, %v5474_v36  ;;  %4300 = vrsqrt.f32 %v2901_v27 }
 0x3b5   : > { %3023 = vst [vmem:[%s5553_s14 + $0xc8] sm:$0xff] %v2991_v11 }
 0x3b6   : > { %v4293_v40 = vpop.eup %4292  ;;  %3024 = vst [vmem:[%s5553_s14 + $0xd0] sm:$0xff] %v2992_v43 }
 0x3b7   : > { %v4295_v37 = vpop.eup %4294  ;;  %v2993_v42 = vmul.f32 %v4293_v40, %v5471_v62 }
 0x3b8   : > { %v2994_v50 = vmul.f32 %v4295_v37, %v5488_v12 }
 0x3b9   : > { %3025 = vst [vmem:[%s5553_s14 + $0xd8] sm:$0xff] %v2993_v42 }
 0x3ba   : > { %v4297_v44 = vpop.eup %4296  ;;  %3026 = vst [vmem:[%s5553_s14 + $0xe0] sm:$0xff] %v2994_v50 }
 0x3bb   : > { %v4299_v60 = vpop.eup %4298  ;;  %v2995_v0 = vmul.f32 %v4297_v44, %v5486_v10 }
 0x3bc   : > { %v2996_v47 = vmul.f32 %v4299_v60, %v5501_v28 }
 0x3bd   : > { %3027 = vst [vmem:[%s5553_s14 + $0xe8] sm:$0xff] %v2995_v0 }
 0x3be   : > { %v4301_v36 = vpop.eup %4300  ;;  %3028 = vst [vmem:[%s5553_s14 + $0xf0] sm:$0xff] %v2996_v47 }
 0x3bf   : > { %v2997_v26 = vmul.f32 %v4301_v36, %v5499_v17 }
 0x3c1   : > { %3029 = vst [vmem:[%s5553_s14 + $0xf8] sm:$0xff] %v2997_v26 }
 0x3c2 PF: > { %p3995_p4 = scmp.ge.s32.totalorder %s4380_s10, 2  ;;  %s3068_s25 = sand.u32 1, %s4360_s27  }
 0x3c3   : > { %s3069_s22 = scalar_lea.sflag [#allocation4], %s3068_s25 }
 0x3c4   : > { %p3992_p2 = pnand %p3995_p4, %p4477_p8 }
 0x3c6   : > { %4355 = dma.done.wait (!%p3992_p2), %s3069_s22, 4096  }
 0x3c7   : > { %4357 = vsyncadd (!%p3992_p2), %s3069_s22, 4294963200  ;;  %s22_s10 = sadd.s32 1, %s4380_s10   ;;  %s5652_s27 = smov %s4364_s28 }
 0x3c8   : > { %p19_p3 = scmp.ge.s32.totalorder %s22_s10, 5   ;;  %s5653_s28 = smov %s4368_s29 }
 0x3c9   : > { %s5654_s29 = smov %s4483_s18  ;;  %s5655_s30 = smov %s4376_s9 }
 0x3ca   : > { %s5656_s9 = smov %s5658_s13  ;;  %21 = sbr.rel (!%p19_p3) target bundleno = 4 (0x4), region = 107 }
 0x3d1   :  { %3082 = vsyncpa [#allocation4], 1 }
 0x3d2   :  { %3084 = vsyncpa [#allocation4 + $0x1], 1 }

// kernel: _lambda_.4
= control target key start
LH: loop header
LB: loop body
LE: loop exit
PB: predicated region body
PF: predicated region fallthrough
CT: control target
= control target key end

     0   :  { %s4613_s27 = smov 0   ;;  %s4615_s28 = smov 0   ;;  %s6122_s0 = inlined_call_operand.vmem [shape: bf16[768,768], index: 0, kind: input, shape index: {}]   ;;  %s6123_s1 = inlined_call_operand.vmem [shape: bf16[768,256], index: 1, kind: input, shape index: {}]   ;;  %s6124_s2 = inlined_call_operand.vmem [shape: f32[768,256], index: 2, kind: input, shape index: {}]   ;;  %s6125_s3 = inlined_call_operand.vmem [shape: f32[256,128], index: 3, kind: input, shape index: {}]   ;;  %s6126_s4 = inlined_call_operand.vmem [shape: f32[1,128], index: 4, kind: input, shape index: {}]   ;;  %s6127_s5 = inlined_call_operand.vmem [shape: f32[256,128], index: 5, kind: input, shape index: {}]   ;;  %s6128_s6 = inlined_call_operand.vmem [shape: f32[1,128], index: 6, kind: input, shape index: {}]   ;;  %s6129_s7 = inlined_call_operand.vmem [shape: f32[768,128], index: 7, kind: output, shape index: {0}]   ;;  %s6130_s8 = inlined_call_operand.vmem [shape: f32[768,128], index: 8, kind: output, shape index: {1}]  }
   0x1   :  { %s4617_s29 = smov 0  }
   0x2 LB: > { %s31_s30 = sadd.s32 1, %s4561_s28  ;;  %p3702_p0 = scmp.ge.s32.totalorder %s4565_s29, 1  ;;  %s4565_s29 = sphi %s4617_s29, %s19_s29   ;;  %s4561_s28 = sphi %s4615_s28, %s6168_s28   ;;  %s4557_s27 = sphi %s4613_s27, %s6167_s27  }
   0x3   : > { %p33_p1 = scmp.ge.s32.totalorder %s31_s30, 3  ;;  %p298_p2 = scmp.lt.s32.totalorder %s4565_s29, 4 }
   0x5   : > { %s6170_s30 = smov (%p33_p1, %s31_s30), 0  ;;  %p299_p3 = pnand %p3702_p0, %p298_p2 }
   0x7   : > { %302 = sbr.rel (%p299_p3) target bundleno = 1118 (0x45e), region = 48 }
   0xe   : > { %v4191_v0 = vld [vmem:[%s6123_s1 + $0x4] ss:$8 sps:$4 sm:$0xff]   ;;  %v4193_v1 = vld [vmem:[%s6123_s1] ss:$8 sps:$4 sm:$0xff]   ;;  %v4194_v2 = vld [vmem:[%s6123_s1 + $0x14] ss:$8 sps:$4 sm:$0xff]  }
   0xf   : > { %1669 = vmatprep.subr.bf16.mxu0 %v4191_v0  ;;  %4005 = vmatprep.subr.bf16.mxu1 %v4191_v0  ;;  %v4196_v3 = vld [vmem:[%s6123_s1 + $0x10] ss:$8 sps:$4 sm:$0xff]   ;;  %v4197_v4 = vld [vmem:[%s6123_s1 + $0x24] ss:$8 sps:$4 sm:$0xff]   ;;  %s3703_s19 = sshll.u32 %s4557_s27, 5 }
  0x10   : > { %1670 = vmatpush1.bf16.msra.mxu0 %v4193_v1  ;;  %4021 = vmatpush1.bf16.msra.mxu1 %v4193_v1  ;;  %v4199_v5 = vld [vmem:[%s6123_s1 + $0x20] ss:$8 sps:$4 sm:$0xff]   ;;  %p350_p4 = scmp.lt.s32.totalorder %s3703_s19, 95  ;;  %v4200_v6 = vld [vmem:[%s6123_s1 + $0x34] ss:$8 sps:$4 sm:$0xff]  }
  0x11   : > { %1671 = vmatprep.subr.bf16.mxu0 %v4194_v2  ;;  %4006 = vmatprep.subr.bf16.mxu1 %v4194_v2  ;;  %v4202_v7 = vld [vmem:[%s6123_s1 + $0x30] ss:$8 sps:$4 sm:$0xff]   ;;  %v4203_v8 = vld [vmem:[%s6123_s1 + $0x44] ss:$8 sps:$4 sm:$0xff]   ;;  %v4205_v9 = vld [vmem:[%s6123_s1 + $0x40] ss:$8 sps:$4 sm:$0xff]  }
  0x12   : > { %s6172_s19 = smov (!%p350_p4, %s3703_s19), 95  ;;  %v4206_v10 = vld [vmem:[%s6123_s1 + $0x54] ss:$8 sps:$4 sm:$0xff]   ;;  %v4208_v11 = vld [vmem:[%s6123_s1 + $0x50] ss:$8 sps:$4 sm:$0xff]  }
  0x13   : > { %s4165_s11 = smul.u32 24, %s6172_s19  ;;  %v4209_v12 = vld [vmem:[%s6123_s1 + $0x64] ss:$8 sps:$4 sm:$0xff]   ;;  %v4211_v14 = vld [vmem:[%s6123_s1 + $0x60] ss:$8 sps:$4 sm:$0xff]   ;;  %s3908_s23 = sshll.u32 %s6172_s19, 4 }
  0x14   : > { %1672 = vmatpush1.bf16.msra.mxu0 %v4196_v3  ;;  %4022 = vmatpush1.bf16.msra.mxu1 %v4196_v3  ;;  %v4212_v15 = vld [vmem:[%s6123_s1 + $0x74] ss:$8 sps:$4 sm:$0xff]   ;;  %v4214_v16 = vld [vmem:[%s6123_s1 + $0x70] ss:$8 sps:$4 sm:$0xff]   ;;  %v4215_v17 = vld [vmem:[%s6123_s1 + $0x84] ss:$8 sps:$4 sm:$0xff]   ;;  %s5529_s26 = scalar_lea.vmem %s6124_s2, %s3908_s23 }
  0x15   : > { %1673 = vmatprep.subr.bf16.mxu0 %v4197_v4  ;;  %4007 = vmatprep.subr.bf16.mxu1 %v4197_v4  ;;  %s4676_s18 = scalar_lea.vmem %s6122_s0, %s4165_s11  ;;  %v4217_v18 = vld [vmem:[%s6123_s1 + $0x80] ss:$8 sps:$4 sm:$0xff]   ;;  %v4218_v19 = vld [vmem:[%s6123_s1 + $0x94] ss:$8 sps:$4 sm:$0xff]   ;;  %v4220_v20 = vld [vmem:[%s6123_s1 + $0x90] ss:$8 sps:$4 sm:$0xff]  }
  0x16   : > { %v4241_v13 = vld [vmem:[%s4676_s18 + $0x4] ss:$24 sps:$4 sm:$0xff]   ;;  %v4223_v22 = vld [vmem:[%s6123_s1 + $0xa0] ss:$8 sps:$4 sm:$0xff]   ;;  %v4226_v24 = vld [vmem:[%s6123_s1 + $0xb0] ss:$8 sps:$4 sm:$0xff]  }
  0x17   : > { %1701 = vmatprep.mubr.bf16.mxu0 %v4241_v13  ;;  %v4221_v21 = vld [vmem:[%s6123_s1 + $0xa4] ss:$8 sps:$4 sm:$0xff]   ;;  %v4224_v23 = vld [vmem:[%s6123_s1 + $0xb4] ss:$8 sps:$4 sm:$0xff]   ;;  %v4229_v26 = vld [vmem:[%s6123_s1 + $0xc0] ss:$8 sps:$4 sm:$0xff]  }
  0x18   : > { %1674 = vmatpush1.bf16.msra.mxu0 %v4199_v5  ;;  %4023 = vmatpush1.bf16.msra.mxu1 %v4199_v5  ;;  %v4227_v25 = vld [vmem:[%s6123_s1 + $0xc4] ss:$8 sps:$4 sm:$0xff]   ;;  %v4230_v27 = vld [vmem:[%s6123_s1 + $0xd4] ss:$8 sps:$4 sm:$0xff]   ;;  %v4232_v28 = vld [vmem:[%s6123_s1 + $0xd0] ss:$8 sps:$4 sm:$0xff]  }
  0x19   : > { %1675 = vmatprep.subr.bf16.mxu0 %v4200_v6  ;;  %4008 = vmatprep.subr.bf16.mxu1 %v4200_v6  ;;  %v4233_v29 = vld [vmem:[%s6123_s1 + $0xe4] ss:$8 sps:$4 sm:$0xff]   ;;  %v4235_v30 = vld [vmem:[%s6123_s1 + $0xe0] ss:$8 sps:$4 sm:$0xff]   ;;  %v4236_v31 = vld [vmem:[%s6123_s1 + $0xf4] ss:$8 sps:$4 sm:$0xff]  }
  0x1a   : > { %v4238_v32 = vld [vmem:[%s6123_s1 + $0xf0] ss:$8 sps:$4 sm:$0xff]   ;;  %v4244_v33 = vld [vmem:[%s6123_s1 + $0x104] ss:$8 sps:$4 sm:$0xff]   ;;  %v4242_v35 = vld [vmem:[%s6123_s1 + $0x100] ss:$8 sps:$4 sm:$0xff]  }
  0x1b   : > { %v4239_v34 = vld [vmem:[%s4676_s18] ss:$24 sps:$4 sm:$0xff]   ;;  %v4248_v36 = vld [vmem:[%s4676_s18 + $0x34] ss:$24 sps:$4 sm:$0xff]   ;;  %v4250_v40 = vld [vmem:[%s4676_s18 + $0x30] ss:$24 sps:$4 sm:$0xff]  }
  0x1c   : > { %1676 = vmatpush1.bf16.msra.mxu0 %v4202_v7  ;;  %4024 = vmatpush1.bf16.msra.mxu1 %v4202_v7  ;;  %v4247_v37 = vld [vmem:[%s6123_s1 + $0x114] ss:$8 sps:$4 sm:$0xff]   ;;  %v4245_v38 = vld [vmem:[%s6123_s1 + $0x110] ss:$8 sps:$4 sm:$0xff]   ;;  %v4253_v39 = vld [vmem:[%s6123_s1 + $0x124] ss:$8 sps:$4 sm:$0xff]  }
  0x1d   : > { %1677 = vmatprep.subr.bf16.mxu0 %v4203_v8  ;;  %4009 = vmatprep.subr.bf16.mxu1 %v4203_v8  ;;  %v4251_v41 = vld [vmem:[%s6123_s1 + $0x120] ss:$8 sps:$4 sm:$0xff]   ;;  %v4257_v42 = vld [vmem:[%s4676_s18 + $0x64] ss:$24 sps:$4 sm:$0xff]   ;;  %v4254_v44 = vld [vmem:[%s6123_s1 + $0x130] ss:$8 sps:$4 sm:$0xff]  }
  0x1e   : > { %v4256_v43 = vld [vmem:[%s6123_s1 + $0x134] ss:$8 sps:$4 sm:$0xff]   ;;  %v4262_v45 = vld [vmem:[%s6123_s1 + $0x144] ss:$8 sps:$4 sm:$0xff]   ;;  %v4259_v46 = vld [vmem:[%s4676_s18 + $0x60] ss:$24 sps:$4 sm:$0xff]  }
  0x1f   : > { %v4260_v47 = vld [vmem:[%s6123_s1 + $0x140] ss:$8 sps:$4 sm:$0xff]   ;;  %v4266_v48 = vld [vmem:[%s4676_s18 + $0x94] ss:$24 sps:$4 sm:$0xff]   ;;  %v4263_v50 = vld [vmem:[%s6123_s1 + $0x150] ss:$8 sps:$4 sm:$0xff]  }
  0x20   : > { %1678 = vmatpush1.bf16.msra.mxu0 %v4205_v9  ;;  %4025 = vmatpush1.bf16.msra.mxu1 %v4205_v9  ;;  %v4265_v49 = vld [vmem:[%s6123_s1 + $0x154] ss:$8 sps:$4 sm:$0xff]   ;;  %v4271_v51 = vld [vmem:[%s6123_s1 + $0x164] ss:$8 sps:$4 sm:$0xff]   ;;  %v4268_v52 = vld [vmem:[%s4676_s18 + $0x90] ss:$24 sps:$4 sm:$0xff]  }
  0x21   : > { %1679 = vmatprep.subr.bf16.mxu0 %v4206_v10  ;;  %4010 = vmatprep.subr.bf16.mxu1 %v4206_v10  ;;  %v4269_v53 = vld [vmem:[%s6123_s1 + $0x160] ss:$8 sps:$4 sm:$0xff]   ;;  %v4275_v54 = vld [vmem:[%s4676_s18 + $0xc4] ss:$24 sps:$4 sm:$0xff]   ;;  %v4272_v56 = vld [vmem:[%s6123_s1 + $0x170] ss:$8 sps:$4 sm:$0xff]  }
  0x22   : > { %v4274_v55 = vld [vmem:[%s6123_s1 + $0x174] ss:$8 sps:$4 sm:$0xff]   ;;  %v4280_v57 = vld [vmem:[%s6123_s1 + $0x184] ss:$8 sps:$4 sm:$0xff]   ;;  %v4277_v58 = vld [vmem:[%s4676_s18 + $0xc0] ss:$24 sps:$4 sm:$0xff]  }
  0x23   : > { %v4278_v59 = vld [vmem:[%s6123_s1 + $0x180] ss:$8 sps:$4 sm:$0xff]   ;;  %v4284_v60 = vld [vmem:[%s4676_s18 + $0xf4] ss:$24 sps:$4 sm:$0xff]   ;;  %v4281_v62 = vld [vmem:[%s6123_s1 + $0x190] ss:$8 sps:$4 sm:$0xff]  }
  0x24   : > { %1680 = vmatpush1.bf16.msra.mxu0 %v4208_v11  ;;  %4026 = vmatpush1.bf16.msra.mxu1 %v4208_v11  ;;  %v4283_v61 = vld [vmem:[%s6123_s1 + $0x194] ss:$8 sps:$4 sm:$0xff]   ;;  %v4289_v63 = vld [vmem:[%s6123_s1 + $0x1a4] ss:$8 sps:$4 sm:$0xff]   ;;  %v4286_v0 = vld [vmem:[%s4676_s18 + $0xf0] ss:$24 sps:$4 sm:$0xff]  }
  0x25   : > { %1681 = vmatprep.subr.bf16.mxu0 %v4209_v12  ;;  %4011 = vmatprep.subr.bf16.mxu1 %v4209_v12  ;;  %v4287_v1 = vld [vmem:[%s6123_s1 + $0x1a0] ss:$8 sps:$4 sm:$0xff]   ;;  %v4293_v2 = vld [vmem:[%s4676_s18 + $0x124] ss:$24 sps:$4 sm:$0xff]   ;;  %v4290_v4 = vld [vmem:[%s6123_s1 + $0x1b0] ss:$8 sps:$4 sm:$0xff]  }
  0x26   : > { %v4292_v3 = vld [vmem:[%s6123_s1 + $0x1b4] ss:$8 sps:$4 sm:$0xff]   ;;  %v4298_v5 = vld [vmem:[%s6123_s1 + $0x1c4] ss:$8 sps:$4 sm:$0xff]   ;;  %v4295_v6 = vld [vmem:[%s4676_s18 + $0x120] ss:$24 sps:$4 sm:$0xff]  }
  0x27   : > { %v4296_v7 = vld [vmem:[%s6123_s1 + $0x1c0] ss:$8 sps:$4 sm:$0xff]   ;;  %v4302_v8 = vld [vmem:[%s4676_s18 + $0x154] ss:$24 sps:$4 sm:$0xff]   ;;  %v4299_v10 = vld [vmem:[%s6123_s1 + $0x1d0] ss:$8 sps:$4 sm:$0xff]  }
  0x28   : > { %1682 = vmatpush1.bf16.msra.mxu0 %v4211_v14  ;;  %4027 = vmatpush1.bf16.msra.mxu1 %v4211_v14  ;;  %v4301_v9 = vld [vmem:[%s6123_s1 + $0x1d4] ss:$8 sps:$4 sm:$0xff]   ;;  %v4307_v11 = vld [vmem:[%s6123_s1 + $0x1e4] ss:$8 sps:$4 sm:$0xff]   ;;  %v4304_v12 = vld [vmem:[%s4676_s18 + $0x150] ss:$24 sps:$4 sm:$0xff]  }
  0x29   : > { %1683 = vmatprep.subr.bf16.mxu0 %v4212_v15  ;;  %4012 = vmatprep.subr.bf16.mxu1 %v4212_v15  ;;  %v4305_v13 = vld [vmem:[%s6123_s1 + $0x1e0] ss:$8 sps:$4 sm:$0xff]   ;;  %v4313_v14 = vld [vmem:[%s4676_s18 + $0xc] ss:$24 sps:$4 sm:$0xff]   ;;  %v4310_v15 = vld [vmem:[%s6123_s1 + $0x1f4] ss:$8 sps:$4 sm:$0xff]  }
  0x2c   : > { %1684 = vmatpush1.bf16.msra.mxu0 %v4214_v16  ;;  %4028 = vmatpush1.bf16.msra.mxu1 %v4214_v16  ;;  %v4308_v16 = vld [vmem:[%s6123_s1 + $0x1f0] ss:$8 sps:$4 sm:$0xff]  }
  0x2d   : > { %1685 = vmatprep.subr.bf16.mxu0 %v4215_v17  ;;  %4013 = vmatprep.subr.bf16.mxu1 %v4215_v17  ;;  %v4316_v17 = vld [vmem:[%s6123_s1 + $0x204] ss:$8 sps:$4 sm:$0xff]  }
  0x30   : > { %1686 = vmatpush1.bf16.msra.mxu0 %v4217_v18  ;;  %4029 = vmatpush1.bf16.msra.mxu1 %v4217_v18  ;;  %v4311_v18 = vld [vmem:[%s4676_s18 + $0x8] ss:$24 sps:$4 sm:$0xff]  }
  0x31   : > { %1687 = vmatprep.subr.bf16.mxu0 %v4218_v19  ;;  %4014 = vmatprep.subr.bf16.mxu1 %v4218_v19  ;;  %v4314_v19 = vld [vmem:[%s6123_s1 + $0x200] ss:$8 sps:$4 sm:$0xff]  }
  0x34   : > { %1688 = vmatpush1.bf16.msra.mxu0 %v4220_v20  ;;  %4030 = vmatpush1.bf16.msra.mxu1 %v4220_v20  ;;  %v4317_v20 = vld [vmem:[%s4676_s18 + $0x3c] ss:$24 sps:$4 sm:$0xff]  }
  0x35   : > { %1689 = vmatprep.subr.bf16.mxu0 %v4221_v21  ;;  %4015 = vmatprep.subr.bf16.mxu1 %v4221_v21  ;;  %v4322_v21 = vld [vmem:[%s6123_s1 + $0x214] ss:$8 sps:$4 sm:$0xff]  }
  0x38   : > { %1690 = vmatpush1.bf16.msra.mxu0 %v4223_v22  ;;  %4031 = vmatpush1.bf16.msra.mxu1 %v4223_v22  ;;  %v4320_v22 = vld [vmem:[%s6123_s1 + $0x210] ss:$8 sps:$4 sm:$0xff]  }
  0x39   : > { %1691 = vmatprep.subr.bf16.mxu0 %v4224_v23  ;;  %4016 = vmatprep.subr.bf16.mxu1 %v4224_v23  ;;  %v4328_v23 = vld [vmem:[%s6123_s1 + $0x224] ss:$8 sps:$4 sm:$0xff]  }
  0x3c   : > { %1692 = vmatpush1.bf16.msra.mxu0 %v4226_v24  ;;  %4032 = vmatpush1.bf16.msra.mxu1 %v4226_v24  ;;  %v4319_v24 = vld [vmem:[%s4676_s18 + $0x38] ss:$24 sps:$4 sm:$0xff]  }
  0x3d   : > { %1693 = vmatprep.subr.bf16.mxu0 %v4227_v25  ;;  %4017 = vmatprep.subr.bf16.mxu1 %v4227_v25  ;;  %v4323_v25 = vld [vmem:[%s4676_s18 + $0x6c] ss:$24 sps:$4 sm:$0xff]  }
  0x40   : > { %1694 = vmatpush1.bf16.msra.mxu0 %v4229_v26  ;;  %4033 = vmatpush1.bf16.msra.mxu1 %v4229_v26  ;;  %v4326_v26 = vld [vmem:[%s6123_s1 + $0x220] ss:$8 sps:$4 sm:$0xff]  }
  0x41   : > { %1695 = vmatprep.subr.bf16.mxu0 %v4230_v27  ;;  %4018 = vmatprep.subr.bf16.mxu1 %v4230_v27  ;;  %v4334_v27 = vld [vmem:[%s6123_s1 + $0x234] ss:$8 sps:$4 sm:$0xff]  }
  0x44   : > { %1696 = vmatpush1.bf16.msra.mxu0 %v4232_v28  ;;  %4034 = vmatpush1.bf16.msra.mxu1 %v4232_v28  ;;  %v4332_v28 = vld [vmem:[%s6123_s1 + $0x230] ss:$8 sps:$4 sm:$0xff]  }
  0x45   : > { %1697 = vmatprep.subr.bf16.mxu0 %v4233_v29  ;;  %4019 = vmatprep.subr.bf16.mxu1 %v4233_v29  ;;  %v4340_v29 = vld [vmem:[%s6123_s1 + $0x244] ss:$8 sps:$4 sm:$0xff]  }
  0x48   : > { %1698 = vmatpush1.bf16.msra.mxu0 %v4235_v30  ;;  %4035 = vmatpush1.bf16.msra.mxu1 %v4235_v30  ;;  %v4325_v30 = vld [vmem:[%s4676_s18 + $0x68] ss:$24 sps:$4 sm:$0xff]  }
  0x49   : > { %1699 = vmatprep.subr.bf16.mxu0 %v4236_v31  ;;  %4020 = vmatprep.subr.bf16.mxu1 %v4236_v31  ;;  %v4329_v31 = vld [vmem:[%s4676_s18 + $0x9c] ss:$24 sps:$4 sm:$0xff]  }
  0x4c   : > { %1700 = vmatpush1.bf16.msra.mxu0 %v4238_v32  ;;  %4036 = vmatpush1.bf16.msra.mxu1 %v4238_v32  ;;  %v4338_v32 = vld [vmem:[%s6123_s1 + $0x240] ss:$8 sps:$4 sm:$0xff]  }
  0x4d   : > { %1862 = vmatprep.subr.bf16.mxu0 %v4244_v33  ;;  %v4346_v33 = vld [vmem:[%s6123_s1 + $0x254] ss:$8 sps:$4 sm:$0xff]  }
  0x4f   : > { %1702 = vmatmul.mubr.bf16.vlgmr.msra.gmra.mrb[0].mxu0 %v4239_v34  ;;  %v4344_v34 = vld [vmem:[%s6123_s1 + $0x250] ss:$8 sps:$4 sm:$0xff]  }
  0x50   : > { %1863 = vmatpush1.bf16.msra.mxu0 %v4242_v35  ;;  %1711 = vmatprep.mubr.bf16.mxu0 %v4248_v36  ;;  %v4352_v35 = vld [vmem:[%s6123_s1 + $0x264] ss:$8 sps:$4 sm:$0xff]   ;;  %v4331_v36 = vld [vmem:[%s4676_s18 + $0x98] ss:$24 sps:$4 sm:$0xff]  }
  0x51   : > { %1864 = vmatprep.subr.bf16.mxu0 %v4247_v37  ;;  %v4335_v37 = vld [vmem:[%s4676_s18 + $0xcc] ss:$24 sps:$4 sm:$0xff]  }
  0x54   : > { %1865 = vmatpush1.bf16.msra.mxu0 %v4245_v38  ;;  %v4350_v38 = vld [vmem:[%s6123_s1 + $0x260] ss:$8 sps:$4 sm:$0xff]  }
  0x55   : > { %1866 = vmatprep.subr.bf16.mxu0 %v4253_v39  ;;  %v4358_v39 = vld [vmem:[%s6123_s1 + $0x274] ss:$8 sps:$4 sm:$0xff]  }
  0x57   : > { %1712 = vmatmul.mubr.bf16.gmra.mrb[4].mxu0 %v4250_v40  ;;  %v4356_v40 = vld [vmem:[%s6123_s1 + $0x270] ss:$8 sps:$4 sm:$0xff]  }
  0x58   : > { %1867 = vmatpush1.bf16.msra.mxu0 %v4251_v41  ;;  %1721 = vmatprep.mubr.bf16.mxu0 %v4257_v42  ;;  %v4364_v41 = vld [vmem:[%s6123_s1 + $0x284] ss:$8 sps:$4 sm:$0xff]   ;;  %v4337_v42 = vld [vmem:[%s4676_s18 + $0xc8] ss:$24 sps:$4 sm:$0xff]  }
  0x59   : > { %1868 = vmatprep.subr.bf16.mxu0 %v4256_v43  ;;  %v4341_v43 = vld [vmem:[%s4676_s18 + $0xfc] ss:$24 sps:$4 sm:$0xff]  }
  0x5c   : > { %1869 = vmatpush1.bf16.msra.mxu0 %v4254_v44  ;;  %v4362_v44 = vld [vmem:[%s6123_s1 + $0x280] ss:$8 sps:$4 sm:$0xff]  }
  0x5d   : > { %1870 = vmatprep.subr.bf16.mxu0 %v4262_v45  ;;  %v4370_v45 = vld [vmem:[%s6123_s1 + $0x294] ss:$8 sps:$4 sm:$0xff]  }
  0x5f   : > { %1722 = vmatmul.mubr.bf16.gmra.mrb[8].mxu0 %v4259_v46  ;;  %v4368_v46 = vld [vmem:[%s6123_s1 + $0x290] ss:$8 sps:$4 sm:$0xff]  }
  0x60   : > { %1871 = vmatpush1.bf16.msra.mxu0 %v4260_v47  ;;  %1731 = vmatprep.mubr.bf16.mxu0 %v4266_v48  ;;  %v4376_v47 = vld [vmem:[%s6123_s1 + $0x2a4] ss:$8 sps:$4 sm:$0xff]   ;;  %v4343_v48 = vld [vmem:[%s4676_s18 + $0xf8] ss:$24 sps:$4 sm:$0xff]  }
  0x61   : > { %1872 = vmatprep.subr.bf16.mxu0 %v4265_v49  ;;  %v4347_v49 = vld [vmem:[%s4676_s18 + $0x12c] ss:$24 sps:$4 sm:$0xff]  }
  0x64   : > { %1873 = vmatpush1.bf16.msra.mxu0 %v4263_v50  ;;  %v4374_v50 = vld [vmem:[%s6123_s1 + $0x2a0] ss:$8 sps:$4 sm:$0xff]  }
  0x65   : > { %1874 = vmatprep.subr.bf16.mxu0 %v4271_v51  ;;  %v4382_v51 = vld [vmem:[%s6123_s1 + $0x2b4] ss:$8 sps:$4 sm:$0xff]  }
  0x67   : > { %1732 = vmatmul.mubr.bf16.gmra.mrb[12].mxu0 %v4268_v52  ;;  %v4380_v52 = vld [vmem:[%s6123_s1 + $0x2b0] ss:$8 sps:$4 sm:$0xff]  }
  0x68   : > { %1875 = vmatpush1.bf16.msra.mxu0 %v4269_v53  ;;  %1741 = vmatprep.mubr.bf16.mxu0 %v4275_v54  ;;  %v4388_v53 = vld [vmem:[%s6123_s1 + $0x2c4] ss:$8 sps:$4 sm:$0xff]   ;;  %v4349_v54 = vld [vmem:[%s4676_s18 + $0x128] ss:$24 sps:$4 sm:$0xff]  }
  0x69   : > { %1876 = vmatprep.subr.bf16.mxu0 %v4274_v55  ;;  %v4353_v55 = vld [vmem:[%s4676_s18 + $0x15c] ss:$24 sps:$4 sm:$0xff]  }
  0x6c   : > { %1877 = vmatpush1.bf16.msra.mxu0 %v4272_v56  ;;  %v4386_v56 = vld [vmem:[%s6123_s1 + $0x2c0] ss:$8 sps:$4 sm:$0xff]  }
  0x6d   : > { %1878 = vmatprep.subr.bf16.mxu0 %v4280_v57  ;;  %v4394_v57 = vld [vmem:[%s6123_s1 + $0x2d4] ss:$8 sps:$4 sm:$0xff]  }
  0x6f   : > { %1742 = vmatmul.mubr.bf16.gmra.mrb[16].mxu0 %v4277_v58  ;;  %v4392_v58 = vld [vmem:[%s6123_s1 + $0x2d0] ss:$8 sps:$4 sm:$0xff]  }
  0x70   : > { %1879 = vmatpush1.bf16.msra.mxu0 %v4278_v59  ;;  %1751 = vmatprep.mubr.bf16.mxu0 %v4284_v60  ;;  %v4400_v59 = vld [vmem:[%s6123_s1 + $0x2e4] ss:$8 sps:$4 sm:$0xff]   ;;  %v4355_v60 = vld [vmem:[%s4676_s18 + $0x158] ss:$24 sps:$4 sm:$0xff]  }
  0x71   : > { %1880 = vmatprep.subr.bf16.mxu0 %v4283_v61  ;;  %v4359_v61 = vld [vmem:[%s4676_s18 + $0x18c] ss:$24 sps:$4 sm:$0xff]  }
  0x74   : > { %1881 = vmatpush1.bf16.msra.mxu0 %v4281_v62  ;;  %v4398_v62 = vld [vmem:[%s6123_s1 + $0x2e0] ss:$8 sps:$4 sm:$0xff]  }
  0x75   : > { %1882 = vmatprep.subr.bf16.mxu0 %v4289_v63  ;;  %v4406_v63 = vld [vmem:[%s6123_s1 + $0x2f4] ss:$8 sps:$4 sm:$0xff]  }
  0x77   : > { %1752 = vmatmul.mubr.bf16.gmra.mrb[20].mxu0 %v4286_v0  ;;  %v4431_v0 = vld [vmem:[%s4676_s18 + $0x180] ss:$24 sps:$4 sm:$0xff]  }
  0x78   : > { %1883 = vmatpush1.bf16.msra.mxu0 %v4287_v1  ;;  %1761 = vmatprep.mubr.bf16.mxu0 %v4293_v2  ;;  %v4433_v1 = vld [vmem:[%s4676_s18 + $0x184] ss:$24 sps:$4 sm:$0xff]   ;;  %v4404_v2 = vld [vmem:[%s6123_s1 + $0x2f0] ss:$8 sps:$4 sm:$0xff]  }
  0x79   : > { %1884 = vmatprep.subr.bf16.mxu0 %v4292_v3  ;;  %1781 = vmatprep.mubr.bf16.mxu1 %v4433_v1  ;;  %v4361_v3 = vld [vmem:[%s4676_s18 + $0x188] ss:$24 sps:$4 sm:$0xff]  }
  0x7a   : > { %1782 = vmatmul.mubr.bf16.vlgmr.msra.gmra.mrb[0].mxu1 %v4431_v0  ;;  %v4418_v0 = vld [vmem:[%s4676_s18 + $0xa0] ss:$24 sps:$4 sm:$0xff]  }
  0x7b   : > { %v2523_v1 = vld [vmem:[%s6125_s3 + $0x80] sm:$0xff] }
  0x7c   : > { %1885 = vmatpush1.bf16.msra.mxu0 %v4290_v4  ;;  %v4365_v4 = vld [vmem:[%s4676_s18 + $0x1bc] ss:$24 sps:$4 sm:$0xff]  }
  0x7d   : > { %1886 = vmatprep.subr.bf16.mxu0 %v4298_v5  ;;  %v4437_v5 = vld [vmem:[%s4676_s18 + $0x1b4] ss:$24 sps:$4 sm:$0xff]  }
  0x7e   : > { %1791 = vmatprep.mubr.bf16.mxu1 %v4437_v5  ;;  %v2525_v5 = vld [vmem:[%s6125_s3 + $0x90] sm:$0xff] }
  0x7f   : > { %1762 = vmatmul.mubr.bf16.gmra.mrb[24].mxu0 %v4295_v6  ;;  %v4439_v6 = vld [vmem:[%s4676_s18 + $0x1b0] ss:$24 sps:$4 sm:$0xff]  }
  0x80   : > { %1887 = vmatpush1.bf16.msra.mxu0 %v4296_v7  ;;  %1771 = vmatprep.mubr.bf16.mxu0 %v4302_v8  ;;  %v4367_v7 = vld [vmem:[%s4676_s18 + $0x1b8] ss:$24 sps:$4 sm:$0xff]   ;;  %v4371_v8 = vld [vmem:[%s4676_s18 + $0x1ec] ss:$24 sps:$4 sm:$0xff]  }
  0x81   : > { %1888 = vmatprep.subr.bf16.mxu0 %v4301_v9  ;;  %v4443_v9 = vld [vmem:[%s4676_s18 + $0x1e4] ss:$24 sps:$4 sm:$0xff]  }
  0x82   : > { %1792 = vmatmul.mubr.bf16.gmra.mrb[4].mxu1 %v4439_v6  ;;  %v2526_v6 = vld [vmem:[%s6125_s3 + $0x98] sm:$0xff] }
  0x83   : > { %1801 = vmatprep.mubr.bf16.mxu1 %v4443_v9  ;;  %v2527_v9 = vld [vmem:[%s6125_s3 + $0xa0] sm:$0xff] }
  0x84   : > { %1889 = vmatpush1.bf16.msra.mxu0 %v4299_v10  ;;  %v4445_v10 = vld [vmem:[%s4676_s18 + $0x1e0] ss:$24 sps:$4 sm:$0xff]  }
  0x85   : > { %1890 = vmatprep.subr.bf16.mxu0 %v4307_v11  ;;  %v4373_v11 = vld [vmem:[%s4676_s18 + $0x1e8] ss:$24 sps:$4 sm:$0xff]  }
  0x87   : > { %1772 = vmatmul.mubr.bf16.gmra.mrb[28].mxu0 %v4304_v12  ;;  %v4377_v12 = vld [vmem:[%s4676_s18 + $0x21c] ss:$24 sps:$4 sm:$0xff]  }
  0x88   : > { %1891 = vmatpush1.bf16.msra.mxu0 %v4305_v13  ;;  %1894 = vmatprep.mubr.bf16.mxu0 %v4313_v14  ;;  %v4449_v13 = vld [vmem:[%s4676_s18 + $0x214] ss:$24 sps:$4 sm:$0xff]   ;;  %v4451_v14 = vld [vmem:[%s4676_s18 + $0x210] ss:$24 sps:$4 sm:$0xff]  }
  0x89   : > { %1892 = vmatprep.subr.bf16.mxu0 %v4310_v15  ;;  %v4379_v15 = vld [vmem:[%s4676_s18 + $0x218] ss:$24 sps:$4 sm:$0xff]  }
  0x8a   : > { %1802 = vmatmul.mubr.bf16.gmra.mrb[8].mxu1 %v4445_v10  ;;  %v2528_v10 = vld [vmem:[%s6125_s3 + $0xa8] sm:$0xff] }
  0x8b   : > { %1811 = vmatprep.mubr.bf16.mxu1 %v4449_v13  ;;  %v2529_v13 = vld [vmem:[%s6125_s3 + $0xb0] sm:$0xff] }
  0x8c   : > { %1893 = vmatpush1.bf16.msra.mxu0 %v4308_v16  ;;  %v4383_v16 = vld [vmem:[%s4676_s18 + $0x24c] ss:$24 sps:$4 sm:$0xff]  }
  0x8d   : > { %2055 = vmatprep.subr.bf16.mxu0 %v4316_v17  ;;  %v4455_v17 = vld [vmem:[%s4676_s18 + $0x244] ss:$24 sps:$4 sm:$0xff]  }
  0x8f   : > { %1895 = vmatmul.mubr.bf16.vlgmr.msra.gmra.mrb[0].mxu0 %v4311_v18  ;;  %v4457_v18 = vld [vmem:[%s4676_s18 + $0x240] ss:$24 sps:$4 sm:$0xff]  }
  0x90   : > { %2056 = vmatpush1.bf16.msra.mxu0 %v4314_v19  ;;  %1904 = vmatprep.mubr.bf16.mxu0 %v4317_v20  ;;  %v4385_v19 = vld [vmem:[%s4676_s18 + $0x248] ss:$24 sps:$4 sm:$0xff]   ;;  %v4389_v20 = vld [vmem:[%s4676_s18 + $0x27c] ss:$24 sps:$4 sm:$0xff]  }
  0x91   : > { %2057 = vmatprep.subr.bf16.mxu0 %v4322_v21  ;;  %v4461_v21 = vld [vmem:[%s4676_s18 + $0x274] ss:$24 sps:$4 sm:$0xff]  }
  0x92   : > { %1812 = vmatmul.mubr.bf16.gmra.mrb[12].mxu1 %v4451_v14  ;;  %v2530_v14 = vld [vmem:[%s6125_s3 + $0xb8] sm:$0xff] }
  0x93   : > { %1821 = vmatprep.mubr.bf16.mxu1 %v4455_v17  ;;  %v2531_v17 = vld [vmem:[%s6125_s3 + $0xc0] sm:$0xff] }
  0x94   : > { %2058 = vmatpush1.bf16.msra.mxu0 %v4320_v22  ;;  %v4463_v22 = vld [vmem:[%s4676_s18 + $0x270] ss:$24 sps:$4 sm:$0xff]  }
  0x95   : > { %2059 = vmatprep.subr.bf16.mxu0 %v4328_v23  ;;  %v4391_v23 = vld [vmem:[%s4676_s18 + $0x278] ss:$24 sps:$4 sm:$0xff]  }
  0x97   : > { %1905 = vmatmul.mubr.bf16.gmra.mrb[4].mxu0 %v4319_v24  ;;  %v4395_v24 = vld [vmem:[%s4676_s18 + $0x2ac] ss:$24 sps:$4 sm:$0xff]  }
  0x98   : > { %1914 = vmatprep.mubr.bf16.mxu0 %v4323_v25  ;;  %2060 = vmatpush1.bf16.msra.mxu0 %v4326_v26  ;;  %v4467_v25 = vld [vmem:[%s4676_s18 + $0x2a4] ss:$24 sps:$4 sm:$0xff]   ;;  %v4469_v26 = vld [vmem:[%s4676_s18 + $0x2a0] ss:$24 sps:$4 sm:$0xff]  }
  0x99   : > { %2061 = vmatprep.subr.bf16.mxu0 %v4334_v27  ;;  %v4397_v27 = vld [vmem:[%s4676_s18 + $0x2a8] ss:$24 sps:$4 sm:$0xff]  }
  0x9a   : > { %1822 = vmatmul.mubr.bf16.gmra.mrb[16].mxu1 %v4457_v18  ;;  %v2532_v18 = vld [vmem:[%s6125_s3 + $0xc8] sm:$0xff] }
  0x9b   : > { %1831 = vmatprep.mubr.bf16.mxu1 %v4461_v21  ;;  %v2533_v21 = vld [vmem:[%s6125_s3 + $0xd0] sm:$0xff] }
  0x9c   : > { %2062 = vmatpush1.bf16.msra.mxu0 %v4332_v28  ;;  %v4401_v28 = vld [vmem:[%s4676_s18 + $0x2dc] ss:$24 sps:$4 sm:$0xff]  }
  0x9d   : > { %2063 = vmatprep.subr.bf16.mxu0 %v4340_v29  ;;  %v4473_v29 = vld [vmem:[%s4676_s18 + $0x2d4] ss:$24 sps:$4 sm:$0xff]  }
  0x9f   : > { %1915 = vmatmul.mubr.bf16.gmra.mrb[8].mxu0 %v4325_v30  ;;  %v4475_v30 = vld [vmem:[%s4676_s18 + $0x2d0] ss:$24 sps:$4 sm:$0xff]  }
  0xa0   : > { %1924 = vmatprep.mubr.bf16.mxu0 %v4329_v31  ;;  %2064 = vmatpush1.bf16.msra.mxu0 %v4338_v32  ;;  %v4403_v31 = vld [vmem:[%s4676_s18 + $0x2d8] ss:$24 sps:$4 sm:$0xff]   ;;  %v4409_v32 = vld [vmem:[%s4676_s18 + $0x14] ss:$24 sps:$4 sm:$0xff]  }
  0xa1   : > { %2065 = vmatprep.subr.bf16.mxu0 %v4346_v33  ;;  %v2507_v33 = vld [vmem:[%s6125_s3] sm:$0xff] }
  0xa2   : > { %1832 = vmatmul.mubr.bf16.gmra.mrb[20].mxu1 %v4463_v22  ;;  %v2534_v22 = vld [vmem:[%s6125_s3 + $0xd8] sm:$0xff] }
  0xa3   : > { %1841 = vmatprep.mubr.bf16.mxu1 %v4467_v25  ;;  %v2535_v25 = vld [vmem:[%s6125_s3 + $0xe0] sm:$0xff] }
  0xa4   : > { %2066 = vmatpush1.bf16.msra.mxu0 %v4344_v34  ;;  %v2508_v34 = vld [vmem:[%s6125_s3 + $0x8] sm:$0xff] }
  0xa5   : > { %2067 = vmatprep.subr.bf16.mxu0 %v4352_v35  ;;  %v2509_v35 = vld [vmem:[%s6125_s3 + $0x10] sm:$0xff] }
  0xa7   : > { %1925 = vmatmul.mubr.bf16.gmra.mrb[12].mxu0 %v4331_v36  ;;  %v4567_v36 = vmov 0.0|0.0  }
  0xa8   : > { %1934 = vmatprep.mubr.bf16.mxu0 %v4335_v37  ;;  %2068 = vmatpush1.bf16.msra.mxu0 %v4350_v38  ;;  %v3910_v37 = vpack.c.bf16 %v2508_v34, %v2507_v33  ;;  %v2510_v38 = vld [vmem:[%s6125_s3 + $0x18] sm:$0xff]  ;;  %v4446_v34 = vld [vmem:[%s4676_s18 + $0x1f4] ss:$24 sps:$4 sm:$0xff]  }
  0xa9   : > { %2069 = vmatprep.subr.bf16.mxu0 %v4358_v39  ;;  %3909 = vmatprep.subr.bf16.mxu1 %v4567_v36  ;;  %v3913_v39 = vpack.c.bf16 %v2510_v38, %v2509_v35  ;;  %v4442_v33 = vld [vmem:[%s4676_s18 + $0x1c0] ss:$24 sps:$4 sm:$0xff]   ;;  %v4448_v35 = vld [vmem:[%s4676_s18 + $0x1f0] ss:$24 sps:$4 sm:$0xff]  }
  0xaa   : > { %1842 = vmatmul.mubr.bf16.gmra.mrb[24].mxu1 %v4469_v26  ;;  %v2536_v26 = vld [vmem:[%s6125_s3 + $0xe8] sm:$0xff]  ;;  %v2537_v38 = vld [vmem:[%s6125_s3 + $0xf0] sm:$0xff] }
  0xab   : > { %1851 = vmatprep.mubr.bf16.mxu1 %v4473_v29  ;;  %3911 = vmatpush1.bf16.msra.mxu1 %v3910_v37  ;;  %v4430_v29 = vld [vmem:[%s4676_s18 + $0x160] ss:$24 sps:$4 sm:$0xff]   ;;  %v4452_v37 = vld [vmem:[%s4676_s18 + $0x224] ss:$24 sps:$4 sm:$0xff]  }
  0xac   : > { %2070 = vmatpush1.bf16.msra.mxu0 %v4356_v40  ;;  %v4407_v40 = vld [vmem:[%s4676_s18 + $0x10] ss:$24 sps:$4 sm:$0xff]   ;;  %3912 = vmatprep.subr.bf16.mxu1 %v4567_v36 }
  0xad   : > { %2071 = vmatprep.subr.bf16.mxu0 %v4364_v41  ;;  %v2511_v41 = vld [vmem:[%s6125_s3 + $0x20] sm:$0xff] }
  0xaf   : > { %1935 = vmatmul.mubr.bf16.gmra.mrb[16].mxu0 %v4337_v42  ;;  %v2512_v42 = vld [vmem:[%s6125_s3 + $0x28] sm:$0xff]  ;;  %3914 = vmatpush1.bf16.msra.mxu1 %v3913_v39  ;;  %v2538_v39 = vld [vmem:[%s6125_s3 + $0xf8] sm:$0xff] }
  0xb0   : > { %1944 = vmatprep.mubr.bf16.mxu0 %v4341_v43  ;;  %2072 = vmatpush1.bf16.msra.mxu0 %v4362_v44  ;;  %v4410_v43 = vld [vmem:[%s4676_s18 + $0x44] ss:$24 sps:$4 sm:$0xff]   ;;  %v3916_v44 = vpack.c.bf16 %v2512_v42, %v2511_v41  ;;  %v4454_v41 = vld [vmem:[%s4676_s18 + $0x220] ss:$24 sps:$4 sm:$0xff]   ;;  %v4458_v42 = vld [vmem:[%s4676_s18 + $0x254] ss:$24 sps:$4 sm:$0xff]  }
  0xb1   : > { %2073 = vmatprep.subr.bf16.mxu0 %v4370_v45  ;;  %3915 = vmatprep.subr.bf16.mxu1 %v4567_v36  ;;  %v2513_v45 = vld [vmem:[%s6125_s3 + $0x30] sm:$0xff] }
  0xb2   : > { %1852 = vmatmul.mubr.bf16.gmra.mrb[28].mxu1 %v4475_v30  ;;  %v4434_v30 = vld [vmem:[%s4676_s18 + $0x194] ss:$24 sps:$4 sm:$0xff]  }
  0xb3   : > { %3917 = vmatpush1.bf16.msra.mxu1 %v3916_v44  ;;  %v4464_v44 = vld [vmem:[%s4676_s18 + $0x284] ss:$24 sps:$4 sm:$0xff]  }
  0xb4   : > { %2074 = vmatpush1.bf16.msra.mxu0 %v4368_v46  ;;  %v2514_v46 = vld [vmem:[%s6125_s3 + $0x38] sm:$0xff]  ;;  %3918 = vmatprep.subr.bf16.mxu1 %v4567_v36 }
  0xb5   : > { %2075 = vmatprep.subr.bf16.mxu0 %v4376_v47  ;;  %v3919_v47 = vpack.c.bf16 %v2514_v46, %v2513_v45  ;;  %v4466_v45 = vld [vmem:[%s4676_s18 + $0x280] ss:$24 sps:$4 sm:$0xff]   ;;  %v4470_v46 = vld [vmem:[%s4676_s18 + $0x2b4] ss:$24 sps:$4 sm:$0xff]  }
  0xb7   : > { %1945 = vmatmul.mubr.bf16.gmra.mrb[20].mxu0 %v4343_v48  ;;  %v4412_v48 = vld [vmem:[%s4676_s18 + $0x40] ss:$24 sps:$4 sm:$0xff]   ;;  %3920 = vmatpush1.bf16.msra.mxu1 %v3919_v47  ;;  %v4472_v47 = vld [vmem:[%s4676_s18 + $0x2b0] ss:$24 sps:$4 sm:$0xff]  }
  0xb8   : > { %1954 = vmatprep.mubr.bf16.mxu0 %v4347_v49  ;;  %2076 = vmatpush1.bf16.msra.mxu0 %v4374_v50  ;;  %v2515_v49 = vld [vmem:[%s6125_s3 + $0x40] sm:$0xff]  ;;  %v2516_v50 = vld [vmem:[%s6125_s3 + $0x48] sm:$0xff] }
  0xb9   : > { %2077 = vmatprep.subr.bf16.mxu0 %v4382_v51  ;;  %v4413_v51 = vld [vmem:[%s4676_s18 + $0x74] ss:$24 sps:$4 sm:$0xff]   ;;  %3921 = vmatprep.subr.bf16.mxu1 %v4567_v36 }
  0xbc   : > { %2078 = vmatpush1.bf16.msra.mxu0 %v4380_v52  ;;  %v3922_v52 = vpack.c.bf16 %v2516_v50, %v2515_v49  ;;  %v4478_v49 = vld [vmem:[%s4676_s18 + $0x2e0] ss:$24 sps:$4 sm:$0xff]  }
  0xbd   : > { %2079 = vmatprep.subr.bf16.mxu0 %v4388_v53  ;;  %v2517_v53 = vld [vmem:[%s6125_s3 + $0x50] sm:$0xff] }
  0xbe   : > { %3923 = vmatpush1.bf16.msra.mxu1 %v3922_v52 }
  0xbf   : > { %1955 = vmatmul.mubr.bf16.gmra.mrb[24].mxu0 %v4349_v54  ;;  %v2518_v54 = vld [vmem:[%s6125_s3 + $0x58] sm:$0xff]  ;;  %3924 = vmatprep.subr.bf16.mxu1 %v4567_v36 }
  0xc0   : > { %1964 = vmatprep.mubr.bf16.mxu0 %v4353_v55  ;;  %2080 = vmatpush1.bf16.msra.mxu0 %v4386_v56  ;;  %v3925_v55 = vpack.c.bf16 %v2518_v54, %v2517_v53  ;;  %v4415_v56 = vld [vmem:[%s4676_s18 + $0x70] ss:$24 sps:$4 sm:$0xff]  }
  0xc1   : > { %2081 = vmatprep.subr.bf16.mxu0 %v4394_v57  ;;  %v2519_v57 = vld [vmem:[%s6125_s3 + $0x60] sm:$0xff] }
  0xc2   : > { %3926 = vmatpush1.bf16.msra.mxu1 %v3925_v55 }
  0xc3   : > { %3927 = vmatprep.subr.bf16.mxu1 %v4567_v36 }
  0xc4   : > { %2082 = vmatpush1.bf16.msra.mxu0 %v4392_v58  ;;  %v2520_v58 = vld [vmem:[%s6125_s3 + $0x68] sm:$0xff] }
  0xc5   : > { %2083 = vmatprep.subr.bf16.mxu0 %v4400_v59  ;;  %v4416_v59 = vld [vmem:[%s4676_s18 + $0xa4] ss:$24 sps:$4 sm:$0xff]  }
  0xc7   : > { %1965 = vmatmul.mubr.bf16.gmra.mrb[28].mxu0 %v4355_v60  ;;  %v3928_v60 = vpack.c.bf16 %v2520_v58, %v2519_v57 }
  0xc8   : > { %1974 = vmatprep.mubr.bf16.mxu0 %v4359_v61  ;;  %2084 = vmatpush1.bf16.msra.mxu0 %v4398_v62  ;;  %v2521_v61 = vld [vmem:[%s6125_s3 + $0x70] sm:$0xff]  ;;  %v2522_v62 = vld [vmem:[%s6125_s3 + $0x78] sm:$0xff] }
  0xc9   : > { %2085 = vmatprep.subr.bf16.mxu0 %v4406_v63  ;;  %3929 = vmatpush1.bf16.msra.mxu1 %v3928_v60  ;;  %v3931_v63 = vpack.c.bf16 %v2522_v62, %v2521_v61 }
  0xca   : > { %3930 = vmatprep.subr.bf16.mxu1 %v4567_v36 }
  0xcc   : > { %2086 = vmatpush1.bf16.msra.mxu0 %v4404_v2  ;;  %v2524_v2 = vld [vmem:[%s6125_s3 + $0x88] sm:$0xff] }
  0xcd   : > { %3932 = vmatpush1.bf16.msra.mxu1 %v3931_v63 }
  0xce   : > { %3933 = vmatprep.subr.bf16.mxu1 %v4567_v36 }
  0xcf   : > { %1975 = vmatmul.mubr.bf16.gmra.mrb[32].mxu0 %v4361_v3  ;;  %v4419_v3 = vld [vmem:[%s4676_s18 + $0xd4] ss:$24 sps:$4 sm:$0xff]  }
  0xd0   : > { %1984 = vmatprep.mubr.bf16.mxu0 %v4365_v4  ;;  %v3934_v4 = vpack.c.bf16 %v2524_v2, %v2523_v1 }
  0xd2   : > { %3935 = vmatpush1.bf16.msra.mxu1 %v3934_v4 }
  0xd3   : > { %3936 = vmatprep.subr.bf16.mxu1 %v4567_v36 }
  0xd7   : > { %1985 = vmatmul.mubr.bf16.gmra.mrb[36].mxu0 %v4367_v7  ;;  %v3937_v7 = vpack.c.bf16 %v2526_v6, %v2525_v5 }
  0xd8   : > { %1994 = vmatprep.mubr.bf16.mxu0 %v4371_v8  ;;  %v4421_v8 = vld [vmem:[%s4676_s18 + $0xd0] ss:$24 sps:$4 sm:$0xff]  }
  0xd9   : > { %3938 = vmatpush1.bf16.msra.mxu1 %v3937_v7 }
  0xda   : > { %3939 = vmatprep.subr.bf16.mxu1 %v4567_v36 }
  0xdf   : > { %1995 = vmatmul.mubr.bf16.gmra.mrb[40].mxu0 %v4373_v11  ;;  %v4422_v11 = vld [vmem:[%s4676_s18 + $0x104] ss:$24 sps:$4 sm:$0xff]  }
  0xe0   : > { %2004 = vmatprep.mubr.bf16.mxu0 %v4377_v12  ;;  %v3940_v12 = vpack.c.bf16 %v2528_v10, %v2527_v9 }
  0xe2   : > { %3941 = vmatpush1.bf16.msra.mxu1 %v3940_v12 }
  0xe3   : > { %3942 = vmatprep.subr.bf16.mxu1 %v4567_v36 }
  0xe7   : > { %2005 = vmatmul.mubr.bf16.gmra.mrb[44].mxu0 %v4379_v15  ;;  %v3943_v15 = vpack.c.bf16 %v2530_v14, %v2529_v13 }
  0xe8   : > { %2014 = vmatprep.mubr.bf16.mxu0 %v4383_v16  ;;  %v4424_v16 = vld [vmem:[%s4676_s18 + $0x100] ss:$24 sps:$4 sm:$0xff]  }
  0xe9   : > { %3944 = vmatpush1.bf16.msra.mxu1 %v3943_v15 }
  0xea   : > { %3945 = vmatprep.subr.bf16.mxu1 %v4567_v36 }
  0xef   : > { %2015 = vmatmul.mubr.bf16.gmra.mrb[48].mxu0 %v4385_v19  ;;  %v4425_v19 = vld [vmem:[%s4676_s18 + $0x134] ss:$24 sps:$4 sm:$0xff]  }
  0xf0   : > { %2024 = vmatprep.mubr.bf16.mxu0 %v4389_v20  ;;  %v3946_v20 = vpack.c.bf16 %v2532_v18, %v2531_v17  ;;  %v2931_v18 = vld [vmem:[%s6127_s5] sm:$0xff] }
  0xf2   : > { %3947 = vmatpush1.bf16.msra.mxu1 %v3946_v20 }
  0xf3   : > { %3948 = vmatprep.subr.bf16.mxu1 %v4567_v36 }
  0xf7   : > { %2025 = vmatmul.mubr.bf16.gmra.mrb[52].mxu0 %v4391_v23  ;;  %v3949_v23 = vpack.c.bf16 %v2534_v22, %v2533_v21 }
  0xf8   : > { %2034 = vmatprep.mubr.bf16.mxu0 %v4395_v24  ;;  %v4427_v24 = vld [vmem:[%s4676_s18 + $0x130] ss:$24 sps:$4 sm:$0xff]  }
  0xf9   : > { %3950 = vmatpush1.bf16.msra.mxu1 %v3949_v23  ;;  %v2933_v23 = vld [vmem:[%s6127_s5 + $0x10] sm:$0xff] }
  0xfa   : > { %3951 = vmatprep.subr.bf16.mxu1 %v4567_v36 }
  0xff   : > { %2035 = vmatmul.mubr.bf16.gmra.mrb[56].mxu0 %v4397_v27  ;;  %v4428_v27 = vld [vmem:[%s4676_s18 + $0x164] ss:$24 sps:$4 sm:$0xff]  }
 0x100   : > { %2044 = vmatprep.mubr.bf16.mxu0 %v4401_v28  ;;  %v3952_v28 = vpack.c.bf16 %v2536_v26, %v2535_v25 }
 0x102   : > { %3953 = vmatpush1.bf16.msra.mxu1 %v3952_v28  ;;  %v2935_v28 = vld [vmem:[%s6127_s5 + $0x20] sm:$0xff] }
 0x103   : > { %3954 = vmatprep.subr.bf16.mxu1 %v4567_v36 }
 0x107   : > { %2045 = vmatmul.mubr.bf16.gmra.mrb[60].mxu0 %v4403_v31  ;;  %v4436_v31 = vld [vmem:[%s4676_s18 + $0x190] ss:$24 sps:$4 sm:$0xff]  }
 0x108   : > { %2087 = vmatprep.mubr.bf16.mxu0 %v4409_v32  ;;  %v4440_v32 = vld [vmem:[%s4676_s18 + $0x1c4] ss:$24 sps:$4 sm:$0xff]  }
 0x10f   : > { %2088 = vmatmul.mubr.bf16.vlgmr.msra.gmra.mrb[0].mxu0 %v4407_v40  ;;  %v3955_v40 = vpack.c.bf16 %v2538_v39, %v2537_v38  ;;  %v2939_v39 = vld [vmem:[%s6127_s5 + $0x40] sm:$0xff] }
 0x110   : > { %2097 = vmatprep.mubr.bf16.mxu0 %v4410_v43  ;;  %v4460_v43 = vld [vmem:[%s4676_s18 + $0x250] ss:$24 sps:$4 sm:$0xff]  }
 0x111   : > { %3956 = vmatpush1.bf16.msra.mxu1 %v3955_v40  ;;  %v2940_v40 = vld [vmem:[%s6127_s5 + $0x48] sm:$0xff] }
 0x112   : > { %3957 = vmatprep.subr.bf16.mxu1 %v4567_v36 }
 0x117   : > { %2098 = vmatmul.mubr.bf16.gmra.mrb[4].mxu0 %v4412_v48  ;;  %v4476_v48 = vld [vmem:[%s4676_s18 + $0x2e4] ss:$24 sps:$4 sm:$0xff]   ;;  %s3709_s18 = sshll.u32 %s6172_s19, 3 }
 0x118   : > { %2107 = vmatprep.mubr.bf16.mxu0 %v4413_v51  ;;  %s5760_s14 = scalar_lea.vmem %s6129_s7, %s3709_s18  ;;  %s6047_s17 = scalar_lea.vmem %s6130_s8, %s3709_s18 }
 0x11f   : > { %2108 = vmatmul.mubr.bf16.gmra.mrb[8].mxu0 %v4415_v56 }
 0x120   : > { %2117 = vmatprep.mubr.bf16.mxu0 %v4416_v59 }
 0x127   : > { %2118 = vmatmul.mubr.bf16.gmra.mrb[12].mxu0 %v4418_v0 }
 0x128   : > { %2127 = vmatprep.mubr.bf16.mxu0 %v4419_v3 }
 0x12f   : > { %2128 = vmatmul.mubr.bf16.gmra.mrb[16].mxu0 %v4421_v8 }
 0x130   : > { %2137 = vmatprep.mubr.bf16.mxu0 %v4422_v11 }
 0x137   : > { %2138 = vmatmul.mubr.bf16.gmra.mrb[20].mxu0 %v4424_v16 }
 0x138   : > { %2147 = vmatprep.mubr.bf16.mxu0 %v4425_v19  ;;  %v2932_v19 = vld [vmem:[%s6127_s5 + $0x8] sm:$0xff] }
 0x139   : > { %v3958_v21 = vpack.c.bf16 %v2932_v19, %v2931_v18  ;;  %v2944_v18 = vld [vmem:[%s6127_s5 + $0x68] sm:$0xff] }
 0x13f   : > { %2148 = vmatmul.mubr.bf16.gmra.mrb[24].mxu0 %v4427_v24  ;;  %v2934_v24 = vld [vmem:[%s6127_s5 + $0x18] sm:$0xff] }
 0x140   : > { %2157 = vmatprep.mubr.bf16.mxu0 %v4428_v27  ;;  %v3961_v27 = vpack.c.bf16 %v2934_v24, %v2933_v23  ;;  %v2945_v24 = vld [vmem:[%s6127_s5 + $0x70] sm:$0xff] }
 0x147   : > { %2158 = vmatmul.mubr.bf16.gmra.mrb[28].mxu0 %v4430_v29  ;;  %v2936_v29 = vld [vmem:[%s6127_s5 + $0x28] sm:$0xff] }
 0x148   : > { %2167 = vmatprep.mubr.bf16.mxu0 %v4434_v30 }
 0x14d   : > { %v5139_v50 = vpop.f32.mrb[0].mxu1 }
 0x14e   : > { %v5141_v51 = vpop.f32.mrb[1].mxu1 }
 0x14f   : > { %2168 = vmatmul.mubr.bf16.gmra.mrb[32].mxu0 %v4436_v31  ;;  %v5143_v52 = vpop.f32.mrb[2].mxu1  ;;  %v3964_v31 = vpack.c.bf16 %v2936_v29, %v2935_v28 }
 0x150   : > { %2177 = vmatprep.mubr.bf16.mxu0 %v4440_v32  ;;  %v5145_v53 = vpop.f32.mrb[3].mxu1 }
 0x155   : > { %v5147_v54 = vpop.f32.mrb[4].mxu1 }
 0x156   : > { %v5149_v55 = vpop.f32.mrb[5].mxu1 }
 0x157   : > { %2178 = vmatmul.mubr.bf16.gmra.mrb[36].mxu0 %v4442_v33  ;;  %v5151_v56 = vpop.f32.mrb[6].mxu1  ;;  %v2937_v33 = vld [vmem:[%s6127_s5 + $0x30] sm:$0xff] }
 0x158   : > { %2187 = vmatprep.mubr.bf16.mxu0 %v4446_v34  ;;  %v5153_v57 = vpop.f32.mrb[7].mxu1  ;;  %v2938_v34 = vld [vmem:[%s6127_s5 + $0x38] sm:$0xff] }
 0x159   : > { %v3967_v38 = vpack.c.bf16 %v2938_v34, %v2937_v33  ;;  %v2947_v33 = vld [vmem:[%s6127_s5 + $0x80] sm:$0xff]  ;;  %v2948_v34 = vld [vmem:[%s6127_s5 + $0x88] sm:$0xff] }
 0x15d   : > { %v5155_v58 = vpop.f32.mrb[8].mxu1 }
 0x15e   : > { %v5157_v59 = vpop.f32.mrb[9].mxu1 }
 0x15f   : > { %2188 = vmatmul.mubr.bf16.gmra.mrb[40].mxu0 %v4448_v35  ;;  %v5159_v60 = vpop.f32.mrb[10].mxu1 }
 0x160   : > { %2197 = vmatprep.mubr.bf16.mxu0 %v4452_v37  ;;  %v5161_v61 = vpop.f32.mrb[11].mxu1 }
 0x165   : > { %v5163_v62 = vpop.f32.mrb[12].mxu1 }
 0x166   : > { %v5165_v63 = vpop.f32.mrb[13].mxu1 }
 0x167   : > { %2198 = vmatmul.mubr.bf16.gmra.mrb[44].mxu0 %v4454_v41  ;;  %v5167_v0 = vpop.f32.mrb[14].mxu1 }
 0x168   : > { %2207 = vmatprep.mubr.bf16.mxu0 %v4458_v42  ;;  %v5169_v1 = vpop.f32.mrb[15].mxu1  ;;  %v3970_v42 = vpack.c.bf16 %v2940_v40, %v2939_v39  ;;  %v3982_v39 = vpack.c.bf16 %v2948_v34, %v2947_v33  ;;  %v2953_v33 = vld [vmem:[%s6127_s5 + $0xb0] sm:$0xff]  ;;  %v2954_v34 = vld [vmem:[%s6127_s5 + $0xb8] sm:$0xff] }
 0x16d   : > { %v5171_v2 = vpop.f32.mrb[16].mxu1 }
 0x16e   : > { %v5173_v3 = vpop.f32.mrb[17].mxu1 }
 0x16f   : > { %2208 = vmatmul.mubr.bf16.gmra.mrb[48].mxu0 %v4460_v43  ;;  %v5175_v4 = vpop.f32.mrb[18].mxu1 }
 0x170   : > { %2217 = vmatprep.mubr.bf16.mxu0 %v4464_v44  ;;  %v5177_v5 = vpop.f32.mrb[19].mxu1  ;;  %v2941_v44 = vld [vmem:[%s6127_s5 + $0x50] sm:$0xff] }
 0x175   : > { %v5179_v6 = vpop.f32.mrb[20].mxu1 }
 0x176   : > { %v5181_v7 = vpop.f32.mrb[21].mxu1 }
 0x177   : > { %2218 = vmatmul.mubr.bf16.gmra.mrb[52].mxu0 %v4466_v45  ;;  %v5183_v8 = vpop.f32.mrb[22].mxu1  ;;  %v2942_v45 = vld [vmem:[%s6127_s5 + $0x58] sm:$0xff] }
 0x178   : > { %2227 = vmatprep.mubr.bf16.mxu0 %v4470_v46  ;;  %v5185_v9 = vpop.f32.mrb[23].mxu1 }
 0x17d   : > { %v5187_v10 = vpop.f32.mrb[24].mxu1 }
 0x17e   : > { %v5189_v11 = vpop.f32.mrb[25].mxu1 }
 0x17f   : > { %2228 = vmatmul.mubr.bf16.gmra.mrb[56].mxu0 %v4472_v47  ;;  %v5191_v12 = vpop.f32.mrb[26].mxu1 }
 0x180   : > { %2237 = vmatprep.mubr.bf16.mxu0 %v4476_v48  ;;  %v5193_v13 = vpop.f32.mrb[27].mxu1  ;;  %v3973_v48 = vpack.c.bf16 %v2942_v45, %v2941_v44  ;;  %v2950_v44 = vld [vmem:[%s6127_s5 + $0x98] sm:$0xff] }
 0x185   : > { %v5195_v14 = vpop.f32.mrb[28].mxu1 }
 0x186   : > { %v5197_v15 = vpop.f32.mrb[29].mxu1 }
 0x187   : > { %2238 = vmatmul.mubr.bf16.gmra.mrb[60].mxu0 %v4478_v49  ;;  %v5199_v16 = vpop.f32.mrb[30].mxu1  ;;  %v2943_v49 = vld [vmem:[%s6127_s5 + $0x60] sm:$0xff] }
 0x188   : > { %v5201_v17 = vpop.f32.mrb[31].mxu1 }
 0x1e2   : > { %v5209_v20 = vpop.f32.mrb[0].mxu0 }
 0x1e3   : > { %v5211_v22 = vpop.f32.mrb[1].mxu0 }
 0x1e4   : > { %v5219_v25 = vpop.f32.mrb[2].mxu0  ;;  %2610 = vmatprep.mubr.f32.mxu1 %v5211_v22 }
 0x1e5   : > { %v5222_v26 = vpop.f32.mrb[3].mxu0  ;;  %2611 = vmatmul.mubr.f32.vlgmr.msra.gmra.mrb[32].mxu1 %v5209_v20 }
 0x1e6   : > { %2615 = vmatprep.mubr.f32.mxu1 %v5222_v26  ;;  %3959 = vmatpush1.bf16.msra.mxu1 %v3958_v21  ;;  %v3976_v21 = vpack.c.bf16 %v2944_v18, %v2943_v49  ;;  %v2951_v18 = vld [vmem:[%s6127_s5 + $0xa0] sm:$0xff] }
 0x1e7   : > { %3960 = vmatprep.subr.bf16.mxu1 %v4567_v36 }
 0x1e9   : > { %2616 = vmatmul.mubr.f32.gmra.mrb[34].mxu1 %v5219_v25 }
 0x1ea   : > { %v5234_v30 = vpop.f32.mrb[4].mxu0  ;;  %3962 = vmatpush1.bf16.msra.mxu1 %v3961_v27  ;;  %v2946_v27 = vld [vmem:[%s6127_s5 + $0x78] sm:$0xff] }
 0x1eb   : > { %v5236_v32 = vpop.f32.mrb[5].mxu0  ;;  %3963 = vmatprep.subr.bf16.mxu1 %v4567_v36 }
 0x1ec   : > { %v5245_v35 = vpop.f32.mrb[6].mxu0  ;;  %2620 = vmatprep.mubr.f32.mxu1 %v5236_v32 }
 0x1ed   : > { %v5248_v37 = vpop.f32.mrb[7].mxu0  ;;  %2621 = vmatmul.mubr.f32.gmra.mrb[36].mxu1 %v5234_v30 }
 0x1ee   : > { %2625 = vmatprep.mubr.f32.mxu1 %v5248_v37  ;;  %3965 = vmatpush1.bf16.msra.mxu1 %v3964_v31  ;;  %v3979_v31 = vpack.c.bf16 %v2946_v27, %v2945_v24 }
 0x1ef   : > { %3966 = vmatprep.subr.bf16.mxu1 %v4567_v36 }
 0x1f1   : > { %2626 = vmatmul.mubr.f32.gmra.mrb[38].mxu1 %v5245_v35 }
 0x1f2   : > { %v5260_v41 = vpop.f32.mrb[8].mxu0  ;;  %3968 = vmatpush1.bf16.msra.mxu1 %v3967_v38 }
 0x1f3   : > { %v5262_v43 = vpop.f32.mrb[9].mxu0  ;;  %3969 = vmatprep.subr.bf16.mxu1 %v4567_v36 }
 0x1f4   : > { %v5271_v46 = vpop.f32.mrb[10].mxu0  ;;  %2630 = vmatprep.mubr.f32.mxu1 %v5262_v43 }
 0x1f5   : > { %v5274_v47 = vpop.f32.mrb[11].mxu0  ;;  %2631 = vmatmul.mubr.f32.gmra.mrb[40].mxu1 %v5260_v41 }
 0x1f6   : > { %2635 = vmatprep.mubr.f32.mxu1 %v5274_v47  ;;  %3971 = vmatpush1.bf16.msra.mxu1 %v3970_v42  ;;  %v2949_v42 = vld [vmem:[%s6127_s5 + $0x90] sm:$0xff] }
 0x1f7   : > { %3972 = vmatprep.subr.bf16.mxu1 %v4567_v36  ;;  %v3985_v49 = vpack.c.bf16 %v2950_v44, %v2949_v42  ;;  %v3991_v44 = vpack.c.bf16 %v2954_v34, %v2953_v33  ;;  %v2958_v33 = vld [vmem:[%s6127_s5 + $0xd8] sm:$0xff] }
 0x1f9   : > { %2636 = vmatmul.mubr.f32.gmra.mrb[42].mxu1 %v5271_v46 }
 0x1fa   : > { %v5286_v19 = vpop.f32.mrb[12].mxu0  ;;  %3974 = vmatpush1.bf16.msra.mxu1 %v3973_v48 }
 0x1fb   : > { %v5288_v23 = vpop.f32.mrb[13].mxu0  ;;  %3975 = vmatprep.subr.bf16.mxu1 %v4567_v36 }
 0x1fc   : > { %v5297_v28 = vpop.f32.mrb[14].mxu0  ;;  %2640 = vmatprep.mubr.f32.mxu1 %v5288_v23 }
 0x1fd   : > { %v5300_v29 = vpop.f32.mrb[15].mxu0  ;;  %2641 = vmatmul.mubr.f32.gmra.mrb[44].mxu1 %v5286_v19 }
 0x1fe   : > { %2645 = vmatprep.mubr.f32.mxu1 %v5300_v29  ;;  %3977 = vmatpush1.bf16.msra.mxu1 %v3976_v21  ;;  %v2952_v21 = vld [vmem:[%s6127_s5 + $0xa8] sm:$0xff] }
 0x1ff   : > { %3978 = vmatprep.subr.bf16.mxu1 %v4567_v36  ;;  %v3988_v27 = vpack.c.bf16 %v2952_v21, %v2951_v18  ;;  %v2956_v18 = vld [vmem:[%s6127_s5 + $0xc8] sm:$0xff] }
 0x201   : > { %2646 = vmatmul.mubr.f32.gmra.mrb[46].mxu1 %v5297_v28 }
 0x202   : > { %v5312_v38 = vpop.f32.mrb[16].mxu0  ;;  %3980 = vmatpush1.bf16.msra.mxu1 %v3979_v31 }
 0x203   : > { %v5314_v40 = vpop.f32.mrb[17].mxu0  ;;  %3981 = vmatprep.subr.bf16.mxu1 %v4567_v36 }
 0x204   : > { %v5323_v45 = vpop.f32.mrb[18].mxu0  ;;  %2650 = vmatprep.mubr.f32.mxu1 %v5314_v40 }
 0x205   : > { %6143 = vst [vmem:[#allocation3_spill] sm:$0xff] %v5323_v45  ;;  %v5326_v48 = vpop.f32.mrb[19].mxu0  ;;  %2651 = vmatmul.mubr.f32.gmra.mrb[48].mxu1 %v5312_v38 }
 0x206   : > { %2655 = vmatprep.mubr.f32.mxu1 %v5326_v48  ;;  %3983 = vmatpush1.bf16.msra.mxu1 %v3982_v39 }
 0x207   : > { %3984 = vmatprep.subr.bf16.mxu1 %v4567_v36 }
 0x209   : > { %2656 = vmatmul.mubr.f32.gmra.mrb[50].mxu1 %v5323_v45 }
 0x20a   : > { %v5338_v24 = vpop.f32.mrb[20].mxu0  ;;  %3986 = vmatpush1.bf16.msra.mxu1 %v3985_v49  ;;  %v2955_v49 = vld [vmem:[%s6127_s5 + $0xc0] sm:$0xff] }
 0x20b   : > { %6144 = vst [vmem:[#allocation4_spill] sm:$0xff] %v5338_v24  ;;  %v5340_v31 = vpop.f32.mrb[21].mxu0  ;;  %3987 = vmatprep.subr.bf16.mxu1 %v4567_v36 }
 0x20c   : > { %6145 = vst [vmem:[#allocation5_spill] sm:$0xff] %v5340_v31  ;;  %v5349_v39 = vpop.f32.mrb[22].mxu0  ;;  %2660 = vmatprep.mubr.f32.mxu1 %v5340_v31 }
 0x20d   : > { %6146 = vst [vmem:[#allocation6_spill] sm:$0xff] %v5349_v39  ;;  %v5352_v42 = vpop.f32.mrb[23].mxu0  ;;  %2661 = vmatmul.mubr.f32.gmra.mrb[52].mxu1 %v5338_v24  ;;  %v3994_v24 = vpack.c.bf16 %v2956_v18, %v2955_v49  ;;  %v2959_v49 = vld [vmem:[%s6127_s5 + $0xe0] sm:$0xff]  ;;  %v2960_v18 = vld [vmem:[%s6127_s5 + $0xe8] sm:$0xff] }
 0x20e   : > { %6147 = vst [vmem:[#allocation7_spill] sm:$0xff] %v5352_v42  ;;  %2665 = vmatprep.mubr.f32.mxu1 %v5352_v42  ;;  %3989 = vmatpush1.bf16.msra.mxu1 %v3988_v27  ;;  %v2957_v27 = vld [vmem:[%s6127_s5 + $0xd0] sm:$0xff] }
 0x20f   : > { %3990 = vmatprep.subr.bf16.mxu1 %v4567_v36 }
 0x211   : > { %2666 = vmatmul.mubr.f32.gmra.mrb[54].mxu1 %v5349_v39 }
 0x212   : > { %v5364_v21 = vpop.f32.mrb[24].mxu0  ;;  %3992 = vmatpush1.bf16.msra.mxu1 %v3991_v44  ;;  %v3997_v44 = vpack.c.bf16 %v2958_v33, %v2957_v27  ;;  %v2962_v27 = vld [vmem:[%s6127_s5 + $0xf8] sm:$0xff] }
 0x213   : > { %6148 = vst [vmem:[#allocation8_spill] sm:$0xff] %v5364_v21  ;;  %v5366_v31 = vpop.f32.mrb[25].mxu0  ;;  %3993 = vmatprep.subr.bf16.mxu1 %v4567_v36 }
 0x214   : > { %6149 = vst [vmem:[#allocation9_spill] sm:$0xff] %v5366_v31  ;;  %v5375_v34 = vpop.f32.mrb[26].mxu0  ;;  %2670 = vmatprep.mubr.f32.mxu1 %v5366_v31 }
 0x215   : > { %6150 = vst [vmem:[#allocation10_spill] sm:$0xff] %v5375_v34  ;;  %v5378_v39 = vpop.f32.mrb[27].mxu0  ;;  %2671 = vmatmul.mubr.f32.gmra.mrb[56].mxu1 %v5364_v21  ;;  %v4000_v21 = vpack.c.bf16 %v2960_v18, %v2959_v49 }
 0x216   : > { %6151 = vst [vmem:[#allocation11_spill] sm:$0xff] %v5378_v39  ;;  %2675 = vmatprep.mubr.f32.mxu1 %v5378_v39  ;;  %3995 = vmatpush1.bf16.msra.mxu1 %v3994_v24  ;;  %v2961_v24 = vld [vmem:[%s6127_s5 + $0xf0] sm:$0xff] }
 0x217   : > { %3996 = vmatprep.subr.bf16.mxu1 %v4567_v36 }
 0x219   : > { %2676 = vmatmul.mubr.f32.gmra.mrb[58].mxu1 %v5375_v34 }
 0x21a   : > { %v5390_v31 = vpop.f32.mrb[28].mxu0  ;;  %3998 = vmatpush1.bf16.msra.mxu1 %v3997_v44  ;;  %v4003_v44 = vpack.c.bf16 %v2962_v27, %v2961_v24 }
 0x21b   : > { %6152 = vst [vmem:[#allocation12_spill] sm:$0xff] %v5390_v31  ;;  %v5392_v42 = vpop.f32.mrb[29].mxu0  ;;  %3999 = vmatprep.subr.bf16.mxu1 %v4567_v36 }
 0x21c   : > { %6153 = vst [vmem:[#allocation13_spill] sm:$0xff] %v5392_v42  ;;  %v5401_v33 = vpop.f32.mrb[30].mxu0  ;;  %2680 = vmatprep.mubr.f32.mxu1 %v5392_v42 }
 0x21d   : > { %v5404_v34 = vpop.f32.mrb[31].mxu0  ;;  %2681 = vmatmul.mubr.f32.gmra.mrb[60].mxu1 %v5390_v31 }
 0x21e   : > { %6154 = vst [vmem:[#allocation14_spill] sm:$0xff] %v5404_v34  ;;  %2685 = vmatprep.mubr.f32.mxu1 %v5404_v34  ;;  %4001 = vmatpush1.bf16.msra.mxu1 %v4000_v21 }
 0x21f   : > { %4002 = vmatprep.subr.bf16.mxu1 %v4567_v36 }
 0x221   : > { %2686 = vmatmul.mubr.f32.gmra.mrb[62].mxu1 %v5401_v33 }
 0x222   : > { %v2169_v49 = vpop.f32.mrb[32].mxu0  ;;  %4004 = vmatpush1.bf16.msra.mxu1 %v4003_v44 }
 0x223   : > { %v5411_v18 = vadd.f32 %v2169_v49, %v5139_v50  ;;  %v2171_v39 = vpop.f32.mrb[33].mxu0 }
 0x224   : > { %v5414_v42 = vadd.f32 %v2171_v39, %v5141_v51  ;;  %v2173_v45 = vpop.f32.mrb[34].mxu0 }
 0x225   : > { %v5417_v31 = vadd.f32 %v2173_v45, %v5143_v52  ;;  %v2175_v34 = vpop.f32.mrb[35].mxu0 }
 0x226   : > { %v5420_v21 = vadd.f32 %v2175_v34, %v5145_v53  ;;  %2690 = vmatprep.mubr.f32.mxu1 %v5414_v42 }
 0x227   : > { %2691 = vmatmul.mubr.f32.gmra.mrb[64].mxu1 %v5411_v18 }
 0x228   : > { %2695 = vmatprep.mubr.f32.mxu1 %v5420_v21 }
 0x22a   : > { %v2179_v36 = vpop.f32.mrb[36].mxu0 }
 0x22b   : > { %v5426_v50 = vadd.f32 %v2179_v36, %v5147_v54  ;;  %v2181_v51 = vpop.f32.mrb[37].mxu0  ;;  %2696 = vmatmul.mubr.f32.gmra.mrb[66].mxu1 %v5417_v31 }
 0x22c   : > { %v5430_v52 = vadd.f32 %v2181_v51, %v5149_v55  ;;  %v2183_v45 = vpop.f32.mrb[38].mxu0 }
 0x22d   : > { %v5433_v53 = vadd.f32 %v2183_v45, %v5151_v56  ;;  %v2185_v39 = vpop.f32.mrb[39].mxu0 }
 0x22e   : > { %v5436_v34 = vadd.f32 %v2185_v39, %v5153_v57  ;;  %2700 = vmatprep.mubr.f32.mxu1 %v5430_v52 }
 0x22f   : > { %2701 = vmatmul.mubr.f32.gmra.mrb[68].mxu1 %v5426_v50 }
 0x230   : > { %2705 = vmatprep.mubr.f32.mxu1 %v5436_v34 }
 0x232   : > { %v2189_v54 = vpop.f32.mrb[40].mxu0 }
 0x233   : > { %v5442_v24 = vadd.f32 %v2189_v54, %v5155_v58  ;;  %v2191_v55 = vpop.f32.mrb[41].mxu0  ;;  %2706 = vmatmul.mubr.f32.gmra.mrb[70].mxu1 %v5433_v53 }
 0x234   : > { %v5446_v56 = vadd.f32 %v2191_v55, %v5157_v59  ;;  %v2193_v27 = vpop.f32.mrb[42].mxu0 }
 0x235   : > { %v5449_v57 = vadd.f32 %v2193_v27, %v5159_v60  ;;  %v2195_v44 = vpop.f32.mrb[43].mxu0 }
 0x236   : > { %v5452_v49 = vadd.f32 %v2195_v44, %v5161_v61  ;;  %2710 = vmatprep.mubr.f32.mxu1 %v5446_v56 }
 0x237   : > { %2711 = vmatmul.mubr.f32.gmra.mrb[72].mxu1 %v5442_v24 }
 0x238   : > { %2715 = vmatprep.mubr.f32.mxu1 %v5452_v49 }
 0x23a   : > { %v2199_v58 = vpop.f32.mrb[44].mxu0 }
 0x23b   : > { %v5458_v36 = vadd.f32 %v2199_v58, %v5163_v62  ;;  %v2201_v59 = vpop.f32.mrb[45].mxu0  ;;  %2716 = vmatmul.mubr.f32.gmra.mrb[74].mxu1 %v5449_v57 }
 0x23c   : > { %v5462_v60 = vadd.f32 %v2201_v59, %v5165_v63  ;;  %v2203_v51 = vpop.f32.mrb[46].mxu0 }
 0x23d   : > { %v5465_v61 = vadd.f32 %v2203_v51, %v5167_v0  ;;  %v2205_v45 = vpop.f32.mrb[47].mxu0 }
 0x23e   : > { %v5468_v39 = vadd.f32 %v2205_v45, %v5169_v1  ;;  %2720 = vmatprep.mubr.f32.mxu1 %v5462_v60 }
 0x23f   : > { %2721 = vmatmul.mubr.f32.gmra.mrb[76].mxu1 %v5458_v36 }
 0x240   : > { %2725 = vmatprep.mubr.f32.mxu1 %v5468_v39 }
 0x242   : > { %v2209_v62 = vpop.f32.mrb[48].mxu0 }
 0x243   : > { %v5474_v54 = vadd.f32 %v2209_v62, %v5171_v2  ;;  %v2211_v63 = vpop.f32.mrb[49].mxu0  ;;  %2726 = vmatmul.mubr.f32.gmra.mrb[78].mxu1 %v5465_v61 }
 0x244   : > { %v5478_v0 = vadd.f32 %v2211_v63, %v5173_v3  ;;  %v2213_v55 = vpop.f32.mrb[50].mxu0 }
 0x245   : > { %v5481_v1 = vadd.f32 %v2213_v55, %v5175_v4  ;;  %v2215_v27 = vpop.f32.mrb[51].mxu0 }
 0x246   : > { %v5484_v44 = vadd.f32 %v2215_v27, %v5177_v5  ;;  %2730 = vmatprep.mubr.f32.mxu1 %v5478_v0 }
 0x247   : > { %2731 = vmatmul.mubr.f32.gmra.mrb[80].mxu1 %v5474_v54 }
 0x248   : > { %2735 = vmatprep.mubr.f32.mxu1 %v5484_v44 }
 0x24a   : > { %v2219_v2 = vpop.f32.mrb[52].mxu0 }
 0x24b   : > { %v5490_v58 = vadd.f32 %v2219_v2, %v5179_v6  ;;  %v2221_v3 = vpop.f32.mrb[53].mxu0  ;;  %2736 = vmatmul.mubr.f32.gmra.mrb[82].mxu1 %v5481_v1 }
 0x24c   : > { %v5494_v4 = vadd.f32 %v2221_v3, %v5181_v7  ;;  %v2223_v59 = vpop.f32.mrb[54].mxu0 }
 0x24d   : > { %v5497_v5 = vadd.f32 %v2223_v59, %v5183_v8  ;;  %v2225_v51 = vpop.f32.mrb[55].mxu0 }
 0x24e   : > { %v5500_v45 = vadd.f32 %v2225_v51, %v5185_v9  ;;  %2740 = vmatprep.mubr.f32.mxu1 %v5494_v4  ;;  %v2444_v51 = vld [vmem:[%s5529_s26 + $0x8] sm:$0xff] }
 0x24f   : > { %2741 = vmatmul.mubr.f32.gmra.mrb[84].mxu1 %v5490_v58 }
 0x250   : > { %2745 = vmatprep.mubr.f32.mxu1 %v5500_v45 }
 0x252   : > { %v2229_v6 = vpop.f32.mrb[56].mxu0 }
 0x253   : > { %v5506_v62 = vadd.f32 %v2229_v6, %v5187_v10  ;;  %v2231_v7 = vpop.f32.mrb[57].mxu0  ;;  %2746 = vmatmul.mubr.f32.gmra.mrb[86].mxu1 %v5497_v5  ;;  %v2868_v6 = vmul.f32 %v2444_v51, %v5211_v22  ;;  %v2452_v51 = vld [vmem:[%s5529_s26 + $0x48] sm:$0xff] }
 0x254   : > { %v5510_v8 = vadd.f32 %v2231_v7, %v5189_v11  ;;  %v2233_v63 = vpop.f32.mrb[58].mxu0  ;;  %v2446_v7 = vld [vmem:[%s5529_s26 + $0x18] sm:$0xff] }
 0x255   : > { %v5513_v9 = vadd.f32 %v2233_v63, %v5191_v12  ;;  %v2235_v55 = vpop.f32.mrb[59].mxu0  ;;  %v2870_v63 = vmul.f32 %v2446_v7, %v5222_v26  ;;  %v2453_v7 = vld [vmem:[%s5529_s26 + $0x50] sm:$0xff] }
 0x256   : > { %v5516_v27 = vadd.f32 %v2235_v55, %v5193_v13  ;;  %2750 = vmatprep.mubr.f32.mxu1 %v5510_v8  ;;  %v2448_v55 = vld [vmem:[%s5529_s26 + $0x28] sm:$0xff] }
 0x257   : > { %2751 = vmatmul.mubr.f32.gmra.mrb[88].mxu1 %v5506_v62  ;;  %v2872_v22 = vmul.f32 %v2448_v55, %v5236_v32  ;;  %v2876_v32 = vmul.f32 %v2452_v51, %v5262_v43  ;;  %v2457_v55 = vld [vmem:[%s5529_s26 + $0x70] sm:$0xff] }
 0x258   : > { %2755 = vmatprep.mubr.f32.mxu1 %v5516_v27  ;;  %v6156_v51 = vld [vmem:[#allocation5_spill] sm:$0xff] }
 0x25a   : > { %v2239_v10 = vpop.f32.mrb[60].mxu0 }
 0x25b   : > { %v5523_v2 = vadd.f32 %v2239_v10, %v5195_v14  ;;  %v2241_v11 = vpop.f32.mrb[61].mxu0  ;;  %2756 = vmatmul.mubr.f32.gmra.mrb[90].mxu1 %v5513_v9 }
 0x25c   : > { %v5532_v12 = vadd.f32 %v2241_v11, %v5197_v15  ;;  %v2243_v13 = vpop.f32.mrb[62].mxu0  ;;  %v2443_v15 = vld [vmem:[%s5529_s26] sm:$0xff] }
 0x25d   : > { %v5535_v14 = vadd.f32 %v2243_v13, %v5199_v16  ;;  %v2245_v3 = vpop.f32.mrb[63].mxu0  ;;  %v2867_v16 = vmul.f32 %v2443_v15, %v5209_v20  ;;  %v2447_v11 = vld [vmem:[%s5529_s26 + $0x20] sm:$0xff]  ;;  %v2450_v13 = vld [vmem:[%s5529_s26 + $0x38] sm:$0xff] }
 0x25e   : > { %v5538_v59 = vadd.f32 %v2245_v3, %v5201_v17  ;;  %2760 = vmatprep.mubr.f32.mxu1 %v5532_v12  ;;  %v2445_v17 = vld [vmem:[%s5529_s26 + $0x10] sm:$0xff]  ;;  %v2871_v20 = vmul.f32 %v2447_v11, %v5234_v30  ;;  %v2874_v26 = vmul.f32 %v2450_v13, %v5248_v37  ;;  %v2451_v15 = vld [vmem:[%s5529_s26 + $0x40] sm:$0xff] }
 0x25f   : > { %2761 = vmatmul.mubr.f32.gmra.mrb[92].mxu1 %v5523_v2  ;;  %v2869_v10 = vmul.f32 %v2445_v17, %v5219_v25  ;;  %v2449_v3 = vld [vmem:[%s5529_s26 + $0x30] sm:$0xff]  ;;  %v2875_v30 = vmul.f32 %v2451_v15, %v5260_v41  ;;  %v2455_v17 = vld [vmem:[%s5529_s26 + $0x60] sm:$0xff]  ;;  %v6157_v15 = vld [vmem:[#allocation4_spill] sm:$0xff] }
 0x260   : > { %2765 = vmatprep.mubr.f32.mxu1 %v5538_v59  ;;  %v2873_v25 = vmul.f32 %v2449_v3, %v5245_v35  ;;  %v2877_v35 = vmul.f32 %v2453_v7, %v5271_v46  ;;  %v2879_v41 = vmul.f32 %v2455_v17, %v5286_v19  ;;  %v2881_v46 = vmul.f32 %v2457_v55, %v5297_v28  ;;  %v2459_v11 = vld [vmem:[%s5529_s26 + $0x80] sm:$0xff]  ;;  %v2461_v13 = vld [vmem:[%s5529_s26 + $0x90] sm:$0xff]  ;;  %v6159_v7 = vld [vmem:[#allocation6_spill] sm:$0xff] }
 0x261   : > { %v2883_v19 = vmul.f32 %v2459_v11, %v5312_v38  ;;  %v6155_v3 = vld [vmem:[#allocation3_spill] sm:$0xff]  ;;  %v2469_v55 = vld [vmem:[%s5529_s26 + $0xd0] sm:$0xff]  ;;  %v6163_v11 = vld [vmem:[#allocation10_spill] sm:$0xff] }
 0x262   : > { %v2885_v28 = vmul.f32 %v2461_v13, %v6155_v3 }
 0x263   : > { %2766 = vmatmul.mubr.f32.gmra.mrb[94].mxu1 %v5535_v14 }
 0x264   : > { %3034 = vmatprep.mubr.f32.mxu1 %v2868_v6  ;;  %v2454_v6 = vld [vmem:[%s5529_s26 + $0x58] sm:$0xff] }
 0x265   : > { %v2878_v37 = vmul.f32 %v2454_v6, %v5274_v47  ;;  %v6158_v6 = vld [vmem:[#allocation7_spill] sm:$0xff] }
 0x267   : > { %3035 = vmatmul.mubr.f32.vlgmr.msra.gmra.mrb[96].mxu1 %v2867_v16  ;;  %v2456_v16 = vld [vmem:[%s5529_s26 + $0x68] sm:$0xff] }
 0x268   : > { %3039 = vmatprep.mubr.f32.mxu1 %v2870_v63  ;;  %v2880_v43 = vmul.f32 %v2456_v16, %v5288_v23  ;;  %v2458_v63 = vld [vmem:[%s5529_s26 + $0x78] sm:$0xff]  ;;  %v2467_v16 = vld [vmem:[%s5529_s26 + $0xc0] sm:$0xff] }
 0x269   : > { %v2882_v47 = vmul.f32 %v2458_v63, %v5300_v29  ;;  %v6161_v63 = vld [vmem:[#allocation8_spill] sm:$0xff] }
 0x26b   : > { %3040 = vmatmul.mubr.f32.gmra.mrb[98].mxu1 %v2869_v10  ;;  %v2460_v10 = vld [vmem:[%s5529_s26 + $0x88] sm:$0xff] }
 0x26c   : > { %3044 = vmatprep.mubr.f32.mxu1 %v2872_v22  ;;  %v2884_v23 = vmul.f32 %v2460_v10, %v5314_v40  ;;  %v2462_v22 = vld [vmem:[%s5529_s26 + $0x98] sm:$0xff] }
 0x26d   : > { %v2886_v29 = vmul.f32 %v2462_v22, %v5326_v48  ;;  %v2471_v22 = vld [vmem:[%s5529_s26 + $0xe0] sm:$0xff] }
 0x26f   : > { %3045 = vmatmul.mubr.f32.gmra.mrb[100].mxu1 %v2871_v20  ;;  %v2464_v20 = vld [vmem:[%s5529_s26 + $0xa8] sm:$0xff] }
 0x270   : > { %3049 = vmatprep.mubr.f32.mxu1 %v2874_v26  ;;  %v2463_v26 = vld [vmem:[%s5529_s26 + $0xa0] sm:$0xff]  ;;  %v2888_v40 = vmul.f32 %v2464_v20, %v6156_v51  ;;  %v6165_v20 = vld [vmem:[#allocation12_spill] sm:$0xff] }
 0x271   : > { %v2887_v38 = vmul.f32 %v2463_v26, %v6157_v15  ;;  %v2895_v3 = vmul.f32 %v2471_v22, %v6165_v20  ;;  %v6166_v26 = vld [vmem:[#allocation14_spill] sm:$0xff]  ;;  %v2475_v15 = vld [vmem:[%s5529_s26 + $0x100] sm:$0xff]  ;;  %v2489_v22 = vld [vmem:[%s5529_s26 + $0x170] sm:$0xff] }
 0x272   : > { %v2491_v20 = vld [vmem:[%s5529_s26 + $0x180] sm:$0xff] }
 0x273   : > { %3050 = vmatmul.mubr.f32.gmra.mrb[102].mxu1 %v2873_v25  ;;  %v2466_v25 = vld [vmem:[%s5529_s26 + $0xb8] sm:$0xff] }
 0x274   : > { %3054 = vmatprep.mubr.f32.mxu1 %v2876_v32  ;;  %v2465_v32 = vld [vmem:[%s5529_s26 + $0xb0] sm:$0xff]  ;;  %v2890_v48 = vmul.f32 %v2466_v25, %v6158_v6  ;;  %v2899_v6 = vmul.f32 %v5411_v18, %v2475_v15 }
 0x277   : > { %3055 = vmatmul.mubr.f32.gmra.mrb[104].mxu1 %v2875_v30  ;;  %v2468_v30 = vld [vmem:[%s5529_s26 + $0xc8] sm:$0xff] }
 0x278   : > { %3059 = vmatprep.mubr.f32.mxu1 %v2878_v37  ;;  %v2889_v37 = vmul.f32 %v2465_v32, %v6159_v7  ;;  %v2478_v32 = vld [vmem:[%s5529_s26 + $0x118] sm:$0xff]  ;;  %v2480_v7 = vld [vmem:[%s5529_s26 + $0x128] sm:$0xff] }
 0x27b   : > { %3060 = vmatmul.mubr.f32.gmra.mrb[106].mxu1 %v2877_v35  ;;  %v6160_v35 = vld [vmem:[#allocation9_spill] sm:$0xff] }
 0x27c   : > { %3064 = vmatprep.mubr.f32.mxu1 %v2880_v43  ;;  %v2892_v17 = vmul.f32 %v2468_v30, %v6160_v35  ;;  %v2470_v43 = vld [vmem:[%s5529_s26 + $0xd8] sm:$0xff]  ;;  %v2902_v30 = vmul.f32 %v5420_v21, %v2478_v32  ;;  %v2481_v35 = vld [vmem:[%s5529_s26 + $0x130] sm:$0xff] }
 0x27f   : > { %3065 = vmatmul.mubr.f32.gmra.mrb[108].mxu1 %v2879_v41  ;;  %v2891_v41 = vmul.f32 %v2467_v16, %v6161_v63  ;;  %v2482_v16 = vld [vmem:[%s5529_s26 + $0x138] sm:$0xff] }
 0x280   : > { %3069 = vmatprep.mubr.f32.mxu1 %v2882_v47  ;;  %v6162_v47 = vld [vmem:[#allocation11_spill] sm:$0xff]  ;;  %v2906_v21 = vmul.f32 %v5436_v34, %v2482_v16  ;;  %v2486_v63 = vld [vmem:[%s5529_s26 + $0x158] sm:$0xff]  ;;  %v2488_v34 = vld [vmem:[%s5529_s26 + $0x168] sm:$0xff] }
 0x281   : > { %v2894_v10 = vmul.f32 %v2470_v43, %v6162_v47  ;;  %v2905_v43 = vmul.f32 %v5433_v53, %v2481_v35 }
 0x283   : > { %3070 = vmatmul.mubr.f32.gmra.mrb[110].mxu1 %v2881_v46  ;;  %v2472_v46 = vld [vmem:[%s5529_s26 + $0xe8] sm:$0xff] }
 0x284   : > { %3074 = vmatprep.mubr.f32.mxu1 %v2884_v23  ;;  %v2893_v23 = vmul.f32 %v2469_v55, %v6163_v11  ;;  %v2485_v55 = vld [vmem:[%s5529_s26 + $0x150] sm:$0xff]  ;;  %v2490_v11 = vld [vmem:[%s5529_s26 + $0x178] sm:$0xff] }
 0x285   : > { %v2909_v53 = vmul.f32 %v5449_v57, %v2485_v55 }
 0x287   : > { %3075 = vmatmul.mubr.f32.gmra.mrb[112].mxu1 %v2883_v19  ;;  %v6164_v19 = vld [vmem:[#allocation13_spill] sm:$0xff] }
 0x288   : > { %3079 = vmatprep.mubr.f32.mxu1 %v2886_v29  ;;  %v2896_v13 = vmul.f32 %v2472_v46, %v6164_v19  ;;  %v2474_v29 = vld [vmem:[%s5529_s26 + $0xf8] sm:$0xff]  ;;  %v2487_v46 = vld [vmem:[%s5529_s26 + $0x160] sm:$0xff]  ;;  %v2914_v19 = vmul.f32 %v5468_v39, %v2490_v11  ;;  %v2915_v39 = vmul.f32 %v5474_v54, %v2491_v20 }
 0x289   : > { %v2898_v51 = vmul.f32 %v2474_v29, %v6166_v26 }
 0x28b   : > { %3080 = vmatmul.mubr.f32.gmra.mrb[114].mxu1 %v2885_v28  ;;  %v2473_v28 = vld [vmem:[%s5529_s26 + $0xf0] sm:$0xff] }
 0x28c   : > { %3084 = vmatprep.mubr.f32.mxu1 %v2888_v40  ;;  %v2476_v40 = vld [vmem:[%s5529_s26 + $0x108] sm:$0xff]  ;;  %v2897_v25 = vmul.f32 %v2473_v28, %v5401_v33  ;;  %v2494_v28 = vld [vmem:[%s5529_s26 + $0x198] sm:$0xff] }
 0x28f   : > { %3085 = vmatmul.mubr.f32.gmra.mrb[116].mxu1 %v2887_v38  ;;  %v2900_v38 = vmul.f32 %v5414_v42, %v2476_v40  ;;  %v2904_v42 = vmul.f32 %v5430_v52, %v2480_v7  ;;  %v2918_v40 = vmul.f32 %v5484_v44, %v2494_v28 }
 0x290   : > { %3089 = vmatprep.mubr.f32.mxu1 %v2890_v48  ;;  %v2477_v48 = vld [vmem:[%s5529_s26 + $0x110] sm:$0xff] }
 0x291   : > { %v2901_v33 = vmul.f32 %v5417_v31, %v2477_v48  ;;  %v2483_v31 = vld [vmem:[%s5529_s26 + $0x140] sm:$0xff] }
 0x293   : > { %3090 = vmatmul.mubr.f32.gmra.mrb[118].mxu1 %v2889_v37  ;;  %v2479_v37 = vld [vmem:[%s5529_s26 + $0x120] sm:$0xff] }
 0x294   : > { %3094 = vmatprep.mubr.f32.mxu1 %v2892_v17  ;;  %v2903_v18 = vmul.f32 %v5426_v50, %v2479_v37  ;;  %v2484_v17 = vld [vmem:[%s5529_s26 + $0x148] sm:$0xff]  ;;  %v2910_v50 = vmul.f32 %v5452_v49, %v2486_v63  ;;  %v2911_v49 = vmul.f32 %v5458_v36, %v2487_v46 }
 0x295   : > { %v2908_v52 = vmul.f32 %v5446_v56, %v2484_v17  ;;  %v2912_v56 = vmul.f32 %v5462_v60, %v2488_v34  ;;  %v2913_v60 = vmul.f32 %v5465_v61, %v2489_v22 }
 0x297   : > { %3095 = vmatmul.mubr.f32.gmra.mrb[120].mxu1 %v2891_v41  ;;  %v2907_v41 = vmul.f32 %v5442_v24, %v2483_v31 }
 0x298   : > { %3099 = vmatprep.mubr.f32.mxu1 %v2894_v10 }
 0x29b   : > { %3100 = vmatmul.mubr.f32.gmra.mrb[122].mxu1 %v2893_v23 }
 0x29c   : > { %3104 = vmatprep.mubr.f32.mxu1 %v2896_v13  ;;  %v2492_v13 = vld [vmem:[%s5529_s26 + $0x188] sm:$0xff] }
 0x29f   : > { %3105 = vmatmul.mubr.f32.gmra.mrb[124].mxu1 %v2895_v3  ;;  %v2916_v3 = vmul.f32 %v5478_v0, %v2492_v13 }
 0x2a0   : > { %3109 = vmatprep.mubr.f32.mxu1 %v2898_v51  ;;  %v2493_v51 = vld [vmem:[%s5529_s26 + $0x190] sm:$0xff] }
 0x2a1   : > { %v2917_v0 = vmul.f32 %v5481_v1, %v2493_v51 }
 0x2a3   : > { %3110 = vmatmul.mubr.f32.gmra.mrb[126].mxu1 %v2897_v25  ;;  %v2496_v25 = vld [vmem:[%s5529_s26 + $0x1a8] sm:$0xff] }
 0x2a4   : > { %3114 = vmatprep.mubr.f32.mxu1 %v2900_v38  ;;  %v2495_v38 = vld [vmem:[%s5529_s26 + $0x1a0] sm:$0xff]  ;;  %v2920_v32 = vmul.f32 %v5494_v4, %v2496_v25 }
 0x2a5   : > { %v2919_v44 = vmul.f32 %v5490_v58, %v2495_v38 }
 0x2a7   : > { %3115 = vmatmul.mubr.f32.gmra.mrb[128].mxu1 %v2899_v6  ;;  %v2498_v6 = vld [vmem:[%s5529_s26 + $0x1b8] sm:$0xff] }
 0x2a8   : > { %3119 = vmatprep.mubr.f32.mxu1 %v2902_v30  ;;  %v2497_v30 = vld [vmem:[%s5529_s26 + $0x1b0] sm:$0xff]  ;;  %v2922_v7 = vmul.f32 %v5500_v45, %v2498_v6 }
 0x2a9   : > { %v2921_v4 = vmul.f32 %v5497_v5, %v2497_v30 }
 0x2ab   : > { %3120 = vmatmul.mubr.f32.gmra.mrb[130].mxu1 %v2901_v33  ;;  %v2500_v33 = vld [vmem:[%s5529_s26 + $0x1c8] sm:$0xff] }
 0x2ac   : > { %3124 = vmatprep.mubr.f32.mxu1 %v2904_v42  ;;  %v2499_v42 = vld [vmem:[%s5529_s26 + $0x1c0] sm:$0xff]  ;;  %v2924_v16 = vmul.f32 %v5510_v8, %v2500_v33 }
 0x2ad   : > { %v2923_v45 = vmul.f32 %v5506_v62, %v2499_v42 }
 0x2af   : > { %3125 = vmatmul.mubr.f32.gmra.mrb[132].mxu1 %v2903_v18  ;;  %v2502_v18 = vld [vmem:[%s5529_s26 + $0x1d8] sm:$0xff] }
 0x2b0   : > { %3129 = vmatprep.mubr.f32.mxu1 %v2906_v21  ;;  %v2501_v21 = vld [vmem:[%s5529_s26 + $0x1d0] sm:$0xff]  ;;  %v2926_v17 = vmul.f32 %v5516_v27, %v2502_v18 }
 0x2b1   : > { %v2925_v8 = vmul.f32 %v5513_v9, %v2501_v21  ;;  %v2505_v27 = vld [vmem:[%s5529_s26 + $0x1f0] sm:$0xff]  ;;  %v5737_v21 = vld [vmem:[%s6126_s4] ss:$0 sm:$0xff] }
 0x2b2   : > { %v2929_v9 = vmul.f32 %v5535_v14, %v2505_v27 }
 0x2b3   : > { %3130 = vmatmul.mubr.f32.gmra.mrb[134].mxu1 %v2905_v43  ;;  %v2504_v43 = vld [vmem:[%s5529_s26 + $0x1e8] sm:$0xff] }
 0x2b4   : > { %3134 = vmatprep.mubr.f32.mxu1 %v2908_v52  ;;  %v2503_v52 = vld [vmem:[%s5529_s26 + $0x1e0] sm:$0xff]  ;;  %v2928_v63 = vmul.f32 %v5532_v12, %v2504_v43 }
 0x2b5   : > { %v2927_v62 = vmul.f32 %v5523_v2, %v2503_v52  ;;  %v5746_v52 = vld [vmem:[%s6128_s6] ss:$0 sm:$0xff] }
 0x2b7   : > { %3135 = vmatmul.mubr.f32.gmra.mrb[136].mxu1 %v2907_v41  ;;  %v2506_v41 = vld [vmem:[%s5529_s26 + $0x1f8] sm:$0xff] }
 0x2b8   : > { %v5632_v47 = vpop.f32.mrb[32].mxu1  ;;  %3139 = vmatprep.mubr.f32.mxu1 %v2910_v50  ;;  %v2930_v34 = vmul.f32 %v5538_v59, %v2506_v41 }
 0x2b9   : > { %v2614_v10 = vpop.f32.mrb[33].mxu1  ;;  %v2613_v43 = vadd.f32 %v5737_v21, %v5632_v47 }
 0x2bb   : > { %3140 = vmatmul.mubr.f32.gmra.mrb[138].mxu1 %v2909_v53  ;;  %vm2771_vm0 = vcmp.gt.f32.partialorder %v2613_v43, 0.0 }
 0x2bc   : > { %v5638_v24 = vpop.f32.mrb[34].mxu1  ;;  %3144 = vmatprep.mubr.f32.mxu1 %v2912_v56 }
 0x2bd   : > { %v2619_v23 = vpop.f32.mrb[35].mxu1  ;;  %v2618_v41 = vadd.f32 %v5737_v21, %v5638_v24 }
 0x2bf   : > { %3145 = vmatmul.mubr.f32.gmra.mrb[140].mxu1 %v2911_v49  ;;  %vm2772_vm2 = vcmp.gt.f32.partialorder %v2618_v41, 0.0 }
 0x2c0   : > { %v5644_v57 = vpop.f32.mrb[36].mxu1  ;;  %3149 = vmatprep.mubr.f32.mxu1 %v2914_v19 }
 0x2c1   : > { %v2624_v29 = vpop.f32.mrb[37].mxu1 }
 0x2c3   : > { %3150 = vmatmul.mubr.f32.gmra.mrb[142].mxu1 %v2913_v60 }
 0x2c4   : > { %v5650_v36 = vpop.f32.mrb[38].mxu1  ;;  %3154 = vmatprep.mubr.f32.mxu1 %v2916_v3 }
 0x2c5   : > { %v2629_v26 = vpop.f32.mrb[39].mxu1 }
 0x2c7   : > { %3155 = vmatmul.mubr.f32.gmra.mrb[144].mxu1 %v2915_v39 }
 0x2c8   : > { %v5656_v61 = vpop.f32.mrb[40].mxu1  ;;  %3159 = vmatprep.mubr.f32.mxu1 %v2918_v40 }
 0x2c9   : > { %v2634_v15 = vpop.f32.mrb[41].mxu1 }
 0x2cb   : > { %3160 = vmatmul.mubr.f32.gmra.mrb[146].mxu1 %v2917_v0 }
 0x2cc   : > { %v5662_v54 = vpop.f32.mrb[42].mxu1  ;;  %3164 = vmatprep.mubr.f32.mxu1 %v2920_v32 }
 0x2cd   : > { %v2639_v48 = vpop.f32.mrb[43].mxu1 }
 0x2cf   : > { %3165 = vmatmul.mubr.f32.gmra.mrb[148].mxu1 %v2919_v44 }
 0x2d0   : > { %v5668_v1 = vpop.f32.mrb[44].mxu1  ;;  %3169 = vmatprep.mubr.f32.mxu1 %v2922_v7 }
 0x2d1   : > { %v2644_v37 = vpop.f32.mrb[45].mxu1 }
 0x2d3   : > { %3170 = vmatmul.mubr.f32.gmra.mrb[150].mxu1 %v2921_v4 }
 0x2d4   : > { %v5674_v58 = vpop.f32.mrb[46].mxu1  ;;  %3174 = vmatprep.mubr.f32.mxu1 %v2924_v16 }
 0x2d5   : > { %v2649_v35 = vpop.f32.mrb[47].mxu1 }
 0x2d7   : > { %3175 = vmatmul.mubr.f32.gmra.mrb[152].mxu1 %v2923_v45 }
 0x2d8   : > { %v5680_v5 = vpop.f32.mrb[48].mxu1  ;;  %3179 = vmatprep.mubr.f32.mxu1 %v2926_v17 }
 0x2d9   : > { %v2654_v31 = vpop.f32.mrb[49].mxu1 }
 0x2db   : > { %3180 = vmatmul.mubr.f32.gmra.mrb[154].mxu1 %v2925_v8 }
 0x2dc   : > { %v5686_v55 = vpop.f32.mrb[50].mxu1  ;;  %3184 = vmatprep.mubr.f32.mxu1 %v2928_v63  ;;  %v2803_v63 = vmul.f32 0.01, %v2613_v43 }
 0x2dd   : > { %v2659_v50 = vpop.f32.mrb[51].mxu1 }
 0x2df   : > { %3185 = vmatmul.mubr.f32.gmra.mrb[156].mxu1 %v2927_v62 }
 0x2e0   : > { %v5691_v53 = vpop.f32.mrb[52].mxu1  ;;  %3189 = vmatprep.mubr.f32.mxu1 %v2930_v34  ;;  %v2835_v34 = vsel %vm2771_vm0, %v2613_v43, %v2803_v63 }
 0x2e1   : > { %v2664_v10 = vpop.f32.mrb[53].mxu1 }
 0x2e3   : > { %3190 = vmatmul.mubr.f32.gmra.mrb[158].mxu1 %v2929_v9  ;;  %v2804_v9 = vmul.f32 0.01, %v2618_v41 }
 0x2e4   : > { %v5694_v12 = vpop.f32.mrb[54].mxu1 }
 0x2e5   : > { %v2669_v46 = vpop.f32.mrb[55].mxu1 }
 0x2e6   : > { %v2623_v46 = vadd.f32 %v5737_v21, %v5644_v57 }
 0x2e8   : > { %v5696_v56 = vpop.f32.mrb[56].mxu1  ;;  %vm2773_vm4 = vcmp.gt.f32.partialorder %v2623_v46, 0.0 }
 0x2e9   : > { %v2674_v11 = vpop.f32.mrb[57].mxu1 }
 0x2ec   : > { %v5698_v49 = vpop.f32.mrb[58].mxu1 }
 0x2ed   : > { %v2679_v2 = vpop.f32.mrb[59].mxu1 }
 0x2f0   : > { %v5700_v23 = vpop.f32.mrb[60].mxu1 }
 0x2f1   : > { %v2684_v59 = vpop.f32.mrb[61].mxu1 }
 0x2f4   : > { %v5702_v22 = vpop.f32.mrb[62].mxu1 }
 0x2f5   : > { %v2689_v19 = vpop.f32.mrb[63].mxu1 }
 0x2fa   : > { %v5704_v13 = vpop.f32.mrb[64].mxu1 }
 0x2fb   : > { %v2694_v14 = vpop.f32.mrb[65].mxu1 }
 0x2fc   : > { %v2836_v14 = vsel %vm2772_vm2, %v2618_v41, %v2804_v9  ;;  %v2638_v41 = vadd.f32 %v5737_v21, %v5662_v54 }
 0x2fe   : > { %v5706_v60 = vpop.f32.mrb[66].mxu1  ;;  %v2808_v54 = vmul.f32 0.01, %v2638_v41  ;;  %vm2776_vm10 = vcmp.gt.f32.partialorder %v2638_v41, 0.0 }
 0x2ff   : > { %v2699_v29 = vpop.f32.mrb[67].mxu1 }
 0x302   : > { %v5708_v20 = vpop.f32.mrb[68].mxu1 }
 0x303   : > { %v2704_v3 = vpop.f32.mrb[69].mxu1 }
 0x304   : > { %v2805_v3 = vmul.f32 0.01, %v2623_v46 }
 0x306   : > { %v5710_v28 = vpop.f32.mrb[70].mxu1 }
 0x307   : > { %v2709_v39 = vpop.f32.mrb[71].mxu1 }
 0x308   : > { %v2628_v39 = vadd.f32 %v5737_v21, %v5650_v36  ;;  %v2837_v36 = vsel %vm2773_vm4, %v2623_v46, %v2805_v3 }
 0x30a   : > { %v5712_v26 = vpop.f32.mrb[72].mxu1  ;;  %vm2774_vm6 = vcmp.gt.f32.partialorder %v2628_v39, 0.0 }
 0x30b   : > { %v2714_v51 = vpop.f32.mrb[73].mxu1 }
 0x30e   : > { %v5714_v40 = vpop.f32.mrb[74].mxu1 }
 0x30f   : > { %v2719_v25 = vpop.f32.mrb[75].mxu1 }
 0x312   : > { %v5716_v0 = vpop.f32.mrb[76].mxu1 }
 0x313   : > { %v2724_v15 = vpop.f32.mrb[77].mxu1 }
 0x316   : > { %v5718_v38 = vpop.f32.mrb[78].mxu1 }
 0x317   : > { %v2729_v32 = vpop.f32.mrb[79].mxu1 }
 0x31a   : > { %v5720_v6 = vpop.f32.mrb[80].mxu1 }
 0x31b   : > { %v2734_v44 = vpop.f32.mrb[81].mxu1 }
 0x31e   : > { %v5722_v48 = vpop.f32.mrb[82].mxu1 }
 0x31f   : > { %v2739_v30 = vpop.f32.mrb[83].mxu1 }
 0x320   : > { %v2633_v30 = vadd.f32 %v5737_v21, %v5656_v61 }
 0x322   : > { %v5724_v7 = vpop.f32.mrb[84].mxu1  ;;  %v2807_v61 = vmul.f32 0.01, %v2633_v30  ;;  %vm2775_vm8 = vcmp.gt.f32.partialorder %v2633_v30, 0.0 }
 0x323   : > { %v2744_v33 = vpop.f32.mrb[85].mxu1 }
 0x326   : > { %v5726_v4 = vpop.f32.mrb[86].mxu1 }
 0x327   : > { %v2749_v37 = vpop.f32.mrb[87].mxu1 }
 0x32a   : > { %v5728_v42 = vpop.f32.mrb[88].mxu1 }
 0x32b   : > { %v2754_v16 = vpop.f32.mrb[89].mxu1 }
 0x32c   : > { %v2806_v16 = vmul.f32 0.01, %v2628_v39 }
 0x32e   : > { %v5730_v18 = vpop.f32.mrb[90].mxu1 }
 0x32f   : > { %v2759_v45 = vpop.f32.mrb[91].mxu1 }
 0x332   : > { %v5732_v35 = vpop.f32.mrb[92].mxu1 }
 0x333   : > { %v2764_v17 = vpop.f32.mrb[93].mxu1 }
 0x336   : > { %v5741_v8 = vpop.f32.mrb[94].mxu1 }
 0x337   : > { %v2769_v31 = vpop.f32.mrb[95].mxu1 }
 0x33a   : > { %v3036_v62 = vpop.f32.mrb[96].mxu1 }
 0x33b   : > { %v3037_v50 = vadd.f32 %v5746_v52, %v3036_v62  ;;  %v3038_v27 = vpop.f32.mrb[97].mxu1 }
 0x33c   : > { %v2838_v27 = vsel %vm2774_vm6, %v2628_v39, %v2806_v16 }
 0x33d   : > { %vm3195_vm1 = vcmp.gt.f32.partialorder %v3037_v50, 0.0  ;;  %v3227_v47 = vmul.f32 0.01, %v3037_v50 }
 0x33e   : > { %v3041_v10 = vpop.f32.mrb[98].mxu1 }
 0x33f   : > { %v3259_v11 = vsel %vm3195_vm1, %v3037_v50, %v3227_v47  ;;  %v3042_v2 = vadd.f32 %v5746_v52, %v3041_v10  ;;  %v3043_v24 = vpop.f32.mrb[99].mxu1 }
 0x340   : > { %v5762_v59 = vadd.f32 %v3259_v11, %v2835_v34  ;;  %v2839_v11 = vsel %vm2775_vm8, %v2633_v30, %v2807_v61 }
 0x341   : > { %vm3196_vm3 = vcmp.gt.f32.partialorder %v3042_v2, 0.0  ;;  %v3228_v19 = vmul.f32 0.01, %v3042_v2 }
 0x342   : > { %v3046_v29 = vpop.f32.mrb[100].mxu1  ;;  %v3323_v57 = vmul.f32 %v5762_v59, %v5762_v59  ;;  %3483 = vst [vmem:[%s5760_s14] sm:$0xff] %v5762_v59 }
 0x343   : > { %v3260_v51 = vsel %vm3196_vm3, %v3042_v2, %v3228_v19  ;;  %v3047_v25 = vadd.f32 %v5746_v52, %v3046_v29  ;;  %v3048_v15 = vpop.f32.mrb[101].mxu1  ;;  %v2643_v19 = vadd.f32 %v5737_v21, %v5668_v1  ;;  %v2648_v1 = vadd.f32 %v5737_v21, %v5674_v58 }
 0x344   : > { %3355 = vadd.xlane.f32.xlu0 %v3323_v57  ;;  %v5771_v32 = vadd.f32 %v3260_v51, %v2836_v14  ;;  %v2840_v51 = vsel %vm2776_vm10, %v2638_v41, %v2808_v54 }
 0x345   : > { %vm3197_vm5 = vcmp.gt.f32.partialorder %v3047_v25, 0.0  ;;  %v3229_v44 = vmul.f32 0.01, %v3047_v25  ;;  %vm2777_vm12 = vcmp.gt.f32.partialorder %v2643_v19, 0.0  ;;  %vm2778_vm14 = vcmp.gt.f32.partialorder %v2648_v1, 0.0 }
 0x346   : > { %v3051_v33 = vpop.f32.mrb[102].mxu1  ;;  %v3324_v37 = vmul.f32 %v5771_v32, %v5771_v32  ;;  %3484 = vst [vmem:[%s5760_s14 + $0x8] sm:$0xff] %v5771_v32 }
 0x347   : > { %v3261_v45 = vsel %vm3197_vm5, %v3047_v25, %v3229_v44  ;;  %v3052_v17 = vadd.f32 %v5746_v52, %v3051_v33  ;;  %v3053_v43 = vpop.f32.mrb[103].mxu1  ;;  %v2809_v44 = vmul.f32 0.01, %v2643_v19 }
 0x348   : > { %3357 = vadd.xlane.f32.xlu0 %v3324_v37  ;;  %v5780_v31 = vadd.f32 %v3261_v45, %v2837_v36  ;;  %v2653_v45 = vadd.f32 %v5737_v21, %v5680_v5 }
 0x349   : > { %vm3198_vm7 = vcmp.gt.f32.partialorder %v3052_v17, 0.0  ;;  %v3230_v63 = vmul.f32 0.01, %v3052_v17  ;;  %v2841_v58 = vsel %vm2777_vm12, %v2643_v19, %v2809_v44 }
 0x34a   : > { %v3056_v62 = vpop.f32.mrb[104].mxu1  ;;  %v3325_v50 = vmul.f32 %v5780_v31, %v5780_v31  ;;  %3485 = vst [vmem:[%s5760_s14 + $0x10] sm:$0xff] %v5780_v31  ;;  %v2811_v5 = vmul.f32 0.01, %v2653_v45  ;;  %vm2779_vm0 = vcmp.gt.f32.partialorder %v2653_v45, 0.0 }
 0x34b   : > { %v3262_v47 = vsel %vm3198_vm7, %v3052_v17, %v3230_v63  ;;  %v3057_v34 = vadd.f32 %v5746_v52, %v3056_v62  ;;  %v3058_v9 = vpop.f32.mrb[105].mxu1  ;;  %v2810_v63 = vmul.f32 0.01, %v2648_v1 }
 0x34c   : > { %3359 = vadd.xlane.f32.xlu1 %v3325_v50  ;;  %v5789_v10 = vadd.f32 %v3262_v47, %v2838_v27  ;;  %v2658_v47 = vadd.f32 %v5737_v21, %v5686_v55 }
 0x34d   : > { %vm3199_vm9 = vcmp.gt.f32.partialorder %v3057_v34, 0.0  ;;  %v3231_v46 = vmul.f32 0.01, %v3057_v34 }
 0x34e   : > { %v3061_v2 = vpop.f32.mrb[106].mxu1  ;;  %v3326_v24 = vmul.f32 %v5789_v10, %v5789_v10  ;;  %3486 = vst [vmem:[%s5760_s14 + $0x18] sm:$0xff] %v5789_v10  ;;  %v2812_v55 = vmul.f32 0.01, %v2658_v47  ;;  %vm2780_vm2 = vcmp.gt.f32.partialorder %v2658_v47, 0.0 }
 0x34f   : > { %v3263_v14 = vsel %vm3199_vm9, %v3057_v34, %v3231_v46  ;;  %v3062_v29 = vadd.f32 %v5746_v52, %v3061_v2  ;;  %v3063_v57 = vpop.f32.mrb[107].mxu1  ;;  %v2842_v46 = vsel %vm2778_vm14, %v2648_v1, %v2810_v63 }
 0x350   : > { %3361 = vadd.xlane.f32.xlu1 %v3326_v24  ;;  %v5798_v3 = vadd.f32 %v3263_v14, %v2839_v11  ;;  %v2843_v14 = vsel %vm2779_vm0, %v2653_v45, %v2811_v5 }
 0x351   : > { %vm3200_vm11 = vcmp.gt.f32.partialorder %v3062_v29, 0.0  ;;  %v3232_v39 = vmul.f32 0.01, %v3062_v29 }
 0x352   : > { %v3066_v25 = vpop.f32.mrb[108].mxu1  ;;  %v3327_v15 = vmul.f32 %v5798_v3, %v5798_v3  ;;  %3487 = vst [vmem:[%s5760_s14 + $0x20] sm:$0xff] %v5798_v3 }
 0x353   : > { %v3264_v30 = vsel %vm3200_vm11, %v3062_v29, %v3232_v39  ;;  %v3067_v33 = vadd.f32 %v5746_v52, %v3066_v25  ;;  %v3068_v37 = vpop.f32.mrb[109].mxu1  ;;  %v2663_v39 = vadd.f32 %v5737_v21, %v5691_v53  ;;  %v2668_v53 = vadd.f32 %v5737_v21, %v5694_v12 }
 0x354   : > { %3363 = vadd.xlane.f32.xlu0 %v3327_v15  ;;  %v5807_v36 = vadd.f32 %v3264_v30, %v2840_v51  ;;  %v2844_v30 = vsel %vm2780_vm2, %v2658_v47, %v2812_v55 }
 0x355   : > { %vm3201_vm13 = vcmp.gt.f32.partialorder %v3067_v33, 0.0  ;;  %v3233_v16 = vmul.f32 0.01, %v3067_v33  ;;  %vm2781_vm4 = vcmp.gt.f32.partialorder %v2663_v39, 0.0  ;;  %vm2782_vm6 = vcmp.gt.f32.partialorder %v2668_v53, 0.0 }
 0x356   : > { %v3071_v17 = vpop.f32.mrb[110].mxu1  ;;  %v3328_v43 = vmul.f32 %v5807_v36, %v5807_v36  ;;  %3488 = vst [vmem:[%s5760_s14 + $0x28] sm:$0xff] %v5807_v36 }
 0x357   : > { %v3265_v61 = vsel %vm3201_vm13, %v3067_v33, %v3233_v16  ;;  %v3072_v41 = vadd.f32 %v5746_v52, %v3071_v17  ;;  %v3073_v62 = vpop.f32.mrb[111].mxu1  ;;  %v2813_v16 = vmul.f32 0.01, %v2663_v39 }
 0x358   : > { %3365 = vadd.xlane.f32.xlu1 %v3328_v43  ;;  %v5816_v50 = vadd.f32 %v3265_v61, %v2841_v58  ;;  %v2673_v61 = vadd.f32 %v5737_v21, %v5696_v56 }
 0x359   : > { %vm3202_vm15 = vcmp.gt.f32.partialorder %v3072_v41, 0.0  ;;  %v3234_v27 = vmul.f32 0.01, %v3072_v41  ;;  %v2845_v12 = vsel %vm2781_vm4, %v2663_v39, %v2813_v16 }
 0x35a   : > { %v3076_v34 = vpop.f32.mrb[112].mxu1  ;;  %v3329_v9 = vmul.f32 %v5816_v50, %v5816_v50  ;;  %3489 = vst [vmem:[%s5760_s14 + $0x30] sm:$0xff] %v5816_v50  ;;  %v2815_v56 = vmul.f32 0.01, %v2673_v61  ;;  %vm2783_vm8 = vcmp.gt.f32.partialorder %v2673_v61, 0.0 }
 0x35b   : > { %v3266_v11 = vsel %vm3202_vm15, %v3072_v41, %v3234_v27  ;;  %v3077_v54 = vadd.f32 %v5746_v52, %v3076_v34  ;;  %v3078_v2 = vpop.f32.mrb[113].mxu1  ;;  %v2814_v27 = vmul.f32 0.01, %v2668_v53 }
 0x35c   : > { %3367 = vadd.xlane.f32.xlu0 %v3329_v9  ;;  %v5825_v24 = vadd.f32 %v3266_v11, %v2842_v46  ;;  %v2678_v11 = vadd.f32 %v5737_v21, %v5698_v49 }
 0x35d   : > { %vm3203_vm1 = vcmp.gt.f32.partialorder %v3077_v54, 0.0  ;;  %v3235_v19 = vmul.f32 0.01, %v3077_v54 }
 0x35e   : > { %v3081_v29 = vpop.f32.mrb[114].mxu1  ;;  %v3330_v57 = vmul.f32 %v5825_v24, %v5825_v24  ;;  %3490 = vst [vmem:[%s5760_s14 + $0x38] sm:$0xff] %v5825_v24  ;;  %v2816_v49 = vmul.f32 0.01, %v2678_v11  ;;  %vm2784_vm10 = vcmp.gt.f32.partialorder %v2678_v11, 0.0 }
 0x35f   : > { %v3267_v51 = vsel %vm3203_vm1, %v3077_v54, %v3235_v19  ;;  %v3082_v25 = vadd.f32 %v5746_v52, %v3081_v29  ;;  %v3083_v15 = vpop.f32.mrb[115].mxu1  ;;  %v2846_v19 = vsel %vm2782_vm6, %v2668_v53, %v2814_v27 }
 0x360   : > { %3369 = vadd.xlane.f32.xlu1 %v3330_v57  ;;  %v5834_v44 = vadd.f32 %v3267_v51, %v2843_v14  ;;  %v2847_v51 = vsel %vm2783_vm8, %v2673_v61, %v2815_v56 }
 0x361   : > { %vm3204_vm3 = vcmp.gt.f32.partialorder %v3082_v25, 0.0  ;;  %v3236_v1 = vmul.f32 0.01, %v3082_v25 }
 0x362   : > { %v3086_v33 = vpop.f32.mrb[116].mxu1  ;;  %v3331_v37 = vmul.f32 %v5834_v44, %v5834_v44  ;;  %3491 = vst [vmem:[%s5760_s14 + $0x40] sm:$0xff] %v5834_v44 }
 0x363   : > { %v3268_v45 = vsel %vm3204_vm3, %v3082_v25, %v3236_v1  ;;  %v3087_v17 = vadd.f32 %v5746_v52, %v3086_v33  ;;  %v3088_v43 = vpop.f32.mrb[117].mxu1  ;;  %v2683_v1 = vadd.f32 %v5737_v21, %v5700_v23  ;;  %v2688_v23 = vadd.f32 %v5737_v21, %v5702_v22 }
 0x364   : > { %3371 = vadd.xlane.f32.xlu0 %v3331_v37  ;;  %v5843_v58 = vadd.f32 %v3268_v45, %v2844_v30  ;;  %v2848_v45 = vsel %vm2784_vm10, %v2678_v11, %v2816_v49 }
 0x365   : > { %vm3205_vm5 = vcmp.gt.f32.partialorder %v3087_v17, 0.0  ;;  %v3237_v63 = vmul.f32 0.01, %v3087_v17  ;;  %vm2785_vm12 = vcmp.gt.f32.partialorder %v2683_v1, 0.0  ;;  %vm2786_vm14 = vcmp.gt.f32.partialorder %v2688_v23, 0.0 }
 0x366   : > { %v3091_v41 = vpop.f32.mrb[118].mxu1  ;;  %v3332_v62 = vmul.f32 %v5843_v58, %v5843_v58  ;;  %3492 = vst [vmem:[%s5760_s14 + $0x48] sm:$0xff] %v5843_v58 }
 0x367   : > { %v3269_v5 = vsel %vm3205_vm5, %v3087_v17, %v3237_v63  ;;  %v3092_v47 = vadd.f32 %v5746_v52, %v3091_v41  ;;  %v3093_v34 = vpop.f32.mrb[119].mxu1  ;;  %v2817_v63 = vmul.f32 0.01, %v2683_v1 }
 0x368   : > { %3373 = vadd.xlane.f32.xlu1 %v3332_v62  ;;  %v5852_v9 = vadd.f32 %v3269_v5, %v2845_v12  ;;  %v2693_v5 = vadd.f32 %v5737_v21, %v5704_v13 }
 0x369   : > { %vm3206_vm7 = vcmp.gt.f32.partialorder %v3092_v47, 0.0  ;;  %v3238_v46 = vmul.f32 0.01, %v3092_v47  ;;  %v2849_v22 = vsel %vm2785_vm12, %v2683_v1, %v2817_v63 }
 0x36a   : > { %v3096_v54 = vpop.f32.mrb[120].mxu1  ;;  %v3333_v2 = vmul.f32 %v5852_v9, %v5852_v9  ;;  %3493 = vst [vmem:[%s5760_s14 + $0x50] sm:$0xff] %v5852_v9  ;;  %v2819_v13 = vmul.f32 0.01, %v2693_v5  ;;  %vm2787_vm0 = vcmp.gt.f32.partialorder %v2693_v5, 0.0 }
 0x36b   : > { %v3270_v14 = vsel %vm3206_vm7, %v3092_v47, %v3238_v46  ;;  %v3097_v55 = vadd.f32 %v5746_v52, %v3096_v54  ;;  %v3098_v29 = vpop.f32.mrb[121].mxu1  ;;  %v2818_v46 = vmul.f32 0.01, %v2688_v23 }
 0x36c   : > { %3375 = vadd.xlane.f32.xlu0 %v3333_v2  ;;  %v5861_v57 = vadd.f32 %v3270_v14, %v2846_v19  ;;  %v2698_v14 = vadd.f32 %v5737_v21, %v5706_v60 }
 0x36d   : > { %vm3207_vm9 = vcmp.gt.f32.partialorder %v3097_v55, 0.0  ;;  %v3239_v39 = vmul.f32 0.01, %v3097_v55 }
 0x36e   : > { %v3101_v25 = vpop.f32.mrb[122].mxu1  ;;  %v3334_v15 = vmul.f32 %v5861_v57, %v5861_v57  ;;  %3494 = vst [vmem:[%s5760_s14 + $0x58] sm:$0xff] %v5861_v57  ;;  %v2820_v60 = vmul.f32 0.01, %v2698_v14  ;;  %vm2788_vm2 = vcmp.gt.f32.partialorder %v2698_v14, 0.0 }
 0x36f   : > { %v3271_v30 = vsel %vm3207_vm9, %v3097_v55, %v3239_v39  ;;  %v3102_v33 = vadd.f32 %v5746_v52, %v3101_v25  ;;  %v3103_v37 = vpop.f32.mrb[123].mxu1  ;;  %v2850_v39 = vsel %vm2786_vm14, %v2688_v23, %v2818_v46 }
 0x370   : > { %3377 = vadd.xlane.f32.xlu1 %v3334_v15  ;;  %v5870_v16 = vadd.f32 %v3271_v30, %v2847_v51  ;;  %v2851_v30 = vsel %vm2787_vm0, %v2693_v5, %v2819_v13 }
 0x371   : > { %vm3208_vm11 = vcmp.gt.f32.partialorder %v3102_v33, 0.0  ;;  %v3240_v53 = vmul.f32 0.01, %v3102_v33 }
 0x372   : > { %v3106_v17 = vpop.f32.mrb[124].mxu1  ;;  %v3335_v43 = vmul.f32 %v5870_v16, %v5870_v16  ;;  %3495 = vst [vmem:[%s5760_s14 + $0x60] sm:$0xff] %v5870_v16 }
 0x373   : > { %v3272_v61 = vsel %vm3208_vm11, %v3102_v33, %v3240_v53  ;;  %v3107_v41 = vadd.f32 %v5746_v52, %v3106_v17  ;;  %v3108_v62 = vpop.f32.mrb[125].mxu1  ;;  %v2703_v53 = vadd.f32 %v5737_v21, %v5708_v20  ;;  %v2708_v20 = vadd.f32 %v5737_v21, %v5710_v28 }
 0x374   : > { %3379 = vadd.xlane.f32.xlu0 %v3335_v43  ;;  %v5879_v12 = vadd.f32 %v3272_v61, %v2848_v45  ;;  %v2852_v61 = vsel %vm2788_vm2, %v2698_v14, %v2820_v60 }
 0x375   : > { %vm3209_vm13 = vcmp.gt.f32.partialorder %v3107_v41, 0.0  ;;  %v3241_v27 = vmul.f32 0.01, %v3107_v41  ;;  %vm2789_vm4 = vcmp.gt.f32.partialorder %v2703_v53, 0.0  ;;  %vm2790_vm6 = vcmp.gt.f32.partialorder %v2708_v20, 0.0 }
 0x376   : > { %v3111_v47 = vpop.f32.mrb[126].mxu1  ;;  %v3336_v34 = vmul.f32 %v5879_v12, %v5879_v12  ;;  %3496 = vst [vmem:[%s5760_s14 + $0x68] sm:$0xff] %v5879_v12 }
 0x377   : > { %v3273_v56 = vsel %vm3209_vm13, %v3107_v41, %v3241_v27  ;;  %v3112_v11 = vadd.f32 %v5746_v52, %v3111_v47  ;;  %v3113_v54 = vpop.f32.mrb[127].mxu1  ;;  %v2821_v27 = vmul.f32 0.01, %v2703_v53 }
 0x378   : > { %3381 = vadd.xlane.f32.xlu1 %v3336_v34  ;;  %v5888_v2 = vadd.f32 %v3273_v56, %v2849_v22  ;;  %v2713_v56 = vadd.f32 %v5737_v21, %v5712_v26 }
 0x379   : > { %vm3210_vm15 = vcmp.gt.f32.partialorder %v3112_v11, 0.0  ;;  %v3242_v19 = vmul.f32 0.01, %v3112_v11  ;;  %v2853_v28 = vsel %vm2789_vm4, %v2703_v53, %v2821_v27 }
 0x37a   : > { %v3116_v55 = vpop.f32.mrb[128].mxu1  ;;  %v3337_v29 = vmul.f32 %v5888_v2, %v5888_v2  ;;  %3497 = vst [vmem:[%s5760_s14 + $0x70] sm:$0xff] %v5888_v2  ;;  %v2823_v26 = vmul.f32 0.01, %v2713_v56  ;;  %vm2791_vm8 = vcmp.gt.f32.partialorder %v2713_v56, 0.0 }
 0x37b   : > { %v3274_v51 = vsel %vm3210_vm15, %v3112_v11, %v3242_v19  ;;  %v3117_v49 = vadd.f32 %v5746_v52, %v3116_v55  ;;  %v3118_v25 = vpop.f32.mrb[129].mxu1  ;;  %v2822_v19 = vmul.f32 0.01, %v2708_v20 }
 0x37c   : > { %3383 = vadd.xlane.f32.xlu0 %v3337_v29  ;;  %v5897_v15 = vadd.f32 %v3274_v51, %v2850_v39  ;;  %v2718_v51 = vadd.f32 %v5737_v21, %v5714_v40 }
 0x37d   : > { %vm3211_vm1 = vcmp.gt.f32.partialorder %v3117_v49, 0.0  ;;  %v3243_v1 = vmul.f32 0.01, %v3117_v49 }
 0x37e   : > { %v3121_v33 = vpop.f32.mrb[130].mxu1  ;;  %v3338_v37 = vmul.f32 %v5897_v15, %v5897_v15  ;;  %3498 = vst [vmem:[%s5760_s14 + $0x78] sm:$0xff] %v5897_v15  ;;  %v2824_v40 = vmul.f32 0.01, %v2718_v51  ;;  %vm2792_vm10 = vcmp.gt.f32.partialorder %v2718_v51, 0.0 }
 0x37f   : > { %v3275_v45 = vsel %vm3211_vm1, %v3117_v49, %v3243_v1  ;;  %v3122_v17 = vadd.f32 %v5746_v52, %v3121_v33  ;;  %v3123_v43 = vpop.f32.mrb[131].mxu1  ;;  %v2854_v1 = vsel %vm2790_vm6, %v2708_v20, %v2822_v19 }
 0x380   : > { %3385 = vadd.xlane.f32.xlu1 %v3338_v37  ;;  %v5906_v63 = vadd.f32 %v3275_v45, %v2851_v30  ;;  %v2855_v45 = vsel %vm2791_vm8, %v2713_v56, %v2823_v26 }
 0x381   : > { %vm3212_vm3 = vcmp.gt.f32.partialorder %v3122_v17, 0.0  ;;  %v3244_v23 = vmul.f32 0.01, %v3122_v17 }
 0x382   : > { %v3126_v41 = vpop.f32.mrb[132].mxu1  ;;  %v3339_v62 = vmul.f32 %v5906_v63, %v5906_v63  ;;  %3499 = vst [vmem:[%s5760_s14 + $0x80] sm:$0xff] %v5906_v63 }
 0x383   : > { %v3276_v5 = vsel %vm3212_vm3, %v3122_v17, %v3244_v23  ;;  %v3127_v47 = vadd.f32 %v5746_v52, %v3126_v41  ;;  %v3128_v34 = vpop.f32.mrb[133].mxu1  ;;  %v2723_v23 = vadd.f32 %v5737_v21, %v5716_v0  ;;  %v2728_v0 = vadd.f32 %v5737_v21, %v5718_v38 }
 0x384   : > { %3387 = vadd.xlane.f32.xlu0 %v3339_v62  ;;  %v5915_v22 = vadd.f32 %v3276_v5, %v2852_v61  ;;  %v2856_v5 = vsel %vm2792_vm10, %v2718_v51, %v2824_v40 }
 0x385   : > { %vm3213_vm5 = vcmp.gt.f32.partialorder %v3127_v47, 0.0  ;;  %v3245_v46 = vmul.f32 0.01, %v3127_v47  ;;  %vm2793_vm12 = vcmp.gt.f32.partialorder %v2723_v23, 0.0  ;;  %vm2794_vm14 = vcmp.gt.f32.partialorder %v2728_v0, 0.0 }
 0x386   : > { %v3131_v11 = vpop.f32.mrb[134].mxu1  ;;  %v3340_v54 = vmul.f32 %v5915_v22, %v5915_v22  ;;  %3500 = vst [vmem:[%s5760_s14 + $0x88] sm:$0xff] %v5915_v22 }
 0x387   : > { %v3277_v13 = vsel %vm3213_vm5, %v3127_v47, %v3245_v46  ;;  %v3132_v14 = vadd.f32 %v5746_v52, %v3131_v11  ;;  %v3133_v55 = vpop.f32.mrb[135].mxu1  ;;  %v2825_v46 = vmul.f32 0.01, %v2723_v23 }
 0x388   : > { %3389 = vadd.xlane.f32.xlu1 %v3340_v54  ;;  %v5924_v29 = vadd.f32 %v3277_v13, %v2853_v28  ;;  %v2733_v13 = vadd.f32 %v5737_v21, %v5720_v6 }
 0x389   : > { %vm3214_vm7 = vcmp.gt.f32.partialorder %v3132_v14, 0.0  ;;  %v3246_v39 = vmul.f32 0.01, %v3132_v14  ;;  %v2857_v38 = vsel %vm2793_vm12, %v2723_v23, %v2825_v46 }
 0x38a   : > { %v3136_v49 = vpop.f32.mrb[136].mxu1  ;;  %v3341_v25 = vmul.f32 %v5924_v29, %v5924_v29  ;;  %3501 = vst [vmem:[%s5760_s14 + $0x90] sm:$0xff] %v5924_v29  ;;  %v2827_v6 = vmul.f32 0.01, %v2733_v13  ;;  %vm2795_vm0 = vcmp.gt.f32.partialorder %v2733_v13, 0.0 }
 0x38b   : > { %v3278_v30 = vsel %vm3214_vm7, %v3132_v14, %v3246_v39  ;;  %v3137_v60 = vadd.f32 %v5746_v52, %v3136_v49  ;;  %v3138_v33 = vpop.f32.mrb[137].mxu1  ;;  %v2826_v39 = vmul.f32 0.01, %v2728_v0 }
 0x38c   : > { %3391 = vadd.xlane.f32.xlu0 %v3341_v25  ;;  %v5933_v37 = vadd.f32 %v3278_v30, %v2854_v1  ;;  %v2738_v30 = vadd.f32 %v5737_v21, %v5722_v48 }
 0x38d   : > { %vm3215_vm9 = vcmp.gt.f32.partialorder %v3137_v60, 0.0  ;;  %v3247_v53 = vmul.f32 0.01, %v3137_v60 }
 0x38e   : > { %v3141_v17 = vpop.f32.mrb[138].mxu1  ;;  %v3342_v43 = vmul.f32 %v5933_v37, %v5933_v37  ;;  %3502 = vst [vmem:[%s5760_s14 + $0x98] sm:$0xff] %v5933_v37  ;;  %v2828_v48 = vmul.f32 0.01, %v2738_v30  ;;  %vm2796_vm2 = vcmp.gt.f32.partialorder %v2738_v30, 0.0 }
 0x38f   : > { %v3279_v61 = vsel %vm3215_vm9, %v3137_v60, %v3247_v53  ;;  %v3142_v41 = vadd.f32 %v5746_v52, %v3141_v17  ;;  %v3143_v62 = vpop.f32.mrb[139].mxu1  ;;  %v2858_v53 = vsel %vm2794_vm14, %v2728_v0, %v2826_v39 }
 0x390   : > { %3393 = vadd.xlane.f32.xlu1 %v3342_v43  ;;  %v5942_v27 = vadd.f32 %v3279_v61, %v2855_v45  ;;  %v2859_v61 = vsel %vm2795_vm0, %v2733_v13, %v2827_v6 }
 0x391   : > { %vm3216_vm11 = vcmp.gt.f32.partialorder %v3142_v41, 0.0  ;;  %v3248_v20 = vmul.f32 0.01, %v3142_v41 }
 0x392   : > { %v3146_v47 = vpop.f32.mrb[140].mxu1  ;;  %v3343_v34 = vmul.f32 %v5942_v27, %v5942_v27  ;;  %3503 = vst [vmem:[%s5760_s14 + $0xa0] sm:$0xff] %v5942_v27 }
 0x393   : > { %v3280_v56 = vsel %vm3216_vm11, %v3142_v41, %v3248_v20  ;;  %v3147_v11 = vadd.f32 %v5746_v52, %v3146_v47  ;;  %v3148_v54 = vpop.f32.mrb[141].mxu1  ;;  %v2743_v20 = vadd.f32 %v5737_v21, %v5724_v7  ;;  %v2748_v7 = vadd.f32 %v5737_v21, %v5726_v4 }
 0x394   : > { %3395 = vadd.xlane.f32.xlu0 %v3343_v34  ;;  %v5951_v28 = vadd.f32 %v3280_v56, %v2856_v5  ;;  %v2860_v56 = vsel %vm2796_vm2, %v2738_v30, %v2828_v48 }
 0x395   : > { %vm3217_vm13 = vcmp.gt.f32.partialorder %v3147_v11, 0.0  ;;  %v3249_v19 = vmul.f32 0.01, %v3147_v11  ;;  %vm2797_vm4 = vcmp.gt.f32.partialorder %v2743_v20, 0.0  ;;  %vm2798_vm6 = vcmp.gt.f32.partialorder %v2748_v7, 0.0 }
 0x396   : > { %v3151_v14 = vpop.f32.mrb[142].mxu1  ;;  %v3344_v55 = vmul.f32 %v5951_v28, %v5951_v28  ;;  %3504 = vst [vmem:[%s5760_s14 + $0xa8] sm:$0xff] %v5951_v28 }
 0x397   : > { %v3281_v26 = vsel %vm3217_vm13, %v3147_v11, %v3249_v19  ;;  %v3152_v51 = vadd.f32 %v5746_v52, %v3151_v14  ;;  %v3153_v49 = vpop.f32.mrb[143].mxu1  ;;  %v2829_v19 = vmul.f32 0.01, %v2743_v20 }
 0x398   : > { %3397 = vadd.xlane.f32.xlu1 %v3344_v55  ;;  %v5960_v25 = vadd.f32 %v3281_v26, %v2857_v38  ;;  %v2753_v26 = vadd.f32 %v5737_v21, %v5728_v42 }
 0x399   : > { %vm3218_vm15 = vcmp.gt.f32.partialorder %v3152_v51, 0.0  ;;  %v3250_v1 = vmul.f32 0.01, %v3152_v51  ;;  %v2861_v4 = vsel %vm2797_vm4, %v2743_v20, %v2829_v19 }
 0x39a   : > { %v3156_v60 = vpop.f32.mrb[144].mxu1  ;;  %v3345_v33 = vmul.f32 %v5960_v25, %v5960_v25  ;;  %3505 = vst [vmem:[%s5760_s14 + $0xb0] sm:$0xff] %v5960_v25  ;;  %v2831_v42 = vmul.f32 0.01, %v2753_v26  ;;  %vm2799_vm8 = vcmp.gt.f32.partialorder %v2753_v26, 0.0 }
 0x39b   : > { %v3282_v45 = vsel %vm3218_vm15, %v3152_v51, %v3250_v1  ;;  %v3157_v40 = vadd.f32 %v5746_v52, %v3156_v60  ;;  %v3158_v17 = vpop.f32.mrb[145].mxu1  ;;  %v2830_v1 = vmul.f32 0.01, %v2748_v7 }
 0x39c   : > { %3399 = vadd.xlane.f32.xlu0 %v3345_v33  ;;  %v5969_v43 = vadd.f32 %v3282_v45, %v2858_v53  ;;  %v2758_v45 = vadd.f32 %v5737_v21, %v5730_v18 }
 0x39d   : > { %vm3219_vm1 = vcmp.gt.f32.partialorder %v3157_v40, 0.0  ;;  %v3251_v23 = vmul.f32 0.01, %v3157_v40 }
 0x39e   : > { %v3161_v41 = vpop.f32.mrb[146].mxu1  ;;  %v3346_v62 = vmul.f32 %v5969_v43, %v5969_v43  ;;  %3506 = vst [vmem:[%s5760_s14 + $0xb8] sm:$0xff] %v5969_v43  ;;  %v2832_v18 = vmul.f32 0.01, %v2758_v45  ;;  %vm2800_vm10 = vcmp.gt.f32.partialorder %v2758_v45, 0.0 }
 0x39f   : > { %v3283_v5 = vsel %vm3219_vm1, %v3157_v40, %v3251_v23  ;;  %v3162_v47 = vadd.f32 %v5746_v52, %v3161_v41  ;;  %v3163_v34 = vpop.f32.mrb[147].mxu1  ;;  %v2862_v23 = vsel %vm2798_vm6, %v2748_v7, %v2830_v1 }
 0x3a0   : > { %3401 = vadd.xlane.f32.xlu1 %v3346_v62  ;;  %v5978_v46 = vadd.f32 %v3283_v5, %v2859_v61  ;;  %v2863_v5 = vsel %vm2799_vm8, %v2753_v26, %v2831_v42 }
 0x3a1   : > { %vm3220_vm3 = vcmp.gt.f32.partialorder %v3162_v47, 0.0  ;;  %v3252_v0 = vmul.f32 0.01, %v3162_v47 }
 0x3a2   : > { %v3166_v11 = vpop.f32.mrb[148].mxu1  ;;  %v3347_v54 = vmul.f32 %v5978_v46, %v5978_v46  ;;  %3507 = vst [vmem:[%s5760_s14 + $0xc0] sm:$0xff] %v5978_v46 }
 0x3a3   : > { %v3284_v13 = vsel %vm3220_vm3, %v3162_v47, %v3252_v0  ;;  %v3167_v14 = vadd.f32 %v5746_v52, %v3166_v11  ;;  %v3168_v55 = vpop.f32.mrb[149].mxu1  ;;  %v2763_v0 = vadd.f32 %v5737_v21, %v5732_v35  ;;  %v2768_v35 = vadd.f32 %v5737_v21, %v5741_v8 }
 0x3a4   : > { %3403 = vadd.xlane.f32.xlu0 %v3347_v54  ;;  %v5987_v38 = vadd.f32 %v3284_v13, %v2860_v56  ;;  %v2864_v13 = vsel %vm2800_vm10, %v2758_v45, %v2832_v18 }
 0x3a5   : > { %vm3221_vm5 = vcmp.gt.f32.partialorder %v3167_v14, 0.0  ;;  %v3253_v39 = vmul.f32 0.01, %v3167_v14  ;;  %vm2801_vm12 = vcmp.gt.f32.partialorder %v2763_v0, 0.0  ;;  %vm2802_vm14 = vcmp.gt.f32.partialorder %v2768_v35, 0.0 }
 0x3a6   : > { %v3171_v51 = vpop.f32.mrb[150].mxu1  ;;  %v3348_v49 = vmul.f32 %v5987_v38, %v5987_v38  ;;  %3508 = vst [vmem:[%s5760_s14 + $0xc8] sm:$0xff] %v5987_v38 }
 0x3a7   : > { %v3285_v6 = vsel %vm3221_vm5, %v3167_v14, %v3253_v39  ;;  %v3172_v30 = vadd.f32 %v5746_v52, %v3171_v51  ;;  %v3173_v60 = vpop.f32.mrb[151].mxu1  ;;  %v2833_v39 = vmul.f32 0.01, %v2763_v0 }
 0x3a8   : > { %3405 = vadd.xlane.f32.xlu1 %v3348_v49  ;;  %v5996_v33 = vadd.f32 %v3285_v6, %v2861_v4 }
 0x3a9   : > { %vm3222_vm7 = vcmp.gt.f32.partialorder %v3172_v30, 0.0  ;;  %v3254_v53 = vmul.f32 0.01, %v3172_v30  ;;  %v2865_v60 = vsel %vm2801_vm12, %v2763_v0, %v2833_v39 }
 0x3aa   : > { %v3176_v40 = vpop.f32.mrb[152].mxu1  ;;  %v3349_v17 = vmul.f32 %v5996_v33, %v5996_v33  ;;  %3509 = vst [vmem:[%s5760_s14 + $0xd0] sm:$0xff] %v5996_v33 }
 0x3ab   : > { %v3286_v61 = vsel %vm3222_vm7, %v3172_v30, %v3254_v53  ;;  %v3177_v48 = vadd.f32 %v5746_v52, %v3176_v40  ;;  %v3178_v41 = vpop.f32.mrb[153].mxu1  ;;  %v2834_v53 = vmul.f32 0.01, %v2768_v35 }
 0x3ac   : > { %3407 = vadd.xlane.f32.xlu0 %v3349_v17  ;;  %v6005_v62 = vadd.f32 %v3286_v61, %v2862_v23 }
 0x3ad   : > { %vm3223_vm9 = vcmp.gt.f32.partialorder %v3177_v48, 0.0  ;;  %v3255_v20 = vmul.f32 0.01, %v3177_v48  ;;  %v2866_v23 = vsel %vm2802_vm14, %v2768_v35, %v2834_v53 }
 0x3ae   : > { %v3181_v47 = vpop.f32.mrb[154].mxu1  ;;  %v3350_v34 = vmul.f32 %v6005_v62, %v6005_v62  ;;  %3510 = vst [vmem:[%s5760_s14 + $0xd8] sm:$0xff] %v6005_v62 }
 0x3af   : > { %v3287_v56 = vsel %vm3223_vm9, %v3177_v48, %v3255_v20  ;;  %v3182_v11 = vadd.f32 %v5746_v52, %v3181_v47  ;;  %v3183_v54 = vpop.f32.mrb[155].mxu1 }
 0x3b0   : > { %3409 = vadd.xlane.f32.xlu1 %v3350_v34  ;;  %v6014_v19 = vadd.f32 %v3287_v56, %v2863_v5 }
 0x3b1   : > { %vm3224_vm11 = vcmp.gt.f32.partialorder %v3182_v11, 0.0  ;;  %v3256_v7 = vmul.f32 0.01, %v3182_v11 }
 0x3b2   : > { %v3186_v14 = vpop.f32.mrb[156].mxu1  ;;  %v3351_v55 = vmul.f32 %v6014_v19, %v6014_v19  ;;  %3511 = vst [vmem:[%s5760_s14 + $0xe0] sm:$0xff] %v6014_v19 }
 0x3b3   : > { %v3288_v26 = vsel %vm3224_vm11, %v3182_v11, %v3256_v7  ;;  %v3187_v51 = vadd.f32 %v5746_v52, %v3186_v14  ;;  %v3188_v49 = vpop.f32.mrb[157].mxu1 }
 0x3b4   : > { %3411 = vadd.xlane.f32.xlu0 %v3351_v55  ;;  %v6023_v4 = vadd.f32 %v3288_v26, %v2864_v13 }
 0x3b5   : > { %vm3225_vm13 = vcmp.gt.f32.partialorder %v3187_v51, 0.0  ;;  %v3257_v1 = vmul.f32 0.01, %v3187_v51 }
 0x3b6   : > { %v3191_v6 = vpop.f32.mrb[158].mxu1  ;;  %v3352_v30 = vmul.f32 %v6023_v4, %v6023_v4  ;;  %3512 = vst [vmem:[%s5760_s14 + $0xe8] sm:$0xff] %v6023_v4 }
 0x3b7   : > { %v3289_v21 = vsel %vm3225_vm13, %v3187_v51, %v3257_v1  ;;  %v3192_v8 = vadd.f32 %v5746_v52, %v3191_v6  ;;  %v3193_v42 = vpop.f32.mrb[159].mxu1 }
 0x3b8   : > { %3413 = vadd.xlane.f32.xlu1 %v3352_v30  ;;  %v6030_v45 = vadd.f32 %v3289_v21, %v2865_v60 }
 0x3b9   : > { %vm3226_vm15 = vcmp.gt.f32.partialorder %v3192_v8, 0.0  ;;  %v3258_v40 = vmul.f32 0.01, %v3192_v8 }
 0x3ba   : > { %v3353_v17 = vmul.f32 %v6030_v45, %v6030_v45  ;;  %3513 = vst [vmem:[%s5760_s14 + $0xf0] sm:$0xff] %v6030_v45 }
 0x3bb   : > { %v3290_v61 = vsel %vm3226_vm15, %v3192_v8, %v3258_v40 }
 0x3bc   : > { %3415 = vadd.xlane.f32.xlu0 %v3353_v17  ;;  %v6036_v48 = vadd.f32 %v3290_v61, %v2866_v23 }
 0x3be   : > { %v3354_v52 = vmul.f32 %v6036_v48, %v6036_v48  ;;  %3514 = vst [vmem:[%s5760_s14 + $0xf8] sm:$0xff] %v6036_v48 }
 0x3c0   : > { %3417 = vadd.xlane.f32.xlu1 %v3354_v52 }
 0x3d1   : > { %v3356_v41 = vpop.xlane.xlu0 %3355 }
 0x3d2   : > { %v3419_v20 = vmax.f32 %v3356_v41, 1e-24 }
 0x3d4   : > { %4479 = vrsqrt.f32 %v3419_v20 }
 0x3d5   : > { %v3358_v5 = vpop.xlane.xlu0 %3357 }
 0x3d6   : > { %v3420_v18 = vmax.f32 %v3358_v5, 1e-24 }
 0x3d8   : > { %4481 = vrsqrt.f32 %v3420_v18 }
 0x3d9   : > { %v3360_v47 = vpop.xlane.xlu1 %3359 }
 0x3da   : > { %v3421_v34 = vmax.f32 %v3360_v47, 1e-24 }
 0x3dc   : > { %4483 = vrsqrt.f32 %v3421_v34 }
 0x3dd   : > { %v3362_v0 = vpop.xlane.xlu1 %3361 }
 0x3de   : > { %v4480_v56 = vpop.eup %4479  ;;  %v3422_v11 = vmax.f32 %v3362_v0, 1e-24 }
 0x3df   : > { %v3515_v54 = vmul.f32 %v4480_v56, %v5762_v59 }
 0x3e0   : > { %4485 = vrsqrt.f32 %v3422_v11 }
 0x3e1   : > { %3547 = vst [vmem:[%s6047_s17] sm:$0xff] %v3515_v54  ;;  %v3364_v7 = vpop.xlane.xlu0 %3363 }
 0x3e2   : > { %v4482_v13 = vpop.eup %4481  ;;  %v3423_v14 = vmax.f32 %v3364_v7, 1e-24 }
 0x3e3   : > { %v3516_v55 = vmul.f32 %v4482_v13, %v5771_v32 }
 0x3e4   : > { %4487 = vrsqrt.f32 %v3423_v14 }
 0x3e5   : > { %3548 = vst [vmem:[%s6047_s17 + $0x8] sm:$0xff] %v3516_v55  ;;  %v3366_v39 = vpop.xlane.xlu1 %3365 }
 0x3e6   : > { %v4484_v35 = vpop.eup %4483  ;;  %v3424_v26 = vmax.f32 %v3366_v39, 1e-24 }
 0x3e7   : > { %v3517_v51 = vmul.f32 %v4484_v35, %v5780_v31 }
 0x3e8   : > { %4489 = vrsqrt.f32 %v3424_v26 }
 0x3e9   : > { %3549 = vst [vmem:[%s6047_s17 + $0x10] sm:$0xff] %v3517_v51  ;;  %v3368_v49 = vpop.xlane.xlu0 %3367 }
 0x3ea   : > { %v4486_v59 = vpop.eup %4485  ;;  %v3425_v1 = vmax.f32 %v3368_v49, 1e-24 }
 0x3eb   : > { %v3518_v6 = vmul.f32 %v4486_v59, %v5789_v10 }
 0x3ec   : > { %4491 = vrsqrt.f32 %v3425_v1 }
 0x3ed   : > { %3550 = vst [vmem:[%s6047_s17 + $0x18] sm:$0xff] %v3518_v6  ;;  %v3370_v30 = vpop.xlane.xlu1 %3369 }
 0x3ee   : > { %v4488_v32 = vpop.eup %4487  ;;  %v3426_v60 = vmax.f32 %v3370_v30, 1e-24 }
 0x3ef   : > { %v3519_v53 = vmul.f32 %v4488_v32, %v5798_v3 }
 0x3f0   : > { %4493 = vrsqrt.f32 %v3426_v60 }
 0x3f1   : > { %3551 = vst [vmem:[%s6047_s17 + $0x20] sm:$0xff] %v3519_v53  ;;  %v3372_v21 = vpop.xlane.xlu0 %3371 }
 0x3f2   : > { %v4490_v31 = vpop.eup %4489  ;;  %v3427_v8 = vmax.f32 %v3372_v21, 1e-24 }
 0x3f3   : > { %v3520_v42 = vmul.f32 %v4490_v31, %v5807_v36 }
 0x3f4   : > { %4495 = vrsqrt.f32 %v3427_v8 }
 0x3f5   : > { %3552 = vst [vmem:[%s6047_s17 + $0x28] sm:$0xff] %v3520_v42  ;;  %v3374_v40 = vpop.xlane.xlu1 %3373 }
 0x3f6   : > { %v4492_v10 = vpop.eup %4491  ;;  %v3428_v17 = vmax.f32 %v3374_v40, 1e-24 }
 0x3f7   : > { %v3521_v23 = vmul.f32 %v4492_v10, %v5816_v50 }
 0x3f8   : > { %4497 = vrsqrt.f32 %v3428_v17 }
 0x3f9   : > { %3553 = vst [vmem:[%s6047_s17 + $0x30] sm:$0xff] %v3521_v23  ;;  %v3376_v61 = vpop.xlane.xlu0 %3375 }
 0x3fa   : > { %v4494_v3 = vpop.eup %4493  ;;  %v3429_v52 = vmax.f32 %v3376_v61, 1e-24 }
 0x3fb   : > { %v3522_v41 = vmul.f32 %v4494_v3, %v5825_v24 }
 0x3fc   : > { %4499 = vrsqrt.f32 %v3429_v52 }
 0x3fd   : > { %3554 = vst [vmem:[%s6047_s17 + $0x38] sm:$0xff] %v3522_v41  ;;  %v3378_v20 = vpop.xlane.xlu1 %3377 }
 0x3fe   : > { %v4496_v36 = vpop.eup %4495  ;;  %v3430_v5 = vmax.f32 %v3378_v20, 1e-24 }
 0x3ff   : > { %v3523_v18 = vmul.f32 %v4496_v36, %v5834_v44 }
 0x400   : > { %4501 = vrsqrt.f32 %v3430_v5 }
 0x401   : > { %3555 = vst [vmem:[%s6047_s17 + $0x40] sm:$0xff] %v3523_v18  ;;  %v3380_v47 = vpop.xlane.xlu0 %3379 }
 0x402   : > { %v4498_v50 = vpop.eup %4497  ;;  %v3431_v34 = vmax.f32 %v3380_v47, 1e-24 }
 0x403   : > { %v3524_v0 = vmul.f32 %v4498_v50, %v5843_v58 }
 0x404   : > { %4503 = vrsqrt.f32 %v3431_v34 }
 0x405   : > { %3556 = vst [vmem:[%s6047_s17 + $0x48] sm:$0xff] %v3524_v0  ;;  %v3382_v56 = vpop.xlane.xlu1 %3381 }
 0x406   : > { %v4500_v24 = vpop.eup %4499  ;;  %v3432_v11 = vmax.f32 %v3382_v56, 1e-24 }
 0x407   : > { %v3525_v54 = vmul.f32 %v4500_v24, %v5852_v9 }
 0x408   : > { %4505 = vrsqrt.f32 %v3432_v11 }
 0x409   : > { %3557 = vst [vmem:[%s6047_s17 + $0x50] sm:$0xff] %v3525_v54  ;;  %v3384_v7 = vpop.xlane.xlu0 %3383 }
 0x40a   : > { %v4502_v44 = vpop.eup %4501  ;;  %v3433_v13 = vmax.f32 %v3384_v7, 1e-24 }
 0x40b   : > { %v3526_v14 = vmul.f32 %v4502_v44, %v5861_v57 }
 0x40c   : > { %4507 = vrsqrt.f32 %v3433_v13 }
 0x40d   : > { %3558 = vst [vmem:[%s6047_s17 + $0x58] sm:$0xff] %v3526_v14  ;;  %v3386_v55 = vpop.xlane.xlu1 %3385 }
 0x40e   : > { %v4504_v58 = vpop.eup %4503  ;;  %v3434_v39 = vmax.f32 %v3386_v55, 1e-24 }
 0x40f   : > { %v3527_v35 = vmul.f32 %v4504_v58, %v5870_v16 }
 0x410   : > { %4509 = vrsqrt.f32 %v3434_v39 }
 0x411   : > { %3559 = vst [vmem:[%s6047_s17 + $0x60] sm:$0xff] %v3527_v35  ;;  %v3388_v26 = vpop.xlane.xlu0 %3387 }
 0x412   : > { %v4506_v9 = vpop.eup %4505  ;;  %v3435_v51 = vmax.f32 %v3388_v26, 1e-24 }
 0x413   : > { %v3528_v49 = vmul.f32 %v4506_v9, %v5879_v12 }
 0x414   : > { %4511 = vrsqrt.f32 %v3435_v51 }
 0x415   : > { %3560 = vst [vmem:[%s6047_s17 + $0x68] sm:$0xff] %v3528_v49  ;;  %v3390_v59 = vpop.xlane.xlu1 %3389 }
 0x416   : > { %v4508_v57 = vpop.eup %4507  ;;  %v3436_v1 = vmax.f32 %v3390_v59, 1e-24 }
 0x417   : > { %v3529_v6 = vmul.f32 %v4508_v57, %v5888_v2 }
 0x418   : > { %4513 = vrsqrt.f32 %v3436_v1 }
 0x419   : > { %3561 = vst [vmem:[%s6047_s17 + $0x70] sm:$0xff] %v3529_v6  ;;  %v3392_v30 = vpop.xlane.xlu0 %3391 }
 0x41a   : > { %v4510_v16 = vpop.eup %4509  ;;  %v3437_v32 = vmax.f32 %v3392_v30, 1e-24 }
 0x41b   : > { %v3530_v60 = vmul.f32 %v4510_v16, %v5897_v15 }
 0x41c   : > { %4515 = vrsqrt.f32 %v3437_v32 }
 0x41d   : > { %3562 = vst [vmem:[%s6047_s17 + $0x78] sm:$0xff] %v3530_v60  ;;  %v3394_v53 = vpop.xlane.xlu1 %3393 }
 0x41e   : > { %v4512_v12 = vpop.eup %4511  ;;  %v3438_v21 = vmax.f32 %v3394_v53, 1e-24 }
 0x41f   : > { %v3531_v31 = vmul.f32 %v4512_v12, %v5906_v63 }
 0x420   : > { %4517 = vrsqrt.f32 %v3438_v21 }
 0x421   : > { %3563 = vst [vmem:[%s6047_s17 + $0x80] sm:$0xff] %v3531_v31  ;;  %v3396_v8 = vpop.xlane.xlu0 %3395 }
 0x422   : > { %v4514_v2 = vpop.eup %4513  ;;  %v3439_v42 = vmax.f32 %v3396_v8, 1e-24 }
 0x423   : > { %v3532_v40 = vmul.f32 %v4514_v2, %v5915_v22 }
 0x424   : > { %4519 = vrsqrt.f32 %v3439_v42 }
 0x425   : > { %3564 = vst [vmem:[%s6047_s17 + $0x88] sm:$0xff] %v3532_v40  ;;  %v3398_v10 = vpop.xlane.xlu1 %3397 }
 0x426   : > { %v4516_v15 = vpop.eup %4515  ;;  %v3440_v17 = vmax.f32 %v3398_v10, 1e-24 }
 0x427   : > { %v3533_v23 = vmul.f32 %v4516_v15, %v5924_v29 }
 0x428   : > { %4521 = vrsqrt.f32 %v3440_v17 }
 0x429   : > { %3565 = vst [vmem:[%s6047_s17 + $0x90] sm:$0xff] %v3533_v23  ;;  %v3400_v61 = vpop.xlane.xlu0 %3399 }
 0x42a   : > { %v4518_v63 = vpop.eup %4517  ;;  %v3441_v3 = vmax.f32 %v3400_v61, 1e-24 }
 0x42b   : > { %v3534_v52 = vmul.f32 %v4518_v63, %v5933_v37 }
 0x42c   : > { %4523 = vrsqrt.f32 %v3441_v3 }
 0x42d   : > { %3566 = vst [vmem:[%s6047_s17 + $0x98] sm:$0xff] %v3534_v52  ;;  %v3402_v41 = vpop.xlane.xlu1 %3401 }
 0x42e   : > { %v4520_v22 = vpop.eup %4519  ;;  %v3442_v20 = vmax.f32 %v3402_v41, 1e-24 }
 0x42f   : > { %v3535_v36 = vmul.f32 %v4520_v22, %v5942_v27 }
 0x430   : > { %4525 = vrsqrt.f32 %v3442_v20 }
 0x431   : > { %3567 = vst [vmem:[%s6047_s17 + $0xa0] sm:$0xff] %v3535_v36  ;;  %v3404_v5 = vpop.xlane.xlu0 %3403 }
 0x432   : > { %v4522_v29 = vpop.eup %4521  ;;  %v3443_v18 = vmax.f32 %v3404_v5, 1e-24 }
 0x433   : > { %v3536_v47 = vmul.f32 %v4522_v29, %v5951_v28 }
 0x434   : > { %4527 = vrsqrt.f32 %v3443_v18 }
 0x435   : > { %3568 = vst [vmem:[%s6047_s17 + $0xa8] sm:$0xff] %v3536_v47  ;;  %v3406_v50 = vpop.xlane.xlu1 %3405 }
 0x436   : > { %v4524_v37 = vpop.eup %4523  ;;  %v3444_v34 = vmax.f32 %v3406_v50, 1e-24 }
 0x437   : > { %v3537_v0 = vmul.f32 %v4524_v37, %v5960_v25 }
 0x438   : > { %4529 = vrsqrt.f32 %v3444_v34 }
 0x439   : > { %3569 = vst [vmem:[%s6047_s17 + $0xb0] sm:$0xff] %v3537_v0  ;;  %v3408_v56 = vpop.xlane.xlu0 %3407 }
 0x43a   : > { %v4526_v27 = vpop.eup %4525  ;;  %v3445_v24 = vmax.f32 %v3408_v56, 1e-24 }
 0x43b   : > { %v3538_v11 = vmul.f32 %v4526_v27, %v5969_v43 }
 0x43c   : > { %4531 = vrsqrt.f32 %v3445_v24 }
 0x43d   : > { %3570 = vst [vmem:[%s6047_s17 + $0xb8] sm:$0xff] %v3538_v11  ;;  %v3410_v54 = vpop.xlane.xlu1 %3409 }
 0x43e   : > { %v4528_v28 = vpop.eup %4527  ;;  %v3446_v7 = vmax.f32 %v3410_v54, 1e-24 }
 0x43f   : > { %v3539_v44 = vmul.f32 %v4528_v28, %v5978_v46 }
 0x440   : > { %4533 = vrsqrt.f32 %v3446_v7 }
 0x441   : > { %3571 = vst [vmem:[%s6047_s17 + $0xc0] sm:$0xff] %v3539_v44  ;;  %v3412_v13 = vpop.xlane.xlu0 %3411 }
 0x442   : > { %v4530_v25 = vpop.eup %4529  ;;  %v3447_v14 = vmax.f32 %v3412_v13, 1e-24 }
 0x443   : > { %v3540_v55 = vmul.f32 %v4530_v25, %v5987_v38 }
 0x444   : > { %4535 = vrsqrt.f32 %v3447_v14 }
 0x445   : > { %3572 = vst [vmem:[%s6047_s17 + $0xc8] sm:$0xff] %v3540_v55  ;;  %v3414_v58 = vpop.xlane.xlu1 %3413 }
 0x446   : > { %v4532_v43 = vpop.eup %4531  ;;  %v3448_v39 = vmax.f32 %v3414_v58, 1e-24 }
 0x447   : > { %v3541_v35 = vmul.f32 %v4532_v43, %v5996_v33 }
 0x448   : > { %4537 = vrsqrt.f32 %v3448_v39 }
 0x449   : > { %3573 = vst [vmem:[%s6047_s17 + $0xd0] sm:$0xff] %v3541_v35  ;;  %v3416_v46 = vpop.xlane.xlu0 %3415 }
 0x44a   : > { %v4534_v26 = vpop.eup %4533  ;;  %v3449_v9 = vmax.f32 %v3416_v46, 1e-24 }
 0x44b   : > { %v3542_v51 = vmul.f32 %v4534_v26, %v6005_v62 }
 0x44c   : > { %4539 = vrsqrt.f32 %v3449_v9 }
 0x44d   : > { %3574 = vst [vmem:[%s6047_s17 + $0xd8] sm:$0xff] %v3542_v51  ;;  %v3418_v38 = vpop.xlane.xlu1 %3417 }
 0x44e   : > { %v4536_v49 = vpop.eup %4535  ;;  %v3450_v59 = vmax.f32 %v3418_v38, 1e-24 }
 0x44f   : > { %v3543_v57 = vmul.f32 %v4536_v49, %v6014_v19 }
 0x450   : > { %4541 = vrsqrt.f32 %v3450_v59 }
 0x451   : > { %3575 = vst [vmem:[%s6047_s17 + $0xe0] sm:$0xff] %v3543_v57 }
 0x452   : > { %v4538_v33 = vpop.eup %4537 }
 0x453   : > { %v3544_v1 = vmul.f32 %v4538_v33, %v6023_v4 }
 0x455   : > { %3576 = vst [vmem:[%s6047_s17 + $0xe8] sm:$0xff] %v3544_v1 }
 0x456   : > { %v4540_v6 = vpop.eup %4539 }
 0x457   : > { %v3545_v30 = vmul.f32 %v4540_v6, %v6030_v45 }
 0x459   : > { %3577 = vst [vmem:[%s6047_s17 + $0xf0] sm:$0xff] %v3545_v30 }
 0x45a   : > { %v4542_v16 = vpop.eup %4541 }
 0x45b   : > { %v3546_v62 = vmul.f32 %v4542_v16, %v6036_v48 }
 0x45d   : > { %3578 = vst [vmem:[%s6047_s17 + $0xf8] sm:$0xff] %v3546_v62 }
 0x45e PF: > { %s19_s29 = sadd.s32 1, %s4565_s29   ;;  %s6167_s27 = smov %s4561_s28 }
 0x45f   : > { %p16_p5 = scmp.ge.s32.totalorder %s19_s29, 5   ;;  %s6168_s28 = smov %s6170_s30 }
 0x461   :  { %18 = sbr.rel (!%p16_p5) target bundleno = 2 (0x2), region = 102 }

</bundles_post_ra>
